<compile_context>
chip_gen: v6e
topology: v6e:2x2x1
jax: 0.10.0
libtpu: 0.0.40
codegen_flags: <defaults>
</compile_context>

<pallas_src>
import functools

import jax
import jax.numpy as jnp
import numpy as np
from jax.experimental import pallas as pl
from jax.experimental.pallas import tpu as pltpu


def _round_up(x, m):
    return ((x + m - 1) // m) * m


def _conv3x3_bias_relu(src_ref, w_ref, b_ref, acc_ref, mask, f0, L, WP):
    """3x3 'same' conv + bias + ReLU over a flattened zero-padded image.

    src_ref : (NB, Cin) ref holding the zero-padded (H+2, W+2, Cin) image
              row-major at rows [f0-WP, f0-WP+(H+2)*WP); everything else zero.
    w_ref   : (3, 3, Cin, Cout) HWIO conv weight ref.
    b_ref   : (1, Cout) bias ref.
    acc_ref : (L, Cout) f32 accumulator scratch, L = H*WP.
    mask    : (L, 1) f32, 0.0 on the halo columns of each padded row.
    Returns the (L, Cout) activation with halo columns forced to zero, i.e.
    exactly rows 1..H of the NEXT layer's flattened zero-padded input.
    """
    acc_ref[...] = jnp.zeros_like(acc_ref)
    for kh in range(3):
        for kw in range(3):
            s = f0 + (kh - 1) * WP + (kw - 1)          # static contiguous tap
            acc_ref[...] += jnp.dot(src_ref[s:s + L, :], w_ref[kh, kw],
                                    preferred_element_type=jnp.float32)
    a = jnp.maximum(acc_ref[...] + b_ref[...], 0.0)     # fused bias + ReLU
    return a * mask                                      # zero the halo cols


def _toy_fused_kernel(x_ref, mask_ref,
                      w1_ref, b1_ref, w2_ref, b2_ref, w3_ref, b3_ref,
                      wfc_ref, bfc_ref, o_ref,
                      pad2_ref, pad3_ref, acc1_ref, acc2_ref, acc3_ref,
                      *, H, W, slack):
    WP = W + 2
    L = H * WP
    f0 = slack + WP           # chosen so f0 % 8 == 0 -> aligned interior stores

    mask = mask_ref[...]      # (L, 1) f32, hoisted once for all three layers

    # ---- conv1: 3 -> 64 ----------------------------------------------------
    a1 = _conv3x3_bias_relu(x_ref.at[0], w1_ref, b1_ref, acc1_ref,
                            mask, f0, L, WP)                       # (L, 64)
    pad2_ref[...] = jnp.zeros_like(pad2_ref)
    pad2_ref[f0:f0 + L, :] = a1                                    # aligned

    # ---- conv2: 64 -> 128 ----------------------------------------------------
    a2 = _conv3x3_bias_relu(pad2_ref, w2_ref, b2_ref, acc2_ref,
                            mask, f0, L, WP)                       # (L, 128)
    pad3_ref[...] = jnp.zeros_like(pad3_ref)
    pad3_ref[f0:f0 + L, :] = a2

    # ---- conv3: 128 -> 128 ---------------------------------------------------
    a3 = _conv3x3_bias_relu(pad3_ref, w3_ref, b3_ref, acc3_ref,
                            mask, f0, L, WP)                       # (L, 128)

    # ---- global average pool + fc (fused epilogue) ---------------------------
    pooled = jnp.sum(a3, axis=0, keepdims=True) * (1.0 / (H * W))  # (1, 128)
    out = jnp.dot(pooled, wfc_ref[...],
                  preferred_element_type=jnp.float32) + bfc_ref[...]
    o_ref[...] = out.reshape(o_ref.shape).astype(o_ref.dtype)


def toy_model_forward(x_nchw, params):
    """Fused ToyModel forward. x_nchw: (N, 3, H, W) float32 -> (N, 10)."""
    x = jnp.transpose(x_nchw, (0, 2, 3, 1)).astype(jnp.float32)    # NCHW -> NHWC
    N, H, W, cin = x.shape
    WP = W + 2
    ROWS = (H + 2) * WP
    L = H * WP
    # slack rows before the padded image; chosen so the interior write offset
    # f0 = slack + WP is sublane-aligned (multiple of 8) and slack >= 1.
    slack = (8 - (WP % 8)) % 8
    if slack == 0:
        slack = 8
    NB = _round_up(slack + ROWS + 1, 8)   # covers the furthest conv tap read

    c1 = params["w1"].shape[-1]          # 64
    c2 = params["w2"].shape[-1]          # 128
    c3 = params["w3"].shape[-1]          # 128
    n_out = params["w_fc"].shape[-1]     # 10

    # Zero-pad spatially, flatten row-major, add the zero slack rows.
    xp = jnp.pad(x, ((0, 0), (1, 1), (1, 1), (0, 0)))               # (N,H+2,W+2,C)
    x2 = xp.reshape(N, ROWS, cin)
    x2 = jnp.pad(x2, ((0, 0), (slack, NB - slack - ROWS), (0, 0)))  # (N,NB,C)

    # Halo-column mask: row i of the conv output corresponds to padded column
    # i % WP; columns 0 and W+1 are the zero halo of the next layer's input.
    col = jnp.arange(L, dtype=jnp.int32) % WP
    mask = ((col >= 1) & (col <= W)).astype(jnp.float32).reshape(L, 1)

    full2 = lambda n: (0, 0)
    full4 = lambda n: (0, 0, 0, 0)

    kernel = functools.partial(_toy_fused_kernel, H=H, W=W, slack=slack)

    out = pl.pallas_call(
        kernel,
        out_shape=jax.ShapeDtypeStruct((N, 1, n_out), jnp.float32),
        grid_spec=pltpu.PrefetchScalarGridSpec(
            num_scalar_prefetch=0,
            grid=(N,),
            in_specs=[
                pl.BlockSpec((1, NB, cin), lambda n: (n, 0, 0)),   # padded image
                pl.BlockSpec((L, 1), full2),                       # halo mask
                pl.BlockSpec((3, 3, cin, c1), full4),
                pl.BlockSpec((1, c1), full2),
                pl.BlockSpec((3, 3, c1, c2), full4),
                pl.BlockSpec((1, c2), full2),
                pl.BlockSpec((3, 3, c2, c3), full4),
                pl.BlockSpec((1, c3), full2),
                pl.BlockSpec((c3, n_out), full2),
                pl.BlockSpec((1, n_out), full2),
            ],
            out_specs=pl.BlockSpec((1, 1, n_out), lambda n: (n, 0, 0)),
            scratch_shapes=[
                pltpu.VMEM((NB, c1), jnp.float32),   # padded act1 (conv2 input)
                pltpu.VMEM((NB, c2), jnp.float32),   # padded act2 (conv3 input)
                pltpu.VMEM((L, c1), jnp.float32),    # conv1 accumulator
                pltpu.VMEM((L, c2), jnp.float32),    # conv2 accumulator
                pltpu.VMEM((L, c3), jnp.float32),    # conv3 accumulator
            ],
        ),
        compiler_params=pltpu.CompilerParams(
            dimension_semantics=("parallel",)),
    )(x2, mask,
      params["w1"], params["b1"].reshape(1, c1),
      params["w2"], params["b2"].reshape(1, c2),
      params["w3"], params["b3"].reshape(1, c3),
      params["w_fc"], params["b_fc"].reshape(1, n_out))
    return out.reshape(N, n_out)


# ---------------------------------------------------------------------------
# Pure-JAX reference (correctness check only)
# ---------------------------------------------------------------------------
def reference_forward(x_nchw, params):
    x = jnp.transpose(x_nchw, (0, 2, 3, 1))

    def conv(x, w, b):
        y = jax.lax.conv_general_dilated(
            x, w, window_strides=(1, 1), padding="SAME",
            dimension_numbers=("NHWC", "HWIO", "NHWC"),
            precision=jax.lax.Precision.HIGHEST)
        return jax.nn.relu(y + b)

    x = conv(x, params["w1"], params["b1"])
    x = conv(x, params["w2"], params["b2"])
    x = conv(x, params["w3"], params["b3"])
    pooled = jnp.mean(x, axis=(1, 2))
    return pooled @ params["w_fc"] + params["b_fc"]


if __name__ == "__main__":
    key = jax.random.PRNGKey(0)
    ks = jax.random.split(key, 9)

    # Deterministic synthetic parameters in the PyTorch layouts of
    # ToyModel.__init__ (OIHW convs, (out,in) fc), then converted to the
    # HWIO / (in,out) layouts the NHWC kernel uses.
    w1_oihw = jax.random.normal(ks[0], (64, 3, 3, 3), jnp.float32) * 0.05
    b1 = jax.random.normal(ks[1], (64,), jnp.float32) * 0.05
    w2_oihw = jax.random.normal(ks[2], (128, 64, 3, 3), jnp.float32) * 0.05
    b2 = jax.random.normal(ks[3], (128,), jnp.float32) * 0.05
    w3_oihw = jax.random.normal(ks[4], (128, 128, 3, 3), jnp.float32) * 0.05
    b3 = jax.random.normal(ks[5], (128,), jnp.float32) * 0.05
    wfc_oi = jax.random.normal(ks[6], (10, 128), jnp.float32) * 0.05
    bfc = jax.random.normal(ks[7], (10,), jnp.float32) * 0.05

    params = {
        "w1": jnp.transpose(w1_oihw, (2, 3, 1, 0)), "b1": b1,   # OIHW -> HWIO
        "w2": jnp.transpose(w2_oihw, (2, 3, 1, 0)), "b2": b2,
        "w3": jnp.transpose(w3_oihw, (2, 3, 1, 0)), "b3": b3,
        "w_fc": wfc_oi.T, "b_fc": bfc,                          # (out,in)->(in,out)
    }

    # Small NCHW input, mirroring the PyTorch module's expected layout.
    N, C, H, W = 2, 3, 16, 16
    x = jax.random.normal(ks[8], (N, C, H, W), jnp.float32)

    fwd = jax.jit(toy_model_forward)
    out = jax.block_until_ready(fwd(x, params))
    assert out.shape == (N, 10) and out.dtype == jnp.float32

    ref = jax.block_until_ready(reference_forward(x, params))
    np.testing.assert_allclose(np.asarray(out), np.asarray(ref),
                               rtol=2e-3, atol=2e-3)

    print("KERNEL_OK")
</pallas_src>

<mosaic_0001>
module attributes {stable_mosaic.version = 11 : i64} {
  func.func @_toy_fused_kernel(%arg0: i32, %arg1: memref<1x336x3xf32, #tpu.memory_space<vmem>>, %arg2: memref<288x1xf32, #tpu.memory_space<vmem>>, %arg3: memref<3x3x3x64xf32, #tpu.memory_space<vmem>>, %arg4: memref<1x64xf32, #tpu.memory_space<vmem>>, %arg5: memref<3x3x64x128xf32, #tpu.memory_space<vmem>>, %arg6: memref<1x128xf32, #tpu.memory_space<vmem>>, %arg7: memref<3x3x128x128xf32, #tpu.memory_space<vmem>>, %arg8: memref<1x128xf32, #tpu.memory_space<vmem>>, %arg9: memref<128x10xf32, #tpu.memory_space<vmem>>, %arg10: memref<1x10xf32, #tpu.memory_space<vmem>>, %arg11: memref<1x1x10xf32, #tpu.memory_space<vmem>>, %arg12: memref<336x64xf32, #tpu.memory_space<vmem>>, %arg13: memref<336x128xf32, #tpu.memory_space<vmem>>, %arg14: memref<288x64xf32, #tpu.memory_space<vmem>>, %arg15: memref<288x128xf32, #tpu.memory_space<vmem>>, %arg16: memref<288x128xf32, #tpu.memory_space<vmem>>) attributes {dimension_semantics = [#tpu.dimension_semantics<parallel>], iteration_bounds = array<i64: 2>, scalar_prefetch = 0 : i64, scratch_operands = 5 : i64, tpu.core_type = #tpu.core_type<tc>, window_params = [{transform_indices = @transform_0, window_bounds = array<i64: 1, 336, 3>}, {pipeline_mode = #tpu.pipeline_mode<synchronous>, transform_indices = @transform_1, window_bounds = array<i64: 288, 1>}, {pipeline_mode = #tpu.pipeline_mode<synchronous>, transform_indices = @transform_2, window_bounds = array<i64: 3, 3, 3, 64>}, {pipeline_mode = #tpu.pipeline_mode<synchronous>, transform_indices = @transform_3, window_bounds = array<i64: 1, 64>}, {pipeline_mode = #tpu.pipeline_mode<synchronous>, transform_indices = @transform_4, window_bounds = array<i64: 3, 3, 64, 128>}, {pipeline_mode = #tpu.pipeline_mode<synchronous>, transform_indices = @transform_5, window_bounds = array<i64: 1, 128>}, {pipeline_mode = #tpu.pipeline_mode<synchronous>, transform_indices = @transform_6, window_bounds = array<i64: 3, 3, 128, 128>}, {pipeline_mode = #tpu.pipeline_mode<synchronous>, transform_indices = @transform_7, window_bounds = array<i64: 1, 128>}, {pipeline_mode = #tpu.pipeline_mode<synchronous>, transform_indices = @transform_8, window_bounds = array<i64: 128, 10>}, {pipeline_mode = #tpu.pipeline_mode<synchronous>, transform_indices = @transform_9, window_bounds = array<i64: 1, 10>}, {transform_indices = @transform_10, window_bounds = array<i64: 1, 1, 10>}]} {
    %c0 = arith.constant 0 : index
    %c0_0 = arith.constant 0 : index
    %0 = vector.load %arg2[%c0, %c0_0] : memref<288x1xf32, #tpu.memory_space<vmem>>, vector<288x1xf32>
    %cst = arith.constant 0.000000e+00 : f32
    %1 = vector.broadcast %cst : f32 to vector<288x64xf32>
    %c0_1 = arith.constant 0 : index
    %c0_2 = arith.constant 0 : index
    %2 = vector.load %arg14[%c0_1, %c0_2] : memref<288x64xf32, #tpu.memory_space<vmem>>, vector<288x64xf32>
    tpu.vector_store %arg14[%c0_1, %c0_2], %1 {strides = array<i32>} : memref<288x64xf32, #tpu.memory_space<vmem>>, vector<288x64xf32>,
    %c0_3 = arith.constant 0 : index
    %c0_4 = arith.constant 0 : index
    %3 = vector.load %arg14[%c0_3, %c0_4] : memref<288x64xf32, #tpu.memory_space<vmem>>, vector<288x64xf32>
    %c0_i32 = arith.constant 0 : i32
    %c0_i32_5 = arith.constant 0 : i32
    %c0_i32_6 = arith.constant 0 : i32
    %4 = tpu.memref_slice %arg1[%c0_i32, %c0_i32_5, %c0_i32_6] : memref<1x336x3xf32, #tpu.memory_space<vmem>> -> memref<1x336x3xf32, #tpu.memory_space<vmem>>
    %5 = tpu.memref_squeeze %4 : memref<1x336x3xf32, #tpu.memory_space<vmem>> -> memref<336x3xf32, #tpu.memory_space<vmem>>
    %c5 = arith.constant 5 : index
    %c0_7 = arith.constant 0 : index
    %6 = vector.load %5[%c5, %c0_7] : memref<336x3xf32, #tpu.memory_space<vmem>>, vector<288x3xf32>
    %c0_8 = arith.constant 0 : index
    %c0_9 = arith.constant 0 : index
    %c0_10 = arith.constant 0 : index
    %c0_11 = arith.constant 0 : index
    %7 = vector.load %arg3[%c0_8, %c0_9, %c0_10, %c0_11] : memref<3x3x3x64xf32, #tpu.memory_space<vmem>>, vector<1x1x3x64xf32>
    %8 = vector.shape_cast %7 : vector<1x1x3x64xf32> to vector<3x64xf32>
    %cst_12 = arith.constant dense<0.000000e+00> : vector<288x64xf32>
    %9 = tpu.matmul %6, %8, %cst_12 {dimension_numbers = #tpu.dot_dimension_numbers<[1], [0], [0], [1], [0, 0, 1, 1], [], []>} : vector<288x3xf32>, vector<3x64xf32>, vector<288x64xf32> -> vector<288x64xf32>
    %10 = arith.addf %3, %9 : vector<288x64xf32>
    %c0_13 = arith.constant 0 : index
    %c0_14 = arith.constant 0 : index
    %11 = vector.load %arg14[%c0_13, %c0_14] : memref<288x64xf32, #tpu.memory_space<vmem>>, vector<288x64xf32>
    tpu.vector_store %arg14[%c0_13, %c0_14], %10 {strides = array<i32>} : memref<288x64xf32, #tpu.memory_space<vmem>>, vector<288x64xf32>,
    %c0_15 = arith.constant 0 : index
    %c0_16 = arith.constant 0 : index
    %12 = vector.load %arg14[%c0_15, %c0_16] : memref<288x64xf32, #tpu.memory_space<vmem>>, vector<288x64xf32>
    %c0_i32_17 = arith.constant 0 : i32
    %c0_i32_18 = arith.constant 0 : i32
    %c0_i32_19 = arith.constant 0 : i32
    %13 = tpu.memref_slice %arg1[%c0_i32_17, %c0_i32_18, %c0_i32_19] : memref<1x336x3xf32, #tpu.memory_space<vmem>> -> memref<1x336x3xf32, #tpu.memory_space<vmem>>
    %14 = tpu.memref_squeeze %13 : memref<1x336x3xf32, #tpu.memory_space<vmem>> -> memref<336x3xf32, #tpu.memory_space<vmem>>
    %c6 = arith.constant 6 : index
    %c0_20 = arith.constant 0 : index
    %15 = vector.load %14[%c6, %c0_20] : memref<336x3xf32, #tpu.memory_space<vmem>>, vector<288x3xf32>
    %c0_21 = arith.constant 0 : index
    %c1 = arith.constant 1 : index
    %c0_22 = arith.constant 0 : index
    %c0_23 = arith.constant 0 : index
    %16 = vector.load %arg3[%c0_21, %c1, %c0_22, %c0_23] : memref<3x3x3x64xf32, #tpu.memory_space<vmem>>, vector<1x1x3x64xf32>
    %17 = vector.shape_cast %16 : vector<1x1x3x64xf32> to vector<3x64xf32>
    %cst_24 = arith.constant dense<0.000000e+00> : vector<288x64xf32>
    %18 = tpu.matmul %15, %17, %cst_24 {dimension_numbers = #tpu.dot_dimension_numbers<[1], [0], [0], [1], [0, 0, 1, 1], [], []>} : vector<288x3xf32>, vector<3x64xf32>, vector<288x64xf32> -> vector<288x64xf32>
    %19 = arith.addf %12, %18 : vector<288x64xf32>
    %c0_25 = arith.constant 0 : index
    %c0_26 = arith.constant 0 : index
    %20 = vector.load %arg14[%c0_25, %c0_26] : memref<288x64xf32, #tpu.memory_space<vmem>>, vector<288x64xf32>
    tpu.vector_store %arg14[%c0_25, %c0_26], %19 {strides = array<i32>} : memref<288x64xf32, #tpu.memory_space<vmem>>, vector<288x64xf32>,
    %c0_27 = arith.constant 0 : index
    %c0_28 = arith.constant 0 : index
    %21 = vector.load %arg14[%c0_27, %c0_28] : memref<288x64xf32, #tpu.memory_space<vmem>>, vector<288x64xf32>
    %c0_i32_29 = arith.constant 0 : i32
    %c0_i32_30 = arith.constant 0 : i32
    %c0_i32_31 = arith.constant 0 : i32
    %22 = tpu.memref_slice %arg1[%c0_i32_29, %c0_i32_30, %c0_i32_31] : memref<1x336x3xf32, #tpu.memory_space<vmem>> -> memref<1x336x3xf32, #tpu.memory_space<vmem>>
    %23 = tpu.memref_squeeze %22 : memref<1x336x3xf32, #tpu.memory_space<vmem>> -> memref<336x3xf32, #tpu.memory_space<vmem>>
    %c7 = arith.constant 7 : index
    %c0_32 = arith.constant 0 : index
    %24 = vector.load %23[%c7, %c0_32] : memref<336x3xf32, #tpu.memory_space<vmem>>, vector<288x3xf32>
    %c0_33 = arith.constant 0 : index
    %c2 = arith.constant 2 : index
    %c0_34 = arith.constant 0 : index
    %c0_35 = arith.constant 0 : index
    %25 = vector.load %arg3[%c0_33, %c2, %c0_34, %c0_35] : memref<3x3x3x64xf32, #tpu.memory_space<vmem>>, vector<1x1x3x64xf32>
    %26 = vector.shape_cast %25 : vector<1x1x3x64xf32> to vector<3x64xf32>
    %cst_36 = arith.constant dense<0.000000e+00> : vector<288x64xf32>
    %27 = tpu.matmul %24, %26, %cst_36 {dimension_numbers = #tpu.dot_dimension_numbers<[1], [0], [0], [1], [0, 0, 1, 1], [], []>} : vector<288x3xf32>, vector<3x64xf32>, vector<288x64xf32> -> vector<288x64xf32>
    %28 = arith.addf %21, %27 : vector<288x64xf32>
    %c0_37 = arith.constant 0 : index
    %c0_38 = arith.constant 0 : index
    %29 = vector.load %arg14[%c0_37, %c0_38] : memref<288x64xf32, #tpu.memory_space<vmem>>, vector<288x64xf32>
    tpu.vector_store %arg14[%c0_37, %c0_38], %28 {strides = array<i32>} : memref<288x64xf32, #tpu.memory_space<vmem>>, vector<288x64xf32>,
    %c0_39 = arith.constant 0 : index
    %c0_40 = arith.constant 0 : index
    %30 = vector.load %arg14[%c0_39, %c0_40] : memref<288x64xf32, #tpu.memory_space<vmem>>, vector<288x64xf32>
    %c0_i32_41 = arith.constant 0 : i32
    %c0_i32_42 = arith.constant 0 : i32
    %c0_i32_43 = arith.constant 0 : i32
    %31 = tpu.memref_slice %arg1[%c0_i32_41, %c0_i32_42, %c0_i32_43] : memref<1x336x3xf32, #tpu.memory_space<vmem>> -> memref<1x336x3xf32, #tpu.memory_space<vmem>>
    %32 = tpu.memref_squeeze %31 : memref<1x336x3xf32, #tpu.memory_space<vmem>> -> memref<336x3xf32, #tpu.memory_space<vmem>>
    %c23 = arith.constant 23 : index
    %c0_44 = arith.constant 0 : index
    %33 = vector.load %32[%c23, %c0_44] : memref<336x3xf32, #tpu.memory_space<vmem>>, vector<288x3xf32>
    %c1_45 = arith.constant 1 : index
    %c0_46 = arith.constant 0 : index
    %c0_47 = arith.constant 0 : index
    %c0_48 = arith.constant 0 : index
    %34 = vector.load %arg3[%c1_45, %c0_46, %c0_47, %c0_48] : memref<3x3x3x64xf32, #tpu.memory_space<vmem>>, vector<1x1x3x64xf32>
    %35 = vector.shape_cast %34 : vector<1x1x3x64xf32> to vector<3x64xf32>
    %cst_49 = arith.constant dense<0.000000e+00> : vector<288x64xf32>
    %36 = tpu.matmul %33, %35, %cst_49 {dimension_numbers = #tpu.dot_dimension_numbers<[1], [0], [0], [1], [0, 0, 1, 1], [], []>} : vector<288x3xf32>, vector<3x64xf32>, vector<288x64xf32> -> vector<288x64xf32>
    %37 = arith.addf %30, %36 : vector<288x64xf32>
    %c0_50 = arith.constant 0 : index
    %c0_51 = arith.constant 0 : index
    %38 = vector.load %arg14[%c0_50, %c0_51] : memref<288x64xf32, #tpu.memory_space<vmem>>, vector<288x64xf32>
    tpu.vector_store %arg14[%c0_50, %c0_51], %37 {strides = array<i32>} : memref<288x64xf32, #tpu.memory_space<vmem>>, vector<288x64xf32>,
    %c0_52 = arith.constant 0 : index
    %c0_53 = arith.constant 0 : index
    %39 = vector.load %arg14[%c0_52, %c0_53] : memref<288x64xf32, #tpu.memory_space<vmem>>, vector<288x64xf32>
    %c0_i32_54 = arith.constant 0 : i32
    %c0_i32_55 = arith.constant 0 : i32
    %c0_i32_56 = arith.constant 0 : i32
    %40 = tpu.memref_slice %arg1[%c0_i32_54, %c0_i32_55, %c0_i32_56] : memref<1x336x3xf32, #tpu.memory_space<vmem>> -> memref<1x336x3xf32, #tpu.memory_space<vmem>>
    %41 = tpu.memref_squeeze %40 : memref<1x336x3xf32, #tpu.memory_space<vmem>> -> memref<336x3xf32, #tpu.memory_space<vmem>>
    %c24 = arith.constant 24 : index
    %c0_57 = arith.constant 0 : index
    %42 = vector.load %41[%c24, %c0_57] : memref<336x3xf32, #tpu.memory_space<vmem>>, vector<288x3xf32>
    %c1_58 = arith.constant 1 : index
    %c1_59 = arith.constant 1 : index
    %c0_60 = arith.constant 0 : index
    %c0_61 = arith.constant 0 : index
    %43 = vector.load %arg3[%c1_58, %c1_59, %c0_60, %c0_61] : memref<3x3x3x64xf32, #tpu.memory_space<vmem>>, vector<1x1x3x64xf32>
    %44 = vector.shape_cast %43 : vector<1x1x3x64xf32> to vector<3x64xf32>
    %cst_62 = arith.constant dense<0.000000e+00> : vector<288x64xf32>
    %45 = tpu.matmul %42, %44, %cst_62 {dimension_numbers = #tpu.dot_dimension_numbers<[1], [0], [0], [1], [0, 0, 1, 1], [], []>} : vector<288x3xf32>, vector<3x64xf32>, vector<288x64xf32> -> vector<288x64xf32>
    %46 = arith.addf %39, %45 : vector<288x64xf32>
    %c0_63 = arith.constant 0 : index
    %c0_64 = arith.constant 0 : index
    %47 = vector.load %arg14[%c0_63, %c0_64] : memref<288x64xf32, #tpu.memory_space<vmem>>, vector<288x64xf32>
    tpu.vector_store %arg14[%c0_63, %c0_64], %46 {strides = array<i32>} : memref<288x64xf32, #tpu.memory_space<vmem>>, vector<288x64xf32>,
    %c0_65 = arith.constant 0 : index
    %c0_66 = arith.constant 0 : index
    %48 = vector.load %arg14[%c0_65, %c0_66] : memref<288x64xf32, #tpu.memory_space<vmem>>, vector<288x64xf32>
    %c0_i32_67 = arith.constant 0 : i32
    %c0_i32_68 = arith.constant 0 : i32
    %c0_i32_69 = arith.constant 0 : i32
    %49 = tpu.memref_slice %arg1[%c0_i32_67, %c0_i32_68, %c0_i32_69] : memref<1x336x3xf32, #tpu.memory_space<vmem>> -> memref<1x336x3xf32, #tpu.memory_space<vmem>>
    %50 = tpu.memref_squeeze %49 : memref<1x336x3xf32, #tpu.memory_space<vmem>> -> memref<336x3xf32, #tpu.memory_space<vmem>>
    %c25 = arith.constant 25 : index
    %c0_70 = arith.constant 0 : index
    %51 = vector.load %50[%c25, %c0_70] : memref<336x3xf32, #tpu.memory_space<vmem>>, vector<288x3xf32>
    %c1_71 = arith.constant 1 : index
    %c2_72 = arith.constant 2 : index
    %c0_73 = arith.constant 0 : index
    %c0_74 = arith.constant 0 : index
    %52 = vector.load %arg3[%c1_71, %c2_72, %c0_73, %c0_74] : memref<3x3x3x64xf32, #tpu.memory_space<vmem>>, vector<1x1x3x64xf32>
    %53 = vector.shape_cast %52 : vector<1x1x3x64xf32> to vector<3x64xf32>
    %cst_75 = arith.constant dense<0.000000e+00> : vector<288x64xf32>
    %54 = tpu.matmul %51, %53, %cst_75 {dimension_numbers = #tpu.dot_dimension_numbers<[1], [0], [0], [1], [0, 0, 1, 1], [], []>} : vector<288x3xf32>, vector<3x64xf32>, vector<288x64xf32> -> vector<288x64xf32>
    %55 = arith.addf %48, %54 : vector<288x64xf32>
    %c0_76 = arith.constant 0 : index
    %c0_77 = arith.constant 0 : index
    %56 = vector.load %arg14[%c0_76, %c0_77] : memref<288x64xf32, #tpu.memory_space<vmem>>, vector<288x64xf32>
    tpu.vector_store %arg14[%c0_76, %c0_77], %55 {strides = array<i32>} : memref<288x64xf32, #tpu.memory_space<vmem>>, vector<288x64xf32>,
    %c0_78 = arith.constant 0 : index
    %c0_79 = arith.constant 0 : index
    %57 = vector.load %arg14[%c0_78, %c0_79] : memref<288x64xf32, #tpu.memory_space<vmem>>, vector<288x64xf32>
    %c0_i32_80 = arith.constant 0 : i32
    %c0_i32_81 = arith.constant 0 : i32
    %c0_i32_82 = arith.constant 0 : i32
    %58 = tpu.memref_slice %arg1[%c0_i32_80, %c0_i32_81, %c0_i32_82] : memref<1x336x3xf32, #tpu.memory_space<vmem>> -> memref<1x336x3xf32, #tpu.memory_space<vmem>>
    %59 = tpu.memref_squeeze %58 : memref<1x336x3xf32, #tpu.memory_space<vmem>> -> memref<336x3xf32, #tpu.memory_space<vmem>>
    %c41 = arith.constant 41 : index
    %c0_83 = arith.constant 0 : index
    %60 = vector.load %59[%c41, %c0_83] : memref<336x3xf32, #tpu.memory_space<vmem>>, vector<288x3xf32>
    %c2_84 = arith.constant 2 : index
    %c0_85 = arith.constant 0 : index
    %c0_86 = arith.constant 0 : index
    %c0_87 = arith.constant 0 : index
    %61 = vector.load %arg3[%c2_84, %c0_85, %c0_86, %c0_87] : memref<3x3x3x64xf32, #tpu.memory_space<vmem>>, vector<1x1x3x64xf32>
    %62 = vector.shape_cast %61 : vector<1x1x3x64xf32> to vector<3x64xf32>
    %cst_88 = arith.constant dense<0.000000e+00> : vector<288x64xf32>
    %63 = tpu.matmul %60, %62, %cst_88 {dimension_numbers = #tpu.dot_dimension_numbers<[1], [0], [0], [1], [0, 0, 1, 1], [], []>} : vector<288x3xf32>, vector<3x64xf32>, vector<288x64xf32> -> vector<288x64xf32>
    %64 = arith.addf %57, %63 : vector<288x64xf32>
    %c0_89 = arith.constant 0 : index
    %c0_90 = arith.constant 0 : index
    %65 = vector.load %arg14[%c0_89, %c0_90] : memref<288x64xf32, #tpu.memory_space<vmem>>, vector<288x64xf32>
    tpu.vector_store %arg14[%c0_89, %c0_90], %64 {strides = array<i32>} : memref<288x64xf32, #tpu.memory_space<vmem>>, vector<288x64xf32>,
    %c0_91 = arith.constant 0 : index
    %c0_92 = arith.constant 0 : index
    %66 = vector.load %arg14[%c0_91, %c0_92] : memref<288x64xf32, #tpu.memory_space<vmem>>, vector<288x64xf32>
    %c0_i32_93 = arith.constant 0 : i32
    %c0_i32_94 = arith.constant 0 : i32
    %c0_i32_95 = arith.constant 0 : i32
    %67 = tpu.memref_slice %arg1[%c0_i32_93, %c0_i32_94, %c0_i32_95] : memref<1x336x3xf32, #tpu.memory_space<vmem>> -> memref<1x336x3xf32, #tpu.memory_space<vmem>>
    %68 = tpu.memref_squeeze %67 : memref<1x336x3xf32, #tpu.memory_space<vmem>> -> memref<336x3xf32, #tpu.memory_space<vmem>>
    %c42 = arith.constant 42 : index
    %c0_96 = arith.constant 0 : index
    %69 = vector.load %68[%c42, %c0_96] : memref<336x3xf32, #tpu.memory_space<vmem>>, vector<288x3xf32>
    %c2_97 = arith.constant 2 : index
    %c1_98 = arith.constant 1 : index
    %c0_99 = arith.constant 0 : index
    %c0_100 = arith.constant 0 : index
    %70 = vector.load %arg3[%c2_97, %c1_98, %c0_99, %c0_100] : memref<3x3x3x64xf32, #tpu.memory_space<vmem>>, vector<1x1x3x64xf32>
    %71 = vector.shape_cast %70 : vector<1x1x3x64xf32> to vector<3x64xf32>
    %cst_101 = arith.constant dense<0.000000e+00> : vector<288x64xf32>
    %72 = tpu.matmul %69, %71, %cst_101 {dimension_numbers = #tpu.dot_dimension_numbers<[1], [0], [0], [1], [0, 0, 1, 1], [], []>} : vector<288x3xf32>, vector<3x64xf32>, vector<288x64xf32> -> vector<288x64xf32>
    %73 = arith.addf %66, %72 : vector<288x64xf32>
    %c0_102 = arith.constant 0 : index
    %c0_103 = arith.constant 0 : index
    %74 = vector.load %arg14[%c0_102, %c0_103] : memref<288x64xf32, #tpu.memory_space<vmem>>, vector<288x64xf32>
    tpu.vector_store %arg14[%c0_102, %c0_103], %73 {strides = array<i32>} : memref<288x64xf32, #tpu.memory_space<vmem>>, vector<288x64xf32>,
    %c0_104 = arith.constant 0 : index
    %c0_105 = arith.constant 0 : index
    %75 = vector.load %arg14[%c0_104, %c0_105] : memref<288x64xf32, #tpu.memory_space<vmem>>, vector<288x64xf32>
    %c0_i32_106 = arith.constant 0 : i32
    %c0_i32_107 = arith.constant 0 : i32
    %c0_i32_108 = arith.constant 0 : i32
    %76 = tpu.memref_slice %arg1[%c0_i32_106, %c0_i32_107, %c0_i32_108] : memref<1x336x3xf32, #tpu.memory_space<vmem>> -> memref<1x336x3xf32, #tpu.memory_space<vmem>>
    %77 = tpu.memref_squeeze %76 : memref<1x336x3xf32, #tpu.memory_space<vmem>> -> memref<336x3xf32, #tpu.memory_space<vmem>>
    %c43 = arith.constant 43 : index
    %c0_109 = arith.constant 0 : index
    %78 = vector.load %77[%c43, %c0_109] : memref<336x3xf32, #tpu.memory_space<vmem>>, vector<288x3xf32>
    %c2_110 = arith.constant 2 : index
    %c2_111 = arith.constant 2 : index
    %c0_112 = arith.constant 0 : index
    %c0_113 = arith.constant 0 : index
    %79 = vector.load %arg3[%c2_110, %c2_111, %c0_112, %c0_113] : memref<3x3x3x64xf32, #tpu.memory_space<vmem>>, vector<1x1x3x64xf32>
    %80 = vector.shape_cast %79 : vector<1x1x3x64xf32> to vector<3x64xf32>
    %cst_114 = arith.constant dense<0.000000e+00> : vector<288x64xf32>
    %81 = tpu.matmul %78, %80, %cst_114 {dimension_numbers = #tpu.dot_dimension_numbers<[1], [0], [0], [1], [0, 0, 1, 1], [], []>} : vector<288x3xf32>, vector<3x64xf32>, vector<288x64xf32> -> vector<288x64xf32>
    %82 = arith.addf %75, %81 : vector<288x64xf32>
    %c0_115 = arith.constant 0 : index
    %c0_116 = arith.constant 0 : index
    %83 = vector.load %arg14[%c0_115, %c0_116] : memref<288x64xf32, #tpu.memory_space<vmem>>, vector<288x64xf32>
    tpu.vector_store %arg14[%c0_115, %c0_116], %82 {strides = array<i32>} : memref<288x64xf32, #tpu.memory_space<vmem>>, vector<288x64xf32>,
    %c0_117 = arith.constant 0 : index
    %c0_118 = arith.constant 0 : index
    %84 = vector.load %arg14[%c0_117, %c0_118] : memref<288x64xf32, #tpu.memory_space<vmem>>, vector<288x64xf32>
    %c0_119 = arith.constant 0 : index
    %c0_120 = arith.constant 0 : index
    %85 = vector.load %arg4[%c0_119, %c0_120] : memref<1x64xf32, #tpu.memory_space<vmem>>, vector<1x64xf32>
    %86 = vector.broadcast %85 : vector<1x64xf32> to vector<288x64xf32>
    %87 = arith.addf %84, %86 : vector<288x64xf32>
    %cst_121 = arith.constant 0.000000e+00 : f32
    %88 = vector.broadcast %cst_121 : f32 to vector<288x64xf32>
    %89 = arith.maximumf %87, %88 : vector<288x64xf32>
    %90 = vector.broadcast %0 : vector<288x1xf32> to vector<288x64xf32>
    %91 = arith.mulf %89, %90 : vector<288x64xf32>
    %cst_122 = arith.constant 0.000000e+00 : f32
    %92 = vector.broadcast %cst_122 : f32 to vector<336x64xf32>
    %c0_123 = arith.constant 0 : index
    %c0_124 = arith.constant 0 : index
    %93 = vector.load %arg12[%c0_123, %c0_124] : memref<336x64xf32, #tpu.memory_space<vmem>>, vector<336x64xf32>
    tpu.vector_store %arg12[%c0_123, %c0_124], %92 {strides = array<i32>} : memref<336x64xf32, #tpu.memory_space<vmem>>, vector<336x64xf32>,
    %c24_125 = arith.constant 24 : index
    %c0_126 = arith.constant 0 : index
    %94 = vector.load %arg12[%c24_125, %c0_126] : memref<336x64xf32, #tpu.memory_space<vmem>>, vector<288x64xf32>
    tpu.vector_store %arg12[%c24_125, %c0_126], %91 {strides = array<i32>} : memref<336x64xf32, #tpu.memory_space<vmem>>, vector<288x64xf32>,
    %cst_127 = arith.constant 0.000000e+00 : f32
    %95 = vector.broadcast %cst_127 : f32 to vector<288x128xf32>
    %c0_128 = arith.constant 0 : index
    %c0_129 = arith.constant 0 : index
    %96 = vector.load %arg15[%c0_128, %c0_129] : memref<288x128xf32, #tpu.memory_space<vmem>>, vector<288x128xf32>
    tpu.vector_store %arg15[%c0_128, %c0_129], %95 {strides = array<i32>} : memref<288x128xf32, #tpu.memory_space<vmem>>, vector<288x128xf32>,
    %c0_130 = arith.constant 0 : index
    %c0_131 = arith.constant 0 : index
    %97 = vector.load %arg15[%c0_130, %c0_131] : memref<288x128xf32, #tpu.memory_space<vmem>>, vector<288x128xf32>
    %c5_132 = arith.constant 5 : index
    %c0_133 = arith.constant 0 : index
    %98 = vector.load %arg12[%c5_132, %c0_133] : memref<336x64xf32, #tpu.memory_space<vmem>>, vector<288x64xf32>
    %c0_134 = arith.constant 0 : index
    %c0_135 = arith.constant 0 : index
    %c0_136 = arith.constant 0 : index
    %c0_137 = arith.constant 0 : index
    %99 = vector.load %arg5[%c0_134, %c0_135, %c0_136, %c0_137] : memref<3x3x64x128xf32, #tpu.memory_space<vmem>>, vector<1x1x64x128xf32>
    %100 = vector.shape_cast %99 : vector<1x1x64x128xf32> to vector<64x128xf32>
    %cst_138 = arith.constant dense<0.000000e+00> : vector<288x128xf32>
    %101 = tpu.matmul %98, %100, %cst_138 {dimension_numbers = #tpu.dot_dimension_numbers<[1], [0], [0], [1], [0, 0, 1, 1], [], []>} : vector<288x64xf32>, vector<64x128xf32>, vector<288x128xf32> -> vector<288x128xf32>
    %102 = arith.addf %97, %101 : vector<288x128xf32>
    %c0_139 = arith.constant 0 : index
    %c0_140 = arith.constant 0 : index
    %103 = vector.load %arg15[%c0_139, %c0_140] : memref<288x128xf32, #tpu.memory_space<vmem>>, vector<288x128xf32>
    tpu.vector_store %arg15[%c0_139, %c0_140], %102 {strides = array<i32>} : memref<288x128xf32, #tpu.memory_space<vmem>>, vector<288x128xf32>,
    %c0_141 = arith.constant 0 : index
    %c0_142 = arith.constant 0 : index
    %104 = vector.load %arg15[%c0_141, %c0_142] : memref<288x128xf32, #tpu.memory_space<vmem>>, vector<288x128xf32>
    %c6_143 = arith.constant 6 : index
    %c0_144 = arith.constant 0 : index
    %105 = vector.load %arg12[%c6_143, %c0_144] : memref<336x64xf32, #tpu.memory_space<vmem>>, vector<288x64xf32>
    %c0_145 = arith.constant 0 : index
    %c1_146 = arith.constant 1 : index
    %c0_147 = arith.constant 0 : index
    %c0_148 = arith.constant 0 : index
    %106 = vector.load %arg5[%c0_145, %c1_146, %c0_147, %c0_148] : memref<3x3x64x128xf32, #tpu.memory_space<vmem>>, vector<1x1x64x128xf32>
    %107 = vector.shape_cast %106 : vector<1x1x64x128xf32> to vector<64x128xf32>
    %cst_149 = arith.constant dense<0.000000e+00> : vector<288x128xf32>
    %108 = tpu.matmul %105, %107, %cst_149 {dimension_numbers = #tpu.dot_dimension_numbers<[1], [0], [0], [1], [0, 0, 1, 1], [], []>} : vector<288x64xf32>, vector<64x128xf32>, vector<288x128xf32> -> vector<288x128xf32>
    %109 = arith.addf %104, %108 : vector<288x128xf32>
    %c0_150 = arith.constant 0 : index
    %c0_151 = arith.constant 0 : index
    %110 = vector.load %arg15[%c0_150, %c0_151] : memref<288x128xf32, #tpu.memory_space<vmem>>, vector<288x128xf32>
    tpu.vector_store %arg15[%c0_150, %c0_151], %109 {strides = array<i32>} : memref<288x128xf32, #tpu.memory_space<vmem>>, vector<288x128xf32>,
    %c0_152 = arith.constant 0 : index
    %c0_153 = arith.constant 0 : index
    %111 = vector.load %arg15[%c0_152, %c0_153] : memref<288x128xf32, #tpu.memory_space<vmem>>, vector<288x128xf32>
    %c7_154 = arith.constant 7 : index
    %c0_155 = arith.constant 0 : index
    %112 = vector.load %arg12[%c7_154, %c0_155] : memref<336x64xf32, #tpu.memory_space<vmem>>, vector<288x64xf32>
    %c0_156 = arith.constant 0 : index
    %c2_157 = arith.constant 2 : index
    %c0_158 = arith.constant 0 : index
    %c0_159 = arith.constant 0 : index
    %113 = vector.load %arg5[%c0_156, %c2_157, %c0_158, %c0_159] : memref<3x3x64x128xf32, #tpu.memory_space<vmem>>, vector<1x1x64x128xf32>
    %114 = vector.shape_cast %113 : vector<1x1x64x128xf32> to vector<64x128xf32>
    %cst_160 = arith.constant dense<0.000000e+00> : vector<288x128xf32>
    %115 = tpu.matmul %112, %114, %cst_160 {dimension_numbers = #tpu.dot_dimension_numbers<[1], [0], [0], [1], [0, 0, 1, 1], [], []>} : vector<288x64xf32>, vector<64x128xf32>, vector<288x128xf32> -> vector<288x128xf32>
    %116 = arith.addf %111, %115 : vector<288x128xf32>
    %c0_161 = arith.constant 0 : index
    %c0_162 = arith.constant 0 : index
    %117 = vector.load %arg15[%c0_161, %c0_162] : memref<288x128xf32, #tpu.memory_space<vmem>>, vector<288x128xf32>
    tpu.vector_store %arg15[%c0_161, %c0_162], %116 {strides = array<i32>} : memref<288x128xf32, #tpu.memory_space<vmem>>, vector<288x128xf32>,
    %c0_163 = arith.constant 0 : index
    %c0_164 = arith.constant 0 : index
    %118 = vector.load %arg15[%c0_163, %c0_164] : memref<288x128xf32, #tpu.memory_space<vmem>>, vector<288x128xf32>
    %c23_165 = arith.constant 23 : index
    %c0_166 = arith.constant 0 : index
    %119 = vector.load %arg12[%c23_165, %c0_166] : memref<336x64xf32, #tpu.memory_space<vmem>>, vector<288x64xf32>
    %c1_167 = arith.constant 1 : index
    %c0_168 = arith.constant 0 : index
    %c0_169 = arith.constant 0 : index
    %c0_170 = arith.constant 0 : index
    %120 = vector.load %arg5[%c1_167, %c0_168, %c0_169, %c0_170] : memref<3x3x64x128xf32, #tpu.memory_space<vmem>>, vector<1x1x64x128xf32>
    %121 = vector.shape_cast %120 : vector<1x1x64x128xf32> to vector<64x128xf32>
    %cst_171 = arith.constant dense<0.000000e+00> : vector<288x128xf32>
    %122 = tpu.matmul %119, %121, %cst_171 {dimension_numbers = #tpu.dot_dimension_numbers<[1], [0], [0], [1], [0, 0, 1, 1], [], []>} : vector<288x64xf32>, vector<64x128xf32>, vector<288x128xf32> -> vector<288x128xf32>
    %123 = arith.addf %118, %122 : vector<288x128xf32>
    %c0_172 = arith.constant 0 : index
    %c0_173 = arith.constant 0 : index
    %124 = vector.load %arg15[%c0_172, %c0_173] : memref<288x128xf32, #tpu.memory_space<vmem>>, vector<288x128xf32>
    tpu.vector_store %arg15[%c0_172, %c0_173], %123 {strides = array<i32>} : memref<288x128xf32, #tpu.memory_space<vmem>>, vector<288x128xf32>,
    %c0_174 = arith.constant 0 : index
    %c0_175 = arith.constant 0 : index
    %125 = vector.load %arg15[%c0_174, %c0_175] : memref<288x128xf32, #tpu.memory_space<vmem>>, vector<288x128xf32>
    %c24_176 = arith.constant 24 : index
    %c0_177 = arith.constant 0 : index
    %126 = vector.load %arg12[%c24_176, %c0_177] : memref<336x64xf32, #tpu.memory_space<vmem>>, vector<288x64xf32>
    %c1_178 = arith.constant 1 : index
    %c1_179 = arith.constant 1 : index
    %c0_180 = arith.constant 0 : index
    %c0_181 = arith.constant 0 : index
    %127 = vector.load %arg5[%c1_178, %c1_179, %c0_180, %c0_181] : memref<3x3x64x128xf32, #tpu.memory_space<vmem>>, vector<1x1x64x128xf32>
    %128 = vector.shape_cast %127 : vector<1x1x64x128xf32> to vector<64x128xf32>
    %cst_182 = arith.constant dense<0.000000e+00> : vector<288x128xf32>
    %129 = tpu.matmul %126, %128, %cst_182 {dimension_numbers = #tpu.dot_dimension_numbers<[1], [0], [0], [1], [0, 0, 1, 1], [], []>} : vector<288x64xf32>, vector<64x128xf32>, vector<288x128xf32> -> vector<288x128xf32>
    %130 = arith.addf %125, %129 : vector<288x128xf32>
    %c0_183 = arith.constant 0 : index
    %c0_184 = arith.constant 0 : index
    %131 = vector.load %arg15[%c0_183, %c0_184] : memref<288x128xf32, #tpu.memory_space<vmem>>, vector<288x128xf32>
    tpu.vector_store %arg15[%c0_183, %c0_184], %130 {strides = array<i32>} : memref<288x128xf32, #tpu.memory_space<vmem>>, vector<288x128xf32>,
    %c0_185 = arith.constant 0 : index
    %c0_186 = arith.constant 0 : index
    %132 = vector.load %arg15[%c0_185, %c0_186] : memref<288x128xf32, #tpu.memory_space<vmem>>, vector<288x128xf32>
    %c25_187 = arith.constant 25 : index
    %c0_188 = arith.constant 0 : index
    %133 = vector.load %arg12[%c25_187, %c0_188] : memref<336x64xf32, #tpu.memory_space<vmem>>, vector<288x64xf32>
    %c1_189 = arith.constant 1 : index
    %c2_190 = arith.constant 2 : index
    %c0_191 = arith.constant 0 : index
    %c0_192 = arith.constant 0 : index
    %134 = vector.load %arg5[%c1_189, %c2_190, %c0_191, %c0_192] : memref<3x3x64x128xf32, #tpu.memory_space<vmem>>, vector<1x1x64x128xf32>
    %135 = vector.shape_cast %134 : vector<1x1x64x128xf32> to vector<64x128xf32>
    %cst_193 = arith.constant dense<0.000000e+00> : vector<288x128xf32>
    %136 = tpu.matmul %133, %135, %cst_193 {dimension_numbers = #tpu.dot_dimension_numbers<[1], [0], [0], [1], [0, 0, 1, 1], [], []>} : vector<288x64xf32>, vector<64x128xf32>, vector<288x128xf32> -> vector<288x128xf32>
    %137 = arith.addf %132, %136 : vector<288x128xf32>
    %c0_194 = arith.constant 0 : index
    %c0_195 = arith.constant 0 : index
    %138 = vector.load %arg15[%c0_194, %c0_195] : memref<288x128xf32, #tpu.memory_space<vmem>>, vector<288x128xf32>
    tpu.vector_store %arg15[%c0_194, %c0_195], %137 {strides = array<i32>} : memref<288x128xf32, #tpu.memory_space<vmem>>, vector<288x128xf32>,
    %c0_196 = arith.constant 0 : index
    %c0_197 = arith.constant 0 : index
    %139 = vector.load %arg15[%c0_196, %c0_197] : memref<288x128xf32, #tpu.memory_space<vmem>>, vector<288x128xf32>
    %c41_198 = arith.constant 41 : index
    %c0_199 = arith.constant 0 : index
    %140 = vector.load %arg12[%c41_198, %c0_199] : memref<336x64xf32, #tpu.memory_space<vmem>>, vector<288x64xf32>
    %c2_200 = arith.constant 2 : index
    %c0_201 = arith.constant 0 : index
    %c0_202 = arith.constant 0 : index
    %c0_203 = arith.constant 0 : index
    %141 = vector.load %arg5[%c2_200, %c0_201, %c0_202, %c0_203] : memref<3x3x64x128xf32, #tpu.memory_space<vmem>>, vector<1x1x64x128xf32>
    %142 = vector.shape_cast %141 : vector<1x1x64x128xf32> to vector<64x128xf32>
    %cst_204 = arith.constant dense<0.000000e+00> : vector<288x128xf32>
    %143 = tpu.matmul %140, %142, %cst_204 {dimension_numbers = #tpu.dot_dimension_numbers<[1], [0], [0], [1], [0, 0, 1, 1], [], []>} : vector<288x64xf32>, vector<64x128xf32>, vector<288x128xf32> -> vector<288x128xf32>
    %144 = arith.addf %139, %143 : vector<288x128xf32>
    %c0_205 = arith.constant 0 : index
    %c0_206 = arith.constant 0 : index
    %145 = vector.load %arg15[%c0_205, %c0_206] : memref<288x128xf32, #tpu.memory_space<vmem>>, vector<288x128xf32>
    tpu.vector_store %arg15[%c0_205, %c0_206], %144 {strides = array<i32>} : memref<288x128xf32, #tpu.memory_space<vmem>>, vector<288x128xf32>,
    %c0_207 = arith.constant 0 : index
    %c0_208 = arith.constant 0 : index
    %146 = vector.load %arg15[%c0_207, %c0_208] : memref<288x128xf32, #tpu.memory_space<vmem>>, vector<288x128xf32>
    %c42_209 = arith.constant 42 : index
    %c0_210 = arith.constant 0 : index
    %147 = vector.load %arg12[%c42_209, %c0_210] : memref<336x64xf32, #tpu.memory_space<vmem>>, vector<288x64xf32>
    %c2_211 = arith.constant 2 : index
    %c1_212 = arith.constant 1 : index
    %c0_213 = arith.constant 0 : index
    %c0_214 = arith.constant 0 : index
    %148 = vector.load %arg5[%c2_211, %c1_212, %c0_213, %c0_214] : memref<3x3x64x128xf32, #tpu.memory_space<vmem>>, vector<1x1x64x128xf32>
    %149 = vector.shape_cast %148 : vector<1x1x64x128xf32> to vector<64x128xf32>
    %cst_215 = arith.constant dense<0.000000e+00> : vector<288x128xf32>
    %150 = tpu.matmul %147, %149, %cst_215 {dimension_numbers = #tpu.dot_dimension_numbers<[1], [0], [0], [1], [0, 0, 1, 1], [], []>} : vector<288x64xf32>, vector<64x128xf32>, vector<288x128xf32> -> vector<288x128xf32>
    %151 = arith.addf %146, %150 : vector<288x128xf32>
    %c0_216 = arith.constant 0 : index
    %c0_217 = arith.constant 0 : index
    %152 = vector.load %arg15[%c0_216, %c0_217] : memref<288x128xf32, #tpu.memory_space<vmem>>, vector<288x128xf32>
    tpu.vector_store %arg15[%c0_216, %c0_217], %151 {strides = array<i32>} : memref<288x128xf32, #tpu.memory_space<vmem>>, vector<288x128xf32>,
    %c0_218 = arith.constant 0 : index
    %c0_219 = arith.constant 0 : index
    %153 = vector.load %arg15[%c0_218, %c0_219] : memref<288x128xf32, #tpu.memory_space<vmem>>, vector<288x128xf32>
    %c43_220 = arith.constant 43 : index
    %c0_221 = arith.constant 0 : index
    %154 = vector.load %arg12[%c43_220, %c0_221] : memref<336x64xf32, #tpu.memory_space<vmem>>, vector<288x64xf32>
    %c2_222 = arith.constant 2 : index
    %c2_223 = arith.constant 2 : index
    %c0_224 = arith.constant 0 : index
    %c0_225 = arith.constant 0 : index
    %155 = vector.load %arg5[%c2_222, %c2_223, %c0_224, %c0_225] : memref<3x3x64x128xf32, #tpu.memory_space<vmem>>, vector<1x1x64x128xf32>
    %156 = vector.shape_cast %155 : vector<1x1x64x128xf32> to vector<64x128xf32>
    %cst_226 = arith.constant dense<0.000000e+00> : vector<288x128xf32>
    %157 = tpu.matmul %154, %156, %cst_226 {dimension_numbers = #tpu.dot_dimension_numbers<[1], [0], [0], [1], [0, 0, 1, 1], [], []>} : vector<288x64xf32>, vector<64x128xf32>, vector<288x128xf32> -> vector<288x128xf32>
    %158 = arith.addf %153, %157 : vector<288x128xf32>
    %c0_227 = arith.constant 0 : index
    %c0_228 = arith.constant 0 : index
    %159 = vector.load %arg15[%c0_227, %c0_228] : memref<288x128xf32, #tpu.memory_space<vmem>>, vector<288x128xf32>
    tpu.vector_store %arg15[%c0_227, %c0_228], %158 {strides = array<i32>} : memref<288x128xf32, #tpu.memory_space<vmem>>, vector<288x128xf32>,
    %c0_229 = arith.constant 0 : index
    %c0_230 = arith.constant 0 : index
    %160 = vector.load %arg15[%c0_229, %c0_230] : memref<288x128xf32, #tpu.memory_space<vmem>>, vector<288x128xf32>
    %c0_231 = arith.constant 0 : index
    %c0_232 = arith.constant 0 : index
    %161 = vector.load %arg6[%c0_231, %c0_232] : memref<1x128xf32, #tpu.memory_space<vmem>>, vector<1x128xf32>
    %162 = vector.broadcast %161 : vector<1x128xf32> to vector<288x128xf32>
    %163 = arith.addf %160, %162 : vector<288x128xf32>
    %cst_233 = arith.constant 0.000000e+00 : f32
    %164 = vector.broadcast %cst_233 : f32 to vector<288x128xf32>
    %165 = arith.maximumf %163, %164 : vector<288x128xf32>
    %166 = vector.broadcast %0 : vector<288x1xf32> to vector<288x128xf32>
    %167 = arith.mulf %165, %166 : vector<288x128xf32>
    %cst_234 = arith.constant 0.000000e+00 : f32
    %168 = vector.broadcast %cst_234 : f32 to vector<336x128xf32>
    %c0_235 = arith.constant 0 : index
    %c0_236 = arith.constant 0 : index
    %169 = vector.load %arg13[%c0_235, %c0_236] : memref<336x128xf32, #tpu.memory_space<vmem>>, vector<336x128xf32>
    tpu.vector_store %arg13[%c0_235, %c0_236], %168 {strides = array<i32>} : memref<336x128xf32, #tpu.memory_space<vmem>>, vector<336x128xf32>,
    %c24_237 = arith.constant 24 : index
    %c0_238 = arith.constant 0 : index
    %170 = vector.load %arg13[%c24_237, %c0_238] : memref<336x128xf32, #tpu.memory_space<vmem>>, vector<288x128xf32>
    tpu.vector_store %arg13[%c24_237, %c0_238], %167 {strides = array<i32>} : memref<336x128xf32, #tpu.memory_space<vmem>>, vector<288x128xf32>,
    %cst_239 = arith.constant 0.000000e+00 : f32
    %171 = vector.broadcast %cst_239 : f32 to vector<288x128xf32>
    %c0_240 = arith.constant 0 : index
    %c0_241 = arith.constant 0 : index
    %172 = vector.load %arg16[%c0_240, %c0_241] : memref<288x128xf32, #tpu.memory_space<vmem>>, vector<288x128xf32>
    tpu.vector_store %arg16[%c0_240, %c0_241], %171 {strides = array<i32>} : memref<288x128xf32, #tpu.memory_space<vmem>>, vector<288x128xf32>,
    %c0_242 = arith.constant 0 : index
    %c0_243 = arith.constant 0 : index
    %173 = vector.load %arg16[%c0_242, %c0_243] : memref<288x128xf32, #tpu.memory_space<vmem>>, vector<288x128xf32>
    %c5_244 = arith.constant 5 : index
    %c0_245 = arith.constant 0 : index
    %174 = vector.load %arg13[%c5_244, %c0_245] : memref<336x128xf32, #tpu.memory_space<vmem>>, vector<288x128xf32>
    %c0_246 = arith.constant 0 : index
    %c0_247 = arith.constant 0 : index
    %c0_248 = arith.constant 0 : index
    %c0_249 = arith.constant 0 : index
    %175 = vector.load %arg7[%c0_246, %c0_247, %c0_248, %c0_249] : memref<3x3x128x128xf32, #tpu.memory_space<vmem>>, vector<1x1x128x128xf32>
    %176 = vector.shape_cast %175 : vector<1x1x128x128xf32> to vector<128x128xf32>
    %cst_250 = arith.constant dense<0.000000e+00> : vector<288x128xf32>
    %177 = tpu.matmul %174, %176, %cst_250 {dimension_numbers = #tpu.dot_dimension_numbers<[1], [0], [0], [1], [0, 0, 1, 1], [], []>} : vector<288x128xf32>, vector<128x128xf32>, vector<288x128xf32> -> vector<288x128xf32>
    %178 = arith.addf %173, %177 : vector<288x128xf32>
    %c0_251 = arith.constant 0 : index
    %c0_252 = arith.constant 0 : index
    %179 = vector.load %arg16[%c0_251, %c0_252] : memref<288x128xf32, #tpu.memory_space<vmem>>, vector<288x128xf32>
    tpu.vector_store %arg16[%c0_251, %c0_252], %178 {strides = array<i32>} : memref<288x128xf32, #tpu.memory_space<vmem>>, vector<288x128xf32>,
    %c0_253 = arith.constant 0 : index
    %c0_254 = arith.constant 0 : index
    %180 = vector.load %arg16[%c0_253, %c0_254] : memref<288x128xf32, #tpu.memory_space<vmem>>, vector<288x128xf32>
    %c6_255 = arith.constant 6 : index
    %c0_256 = arith.constant 0 : index
    %181 = vector.load %arg13[%c6_255, %c0_256] : memref<336x128xf32, #tpu.memory_space<vmem>>, vector<288x128xf32>
    %c0_257 = arith.constant 0 : index
    %c1_258 = arith.constant 1 : index
    %c0_259 = arith.constant 0 : index
    %c0_260 = arith.constant 0 : index
    %182 = vector.load %arg7[%c0_257, %c1_258, %c0_259, %c0_260] : memref<3x3x128x128xf32, #tpu.memory_space<vmem>>, vector<1x1x128x128xf32>
    %183 = vector.shape_cast %182 : vector<1x1x128x128xf32> to vector<128x128xf32>
    %cst_261 = arith.constant dense<0.000000e+00> : vector<288x128xf32>
    %184 = tpu.matmul %181, %183, %cst_261 {dimension_numbers = #tpu.dot_dimension_numbers<[1], [0], [0], [1], [0, 0, 1, 1], [], []>} : vector<288x128xf32>, vector<128x128xf32>, vector<288x128xf32> -> vector<288x128xf32>
    %185 = arith.addf %180, %184 : vector<288x128xf32>
    %c0_262 = arith.constant 0 : index
    %c0_263 = arith.constant 0 : index
    %186 = vector.load %arg16[%c0_262, %c0_263] : memref<288x128xf32, #tpu.memory_space<vmem>>, vector<288x128xf32>
    tpu.vector_store %arg16[%c0_262, %c0_263], %185 {strides = array<i32>} : memref<288x128xf32, #tpu.memory_space<vmem>>, vector<288x128xf32>,
    %c0_264 = arith.constant 0 : index
    %c0_265 = arith.constant 0 : index
    %187 = vector.load %arg16[%c0_264, %c0_265] : memref<288x128xf32, #tpu.memory_space<vmem>>, vector<288x128xf32>
    %c7_266 = arith.constant 7 : index
    %c0_267 = arith.constant 0 : index
    %188 = vector.load %arg13[%c7_266, %c0_267] : memref<336x128xf32, #tpu.memory_space<vmem>>, vector<288x128xf32>
    %c0_268 = arith.constant 0 : index
    %c2_269 = arith.constant 2 : index
    %c0_270 = arith.constant 0 : index
    %c0_271 = arith.constant 0 : index
    %189 = vector.load %arg7[%c0_268, %c2_269, %c0_270, %c0_271] : memref<3x3x128x128xf32, #tpu.memory_space<vmem>>, vector<1x1x128x128xf32>
    %190 = vector.shape_cast %189 : vector<1x1x128x128xf32> to vector<128x128xf32>
    %cst_272 = arith.constant dense<0.000000e+00> : vector<288x128xf32>
    %191 = tpu.matmul %188, %190, %cst_272 {dimension_numbers = #tpu.dot_dimension_numbers<[1], [0], [0], [1], [0, 0, 1, 1], [], []>} : vector<288x128xf32>, vector<128x128xf32>, vector<288x128xf32> -> vector<288x128xf32>
    %192 = arith.addf %187, %191 : vector<288x128xf32>
    %c0_273 = arith.constant 0 : index
    %c0_274 = arith.constant 0 : index
    %193 = vector.load %arg16[%c0_273, %c0_274] : memref<288x128xf32, #tpu.memory_space<vmem>>, vector<288x128xf32>
    tpu.vector_store %arg16[%c0_273, %c0_274], %192 {strides = array<i32>} : memref<288x128xf32, #tpu.memory_space<vmem>>, vector<288x128xf32>,
    %c0_275 = arith.constant 0 : index
    %c0_276 = arith.constant 0 : index
    %194 = vector.load %arg16[%c0_275, %c0_276] : memref<288x128xf32, #tpu.memory_space<vmem>>, vector<288x128xf32>
    %c23_277 = arith.constant 23 : index
    %c0_278 = arith.constant 0 : index
    %195 = vector.load %arg13[%c23_277, %c0_278] : memref<336x128xf32, #tpu.memory_space<vmem>>, vector<288x128xf32>
    %c1_279 = arith.constant 1 : index
    %c0_280 = arith.constant 0 : index
    %c0_281 = arith.constant 0 : index
    %c0_282 = arith.constant 0 : index
    %196 = vector.load %arg7[%c1_279, %c0_280, %c0_281, %c0_282] : memref<3x3x128x128xf32, #tpu.memory_space<vmem>>, vector<1x1x128x128xf32>
    %197 = vector.shape_cast %196 : vector<1x1x128x128xf32> to vector<128x128xf32>
    %cst_283 = arith.constant dense<0.000000e+00> : vector<288x128xf32>
    %198 = tpu.matmul %195, %197, %cst_283 {dimension_numbers = #tpu.dot_dimension_numbers<[1], [0], [0], [1], [0, 0, 1, 1], [], []>} : vector<288x128xf32>, vector<128x128xf32>, vector<288x128xf32> -> vector<288x128xf32>
    %199 = arith.addf %194, %198 : vector<288x128xf32>
    %c0_284 = arith.constant 0 : index
    %c0_285 = arith.constant 0 : index
    %200 = vector.load %arg16[%c0_284, %c0_285] : memref<288x128xf32, #tpu.memory_space<vmem>>, vector<288x128xf32>
    tpu.vector_store %arg16[%c0_284, %c0_285], %199 {strides = array<i32>} : memref<288x128xf32, #tpu.memory_space<vmem>>, vector<288x128xf32>,
    %c0_286 = arith.constant 0 : index
    %c0_287 = arith.constant 0 : index
    %201 = vector.load %arg16[%c0_286, %c0_287] : memref<288x128xf32, #tpu.memory_space<vmem>>, vector<288x128xf32>
    %c24_288 = arith.constant 24 : index
    %c0_289 = arith.constant 0 : index
    %202 = vector.load %arg13[%c24_288, %c0_289] : memref<336x128xf32, #tpu.memory_space<vmem>>, vector<288x128xf32>
    %c1_290 = arith.constant 1 : index
    %c1_291 = arith.constant 1 : index
    %c0_292 = arith.constant 0 : index
    %c0_293 = arith.constant 0 : index
    %203 = vector.load %arg7[%c1_290, %c1_291, %c0_292, %c0_293] : memref<3x3x128x128xf32, #tpu.memory_space<vmem>>, vector<1x1x128x128xf32>
    %204 = vector.shape_cast %203 : vector<1x1x128x128xf32> to vector<128x128xf32>
    %cst_294 = arith.constant dense<0.000000e+00> : vector<288x128xf32>
    %205 = tpu.matmul %202, %204, %cst_294 {dimension_numbers = #tpu.dot_dimension_numbers<[1], [0], [0], [1], [0, 0, 1, 1], [], []>} : vector<288x128xf32>, vector<128x128xf32>, vector<288x128xf32> -> vector<288x128xf32>
    %206 = arith.addf %201, %205 : vector<288x128xf32>
    %c0_295 = arith.constant 0 : index
    %c0_296 = arith.constant 0 : index
    %207 = vector.load %arg16[%c0_295, %c0_296] : memref<288x128xf32, #tpu.memory_space<vmem>>, vector<288x128xf32>
    tpu.vector_store %arg16[%c0_295, %c0_296], %206 {strides = array<i32>} : memref<288x128xf32, #tpu.memory_space<vmem>>, vector<288x128xf32>,
    %c0_297 = arith.constant 0 : index
    %c0_298 = arith.constant 0 : index
    %208 = vector.load %arg16[%c0_297, %c0_298] : memref<288x128xf32, #tpu.memory_space<vmem>>, vector<288x128xf32>
    %c25_299 = arith.constant 25 : index
    %c0_300 = arith.constant 0 : index
    %209 = vector.load %arg13[%c25_299, %c0_300] : memref<336x128xf32, #tpu.memory_space<vmem>>, vector<288x128xf32>
    %c1_301 = arith.constant 1 : index
    %c2_302 = arith.constant 2 : index
    %c0_303 = arith.constant 0 : index
    %c0_304 = arith.constant 0 : index
    %210 = vector.load %arg7[%c1_301, %c2_302, %c0_303, %c0_304] : memref<3x3x128x128xf32, #tpu.memory_space<vmem>>, vector<1x1x128x128xf32>
    %211 = vector.shape_cast %210 : vector<1x1x128x128xf32> to vector<128x128xf32>
    %cst_305 = arith.constant dense<0.000000e+00> : vector<288x128xf32>
    %212 = tpu.matmul %209, %211, %cst_305 {dimension_numbers = #tpu.dot_dimension_numbers<[1], [0], [0], [1], [0, 0, 1, 1], [], []>} : vector<288x128xf32>, vector<128x128xf32>, vector<288x128xf32> -> vector<288x128xf32>
    %213 = arith.addf %208, %212 : vector<288x128xf32>
    %c0_306 = arith.constant 0 : index
    %c0_307 = arith.constant 0 : index
    %214 = vector.load %arg16[%c0_306, %c0_307] : memref<288x128xf32, #tpu.memory_space<vmem>>, vector<288x128xf32>
    tpu.vector_store %arg16[%c0_306, %c0_307], %213 {strides = array<i32>} : memref<288x128xf32, #tpu.memory_space<vmem>>, vector<288x128xf32>,
    %c0_308 = arith.constant 0 : index
    %c0_309 = arith.constant 0 : index
    %215 = vector.load %arg16[%c0_308, %c0_309] : memref<288x128xf32, #tpu.memory_space<vmem>>, vector<288x128xf32>
    %c41_310 = arith.constant 41 : index
    %c0_311 = arith.constant 0 : index
    %216 = vector.load %arg13[%c41_310, %c0_311] : memref<336x128xf32, #tpu.memory_space<vmem>>, vector<288x128xf32>
    %c2_312 = arith.constant 2 : index
    %c0_313 = arith.constant 0 : index
    %c0_314 = arith.constant 0 : index
    %c0_315 = arith.constant 0 : index
    %217 = vector.load %arg7[%c2_312, %c0_313, %c0_314, %c0_315] : memref<3x3x128x128xf32, #tpu.memory_space<vmem>>, vector<1x1x128x128xf32>
    %218 = vector.shape_cast %217 : vector<1x1x128x128xf32> to vector<128x128xf32>
    %cst_316 = arith.constant dense<0.000000e+00> : vector<288x128xf32>
    %219 = tpu.matmul %216, %218, %cst_316 {dimension_numbers = #tpu.dot_dimension_numbers<[1], [0], [0], [1], [0, 0, 1, 1], [], []>} : vector<288x128xf32>, vector<128x128xf32>, vector<288x128xf32> -> vector<288x128xf32>
    %220 = arith.addf %215, %219 : vector<288x128xf32>
    %c0_317 = arith.constant 0 : index
    %c0_318 = arith.constant 0 : index
    %221 = vector.load %arg16[%c0_317, %c0_318] : memref<288x128xf32, #tpu.memory_space<vmem>>, vector<288x128xf32>
    tpu.vector_store %arg16[%c0_317, %c0_318], %220 {strides = array<i32>} : memref<288x128xf32, #tpu.memory_space<vmem>>, vector<288x128xf32>,
    %c0_319 = arith.constant 0 : index
    %c0_320 = arith.constant 0 : index
    %222 = vector.load %arg16[%c0_319, %c0_320] : memref<288x128xf32, #tpu.memory_space<vmem>>, vector<288x128xf32>
    %c42_321 = arith.constant 42 : index
    %c0_322 = arith.constant 0 : index
    %223 = vector.load %arg13[%c42_321, %c0_322] : memref<336x128xf32, #tpu.memory_space<vmem>>, vector<288x128xf32>
    %c2_323 = arith.constant 2 : index
    %c1_324 = arith.constant 1 : index
    %c0_325 = arith.constant 0 : index
    %c0_326 = arith.constant 0 : index
    %224 = vector.load %arg7[%c2_323, %c1_324, %c0_325, %c0_326] : memref<3x3x128x128xf32, #tpu.memory_space<vmem>>, vector<1x1x128x128xf32>
    %225 = vector.shape_cast %224 : vector<1x1x128x128xf32> to vector<128x128xf32>
    %cst_327 = arith.constant dense<0.000000e+00> : vector<288x128xf32>
    %226 = tpu.matmul %223, %225, %cst_327 {dimension_numbers = #tpu.dot_dimension_numbers<[1], [0], [0], [1], [0, 0, 1, 1], [], []>} : vector<288x128xf32>, vector<128x128xf32>, vector<288x128xf32> -> vector<288x128xf32>
    %227 = arith.addf %222, %226 : vector<288x128xf32>
    %c0_328 = arith.constant 0 : index
    %c0_329 = arith.constant 0 : index
    %228 = vector.load %arg16[%c0_328, %c0_329] : memref<288x128xf32, #tpu.memory_space<vmem>>, vector<288x128xf32>
    tpu.vector_store %arg16[%c0_328, %c0_329], %227 {strides = array<i32>} : memref<288x128xf32, #tpu.memory_space<vmem>>, vector<288x128xf32>,
    %c0_330 = arith.constant 0 : index
    %c0_331 = arith.constant 0 : index
    %229 = vector.load %arg16[%c0_330, %c0_331] : memref<288x128xf32, #tpu.memory_space<vmem>>, vector<288x128xf32>
    %c43_332 = arith.constant 43 : index
    %c0_333 = arith.constant 0 : index
    %230 = vector.load %arg13[%c43_332, %c0_333] : memref<336x128xf32, #tpu.memory_space<vmem>>, vector<288x128xf32>
    %c2_334 = arith.constant 2 : index
    %c2_335 = arith.constant 2 : index
    %c0_336 = arith.constant 0 : index
    %c0_337 = arith.constant 0 : index
    %231 = vector.load %arg7[%c2_334, %c2_335, %c0_336, %c0_337] : memref<3x3x128x128xf32, #tpu.memory_space<vmem>>, vector<1x1x128x128xf32>
    %232 = vector.shape_cast %231 : vector<1x1x128x128xf32> to vector<128x128xf32>
    %cst_338 = arith.constant dense<0.000000e+00> : vector<288x128xf32>
    %233 = tpu.matmul %230, %232, %cst_338 {dimension_numbers = #tpu.dot_dimension_numbers<[1], [0], [0], [1], [0, 0, 1, 1], [], []>} : vector<288x128xf32>, vector<128x128xf32>, vector<288x128xf32> -> vector<288x128xf32>
    %234 = arith.addf %229, %233 : vector<288x128xf32>
    %c0_339 = arith.constant 0 : index
    %c0_340 = arith.constant 0 : index
    %235 = vector.load %arg16[%c0_339, %c0_340] : memref<288x128xf32, #tpu.memory_space<vmem>>, vector<288x128xf32>
    tpu.vector_store %arg16[%c0_339, %c0_340], %234 {strides = array<i32>} : memref<288x128xf32, #tpu.memory_space<vmem>>, vector<288x128xf32>,
    %c0_341 = arith.constant 0 : index
    %c0_342 = arith.constant 0 : index
    %236 = vector.load %arg16[%c0_341, %c0_342] : memref<288x128xf32, #tpu.memory_space<vmem>>, vector<288x128xf32>
    %c0_343 = arith.constant 0 : index
    %c0_344 = arith.constant 0 : index
    %237 = vector.load %arg8[%c0_343, %c0_344] : memref<1x128xf32, #tpu.memory_space<vmem>>, vector<1x128xf32>
    %238 = vector.broadcast %237 : vector<1x128xf32> to vector<288x128xf32>
    %239 = arith.addf %236, %238 : vector<288x128xf32>
    %cst_345 = arith.constant 0.000000e+00 : f32
    %240 = vector.broadcast %cst_345 : f32 to vector<288x128xf32>
    %241 = arith.maximumf %239, %240 : vector<288x128xf32>
    %242 = vector.broadcast %0 : vector<288x1xf32> to vector<288x128xf32>
    %243 = arith.mulf %241, %242 : vector<288x128xf32>
    %cst_346 = arith.constant dense<0.000000e+00> : vector<128xf32>
    %244 = vector.multi_reduction <add>, %243, %cst_346 [0] : vector<288x128xf32> to vector<128xf32>
    %245 = vector.shape_cast %244 : vector<128xf32> to vector<1x128xf32>
    %cst_347 = arith.constant 3.906250e-03 : f32
    %246 = vector.broadcast %cst_347 : f32 to vector<1x128xf32>
    %247 = arith.mulf %245, %246 : vector<1x128xf32>
    %c0_348 = arith.constant 0 : index
    %c0_349 = arith.constant 0 : index
    %248 = vector.load %arg9[%c0_348, %c0_349] : memref<128x10xf32, #tpu.memory_space<vmem>>, vector<128x10xf32>
    %cst_350 = arith.constant dense<0.000000e+00> : vector<1x10xf32>
    %249 = tpu.matmul %247, %248, %cst_350 {dimension_numbers = #tpu.dot_dimension_numbers<[1], [0], [0], [1], [0, 0, 1, 1], [], []>} : vector<1x128xf32>, vector<128x10xf32>, vector<1x10xf32> -> vector<1x10xf32>
    %c0_351 = arith.constant 0 : index
    %c0_352 = arith.constant 0 : index
    %250 = vector.load %arg10[%c0_351, %c0_352] : memref<1x10xf32, #tpu.memory_space<vmem>>, vector<1x10xf32>
    %251 = arith.addf %249, %250 : vector<1x10xf32>
    %252 = vector.shape_cast %251 : vector<1x10xf32> to vector<1x1x10xf32>
    %c0_353 = arith.constant 0 : index
    %c0_354 = arith.constant 0 : index
    %c0_355 = arith.constant 0 : index
    %253 = vector.load %arg11[%c0_353, %c0_354, %c0_355] : memref<1x1x10xf32, #tpu.memory_space<vmem>>, vector<1x1x10xf32>
    tpu.vector_store %arg11[%c0_353, %c0_354, %c0_355], %252 {strides = array<i32>} : memref<1x1x10xf32, #tpu.memory_space<vmem>>, vector<1x1x10xf32>,
    return
  }
  func.func @transform_0(%arg0: i32) -> (i32, i32, i32) {
    %c0_i32 = arith.constant 0 : i32
    %c0_i32_0 = arith.constant 0 : i32
    %c0_i32_1 = arith.constant 0 : i32
    return %arg0, %c0_i32, %c0_i32_0 : i32, i32, i32
  }
  func.func @transform_1(%arg0: i32) -> (i32, i32) {
    %c0_i32 = arith.constant 0 : i32
    %c0_i32_0 = arith.constant 0 : i32
    %c0_i32_1 = arith.constant 0 : i32
    return %c0_i32, %c0_i32_0 : i32, i32
  }
  func.func @transform_2(%arg0: i32) -> (i32, i32, i32, i32) {
    %c0_i32 = arith.constant 0 : i32
    %c0_i32_0 = arith.constant 0 : i32
    %c0_i32_1 = arith.constant 0 : i32
    %c0_i32_2 = arith.constant 0 : i32
    %c0_i32_3 = arith.constant 0 : i32
    return %c0_i32, %c0_i32_0, %c0_i32_1, %c0_i32_2 : i32, i32, i32, i32
  }
  func.func @transform_3(%arg0: i32) -> (i32, i32) {
    %c0_i32 = arith.constant 0 : i32
    %c0_i32_0 = arith.constant 0 : i32
    %c0_i32_1 = arith.constant 0 : i32
    return %c0_i32, %c0_i32_0 : i32, i32
  }
  func.func @transform_4(%arg0: i32) -> (i32, i32, i32, i32) {
    %c0_i32 = arith.constant 0 : i32
    %c0_i32_0 = arith.constant 0 : i32
    %c0_i32_1 = arith.constant 0 : i32
    %c0_i32_2 = arith.constant 0 : i32
    %c0_i32_3 = arith.constant 0 : i32
    return %c0_i32, %c0_i32_0, %c0_i32_1, %c0_i32_2 : i32, i32, i32, i32
  }
  func.func @transform_5(%arg0: i32) -> (i32, i32) {
    %c0_i32 = arith.constant 0 : i32
    %c0_i32_0 = arith.constant 0 : i32
    %c0_i32_1 = arith.constant 0 : i32
    return %c0_i32, %c0_i32_0 : i32, i32
  }
  func.func @transform_6(%arg0: i32) -> (i32, i32, i32, i32) {
    %c0_i32 = arith.constant 0 : i32
    %c0_i32_0 = arith.constant 0 : i32
    %c0_i32_1 = arith.constant 0 : i32
    %c0_i32_2 = arith.constant 0 : i32
    %c0_i32_3 = arith.constant 0 : i32
    return %c0_i32, %c0_i32_0, %c0_i32_1, %c0_i32_2 : i32, i32, i32, i32
  }
  func.func @transform_7(%arg0: i32) -> (i32, i32) {
    %c0_i32 = arith.constant 0 : i32
    %c0_i32_0 = arith.constant 0 : i32
    %c0_i32_1 = arith.constant 0 : i32
    return %c0_i32, %c0_i32_0 : i32, i32
  }
  func.func @transform_8(%arg0: i32) -> (i32, i32) {
    %c0_i32 = arith.constant 0 : i32
    %c0_i32_0 = arith.constant 0 : i32
    %c0_i32_1 = arith.constant 0 : i32
    return %c0_i32, %c0_i32_0 : i32, i32
  }
  func.func @transform_9(%arg0: i32) -> (i32, i32) {
    %c0_i32 = arith.constant 0 : i32
    %c0_i32_0 = arith.constant 0 : i32
    %c0_i32_1 = arith.constant 0 : i32
    return %c0_i32, %c0_i32_0 : i32, i32
  }
  func.func @transform_10(%arg0: i32) -> (i32, i32, i32) {
    %c0_i32 = arith.constant 0 : i32
    %c0_i32_0 = arith.constant 0 : i32
    %c0_i32_1 = arith.constant 0 : i32
    return %arg0, %c0_i32, %c0_i32_0 : i32, i32, i32
  }
}

</mosaic_0001>

<bundles_post_ra>
// kernel: toy_model_forward.1
= control target key start
LH: loop header
LB: loop body
LE: loop exit
PB: predicated region body
PF: predicated region fallthrough
CT: control target
= control target key end

     0   :  { %15 = vsyncpa [#allocation8], 0  ;;  %s22736_s0 = inlined_call_operand.vmem [shape: f32[2,336,3], index: 0, kind: input, shape index: {}]   ;;  %s22737_s1 = inlined_call_operand.vmem [shape: f32[288,1], index: 1, kind: input, shape index: {}]   ;;  %s22738_s2 = inlined_call_operand.vmem [shape: f32[3,3,3,64], index: 2, kind: input, shape index: {}]   ;;  %s22739_s3 = inlined_call_operand.vmem [shape: f32[1,64], index: 3, kind: input, shape index: {}]   ;;  %s22740_s4 = inlined_call_operand.vmem [shape: f32[3,3,64,128], index: 4, kind: input, shape index: {}]   ;;  %s22741_s5 = inlined_call_operand.vmem [shape: f32[1,128], index: 5, kind: input, shape index: {}]   ;;  %s22742_s6 = inlined_call_operand.vmem [shape: f32[3,3,128,128], index: 6, kind: input, shape index: {}]   ;;  %s22743_s7 = inlined_call_operand.vmem [shape: f32[1,128], index: 7, kind: input, shape index: {}]   ;;  %s22744_s8 = inlined_call_operand.vmem [shape: f32[128,10], index: 8, kind: input, shape index: {}]   ;;  %s22745_s9 = inlined_call_operand.vmem [shape: f32[1,10], index: 9, kind: input, shape index: {}]   ;;  %s22746_s10 = inlined_call_operand.hbm [shape: f32[2,1,10], index: 10, kind: output, shape index: {}]  }
   0x1   :  { %17 = vsyncpa [#allocation8 + $0x1], 0  ;;  %s18413_s13 = smov 0   ;;  %s18415_s14 = smov 0  }
   0x2   :  { %s18417_s15 = smov 0   ;;  %s18419_s16 = smov 0  }
   0x3 LB: > { %s18434_s17 = sadd.s32 4294967295, %s18352_s16   ;;  %s14215_s18 = sadd.s32 4294967294, %s18352_s16   ;;  %s18352_s16 = sphi %s18419_s16, %s23082_s16   ;;  %s18348_s15 = sphi %s18417_s15, %s23081_s15   ;;  %s18344_s14 = sphi %s18415_s14, %s23080_s14   ;;  %s18340_s13 = sphi %s18413_s13, %s23079_s13  }
   0x4   : > { %s18438_s19 = sadd.s32 1, %s18352_s16   ;;  %s245_s20 = sadd.s32 1, %s18348_s15 }
   0x5   : > { %s242_s21 = ssub.s32 %s18352_s16, %s18438_s19  ;;  %p255_p0 = scmp.ne.s32.totalorder %s18348_s15, %s18344_s14 }
   0x6   : > { %p243_p1 = scmp.eq.s32.totalorder %s242_s21, 0  ;;  %p256_p2 = scmp.eq.s32.totalorder %s18434_s17, 1 }
   0x7   : > { %p261_p3 = scmp.ne.s32.totalorder %s18344_s14, %s18340_s13  ;;  %p262_p4 = scmp.eq.s32.totalorder %s14215_s18, 1 }
   0x8   : > { %s18449_s22 = scalar_select %p243_p1, %s18348_s15, %s245_s20  }
   0x9   : > { %p18451_p5 = por %p256_p2, %p255_p0  ;;  %p18455_p6 = por %p262_p4, %p261_p3 }
   0xa   : > { %p14218_p7 = scmp.ge.s32.totalorder %s18352_s16, 1  ;;  %p315_p8 = scmp.lt.s32.totalorder %s18352_s16, 3 }
   0xc   : > { %p316_p9 = pnand %p14218_p7, %p315_p8 }
   0xe   : > { %319 = sbr.rel (%p316_p9) target bundleno = 1793 (0x701), region = 60 }
  0x13   : > { %v502_v0 = vld [vmem:[%s22738_s2] sm:$0x7]  ;;  %vm612_vm0 = vcmask 1042432   ;;  %p352_p10 = scmp.lt.s32.totalorder %s18434_s17, 1  ;;  %v14257_v1 = vld [vmem:[%s22738_s2 + $0x4] sm:$0x7] }
  0x14   : > { %18240 = vmatprep.subr.msk.mxu1 %vm612_vm0, %v502_v0  ;;  %16297 = vmatprep.subr.msk.mxu0 %vm612_vm0, %v502_v0  ;;  %v14295_v2 = vld [vmem:[%s22738_s2 + $0x8] sm:$0x7]  ;;  %vm503_vm1 = vcmask 23552   ;;  %v18496_v9 = vld [vmem:[%s22738_s2 + $0xc] sm:$0x7]  ;;  %vm393_vm2 = vcmask 523264  }
  0x15   : > { %18241 = vmatpush3.msk.msra.mxu1 %vm612_vm0, %v502_v0  ;;  %16298 = vmatpush3.msk.msra.mxu0 %vm612_vm0, %v502_v0  ;;  %s353_s11 = scalar_select %p352_p10, %s18434_s17, 1  ;;  %v18501_v10 = vld [vmem:[%s22738_s2 + $0x10] sm:$0x7]  ;;  %v18574_v43 = vld [vmem:[%s22738_s2 + $0x14] sm:$0x7]  ;;  %vm18356_vm3 = vmmov 0  }
  0x16   : > { %16353 = vmatprep.subr.msk.mxu1 %vm612_vm0, %v14257_v1  ;;  %16409 = vmatprep.subr.msk.mxu0 %vm612_vm0, %v14295_v2  ;;  %v18601_v52 = vld [vmem:[%s22738_s2 + $0x18] sm:$0x7]  ;;  %s15080_s25 = sshll.u32 %s18434_s17, 4  ;;  %vm14145_vm4 = vcmask 73728   ;;  %s18357_s17 = smov [#allocation7]  }
  0x17   : > { %s18242_s12 = smul.u32 336, %s353_s11  ;;  %s22701_s30 = scalar_lea.hbm %s22746_s10, %s15080_s25 }
  0x18   : > { %s18296_s18 = sshll.u32 %s18357_s17, 4  ;;  %s18297_s18 = int_to_ptr.vmem [resolvable:$false] %s18296_s18 }
  0x19   : > { %s18481_s21 = scalar_lea.vmem %s22736_s0, %s18242_s12  ;;  %s350_s12 = sand.u32 1, %s18344_s14  }
  0x1a   : > { %v466_v3 = vld [vmem:[%s18481_s21 + $0x5] sm:$0xff]  ;;  %v467_v5 = vld [vmem:[%s18481_s21 + $0xd] sm:$0xff]  ;;  %v468_v7 = vld [vmem:[%s18481_s21 + $0x15] sm:$0xff]  ;;  %s351_s26 = scalar_lea.vmem [#allocation7], %s350_s12  ;;  %s18298_s20 = scalar_lea.vmem %s18297_s18, 32 }
  0x1b   : > { %v486_v4 = vld [vmem:[%s18481_s21 + $0xa5] sm:$0xff]  ;;  %16299 = vmatprep.mubr.msk.f32.mxu0 %vm503_vm1, %v466_v3  ;;  %v487_v6 = vld [vmem:[%s18481_s21 + $0xad] sm:$0xff]  ;;  %v488_v8 = vld [vmem:[%s18481_s21 + $0xb5] sm:$0xff]  ;;  %s14160_s27 = sshll.u32 %s351_s26, 4  ;;  %s14161_s27 = int_to_ptr.vmem [resolvable:$true] %s14160_s27 }
  0x1c   : > { %16329 = vmatprep.mubr.msk.f32.mxu1 %vm503_vm1, %v486_v4  ;;  %16300 = vmatmul.mubr.msk.f32.vlgmr.msra.gmra.mxu0 %vm503_vm1, %v467_v5  ;;  %v469_v11 = vld [vmem:[%s18481_s21 + $0x1d] sm:$0xff]  ;;  %v470_v13 = vld [vmem:[%s18481_s21 + $0x25] sm:$0xff]  ;;  %v471_v15 = vld [vmem:[%s18481_s21 + $0x2d] sm:$0xff]  ;;  %s18292_s11 = scalar_lea.vmem %s14161_s27, 16  ;;  %p18299_p0 = scmp.lt.s32.totalorder %s14161_s27, %s18297_s18 }
  0x1d   : > { %16330 = vmatmul.mubr.msk.f32.vlgmr.msra.gmra.mxu1 %vm503_vm1, %v487_v6  ;;  %16410 = vmatpush3.msk.msra.mxu0 %vm612_vm0, %v14295_v2  ;;  %v489_v12 = vld [vmem:[%s18481_s21 + $0xbd] sm:$0xff]  ;;  %v490_v14 = vld [vmem:[%s18481_s21 + $0xc5] sm:$0xff]  ;;  %v491_v16 = vld [vmem:[%s18481_s21 + $0xcd] sm:$0xff]  ;;  %p18293_p11 = scmp.ne.s32.totalorder %s14161_s27, %s18292_s11  ;;  %p18300_p1 = scmp.lt.s32.totalorder %s18298_s20, %s18292_s11 }
  0x1e   : > { %16354 = vmatpush3.msk.msra.mxu1 %vm612_vm0, %v14257_v1  ;;  %16302 = vmatprep.mubr.msk.f32.mxu0 %vm503_vm1, %v468_v7  ;;  %v472_v17 = vld [vmem:[%s18481_s21 + $0x35] sm:$0xff]  ;;  %v473_v19 = vld [vmem:[%s18481_s21 + $0x3d] sm:$0xff]  ;;  %v474_v21 = vld [vmem:[%s18481_s21 + $0x45] sm:$0xff]  ;;  %v18354_v7 = vmov 0.0  }
  0x1f   : > { %16332 = vmatprep.mubr.msk.f32.mxu1 %vm503_vm1, %v488_v8  ;;  %16465 = vmatprep.subr.msk.mxu1 %vm612_vm0, %v18496_v9  ;;  %v492_v18 = vld [vmem:[%s18481_s21 + $0xd5] sm:$0xff]  ;;  %v493_v20 = vld [vmem:[%s18481_s21 + $0xdd] sm:$0xff]  ;;  %v494_v22 = vld [vmem:[%s18481_s21 + $0xe5] sm:$0xff]  ;;  %395 = vst.msk [vmem:[#allocation4 + $0x8] sm:$0xff] %vm393_vm2, %v18354_v7  ;;  %p18294_p12 = pnand %p18293_p11, %p18451_p5  ;;  %p18301_p2 = por %p18300_p1, %p18299_p0 }
  0x20   : > { %16521 = vmatprep.subr.msk.mxu0 %vm612_vm0, %v18501_v10  ;;  %16303 = vmatmul.mubr.msk.f32.gmra.mxu0 %vm503_vm1, %v469_v11  ;;  %v475_v23 = vld [vmem:[%s18481_s21 + $0x4d] sm:$0xff]  ;;  %v476_v25 = vld [vmem:[%s18481_s21 + $0x55] sm:$0xff]  ;;  %v477_v27 = vld [vmem:[%s18481_s21 + $0x5d] sm:$0xff]  ;;  %394 = vst.msk [vmem:[#allocation4] sm:$0xff] %vm393_vm2, %v18354_v7 }
  0x21   : > { %16333 = vmatmul.mubr.msk.f32.gmra.mxu1 %vm503_vm1, %v489_v12  ;;  %16305 = vmatprep.mubr.msk.f32.mxu0 %vm503_vm1, %v470_v13  ;;  %v495_v24 = vld [vmem:[%s18481_s21 + $0xed] sm:$0xff]  ;;  %v496_v26 = vld [vmem:[%s18481_s21 + $0xf5] sm:$0xff]  ;;  %v497_v28 = vld [vmem:[%s18481_s21 + $0xfd] sm:$0xff]  ;;  %396 = vst.msk [vmem:[#allocation4 + $0x10] sm:$0xff] %vm393_vm2, %v18354_v7  ;;  %p18295_p13 = pneg %p18294_p12 }
  0x22   : > { %16335 = vmatprep.mubr.msk.f32.mxu1 %vm503_vm1, %v490_v14  ;;  %v478_v29 = vld [vmem:[%s18481_s21 + $0x65] sm:$0xff]  ;;  %v479_v31 = vld [vmem:[%s18481_s21 + $0x6d] sm:$0xff]  ;;  %v480_v33 = vld [vmem:[%s18481_s21 + $0x75] sm:$0xff]  ;;  %397 = vst.msk [vmem:[#allocation4 + $0x18] sm:$0xff] %vm393_vm2, %v18354_v7 }
  0x23   : > { %v498_v30 = vld [vmem:[%s18481_s21 + $0x105] sm:$0xff]  ;;  %v499_v32 = vld [vmem:[%s18481_s21 + $0x10d] sm:$0xff]  ;;  %v500_v34 = vld [vmem:[%s18481_s21 + $0x115] sm:$0xff]  ;;  %398 = vst.msk [vmem:[#allocation4 + $0x20] sm:$0xff] %vm393_vm2, %v18354_v7  ;;  %p18302_p3 = pnand %p18301_p2, %p18295_p13 }
  0x24   : > { %16306 = vmatmul.mubr.msk.f32.gmra.mxu0 %vm503_vm1, %v471_v15  ;;  %v481_v35 = vld [vmem:[%s18481_s21 + $0x7d] sm:$0xff]  ;;  %v482_v37 = vld [vmem:[%s18481_s21 + $0x85] sm:$0xff]  ;;  %v483_v39 = vld [vmem:[%s18481_s21 + $0x8d] sm:$0xff]  ;;  %399 = vst.msk [vmem:[#allocation4 + $0x28] sm:$0xff] %vm393_vm2, %v18354_v7 }
  0x25   : > { %16336 = vmatmul.mubr.msk.f32.gmra.mxu1 %vm503_vm1, %v491_v16  ;;  %16308 = vmatprep.mubr.msk.f32.mxu0 %vm503_vm1, %v472_v17  ;;  %v501_v36 = vld [vmem:[%s18481_s21 + $0x11d] sm:$0xff]  ;;  %v969_v38 = vld [vmem:[%s18481_s21 + $0x6] sm:$0xff]  ;;  %v970_v40 = vld [vmem:[%s18481_s21 + $0xe] sm:$0xff]  ;;  %400 = vst.msk [vmem:[#allocation4 + $0x30] sm:$0xff] %vm393_vm2, %v18354_v7 }
  0x26   : > { %16338 = vmatprep.mubr.msk.f32.mxu1 %vm503_vm1, %v492_v18  ;;  %v484_v41 = vld [vmem:[%s18481_s21 + $0x95] sm:$0xff]  ;;  %v485_v44 = vld [vmem:[%s18481_s21 + $0x9d] sm:$0xff]  ;;  %v973_v46 = vld [vmem:[%s18481_s21 + $0x26] sm:$0xff]  ;;  %401 = vst.msk [vmem:[#allocation4 + $0x38] sm:$0xff] %vm393_vm2, %v18354_v7 }
  0x27   : > { %v971_v42 = vld [vmem:[%s18481_s21 + $0x16] sm:$0xff]  ;;  %v972_v45 = vld [vmem:[%s18481_s21 + $0x1e] sm:$0xff]  ;;  %v1471_v47 = vld [vmem:[%s18481_s21 + $0x7] sm:$0xff]  ;;  %402 = vst.msk [vmem:[#allocation4 + $0x40] sm:$0xff] %vm393_vm2, %v18354_v7 }
  0x28   : > { %16309 = vmatmul.mubr.msk.f32.gmra.mxu0 %vm503_vm1, %v473_v19  ;;  %v974_v48 = vld [vmem:[%s18481_s21 + $0x2e] sm:$0xff]  ;;  %v975_v50 = vld [vmem:[%s18481_s21 + $0x36] sm:$0xff]  ;;  %v976_v53 = vld [vmem:[%s18481_s21 + $0x3e] sm:$0xff]  ;;  %403 = vst.msk [vmem:[#allocation4 + $0x48] sm:$0xff] %vm393_vm2, %v18354_v7 }
  0x29   : > { %16339 = vmatmul.mubr.msk.f32.gmra.mxu1 %vm503_vm1, %v493_v20  ;;  %16311 = vmatprep.mubr.msk.f32.mxu0 %vm503_vm1, %v474_v21  ;;  %v1472_v49 = vld [vmem:[%s18481_s21 + $0xf] sm:$0xff]  ;;  %v18596_v51 = vld [vmem:[%s18481_s21 + $0x17] sm:$0xff]  ;;  %v18610_v54 = vld [vmem:[%s18481_s21 + $0x1f] sm:$0xff]  ;;  %404 = vst.msk [vmem:[#allocation4 + $0x50] sm:$0xff] %vm393_vm2, %v18354_v7 }
  0x2a   : > { %16341 = vmatprep.mubr.msk.f32.mxu1 %vm503_vm1, %v494_v22  ;;  %v977_v55 = vld [vmem:[%s18481_s21 + $0x46] sm:$0xff]  ;;  %v978_v57 = vld [vmem:[%s18481_s21 + $0x4e] sm:$0xff]  ;;  %v979_v59 = vld [vmem:[%s18481_s21 + $0x56] sm:$0xff]  ;;  %405 = vst.msk [vmem:[#allocation4 + $0x58] sm:$0xff] %vm393_vm2, %v18354_v7 }
  0x2b   : > { %v18616_v56 = vld [vmem:[%s18481_s21 + $0x27] sm:$0xff]  ;;  %v18628_v58 = vld [vmem:[%s18481_s21 + $0x2f] sm:$0xff]  ;;  %v18632_v60 = vld [vmem:[%s18481_s21 + $0x37] sm:$0xff]  ;;  %406 = vst.msk [vmem:[#allocation4 + $0x60] sm:$0xff] %vm393_vm2, %v18354_v7 }
  0x2c   : > { %16312 = vmatmul.mubr.msk.f32.gmra.mxu0 %vm503_vm1, %v475_v23  ;;  %v980_v61 = vld [vmem:[%s18481_s21 + $0x5e] sm:$0xff]  ;;  %v981_v63 = vld [vmem:[%s18481_s21 + $0x66] sm:$0xff]  ;;  %v982_v1 = vld [vmem:[%s18481_s21 + $0x6e] sm:$0xff]  ;;  %407 = vst.msk [vmem:[#allocation4 + $0x68] sm:$0xff] %vm393_vm2, %v18354_v7 }
  0x2d   : > { %16342 = vmatmul.mubr.msk.f32.gmra.mxu1 %vm503_vm1, %v495_v24  ;;  %16314 = vmatprep.mubr.msk.f32.mxu0 %vm503_vm1, %v476_v25  ;;  %v18642_v62 = vld [vmem:[%s18481_s21 + $0x3f] sm:$0xff]  ;;  %v18646_v0 = vld [vmem:[%s18481_s21 + $0x47] sm:$0xff]  ;;  %v18656_v2 = vld [vmem:[%s18481_s21 + $0x4f] sm:$0xff]  ;;  %408 = vst.msk [vmem:[#allocation4 + $0x70] sm:$0xff] %vm393_vm2, %v18354_v7 }
  0x2e   : > { %16344 = vmatprep.mubr.msk.f32.mxu1 %vm503_vm1, %v496_v26  ;;  %v983_v3 = vld [vmem:[%s18481_s21 + $0x76] sm:$0xff]  ;;  %v18669_v5 = vld [vmem:[%s18481_s21 + $0x7e] sm:$0xff]  ;;  %409 = vst.msk [vmem:[#allocation4 + $0x78] sm:$0xff] %vm393_vm2, %v18354_v7  ;;  %410 = vst.msk [vmem:[#allocation4 + $0x80] sm:$0xff] %vm393_vm2, %v18354_v7 }
  0x2f   : > { %v18660_v4 = vld [vmem:[%s18481_s21 + $0x57] sm:$0xff]  ;;  %v18672_v6 = vld [vmem:[%s18481_s21 + $0x5f] sm:$0xff]  ;;  %411 = vst.msk [vmem:[#allocation4 + $0x88] sm:$0xff] %vm393_vm2, %v18354_v7  ;;  %412 = vst.msk [vmem:[#allocation4 + $0x90] sm:$0xff] %vm393_vm2, %v18354_v7 }
  0x30   : > { %16315 = vmatmul.mubr.msk.f32.gmra.mxu0 %vm503_vm1, %v477_v27  ;;  %413 = vst.msk [vmem:[#allocation4 + $0x98] sm:$0xff] %vm393_vm2, %v18354_v7  ;;  %414 = vst.msk [vmem:[#allocation4 + $0xa0] sm:$0xff] %vm393_vm2, %v18354_v7  ;;  %v985_v8 = vld [vmem:[%s18481_s21 + $0x86] sm:$0xff]  ;;  %v18849_v11 = vld [vmem:[%s18481_s21 + $0x6f] sm:$0xff] }
  0x31   : > { %16345 = vmatmul.mubr.msk.f32.gmra.mxu1 %vm503_vm1, %v497_v28  ;;  %16317 = vmatprep.mubr.msk.f32.mxu0 %vm503_vm1, %v478_v29  ;;  %415 = vst.msk [vmem:[#allocation4 + $0xa8] sm:$0xff] %vm393_vm2, %v18354_v7  ;;  %416 = vst.msk [vmem:[#allocation4 + $0xb0] sm:$0xff] %vm393_vm2, %v18354_v7  ;;  %v987_v12 = vld [vmem:[%s18481_s21 + $0x96] sm:$0xff]  ;;  %v988_v14 = vld [vmem:[%s18481_s21 + $0x9e] sm:$0xff] }
  0x32   : > { %16347 = vmatprep.mubr.msk.f32.mxu1 %vm503_vm1, %v498_v30  ;;  %417 = vst.msk [vmem:[#allocation4 + $0xb8] sm:$0xff] %vm393_vm2, %v18354_v7  ;;  %418 = vst.msk [vmem:[#allocation4 + $0xc0] sm:$0xff] %vm393_vm2, %v18354_v7  ;;  %v18853_v13 = vld [vmem:[%s18481_s21 + $0x77] sm:$0xff]  ;;  %v18863_v15 = vld [vmem:[%s18481_s21 + $0x7f] sm:$0xff] }
  0x33   : > { %419 = vst.msk [vmem:[#allocation4 + $0xc8] sm:$0xff] %vm393_vm2, %v18354_v7  ;;  %420 = vst.msk [vmem:[#allocation4 + $0xd0] sm:$0xff] %vm393_vm2, %v18354_v7  ;;  %v989_v16 = vld [vmem:[%s18481_s21 + $0xa6] sm:$0xff]  ;;  %v990_v18 = vld [vmem:[%s18481_s21 + $0xae] sm:$0xff] }
  0x34   : > { %16318 = vmatmul.mubr.msk.f32.gmra.mxu0 %vm503_vm1, %v479_v31  ;;  %421 = vst.msk [vmem:[#allocation4 + $0xd8] sm:$0xff] %vm393_vm2, %v18354_v7  ;;  %422 = vst.msk [vmem:[#allocation4 + $0xe0] sm:$0xff] %vm393_vm2, %v18354_v7  ;;  %v18867_v17 = vld [vmem:[%s18481_s21 + $0x87] sm:$0xff]  ;;  %v18877_v19 = vld [vmem:[%s18481_s21 + $0x8f] sm:$0xff] }
  0x35   : > { %16348 = vmatmul.mubr.msk.f32.gmra.mxu1 %vm503_vm1, %v499_v32  ;;  %16320 = vmatprep.mubr.msk.f32.mxu0 %vm503_vm1, %v480_v33  ;;  %423 = vst.msk [vmem:[#allocation4 + $0xe8] sm:$0xff] %vm393_vm2, %v18354_v7  ;;  %424 = vst.msk [vmem:[#allocation4 + $0xf0] sm:$0xff] %vm393_vm2, %v18354_v7  ;;  %v991_v20 = vld [vmem:[%s18481_s21 + $0xb6] sm:$0xff]  ;;  %v992_v22 = vld [vmem:[%s18481_s21 + $0xbe] sm:$0xff] }
  0x36   : > { %16350 = vmatprep.mubr.msk.f32.mxu1 %vm503_vm1, %v500_v34  ;;  %425 = vst.msk [vmem:[#allocation4 + $0xf8] sm:$0xff] %vm393_vm2, %v18354_v7  ;;  %426 = vst.msk [vmem:[#allocation4 + $0x100] sm:$0xff] %vm393_vm2, %v18354_v7  ;;  %v18881_v21 = vld [vmem:[%s18481_s21 + $0x97] sm:$0xff]  ;;  %v18891_v23 = vld [vmem:[%s18481_s21 + $0x9f] sm:$0xff] }
  0x37   : > { %427 = vst.msk [vmem:[#allocation4 + $0x108] sm:$0xff] %vm393_vm2, %v18354_v7  ;;  %428 = vst.msk [vmem:[#allocation4 + $0x110] sm:$0xff] %vm393_vm2, %v18354_v7  ;;  %v993_v24 = vld [vmem:[%s18481_s21 + $0xc6] sm:$0xff]  ;;  %v994_v26 = vld [vmem:[%s18481_s21 + $0xce] sm:$0xff] }
  0x38   : > { %16321 = vmatmul.mubr.msk.f32.gmra.mxu0 %vm503_vm1, %v481_v35  ;;  %429 = vst.msk [vmem:[#allocation4 + $0x118] sm:$0xff] %vm393_vm2, %v18354_v7  ;;  %5280 = vst.msk [vmem:[#allocation2] sm:$0xff] %vm393_vm2, %v18354_v7  ;;  %v18895_v25 = vld [vmem:[%s18481_s21 + $0xa7] sm:$0xff]  ;;  %v18905_v27 = vld [vmem:[%s18481_s21 + $0xaf] sm:$0xff] }
  0x39   : > { %16351 = vmatmul.mubr.msk.f32.gmra.mxu1 %vm503_vm1, %v501_v36  ;;  %16323 = vmatprep.mubr.msk.f32.mxu0 %vm503_vm1, %v482_v37  ;;  %5281 = vst.msk [vmem:[#allocation2 + $0x8] sm:$0xff] %vm393_vm2, %v18354_v7  ;;  %5282 = vst.msk [vmem:[#allocation2 + $0x10] sm:$0xff] %vm393_vm2, %v18354_v7  ;;  %v995_v28 = vld [vmem:[%s18481_s21 + $0xd6] sm:$0xff]  ;;  %v996_v30 = vld [vmem:[%s18481_s21 + $0xde] sm:$0xff] }
  0x3a   : > { %16355 = vmatprep.mubr.msk.f32.mxu1 %vm503_vm1, %v969_v38  ;;  %5283 = vst.msk [vmem:[#allocation2 + $0x18] sm:$0xff] %vm393_vm2, %v18354_v7  ;;  %5284 = vst.msk [vmem:[#allocation2 + $0x20] sm:$0xff] %vm393_vm2, %v18354_v7  ;;  %v18909_v29 = vld [vmem:[%s18481_s21 + $0xb7] sm:$0xff]  ;;  %v18919_v31 = vld [vmem:[%s18481_s21 + $0xbf] sm:$0xff] }
  0x3b   : > { %5285 = vst.msk [vmem:[#allocation2 + $0x28] sm:$0xff] %vm393_vm2, %v18354_v7  ;;  %5286 = vst.msk [vmem:[#allocation2 + $0x30] sm:$0xff] %vm393_vm2, %v18354_v7  ;;  %v997_v32 = vld [vmem:[%s18481_s21 + $0xe6] sm:$0xff]  ;;  %v998_v34 = vld [vmem:[%s18481_s21 + $0xee] sm:$0xff] }
  0x3c   : > { %16324 = vmatmul.mubr.msk.f32.gmra.mxu0 %vm503_vm1, %v483_v39  ;;  %5287 = vst.msk [vmem:[#allocation2 + $0x38] sm:$0xff] %vm393_vm2, %v18354_v7  ;;  %5288 = vst.msk [vmem:[#allocation2 + $0x40] sm:$0xff] %vm393_vm2, %v18354_v7  ;;  %v18923_v33 = vld [vmem:[%s18481_s21 + $0xc7] sm:$0xff]  ;;  %v18933_v35 = vld [vmem:[%s18481_s21 + $0xcf] sm:$0xff] }
  0x3d   : > { %16356 = vmatmul.mubr.msk.f32.vlgmr.msra.gmra.mxu1 %vm503_vm1, %v970_v40  ;;  %16326 = vmatprep.mubr.msk.f32.mxu0 %vm503_vm1, %v484_v41  ;;  %5289 = vst.msk [vmem:[#allocation2 + $0x48] sm:$0xff] %vm393_vm2, %v18354_v7  ;;  %5290 = vst.msk [vmem:[#allocation2 + $0x50] sm:$0xff] %vm393_vm2, %v18354_v7  ;;  %v999_v36 = vld [vmem:[%s18481_s21 + $0xf6] sm:$0xff]  ;;  %v1000_v38 = vld [vmem:[%s18481_s21 + $0xfe] sm:$0xff] }
  0x3e   : > { %16466 = vmatpush3.msk.msra.mxu1 %vm612_vm0, %v18496_v9  ;;  %16358 = vmatprep.mubr.msk.f32.mxu1 %vm503_vm1, %v971_v42  ;;  %5291 = vst.msk [vmem:[#allocation2 + $0x58] sm:$0xff] %vm393_vm2, %v18354_v7  ;;  %5292 = vst.msk [vmem:[#allocation2 + $0x60] sm:$0xff] %vm393_vm2, %v18354_v7  ;;  %v18838_v9 = vld [vmem:[%s18481_s21 + $0x67] sm:$0xff]  ;;  %v18937_v37 = vld [vmem:[%s18481_s21 + $0xd7] sm:$0xff] }
  0x3f   : > { %16577 = vmatprep.subr.msk.mxu1 %vm612_vm0, %v18574_v43  ;;  %5293 = vst.msk [vmem:[#allocation2 + $0x68] sm:$0xff] %vm393_vm2, %v18354_v7  ;;  %5294 = vst.msk [vmem:[#allocation2 + $0x70] sm:$0xff] %vm393_vm2, %v18354_v7  ;;  %v18947_v39 = vld [vmem:[%s18481_s21 + $0xdf] sm:$0xff]  ;;  %v18951_v41 = vld [vmem:[%s18481_s21 + $0xe7] sm:$0xff] }
  0x40   : > { %16327 = vmatmul.mubr.msk.f32.gmra.mxu0 %vm503_vm1, %v485_v44  ;;  %5295 = vst.msk [vmem:[#allocation2 + $0x78] sm:$0xff] %vm393_vm2, %v18354_v7  ;;  %5296 = vst.msk [vmem:[#allocation2 + $0x80] sm:$0xff] %vm393_vm2, %v18354_v7  ;;  %v1001_v40 = vld [vmem:[%s18481_s21 + $0x106] sm:$0xff]  ;;  %v1002_v42 = vld [vmem:[%s18481_s21 + $0x10e] sm:$0xff] }
  0x41   : > { %16359 = vmatmul.mubr.msk.f32.gmra.mxu1 %vm503_vm1, %v972_v45  ;;  %16411 = vmatprep.mubr.msk.f32.mxu0 %vm503_vm1, %v1471_v47  ;;  %5297 = vst.msk [vmem:[#allocation2 + $0x88] sm:$0xff] %vm393_vm2, %v18354_v7  ;;  %5298 = vst.msk [vmem:[#allocation2 + $0x90] sm:$0xff] %vm393_vm2, %v18354_v7  ;;  %v18961_v44 = vld [vmem:[%s18481_s21 + $0xef] sm:$0xff]  ;;  %v1004_v47 = vld [vmem:[%s18481_s21 + $0x11e] sm:$0xff] }
  0x42   : > { %16361 = vmatprep.mubr.msk.f32.mxu1 %vm503_vm1, %v973_v46  ;;  %5299 = vst.msk [vmem:[#allocation2 + $0x98] sm:$0xff] %vm393_vm2, %v18354_v7  ;;  %5300 = vst.msk [vmem:[#allocation2 + $0xa0] sm:$0xff] %vm393_vm2, %v18354_v7  ;;  %v1003_v45 = vld [vmem:[%s18481_s21 + $0x116] sm:$0xff] }
  0x43   : > { %5301 = vst.msk [vmem:[#allocation2 + $0xa8] sm:$0xff] %vm393_vm2, %v18354_v7  ;;  %5302 = vst.msk [vmem:[#allocation2 + $0xb0] sm:$0xff] %vm393_vm2, %v18354_v7  ;;  %v18965_v46 = vld [vmem:[%s18481_s21 + $0xf7] sm:$0xff] }
  0x44   : > { %16412 = vmatmul.mubr.msk.f32.vlgmr.msra.gmra.mxu0 %vm503_vm1, %v1472_v49  ;;  %5303 = vst.msk [vmem:[#allocation2 + $0xb8] sm:$0xff] %vm393_vm2, %v18354_v7  ;;  %5304 = vst.msk [vmem:[#allocation2 + $0xc0] sm:$0xff] %vm393_vm2, %v18354_v7  ;;  %v18978_v49 = vld [vmem:[%s18481_s21 + $0x107] sm:$0xff] }
  0x45   : > { %16362 = vmatmul.mubr.msk.f32.gmra.mxu1 %vm503_vm1, %v974_v48  ;;  %16522 = vmatpush3.msk.msra.mxu0 %vm612_vm0, %v18501_v10  ;;  %5305 = vst.msk [vmem:[#allocation2 + $0xc8] sm:$0xff] %vm393_vm2, %v18354_v7  ;;  %5306 = vst.msk [vmem:[#allocation2 + $0xd0] sm:$0xff] %vm393_vm2, %v18354_v7  ;;  %v986_v10 = vld [vmem:[%s18481_s21 + $0x8e] sm:$0xff]  ;;  %v18975_v48 = vld [vmem:[%s18481_s21 + $0xff] sm:$0xff] }
  0x46   : > { %16364 = vmatprep.mubr.msk.f32.mxu1 %vm503_vm1, %v975_v50  ;;  %16414 = vmatprep.mubr.msk.f32.mxu0 %vm503_vm1, %v18596_v51  ;;  %5307 = vst.msk [vmem:[#allocation2 + $0xd8] sm:$0xff] %vm393_vm2, %v18354_v7  ;;  %5308 = vst.msk [vmem:[#allocation2 + $0xe0] sm:$0xff] %vm393_vm2, %v18354_v7  ;;  %v18988_v50 = vld [vmem:[%s18481_s21 + $0x10f] sm:$0xff] }
  0x47   : > { %16633 = vmatprep.subr.msk.mxu0 %vm612_vm0, %v18601_v52  ;;  %5309 = vst.msk [vmem:[#allocation2 + $0xe8] sm:$0xff] %vm393_vm2, %v18354_v7  ;;  %5310 = vst.msk [vmem:[#allocation2 + $0xf0] sm:$0xff] %vm393_vm2, %v18354_v7 }
  0x48   : > { %16415 = vmatmul.mubr.msk.f32.gmra.mxu0 %vm503_vm1, %v18610_v54  ;;  %5311 = vst.msk [vmem:[#allocation2 + $0xf8] sm:$0xff] %vm393_vm2, %v18354_v7  ;;  %5312 = vst.msk [vmem:[#allocation2 + $0x100] sm:$0xff] %vm393_vm2, %v18354_v7 }
  0x49   : > { %16365 = vmatmul.mubr.msk.f32.gmra.mxu1 %vm503_vm1, %v976_v53  ;;  %16417 = vmatprep.mubr.msk.f32.mxu0 %vm503_vm1, %v18616_v56  ;;  %5313 = vst.msk [vmem:[#allocation2 + $0x108] sm:$0xff] %vm393_vm2, %v18354_v7  ;;  %5314 = vst.msk [vmem:[#allocation2 + $0x110] sm:$0xff] %vm393_vm2, %v18354_v7  ;;  %v18991_v53 = vld [vmem:[%s18481_s21 + $0x117] sm:$0xff] }
  0x4a   : > { %16367 = vmatprep.mubr.msk.f32.mxu1 %vm503_vm1, %v977_v55  ;;  %5315 = vst.msk [vmem:[#allocation2 + $0x118] sm:$0xff] %vm393_vm2, %v18354_v7  ;;  %5316 = vst.msk [vmem:[#allocation2 + $0x120] sm:$0xff] %vm393_vm2, %v18354_v7  ;;  %v18996_v55 = vld [vmem:[%s22738_s2 + $0x1c] sm:$0x7] }
  0x4b   : > { %5317 = vst.msk [vmem:[#allocation2 + $0x128] sm:$0xff] %vm393_vm2, %v18354_v7  ;;  %5318 = vst.msk [vmem:[#allocation2 + $0x130] sm:$0xff] %vm393_vm2, %v18354_v7 }
  0x4c   : > { %16418 = vmatmul.mubr.msk.f32.gmra.mxu0 %vm503_vm1, %v18628_v58  ;;  %5319 = vst.msk [vmem:[#allocation2 + $0x138] sm:$0xff] %vm393_vm2, %v18354_v7  ;;  %5320 = vst.msk [vmem:[#allocation2 + $0x140] sm:$0xff] %vm393_vm2, %v18354_v7 }
  0x4d   : > { %16368 = vmatmul.mubr.msk.f32.gmra.mxu1 %vm503_vm1, %v978_v57  ;;  %16420 = vmatprep.mubr.msk.f32.mxu0 %vm503_vm1, %v18632_v60  ;;  %5321 = vst.msk [vmem:[#allocation2 + $0x148] sm:$0xff] %vm393_vm2, %v18354_v7  ;;  %10098 = vst [vmem:[#allocation3] sm:$0xff] %v18354_v7  ;;  %v2475_v57 = vld [vmem:[%s18481_s21 + $0x18] sm:$0xff] }
  0x4e   : > { %16370 = vmatprep.mubr.msk.f32.mxu1 %vm503_vm1, %v979_v59  ;;  %10099 = vst [vmem:[#allocation3 + $0x8] sm:$0xff] %v18354_v7  ;;  %10100 = vst [vmem:[#allocation3 + $0x10] sm:$0xff] %v18354_v7  ;;  %v2479_v59 = vld [vmem:[%s18481_s21 + $0x38] sm:$0xff] }
  0x4f   : > { %10137 = vst [vmem:[#allocation3 + $0x138] sm:$0xff] %v18354_v7  ;;  %10138 = vst [vmem:[#allocation3 + $0x140] sm:$0xff] %v18354_v7 }
  0x50   : > { %16421 = vmatmul.mubr.msk.f32.gmra.mxu0 %vm503_vm1, %v18642_v62  ;;  %10139 = vst [vmem:[#allocation3 + $0x148] sm:$0xff] %v18354_v7  ;;  %v2492_v7 = vld [vmem:[%s18481_s21 + $0xa0] sm:$0xff] }
  0x51   : > { %16371 = vmatmul.mubr.msk.f32.gmra.mxu1 %vm503_vm1, %v980_v61  ;;  %16423 = vmatprep.mubr.msk.f32.mxu0 %vm503_vm1, %v18646_v0  ;;  %v2482_v61 = vld [vmem:[%s18481_s21 + $0x50] sm:$0xff] }
  0x52   : > { %16373 = vmatprep.mubr.msk.f32.mxu1 %vm503_vm1, %v981_v63  ;;  %v2484_v63 = vld [vmem:[%s18481_s21 + $0x60] sm:$0xff] }
  0x54   : > { %16424 = vmatmul.mubr.msk.f32.gmra.mxu0 %vm503_vm1, %v18656_v2 }
  0x55   : > { %16374 = vmatmul.mubr.msk.f32.gmra.mxu1 %vm503_vm1, %v982_v1  ;;  %16426 = vmatprep.mubr.msk.f32.mxu0 %vm503_vm1, %v18660_v4  ;;  %v2486_v1 = vld [vmem:[%s18481_s21 + $0x70] sm:$0xff] }
  0x56   : > { %16376 = vmatprep.mubr.msk.f32.mxu1 %vm503_vm1, %v983_v3  ;;  %v2488_v3 = vld [vmem:[%s18481_s21 + $0x80] sm:$0xff] }
  0x58   : > { %16427 = vmatmul.mubr.msk.f32.gmra.mxu0 %vm503_vm1, %v18672_v6 }
  0x59   : > { %16377 = vmatmul.mubr.msk.f32.gmra.mxu1 %vm503_vm1, %v18669_v5  ;;  %16429 = vmatprep.mubr.msk.f32.mxu0 %vm503_vm1, %v18838_v9  ;;  %v2490_v5 = vld [vmem:[%s18481_s21 + $0x90] sm:$0xff] }
  0x5a   : > { %16379 = vmatprep.mubr.msk.f32.mxu1 %vm503_vm1, %v985_v8  ;;  %v2493_v8 = vld [vmem:[%s18481_s21 + $0xa8] sm:$0xff] }
  0x5c   : > { %16430 = vmatmul.mubr.msk.f32.gmra.mxu0 %vm503_vm1, %v18849_v11 }
  0x5d   : > { %16380 = vmatmul.mubr.msk.f32.gmra.mxu1 %vm503_vm1, %v986_v10  ;;  %16432 = vmatprep.mubr.msk.f32.mxu0 %vm503_vm1, %v18853_v13  ;;  %v357_v10 = vld [vmem:[%s22737_s1] sm:$0xff] }
  0x5e   : > { %16382 = vmatprep.mubr.msk.f32.mxu1 %vm503_vm1, %v987_v12  ;;  %v2495_v12 = vld [vmem:[%s18481_s21 + $0xb8] sm:$0xff] }
  0x60   : > { %16433 = vmatmul.mubr.msk.f32.gmra.mxu0 %vm503_vm1, %v18863_v15 }
  0x61   : > { %16383 = vmatmul.mubr.msk.f32.gmra.mxu1 %vm503_vm1, %v988_v14  ;;  %16435 = vmatprep.mubr.msk.f32.mxu0 %vm503_vm1, %v18867_v17  ;;  %v358_v14 = vld [vmem:[%s22737_s1 + $0x8] sm:$0xff] }
  0x62   : > { %16385 = vmatprep.mubr.msk.f32.mxu1 %vm503_vm1, %v989_v16  ;;  %v2497_v16 = vld [vmem:[%s18481_s21 + $0xc8] sm:$0xff] }
  0x64   : > { %16436 = vmatmul.mubr.msk.f32.gmra.mxu0 %vm503_vm1, %v18877_v19 }
  0x65   : > { %16386 = vmatmul.mubr.msk.f32.gmra.mxu1 %vm503_vm1, %v990_v18  ;;  %16438 = vmatprep.mubr.msk.f32.mxu0 %vm503_vm1, %v18881_v21  ;;  %v361_v18 = vld [vmem:[%s22737_s1 + $0x20] sm:$0xff] }
  0x66   : > { %16388 = vmatprep.mubr.msk.f32.mxu1 %vm503_vm1, %v991_v20  ;;  %v2499_v20 = vld [vmem:[%s18481_s21 + $0xd8] sm:$0xff] }
  0x68   : > { %16439 = vmatmul.mubr.msk.f32.gmra.mxu0 %vm503_vm1, %v18891_v23 }
  0x69   : > { %16389 = vmatmul.mubr.msk.f32.gmra.mxu1 %vm503_vm1, %v992_v22  ;;  %16441 = vmatprep.mubr.msk.f32.mxu0 %vm503_vm1, %v18895_v25  ;;  %v363_v22 = vld [vmem:[%s22737_s1 + $0x30] sm:$0xff] }
  0x6a   : > { %16391 = vmatprep.mubr.msk.f32.mxu1 %vm503_vm1, %v993_v24  ;;  %v2501_v24 = vld [vmem:[%s18481_s21 + $0xe8] sm:$0xff] }
  0x6c   : > { %16442 = vmatmul.mubr.msk.f32.gmra.mxu0 %vm503_vm1, %v18905_v27 }
  0x6d   : > { %16392 = vmatmul.mubr.msk.f32.gmra.mxu1 %vm503_vm1, %v994_v26  ;;  %16444 = vmatprep.mubr.msk.f32.mxu0 %vm503_vm1, %v18909_v29  ;;  %v365_v26 = vld [vmem:[%s22737_s1 + $0x40] sm:$0xff] }
  0x6e   : > { %16394 = vmatprep.mubr.msk.f32.mxu1 %vm503_vm1, %v995_v28  ;;  %v2503_v28 = vld [vmem:[%s18481_s21 + $0xf8] sm:$0xff] }
  0x70   : > { %16445 = vmatmul.mubr.msk.f32.gmra.mxu0 %vm503_vm1, %v18919_v31 }
  0x71   : > { %16395 = vmatmul.mubr.msk.f32.gmra.mxu1 %vm503_vm1, %v996_v30  ;;  %16447 = vmatprep.mubr.msk.f32.mxu0 %vm503_vm1, %v18923_v33  ;;  %v367_v30 = vld [vmem:[%s22737_s1 + $0x50] sm:$0xff] }
  0x72   : > { %16397 = vmatprep.mubr.msk.f32.mxu1 %vm503_vm1, %v997_v32  ;;  %v2007_v32 = vld [vmem:[%s18481_s21 + $0x127] sm:$0xff] }
  0x74   : > { %16448 = vmatmul.mubr.msk.f32.gmra.mxu0 %vm503_vm1, %v18933_v35 }
  0x75   : > { %16398 = vmatmul.mubr.msk.f32.gmra.mxu1 %vm503_vm1, %v998_v34  ;;  %16450 = vmatprep.mubr.msk.f32.mxu0 %vm503_vm1, %v18937_v37  ;;  %v368_v34 = vld [vmem:[%s22737_s1 + $0x58] sm:$0xff] }
  0x76   : > { %16400 = vmatprep.mubr.msk.f32.mxu1 %vm503_vm1, %v999_v36  ;;  %v2008_v36 = vld [vmem:[%s18481_s21 + $0x12f] sm:$0xff] }
  0x78   : > { %16451 = vmatmul.mubr.msk.f32.gmra.mxu0 %vm503_vm1, %v18947_v39 }
  0x79   : > { %16401 = vmatmul.mubr.msk.f32.gmra.mxu1 %vm503_vm1, %v1000_v38  ;;  %16453 = vmatprep.mubr.msk.f32.mxu0 %vm503_vm1, %v18951_v41  ;;  %v2507_v38 = vld [vmem:[%s18481_s21 + $0x118] sm:$0xff] }
  0x7a   : > { %16403 = vmatprep.mubr.msk.f32.mxu1 %vm503_vm1, %v1001_v40  ;;  %v370_v40 = vld [vmem:[%s22737_s1 + $0x68] sm:$0xff] }
  0x7c   : > { %16454 = vmatmul.mubr.msk.f32.gmra.mxu0 %vm503_vm1, %v18961_v44 }
  0x7d   : > { %16404 = vmatmul.mubr.msk.f32.gmra.mxu1 %vm503_vm1, %v1002_v42  ;;  %16456 = vmatprep.mubr.msk.f32.mxu0 %vm503_vm1, %v18965_v46  ;;  %v2508_v42 = vld [vmem:[%s18481_s21 + $0x120] sm:$0xff] }
  0x7e   : > { %16406 = vmatprep.mubr.msk.f32.mxu1 %vm503_vm1, %v1003_v45  ;;  %v2509_v45 = vld [vmem:[%s18481_s21 + $0x128] sm:$0xff] }
  0x80   : > { %16457 = vmatmul.mubr.msk.f32.gmra.mxu0 %vm503_vm1, %v18975_v48 }
  0x81   : > { %16407 = vmatmul.mubr.msk.f32.gmra.mxu1 %vm503_vm1, %v1004_v47  ;;  %16459 = vmatprep.mubr.msk.f32.mxu0 %vm503_vm1, %v18978_v49  ;;  %v372_v47 = vld [vmem:[%s22737_s1 + $0x78] sm:$0xff] }
  0x82   : > { %16467 = vmatprep.mubr.msk.f32.mxu1 %vm503_vm1, %v18596_v51  ;;  %v19007_v51 = vld [vmem:[%s18481_s21 + $0x11f] sm:$0xff] }
  0x84   : > { %16460 = vmatmul.mubr.msk.f32.gmra.mxu0 %vm503_vm1, %v18988_v50 }
  0x85   : > { %16468 = vmatmul.mubr.msk.f32.vlgmr.msra.gmra.mxu1 %vm503_vm1, %v18610_v54  ;;  %16462 = vmatprep.mubr.msk.f32.mxu0 %vm503_vm1, %v18991_v53  ;;  %v2477_v54 = vld [vmem:[%s18481_s21 + $0x28] sm:$0xff] }
  0x86   : > { %16578 = vmatpush3.msk.msra.mxu1 %vm612_vm0, %v18574_v43  ;;  %16470 = vmatprep.mubr.msk.f32.mxu1 %vm503_vm1, %v18616_v56  ;;  %v2476_v43 = vld [vmem:[%s18481_s21 + $0x20] sm:$0xff] }
  0x87   : > { %16689 = vmatprep.subr.msk.mxu1 %vm612_vm0, %v18996_v55  ;;  %v19026_v56 = vld [vmem:[%s22738_s2 + $0x20] sm:$0x7] }
  0x88   : > { %16463 = vmatmul.mubr.msk.f32.gmra.mxu0 %vm503_vm1, %v19007_v51 }
  0x89   : > { %16471 = vmatmul.mubr.msk.f32.gmra.mxu1 %vm503_vm1, %v18628_v58  ;;  %16523 = vmatprep.mubr.msk.f32.mxu0 %vm503_vm1, %v2475_v57  ;;  %v2478_v58 = vld [vmem:[%s18481_s21 + $0x30] sm:$0xff]  ;;  %v2982_v57 = vld [vmem:[%s18481_s21 + $0x41] sm:$0xff] }
  0x8a   : > { %16473 = vmatprep.mubr.msk.f32.mxu1 %vm503_vm1, %v18632_v60  ;;  %v2481_v60 = vld [vmem:[%s18481_s21 + $0x48] sm:$0xff] }
  0x8c   : > { %16524 = vmatmul.mubr.msk.f32.vlgmr.msra.gmra.mxu0 %vm503_vm1, %v2476_v43  ;;  %v2983_v43 = vld [vmem:[%s18481_s21 + $0x49] sm:$0xff] }
  0x8d   : > { %16474 = vmatmul.mubr.msk.f32.gmra.mxu1 %vm503_vm1, %v18642_v62  ;;  %16634 = vmatpush3.msk.msra.mxu0 %vm612_vm0, %v18601_v52  ;;  %v2480_v52 = vld [vmem:[%s18481_s21 + $0x40] sm:$0xff]  ;;  %v2483_v62 = vld [vmem:[%s18481_s21 + $0x58] sm:$0xff] }
  0x8e   : > { %16476 = vmatprep.mubr.msk.f32.mxu1 %vm503_vm1, %v18646_v0  ;;  %16526 = vmatprep.mubr.msk.f32.mxu0 %vm503_vm1, %v2477_v54  ;;  %v2485_v0 = vld [vmem:[%s18481_s21 + $0x68] sm:$0xff]  ;;  %v376_v54 = vld [vmem:[%s22737_s1 + $0x98] sm:$0xff] }
  0x8f   : > { %16745 = vmatprep.subr.msk.mxu0 %vm612_vm0, %v19026_v56 }
  0x90   : > { %16527 = vmatmul.mubr.msk.f32.gmra.mxu0 %vm503_vm1, %v2478_v58  ;;  %v377_v58 = vld [vmem:[%s22737_s1 + $0xa0] sm:$0xff] }
  0x91   : > { %16477 = vmatmul.mubr.msk.f32.gmra.mxu1 %vm503_vm1, %v18656_v2  ;;  %16529 = vmatprep.mubr.msk.f32.mxu0 %vm503_vm1, %v2479_v59  ;;  %v2487_v2 = vld [vmem:[%s18481_s21 + $0x78] sm:$0xff] }
  0x92   : > { %16479 = vmatprep.mubr.msk.f32.mxu1 %vm503_vm1, %v18660_v4  ;;  %v2489_v4 = vld [vmem:[%s18481_s21 + $0x88] sm:$0xff]  ;;  %v2984_v59 = vld [vmem:[%s18481_s21 + $0x51] sm:$0xff] }
  0x94   : > { %16530 = vmatmul.mubr.msk.f32.gmra.mxu0 %vm503_vm1, %v2480_v52  ;;  %v2985_v52 = vld [vmem:[%s18481_s21 + $0x59] sm:$0xff] }
  0x95   : > { %16480 = vmatmul.mubr.msk.f32.gmra.mxu1 %vm503_vm1, %v18672_v6  ;;  %16532 = vmatprep.mubr.msk.f32.mxu0 %vm503_vm1, %v2481_v60  ;;  %v2491_v6 = vld [vmem:[%s18481_s21 + $0x98] sm:$0xff]  ;;  %v378_v60 = vld [vmem:[%s22737_s1 + $0xa8] sm:$0xff] }
  0x96   : > { %16482 = vmatprep.mubr.msk.f32.mxu1 %vm503_vm1, %v18838_v9  ;;  %v18355_v9 = vmov 0  }
  0x97   : > { %18285 = vset.pattern.permute.xlu0 %v18355_v9  ;;  %18286 = vset.pattern.permute.xlu1 %v18355_v9  ;;  %v2988_v9 = vld [vmem:[%s18481_s21 + $0x71] sm:$0xff] }
  0x98   : > { %16533 = vmatmul.mubr.msk.f32.gmra.mxu0 %vm503_vm1, %v2482_v61  ;;  %5066 = vperm.xlu0 %18285, %v357_v10   ;;  %v2986_v61 = vld [vmem:[%s18481_s21 + $0x61] sm:$0xff] }
  0x99   : > { %16483 = vmatmul.mubr.msk.f32.gmra.mxu1 %vm503_vm1, %v18849_v11  ;;  %16535 = vmatprep.mubr.msk.f32.mxu0 %vm503_vm1, %v2483_v62  ;;  %v2494_v11 = vld [vmem:[%s18481_s21 + $0xb0] sm:$0xff]  ;;  %v431_v62 = vld [vmem:[#allocation4 + $0x8] sm:$0xff] }
  0x9a   : > { %16485 = vmatprep.mubr.msk.f32.mxu1 %vm503_vm1, %v18853_v13  ;;  %v359_v13 = vld [vmem:[%s22737_s1 + $0x10] sm:$0xff] }
  0x9b   : > { %5076 = vperm.xlu1 %18286, %v359_v13   ;;  %v453_v13 = vld [vmem:[#allocation4 + $0xb8] sm:$0xff] }
  0x9c   : > { %16536 = vmatmul.mubr.msk.f32.gmra.mxu0 %vm503_vm1, %v2484_v63  ;;  %5071 = vperm.xlu0 %18285, %v358_v14   ;;  %v451_v63 = vld [vmem:[#allocation4 + $0xa8] sm:$0xff]  ;;  %v2989_v14 = vld [vmem:[%s18481_s21 + $0x79] sm:$0xff] }
  0x9d   : > { %16486 = vmatmul.mubr.msk.f32.gmra.mxu1 %vm503_vm1, %v18863_v15  ;;  %16538 = vmatprep.mubr.msk.f32.mxu0 %vm503_vm1, %v2485_v0  ;;  %v2496_v15 = vld [vmem:[%s18481_s21 + $0xc0] sm:$0xff]  ;;  %v2987_v0 = vld [vmem:[%s18481_s21 + $0x69] sm:$0xff] }
  0x9e   : > { %16488 = vmatprep.mubr.msk.f32.mxu1 %vm503_vm1, %v18867_v17  ;;  %v360_v17 = vld [vmem:[%s22737_s1 + $0x18] sm:$0xff] }
  0x9f   : > { %5081 = vperm.xlu1 %18286, %v360_v17   ;;  %v382_v17 = vld [vmem:[%s22737_s1 + $0xc8] sm:$0xff] }
  0xa0   : > { %16539 = vmatmul.mubr.msk.f32.gmra.mxu0 %vm503_vm1, %v2486_v1  ;;  %5086 = vperm.xlu0 %18285, %v361_v18   ;;  %v380_v1 = vld [vmem:[%s22737_s1 + $0xb8] sm:$0xff] }
  0xa1   : > { %16489 = vmatmul.mubr.msk.f32.gmra.mxu1 %vm503_vm1, %v18877_v19  ;;  %16541 = vmatprep.mubr.msk.f32.mxu0 %vm503_vm1, %v2487_v2  ;;  %v2498_v19 = vld [vmem:[%s18481_s21 + $0xd0] sm:$0xff] }
  0xa2   : > { %16491 = vmatprep.mubr.msk.f32.mxu1 %vm503_vm1, %v18881_v21  ;;  %v362_v21 = vld [vmem:[%s22737_s1 + $0x28] sm:$0xff] }
  0xa3   : > { %5091 = vperm.xlu1 %18286, %v362_v21   ;;  %v452_v21 = vld [vmem:[#allocation4 + $0xb0] sm:$0xff] }
  0xa4   : > { %16542 = vmatmul.mubr.msk.f32.gmra.mxu0 %vm503_vm1, %v2488_v3  ;;  %5096 = vperm.xlu0 %18285, %v363_v22   ;;  %v383_v22 = vld [vmem:[%s22737_s1 + $0xd0] sm:$0xff] }
  0xa5   : > { %16492 = vmatmul.mubr.msk.f32.gmra.mxu1 %vm503_vm1, %v18891_v23  ;;  %16544 = vmatprep.mubr.msk.f32.mxu0 %vm503_vm1, %v2489_v4  ;;  %v2500_v23 = vld [vmem:[%s18481_s21 + $0xe0] sm:$0xff] }
  0xa6   : > { %16494 = vmatprep.mubr.msk.f32.mxu1 %vm503_vm1, %v18895_v25  ;;  %v364_v25 = vld [vmem:[%s22737_s1 + $0x38] sm:$0xff]  ;;  %v430_v4 = vld [vmem:[#allocation4] sm:$0xff] }
  0xa7   : > { %5101 = vperm.xlu1 %18286, %v364_v25   ;;  %v2990_v25 = vld [vmem:[%s18481_s21 + $0x81] sm:$0xff] }
  0xa8   : > { %16545 = vmatmul.mubr.msk.f32.gmra.mxu0 %vm503_vm1, %v2490_v5  ;;  %5106 = vperm.xlu0 %18285, %v365_v26   ;;  %v450_v5 = vld [vmem:[#allocation4 + $0xa0] sm:$0xff] }
  0xa9   : > { %16495 = vmatmul.mubr.msk.f32.gmra.mxu1 %vm503_vm1, %v18905_v27  ;;  %16547 = vmatprep.mubr.msk.f32.mxu0 %vm503_vm1, %v2491_v6  ;;  %v2502_v27 = vld [vmem:[%s18481_s21 + $0xf0] sm:$0xff]  ;;  %v381_v6 = vld [vmem:[%s22737_s1 + $0xc0] sm:$0xff] }
  0xaa   : > { %16497 = vmatprep.mubr.msk.f32.mxu1 %vm503_vm1, %v18909_v29  ;;  %v366_v29 = vld [vmem:[%s22737_s1 + $0x48] sm:$0xff] }
  0xab   : > { %5111 = vperm.xlu1 %18286, %v366_v29   ;;  %v455_v29 = vld [vmem:[#allocation4 + $0xc8] sm:$0xff] }
  0xac   : > { %16548 = vmatmul.mubr.msk.f32.gmra.mxu0 %vm503_vm1, %v2492_v7  ;;  %5116 = vperm.xlu0 %18285, %v367_v30   ;;  %v2991_v30 = vld [vmem:[%s18481_s21 + $0x89] sm:$0xff] }
  0xad   : > { %16498 = vmatmul.mubr.msk.f32.gmra.mxu1 %vm503_vm1, %v18919_v31  ;;  %16550 = vmatprep.mubr.msk.f32.mxu0 %vm503_vm1, %v2493_v8  ;;  %v2504_v31 = vld [vmem:[%s18481_s21 + $0x100] sm:$0xff] }
  0xae   : > { %16500 = vmatprep.mubr.msk.f32.mxu1 %vm503_vm1, %v18923_v33  ;;  %v2505_v33 = vld [vmem:[%s18481_s21 + $0x108] sm:$0xff] }
  0xaf   : > { %5121 = vperm.xlu1 %18286, %v368_v34  }
  0xb0   : > { %16551 = vmatmul.mubr.msk.f32.gmra.mxu0 %vm503_vm1, %v2494_v11 }
  0xb1   : > { %16501 = vmatmul.mubr.msk.f32.gmra.mxu1 %vm503_vm1, %v18933_v35  ;;  %16553 = vmatprep.mubr.msk.f32.mxu0 %vm503_vm1, %v2495_v12  ;;  %v369_v35 = vld [vmem:[%s22737_s1 + $0x60] sm:$0xff]  ;;  %v433_v12 = vld [vmem:[#allocation4 + $0x18] sm:$0xff] }
  0xb2   : > { %16503 = vmatprep.mubr.msk.f32.mxu1 %vm503_vm1, %v18937_v37  ;;  %v2506_v37 = vld [vmem:[%s18481_s21 + $0x110] sm:$0xff]  ;;  %5126 = vperm.xlu0 %18285, %v369_v35  }
  0xb3   : > { %5131 = vperm.xlu1 %18286, %v370_v40  }
  0xb4   : > { %16554 = vmatmul.mubr.msk.f32.gmra.mxu0 %vm503_vm1, %v2496_v15 }
  0xb5   : > { %16504 = vmatmul.mubr.msk.f32.gmra.mxu1 %vm503_vm1, %v18947_v39  ;;  %16556 = vmatprep.mubr.msk.f32.mxu0 %vm503_vm1, %v2497_v16  ;;  %v2977_v39 = vld [vmem:[%s18481_s21 + $0x19] sm:$0xff] }
  0xb6   : > { %16506 = vmatprep.mubr.msk.f32.mxu1 %vm503_vm1, %v18951_v41  ;;  %v371_v41 = vld [vmem:[%s22737_s1 + $0x70] sm:$0xff] }
  0xb7   : > { %5136 = vperm.xlu0 %18285, %v371_v41   ;;  %5141 = vperm.xlu1 %18286, %v372_v47   ;;  %v2992_v41 = vld [vmem:[%s18481_s21 + $0x91] sm:$0xff]  ;;  %v2993_v47 = vld [vmem:[%s18481_s21 + $0x99] sm:$0xff] }
  0xb8   : > { %16557 = vmatmul.mubr.msk.f32.gmra.mxu0 %vm503_vm1, %v2498_v19 }
  0xb9   : > { %16507 = vmatmul.mubr.msk.f32.gmra.mxu1 %vm503_vm1, %v18961_v44  ;;  %16559 = vmatprep.mubr.msk.f32.mxu0 %vm503_vm1, %v2499_v20  ;;  %v2978_v44 = vld [vmem:[%s18481_s21 + $0x21] sm:$0xff]  ;;  %v432_v20 = vld [vmem:[#allocation4 + $0x10] sm:$0xff] }
  0xba   : > { %16509 = vmatprep.mubr.msk.f32.mxu1 %vm503_vm1, %v18965_v46  ;;  %v2979_v46 = vld [vmem:[%s18481_s21 + $0x29] sm:$0xff] }
  0xbc   : > { %16560 = vmatmul.mubr.msk.f32.gmra.mxu0 %vm503_vm1, %v2500_v23 }
  0xbd   : > { %16510 = vmatmul.mubr.msk.f32.gmra.mxu1 %vm503_vm1, %v18975_v48  ;;  %16562 = vmatprep.mubr.msk.f32.mxu0 %vm503_vm1, %v2501_v24  ;;  %v373_v48 = vld [vmem:[%s22737_s1 + $0x80] sm:$0xff] }
  0xbe   : > { %16512 = vmatprep.mubr.msk.f32.mxu1 %vm503_vm1, %v18978_v49  ;;  %v2510_v49 = vld [vmem:[%s18481_s21 + $0x130] sm:$0xff]  ;;  %5146 = vperm.xlu0 %18285, %v373_v48  }
  0xc0   : > { %16563 = vmatmul.mubr.msk.f32.gmra.mxu0 %vm503_vm1, %v2502_v27 }
  0xc1   : > { %16513 = vmatmul.mubr.msk.f32.gmra.mxu1 %vm503_vm1, %v18988_v50  ;;  %16565 = vmatprep.mubr.msk.f32.mxu0 %vm503_vm1, %v2503_v28  ;;  %v2980_v50 = vld [vmem:[%s18481_s21 + $0x31] sm:$0xff]  ;;  %v435_v28 = vld [vmem:[#allocation4 + $0x28] sm:$0xff] }
  0xc2   : > { %16515 = vmatprep.mubr.msk.f32.mxu1 %vm503_vm1, %v18991_v53  ;;  %v2981_v53 = vld [vmem:[%s18481_s21 + $0x39] sm:$0xff] }
  0xc4   : > { %16566 = vmatmul.mubr.msk.f32.gmra.mxu0 %vm503_vm1, %v2504_v31 }
  0xc5   : > { %16516 = vmatmul.mubr.msk.f32.gmra.mxu1 %vm503_vm1, %v19007_v51  ;;  %16568 = vmatprep.mubr.msk.f32.mxu0 %vm503_vm1, %v2505_v33  ;;  %v374_v51 = vld [vmem:[%s22737_s1 + $0x88] sm:$0xff]  ;;  %v384_v33 = vld [vmem:[%s22737_s1 + $0xd8] sm:$0xff] }
  0xc6   : > { %16518 = vmatprep.mubr.msk.f32.mxu1 %vm503_vm1, %v2007_v32  ;;  %5151 = vperm.xlu1 %18286, %v374_v51  }
  0xc8   : > { %16569 = vmatmul.mubr.msk.f32.gmra.mxu0 %vm503_vm1, %v2506_v37  ;;  %v454_v37 = vld [vmem:[#allocation4 + $0xc0] sm:$0xff] }
  0xc9   : > { %16519 = vmatmul.mubr.msk.f32.gmra.mxu1 %vm503_vm1, %v2008_v36  ;;  %16571 = vmatprep.mubr.msk.f32.mxu0 %vm503_vm1, %v2507_v38  ;;  %v434_v36 = vld [vmem:[#allocation4 + $0x20] sm:$0xff] }
  0xca   : > { %16579 = vmatprep.mubr.msk.f32.mxu1 %vm503_vm1, %v2977_v39  ;;  %5161 = vperm.xlu1 %18286, %v376_v54   ;;  %v385_v38 = vld [vmem:[%s22737_s1 + $0xe0] sm:$0xff] }
  0xcc   : > { %16572 = vmatmul.mubr.msk.f32.gmra.mxu0 %vm503_vm1, %v2508_v42 }
  0xcd   : > { %16580 = vmatmul.mubr.msk.f32.vlgmr.msra.gmra.mxu1 %vm503_vm1, %v2978_v44  ;;  %16574 = vmatprep.mubr.msk.f32.mxu0 %vm503_vm1, %v2509_v45  ;;  %v437_v45 = vld [vmem:[#allocation4 + $0x38] sm:$0xff] }
  0xce   : > { %16690 = vmatpush3.msk.msra.mxu1 %vm612_vm0, %v18996_v55  ;;  %16582 = vmatprep.mubr.msk.f32.mxu1 %vm503_vm1, %v2979_v46  ;;  %v375_v55 = vld [vmem:[%s22737_s1 + $0x90] sm:$0xff] }
  0xcf   : > { %5156 = vperm.xlu0 %18285, %v375_v55   ;;  %5171 = vperm.xlu1 %18286, %v378_v60   ;;  %v436_v55 = vld [vmem:[#allocation4 + $0x30] sm:$0xff] }
  0xd0   : > { %16575 = vmatmul.mubr.msk.f32.gmra.mxu0 %vm503_vm1, %v2510_v49 }
  0xd1   : > { %16583 = vmatmul.mubr.msk.f32.gmra.mxu1 %vm503_vm1, %v2980_v50  ;;  %16635 = vmatprep.mubr.msk.f32.mxu0 %vm503_vm1, %v2979_v46  ;;  %v457_v46 = vld [vmem:[#allocation4 + $0xd8] sm:$0xff] }
  0xd2   : > { %16585 = vmatprep.mubr.msk.f32.mxu1 %vm503_vm1, %v2981_v53 }
  0xd3   : > { %5166 = vperm.xlu0 %18285, %v377_v58   ;;  %5181 = vperm.xlu1 %18286, %v380_v1   ;;  %v388_v1 = vld [vmem:[%s22737_s1 + $0xf8] sm:$0xff] }
  0xd4   : > { %16636 = vmatmul.mubr.msk.f32.vlgmr.msra.gmra.mxu0 %vm503_vm1, %v2980_v50  ;;  %v386_v50 = vld [vmem:[%s22737_s1 + $0xe8] sm:$0xff] }
  0xd5   : > { %16586 = vmatmul.mubr.msk.f32.gmra.mxu1 %vm503_vm1, %v2982_v57  ;;  %16746 = vmatpush3.msk.msra.mxu0 %vm612_vm0, %v19026_v56  ;;  %v379_v56 = vld [vmem:[%s22737_s1 + $0xb0] sm:$0xff] }
  0xd6   : > { %16588 = vmatprep.mubr.msk.f32.mxu1 %vm503_vm1, %v2983_v43  ;;  %16638 = vmatprep.mubr.msk.f32.mxu0 %vm503_vm1, %v2981_v53 }
  0xd7   : > { %5176 = vperm.xlu0 %18285, %v379_v56   ;;  %5191 = vperm.xlu1 %18286, %v382_v17   ;;  %v439_v56 = vld [vmem:[#allocation4 + $0x48] sm:$0xff] }
  0xd8   : > { %16639 = vmatmul.mubr.msk.f32.gmra.mxu0 %vm503_vm1, %v2982_v57  ;;  %v456_v57 = vld [vmem:[#allocation4 + $0xd0] sm:$0xff]  ;;  %v390_v17 = vld [vmem:[%s22737_s1 + $0x108] sm:$0xff] }
  0xd9   : > { %16589 = vmatmul.mubr.msk.f32.gmra.mxu1 %vm503_vm1, %v2984_v59  ;;  %16641 = vmatprep.mubr.msk.f32.mxu0 %vm503_vm1, %v2983_v43  ;;  %v387_v43 = vld [vmem:[%s22737_s1 + $0xf0] sm:$0xff] }
  0xda   : > { %16591 = vmatprep.mubr.msk.f32.mxu1 %vm503_vm1, %v2985_v52 }
  0xdb   : > { %5186 = vperm.xlu0 %18285, %v381_v6   ;;  %5201 = vperm.xlu1 %18286, %v384_v33   ;;  %v389_v6 = vld [vmem:[%s22737_s1 + $0x100] sm:$0xff]  ;;  %v392_v33 = vld [vmem:[%s22737_s1 + $0x118] sm:$0xff] }
  0xdc   : > { %v16301_v2 = vpop.f32.mrf.mxu0  ;;  %16642 = vmatmul.mubr.msk.f32.gmra.mxu0 %vm503_vm1, %v2984_v59  ;;  %v2994_v59 = vld [vmem:[%s18481_s21 + $0xa1] sm:$0xff] }
  0xdd   : > { %v16331_v3 = vpop.f32.mrf.mxu1  ;;  %16592 = vmatmul.mubr.msk.f32.gmra.mxu1 %vm503_vm1, %v2986_v61  ;;  %v862_v7 = vadd.f32 %v16301_v2, %v431_v62  ;;  %16644 = vmatprep.mubr.msk.f32.mxu0 %vm503_vm1, %v2985_v52  ;;  %v2995_v62 = vld [vmem:[%s18481_s21 + $0xa9] sm:$0xff] }
  0xde   : > { %v882_v8 = vadd.f32 %v16331_v3, %v451_v63  ;;  %16594 = vmatprep.mubr.msk.f32.mxu1 %vm503_vm1, %v2987_v0  ;;  %v682_v10 = vpop.f32.mrf.mxu0 }
  0xdf   : > { %v782_v11 = vpop.f32.mrf.mxu1  ;;  %898 = vst.msk [vmem:[#allocation4 + $0x8] sm:$0xff] %vm393_vm2, %v862_v7  ;;  %v861_v15 = vadd.f32 %v682_v10, %v430_v4  ;;  %5196 = vperm.xlu0 %18285, %v383_v22   ;;  %5211 = vperm.xlu1 %18286, %v386_v50   ;;  %v438_v4 = vld [vmem:[#allocation4 + $0x40] sm:$0xff]  ;;  %v391_v22 = vld [vmem:[%s22737_s1 + $0x110] sm:$0xff] }
  0xe0   : > { %918 = vst.msk [vmem:[#allocation4 + $0xa8] sm:$0xff] %vm393_vm2, %v882_v8  ;;  %v881_v16 = vadd.f32 %v782_v11, %v450_v5  ;;  %v16304_v18 = vpop.f32.mrf.mxu0  ;;  %16645 = vmatmul.mubr.msk.f32.gmra.mxu0 %vm503_vm1, %v2986_v61  ;;  %v459_v61 = vld [vmem:[#allocation4 + $0xe8] sm:$0xff]  ;;  %v458_v5 = vld [vmem:[#allocation4 + $0xe0] sm:$0xff] }
  0xe1   : > { %v16334_v19 = vpop.f32.mrf.mxu1  ;;  %16595 = vmatmul.mubr.msk.f32.gmra.mxu1 %vm503_vm1, %v2988_v9  ;;  %897 = vst.msk [vmem:[#allocation4] sm:$0xff] %vm393_vm2, %v861_v15  ;;  %v864_v23 = vadd.f32 %v16304_v18, %v433_v12  ;;  %16647 = vmatprep.mubr.msk.f32.mxu0 %vm503_vm1, %v2987_v0  ;;  %v441_v12 = vld [vmem:[#allocation4 + $0x58] sm:$0xff] }
  0xe2   : > { %917 = vst.msk [vmem:[#allocation4 + $0xa0] sm:$0xff] %vm393_vm2, %v881_v16  ;;  %v884_v24 = vadd.f32 %v16334_v19, %v453_v13  ;;  %16597 = vmatprep.mubr.msk.f32.mxu1 %vm503_vm1, %v2989_v14  ;;  %v692_v26 = vpop.f32.mrf.mxu0  ;;  %v461_v13 = vld [vmem:[#allocation4 + $0xf8] sm:$0xff] }
  0xe3   : > { %v792_v27 = vpop.f32.mrf.mxu1  ;;  %900 = vst.msk [vmem:[#allocation4 + $0x18] sm:$0xff] %vm393_vm2, %v864_v23  ;;  %v863_v31 = vadd.f32 %v692_v26, %v432_v20  ;;  %5206 = vperm.xlu0 %18285, %v385_v38   ;;  %5221 = vperm.xlu1 %18286, %v388_v1   ;;  %v440_v20 = vld [vmem:[#allocation4 + $0x50] sm:$0xff] }
  0xe4   : > { %920 = vst.msk [vmem:[#allocation4 + $0xb8] sm:$0xff] %vm393_vm2, %v884_v24  ;;  %v883_v32 = vadd.f32 %v792_v27, %v452_v21  ;;  %v16307_v34 = vpop.f32.mrf.mxu0  ;;  %16648 = vmatmul.mubr.msk.f32.gmra.mxu0 %vm503_vm1, %v2988_v9  ;;  %v2996_v9 = vld [vmem:[%s18481_s21 + $0xb1] sm:$0xff] }
  0xe5   : > { %v16337_v35 = vpop.f32.mrf.mxu1  ;;  %16598 = vmatmul.mubr.msk.f32.gmra.mxu1 %vm503_vm1, %v2990_v25  ;;  %899 = vst.msk [vmem:[#allocation4 + $0x10] sm:$0xff] %vm393_vm2, %v863_v31  ;;  %v866_v39 = vadd.f32 %v16307_v34, %v435_v28  ;;  %16650 = vmatprep.mubr.msk.f32.mxu0 %vm503_vm1, %v2989_v14  ;;  %v2997_v14 = vld [vmem:[%s18481_s21 + $0xb9] sm:$0xff]  ;;  %v460_v21 = vld [vmem:[#allocation4 + $0xf0] sm:$0xff]  ;;  %v443_v28 = vld [vmem:[#allocation4 + $0x68] sm:$0xff] }
  0xe6   : > { %919 = vst.msk [vmem:[#allocation4 + $0xb0] sm:$0xff] %vm393_vm2, %v883_v32  ;;  %v886_v40 = vadd.f32 %v16337_v35, %v455_v29  ;;  %16600 = vmatprep.mubr.msk.f32.mxu1 %vm503_vm1, %v2991_v30  ;;  %v702_v42 = vpop.f32.mrf.mxu0  ;;  %v463_v29 = vld [vmem:[#allocation4 + $0x108] sm:$0xff] }
  0xe7   : > { %v802_v44 = vpop.f32.mrf.mxu1  ;;  %902 = vst.msk [vmem:[#allocation4 + $0x28] sm:$0xff] %vm393_vm2, %v866_v39  ;;  %v865_v48 = vadd.f32 %v702_v42, %v434_v36  ;;  %5216 = vperm.xlu0 %18285, %v387_v43   ;;  %5231 = vperm.xlu1 %18286, %v390_v17   ;;  %v442_v36 = vld [vmem:[#allocation4 + $0x60] sm:$0xff] }
  0xe8   : > { %922 = vst.msk [vmem:[#allocation4 + $0xc8] sm:$0xff] %vm393_vm2, %v886_v40  ;;  %v885_v49 = vadd.f32 %v802_v44, %v454_v37  ;;  %v16310_v53 = vpop.f32.mrf.mxu0  ;;  %16651 = vmatmul.mubr.msk.f32.gmra.mxu0 %vm503_vm1, %v2990_v25  ;;  %v2998_v25 = vld [vmem:[%s18481_s21 + $0xc1] sm:$0xff]  ;;  %v3000_v40 = vld [vmem:[%s18481_s21 + $0xd1] sm:$0xff] }
  0xe9   : > { %v16340_v51 = vpop.f32.mrf.mxu1  ;;  %16601 = vmatmul.mubr.msk.f32.gmra.mxu1 %vm503_vm1, %v2992_v41  ;;  %901 = vst.msk [vmem:[#allocation4 + $0x20] sm:$0xff] %vm393_vm2, %v865_v48  ;;  %v868_v54 = vadd.f32 %v16310_v53, %v437_v45  ;;  %16653 = vmatprep.mubr.msk.f32.mxu0 %vm503_vm1, %v2991_v30  ;;  %v2999_v30 = vld [vmem:[%s18481_s21 + $0xc9] sm:$0xff]  ;;  %v462_v37 = vld [vmem:[#allocation4 + $0x100] sm:$0xff]  ;;  %v445_v44 = vld [vmem:[#allocation4 + $0x78] sm:$0xff] }
  0xea   : > { %921 = vst.msk [vmem:[#allocation4 + $0xc0] sm:$0xff] %vm393_vm2, %v885_v49  ;;  %v888_v58 = vadd.f32 %v16340_v51, %v457_v46  ;;  %16603 = vmatprep.mubr.msk.f32.mxu1 %vm503_vm1, %v2993_v47  ;;  %v712_v52 = vpop.f32.mrf.mxu0  ;;  %v465_v45 = vld [vmem:[#allocation4 + $0x118] sm:$0xff]  ;;  %v444_v53 = vld [vmem:[#allocation4 + $0x70] sm:$0xff]  ;;  %v3002_v43 = vld [vmem:[%s18481_s21 + $0xe1] sm:$0xff] }
  0xeb   : > { %v812_v60 = vpop.f32.mrf.mxu1  ;;  %904 = vst.msk [vmem:[#allocation4 + $0x38] sm:$0xff] %vm393_vm2, %v868_v54  ;;  %v867_v63 = vadd.f32 %v712_v52, %v436_v55  ;;  %5226 = vperm.xlu0 %18285, %v389_v6   ;;  %v3001_v46 = vld [vmem:[%s18481_s21 + $0xd9] sm:$0xff]  ;;  %5241 = vperm.xlu1 %18286, %v392_v33   ;;  %v464_v51 = vld [vmem:[#allocation4 + $0x110] sm:$0xff]  ;;  %v3006_v17 = vld [vmem:[%s18481_s21 + $0x101] sm:$0xff] }
  0xec   : > { %924 = vst.msk [vmem:[#allocation4 + $0xd8] sm:$0xff] %vm393_vm2, %v888_v58  ;;  %v887_v0 = vadd.f32 %v812_v60, %v456_v57  ;;  %v16313_v2 = vpop.f32.mrf.mxu0  ;;  %16654 = vmatmul.mubr.msk.f32.gmra.mxu0 %vm503_vm1, %v2992_v41  ;;  %v3003_v52 = vld [vmem:[%s18481_s21 + $0xe9] sm:$0xff]  ;;  %v3009_v33 = vld [vmem:[%s18481_s21 + $0x119] sm:$0xff] }
  0xed   : > { %v16343_v3 = vpop.f32.mrf.mxu1  ;;  %16604 = vmatmul.mubr.msk.f32.gmra.mxu1 %vm503_vm1, %v2994_v59  ;;  %903 = vst.msk [vmem:[#allocation4 + $0x30] sm:$0xff] %vm393_vm2, %v867_v63  ;;  %v870_v7 = vadd.f32 %v16313_v2, %v439_v56  ;;  %16656 = vmatprep.mubr.msk.f32.mxu0 %vm503_vm1, %v2993_v47 }
  0xee   : > { %923 = vst.msk [vmem:[#allocation4 + $0xd0] sm:$0xff] %vm393_vm2, %v887_v0  ;;  %v890_v8 = vadd.f32 %v16343_v3, %v459_v61  ;;  %16606 = vmatprep.mubr.msk.f32.mxu1 %vm503_vm1, %v2995_v62  ;;  %v722_v10 = vpop.f32.mrf.mxu0  ;;  %v446_v0 = vld [vmem:[#allocation4 + $0x80] sm:$0xff]  ;;  %v3004_v3 = vld [vmem:[%s18481_s21 + $0xf1] sm:$0xff] }
  0xef   : > { %v822_v11 = vpop.f32.mrf.mxu1  ;;  %906 = vst.msk [vmem:[#allocation4 + $0x48] sm:$0xff] %vm393_vm2, %v870_v7  ;;  %v869_v15 = vadd.f32 %v722_v10, %v438_v4  ;;  %5236 = vperm.xlu0 %18285, %v391_v22   ;;  %v449_v7 = vld [vmem:[#allocation4 + $0x98] sm:$0xff] }
  0xf0   : > { %926 = vst.msk [vmem:[#allocation4 + $0xe8] sm:$0xff] %vm393_vm2, %v890_v8  ;;  %v889_v16 = vadd.f32 %v822_v11, %v458_v5  ;;  %v16316_v18 = vpop.f32.mrf.mxu0  ;;  %16657 = vmatmul.mubr.msk.f32.gmra.mxu0 %vm503_vm1, %v2994_v59  ;;  %v447_v59 = vld [vmem:[#allocation4 + $0x88] sm:$0xff]  ;;  %v933_v5 = vld [vmem:[#allocation4] sm:$0xff] }
  0xf1   : > { %v16346_v19 = vpop.f32.mrf.mxu1  ;;  %16607 = vmatmul.mubr.msk.f32.gmra.mxu1 %vm503_vm1, %v2996_v9  ;;  %905 = vst.msk [vmem:[#allocation4 + $0x40] sm:$0xff] %vm393_vm2, %v869_v15  ;;  %v872_v23 = vadd.f32 %v16316_v18, %v441_v12  ;;  %16659 = vmatprep.mubr.msk.f32.mxu0 %vm503_vm1, %v2995_v62  ;;  %v934_v62 = vld [vmem:[#allocation4 + $0x8] sm:$0xff]  ;;  %v3005_v8 = vld [vmem:[%s18481_s21 + $0xf9] sm:$0xff] }
  0xf2   : > { %925 = vst.msk [vmem:[#allocation4 + $0xe0] sm:$0xff] %vm393_vm2, %v889_v16  ;;  %v892_v24 = vadd.f32 %v16346_v19, %v461_v13  ;;  %16609 = vmatprep.mubr.msk.f32.mxu1 %vm503_vm1, %v2997_v14  ;;  %v732_v26 = vpop.f32.mrf.mxu0  ;;  %v936_v12 = vld [vmem:[#allocation4 + $0x18] sm:$0xff]  ;;  %v935_v19 = vld [vmem:[#allocation4 + $0x10] sm:$0xff] }
  0xf3   : > { %v832_v27 = vpop.f32.mrf.mxu1  ;;  %908 = vst.msk [vmem:[#allocation4 + $0x58] sm:$0xff] %vm393_vm2, %v872_v23  ;;  %v871_v31 = vadd.f32 %v732_v26, %v440_v20 }
  0xf4   : > { %928 = vst.msk [vmem:[#allocation4 + $0xf8] sm:$0xff] %vm393_vm2, %v892_v24  ;;  %v891_v32 = vadd.f32 %v832_v27, %v460_v21  ;;  %v16319_v34 = vpop.f32.mrf.mxu0  ;;  %16660 = vmatmul.mubr.msk.f32.gmra.mxu0 %vm503_vm1, %v2996_v9  ;;  %v3007_v21 = vld [vmem:[%s18481_s21 + $0x109] sm:$0xff] }
  0xf5   : > { %v16349_v35 = vpop.f32.mrf.mxu1  ;;  %16610 = vmatmul.mubr.msk.f32.gmra.mxu1 %vm503_vm1, %v2998_v25  ;;  %907 = vst.msk [vmem:[#allocation4 + $0x50] sm:$0xff] %vm393_vm2, %v871_v31  ;;  %v874_v38 = vadd.f32 %v16319_v34, %v443_v28  ;;  %16662 = vmatprep.mubr.msk.f32.mxu0 %vm503_vm1, %v2997_v14  ;;  %v448_v14 = vld [vmem:[#allocation4 + $0x90] sm:$0xff]  ;;  %v938_v24 = vld [vmem:[#allocation4 + $0x28] sm:$0xff] }
  0xf6   : > { %927 = vst.msk [vmem:[#allocation4 + $0xf0] sm:$0xff] %vm393_vm2, %v891_v32  ;;  %v894_v39 = vadd.f32 %v16349_v35, %v463_v29  ;;  %16612 = vmatprep.mubr.msk.f32.mxu1 %vm503_vm1, %v2999_v30  ;;  %v742_v41 = vpop.f32.mrf.mxu0  ;;  %v3008_v28 = vld [vmem:[%s18481_s21 + $0x111] sm:$0xff] }
  0xf7   : > { %v842_v42 = vpop.f32.mrf.mxu1  ;;  %910 = vst.msk [vmem:[#allocation4 + $0x68] sm:$0xff] %vm393_vm2, %v874_v38  ;;  %v873_v47 = vadd.f32 %v742_v41, %v442_v36 }
  0xf8   : > { %930 = vst.msk [vmem:[#allocation4 + $0x108] sm:$0xff] %vm393_vm2, %v894_v39  ;;  %v893_v48 = vadd.f32 %v842_v42, %v462_v37  ;;  %v16322_v49 = vpop.f32.mrf.mxu0  ;;  %16663 = vmatmul.mubr.msk.f32.gmra.mxu0 %vm503_vm1, %v2998_v25  ;;  %v940_v37 = vld [vmem:[#allocation4 + $0x38] sm:$0xff]  ;;  %v3010_v42 = vld [vmem:[%s18481_s21 + $0x121] sm:$0xff] }
  0xf9   : > { %v16352_v50 = vpop.f32.mrf.mxu1  ;;  %16613 = vmatmul.mubr.msk.f32.gmra.mxu1 %vm503_vm1, %v3000_v40  ;;  %909 = vst.msk [vmem:[#allocation4 + $0x60] sm:$0xff] %vm393_vm2, %v873_v47  ;;  %v876_v55 = vadd.f32 %v16322_v49, %v445_v44  ;;  %16665 = vmatprep.mubr.msk.f32.mxu0 %vm503_vm1, %v2999_v30  ;;  %v937_v30 = vld [vmem:[#allocation4 + $0x20] sm:$0xff] }
  0xfa   : > { %929 = vst.msk [vmem:[#allocation4 + $0x100] sm:$0xff] %vm393_vm2, %v893_v48  ;;  %v896_v57 = vadd.f32 %v16352_v50, %v465_v45  ;;  %16615 = vmatprep.mubr.msk.f32.mxu1 %vm503_vm1, %v3001_v46  ;;  %v752_v54 = vpop.f32.mrf.mxu0  ;;  %v939_v45 = vld [vmem:[#allocation4 + $0x30] sm:$0xff] }
  0xfb   : > { %v852_v58 = vpop.f32.mrf.mxu1  ;;  %912 = vst.msk [vmem:[#allocation4 + $0x78] sm:$0xff] %vm393_vm2, %v876_v55  ;;  %v875_v60 = vadd.f32 %v752_v54, %v444_v53  ;;  %v3011_v48 = vld [vmem:[%s18481_s21 + $0x129] sm:$0xff] }
  0xfc   : > { %932 = vst.msk [vmem:[#allocation4 + $0x118] sm:$0xff] %vm393_vm2, %v896_v57  ;;  %v895_v56 = vadd.f32 %v852_v58, %v464_v51  ;;  %v16325_v61 = vpop.f32.mrf.mxu0  ;;  %16666 = vmatmul.mubr.msk.f32.gmra.mxu0 %vm503_vm1, %v3000_v40  ;;  %v942_v51 = vld [vmem:[#allocation4 + $0x48] sm:$0xff]  ;;  %v3012_v58 = vld [vmem:[%s18481_s21 + $0x131] sm:$0xff] }
  0xfd   : > { %v16357_v63 = vpop.f32.mrf.mxu1  ;;  %16616 = vmatmul.mubr.msk.f32.gmra.mxu1 %vm503_vm1, %v3002_v43  ;;  %911 = vst.msk [vmem:[#allocation4 + $0x70] sm:$0xff] %vm393_vm2, %v875_v60  ;;  %v878_v1 = vadd.f32 %v16325_v61, %v447_v59  ;;  %16668 = vmatprep.mubr.msk.f32.mxu0 %vm503_vm1, %v3001_v46  ;;  %v3981_v61 = vld [vmem:[%s18481_s21 + $0x2a] sm:$0xff] }
  0xfe   : > { %931 = vst.msk [vmem:[#allocation4 + $0x110] sm:$0xff] %vm393_vm2, %v895_v56  ;;  %v1364_v2 = vadd.f32 %v16357_v63, %v934_v62  ;;  %16618 = vmatprep.mubr.msk.f32.mxu1 %vm503_vm1, %v3003_v52  ;;  %v762_v4 = vpop.f32.mrf.mxu0 }
  0xff   : > { %v1184_v6 = vpop.f32.mrf.mxu1  ;;  %914 = vst.msk [vmem:[#allocation4 + $0x88] sm:$0xff] %vm393_vm2, %v878_v1  ;;  %v877_v9 = vadd.f32 %v762_v4, %v446_v0  ;;  %v944_v1 = vld [vmem:[#allocation4 + $0x58] sm:$0xff] }
 0x100   : > { %1400 = vst.msk [vmem:[#allocation4 + $0x8] sm:$0xff] %vm393_vm2, %v1364_v2  ;;  %v1363_v10 = vadd.f32 %v1184_v6, %v933_v5  ;;  %v16328_v11 = vpop.f32.mrf.mxu0  ;;  %16669 = vmatmul.mubr.msk.f32.gmra.mxu0 %vm503_vm1, %v3002_v43  ;;  %v3982_v6 = vld [vmem:[%s18481_s21 + $0x32] sm:$0xff] }
 0x101   : > { %v16360_v13 = vpop.f32.mrf.mxu1  ;;  %16619 = vmatmul.mubr.msk.f32.gmra.mxu1 %vm503_vm1, %v3004_v3  ;;  %913 = vst.msk [vmem:[#allocation4 + $0x80] sm:$0xff] %vm393_vm2, %v877_v9  ;;  %v880_v15 = vadd.f32 %v16328_v11, %v449_v7  ;;  %16671 = vmatprep.mubr.msk.f32.mxu0 %vm503_vm1, %v3003_v52  ;;  %v941_v52 = vld [vmem:[#allocation4 + $0x40] sm:$0xff]  ;;  %v943_v9 = vld [vmem:[#allocation4 + $0x50] sm:$0xff] }
 0x102   : > { %1399 = vst.msk [vmem:[#allocation4] sm:$0xff] %vm393_vm2, %v1363_v10  ;;  %v1366_v16 = vadd.f32 %v16360_v13, %v936_v12  ;;  %16621 = vmatprep.mubr.msk.f32.mxu1 %vm503_vm1, %v3005_v8  ;;  %v772_v18 = vpop.f32.mrf.mxu0  ;;  %v3513_v7 = vld [vmem:[%s18481_s21 + $0x139] sm:$0xff] }
 0x103   : > { %v1194_v20 = vpop.f32.mrf.mxu1  ;;  %916 = vst.msk [vmem:[#allocation4 + $0x98] sm:$0xff] %vm393_vm2, %v880_v15  ;;  %v879_v22 = vadd.f32 %v772_v18, %v448_v14  ;;  %v3983_v12 = vld [vmem:[%s18481_s21 + $0x3a] sm:$0xff] }
 0x104   : > { %1402 = vst.msk [vmem:[#allocation4 + $0x18] sm:$0xff] %vm393_vm2, %v1366_v16  ;;  %v1365_v23 = vadd.f32 %v1194_v20, %v935_v19  ;;  %v16413_v26 = vpop.f32.mrf.mxu0  ;;  %16672 = vmatmul.mubr.msk.f32.gmra.mxu0 %vm503_vm1, %v3004_v3  ;;  %v946_v16 = vld [vmem:[#allocation4 + $0x68] sm:$0xff] }
 0x105   : > { %v16363_v25 = vpop.f32.mrf.mxu1  ;;  %16622 = vmatmul.mubr.msk.f32.gmra.mxu1 %vm503_vm1, %v3006_v17  ;;  %915 = vst.msk [vmem:[#allocation4 + $0x90] sm:$0xff] %vm393_vm2, %v879_v22  ;;  %16674 = vmatprep.mubr.msk.f32.mxu0 %vm503_vm1, %v3005_v8  ;;  %v3984_v22 = vld [vmem:[%s18481_s21 + $0x42] sm:$0xff] }
 0x106   : > { %1401 = vst.msk [vmem:[#allocation4 + $0x10] sm:$0xff] %vm393_vm2, %v1365_v23  ;;  %v1368_v27 = vadd.f32 %v16363_v25, %v938_v24  ;;  %16624 = vmatprep.mubr.msk.f32.mxu1 %vm503_vm1, %v3007_v21  ;;  %v1686_v32 = vpop.f32.mrf.mxu0  ;;  %v3985_v23 = vld [vmem:[%s18481_s21 + $0x4a] sm:$0xff]  ;;  %v945_v25 = vld [vmem:[#allocation4 + $0x60] sm:$0xff] }
 0x107   : > { %v1436_v29 = vld [vmem:[#allocation4 + $0x8] sm:$0xff]  ;;  %v1204_v31 = vpop.f32.mrf.mxu1 }
 0x108   : > { %1404 = vst.msk [vmem:[#allocation4 + $0x28] sm:$0xff] %vm393_vm2, %v1368_v27  ;;  %v1866_v34 = vadd.f32 %v16413_v26, %v1436_v29  ;;  %v1367_v35 = vadd.f32 %v1204_v31, %v937_v30  ;;  %v16416_v39 = vpop.f32.mrf.mxu0  ;;  %16675 = vmatmul.mubr.msk.f32.gmra.mxu0 %vm503_vm1, %v3006_v17 }
 0x109   : > { %v1435_v36 = vld [vmem:[#allocation4] sm:$0xff]  ;;  %v16366_v38 = vpop.f32.mrf.mxu1  ;;  %16625 = vmatmul.mubr.msk.f32.gmra.mxu1 %vm503_vm1, %v3008_v28  ;;  %16677 = vmatprep.mubr.msk.f32.mxu0 %vm503_vm1, %v3007_v21 }
 0x10a   : > { %1902 = vst.msk [vmem:[#allocation4 + $0x8] sm:$0xff] %vm393_vm2, %v1866_v34  ;;  %1403 = vst.msk [vmem:[#allocation4 + $0x20] sm:$0xff] %vm393_vm2, %v1367_v35  ;;  %v1865_v40 = vadd.f32 %v1686_v32, %v1435_v36  ;;  %v1370_v41 = vadd.f32 %v16366_v38, %v940_v37  ;;  %16627 = vmatprep.mubr.msk.f32.mxu1 %vm503_vm1, %v3009_v33  ;;  %v1696_v47 = vpop.f32.mrf.mxu0  ;;  %v3514_v21 = vld [vmem:[%s18481_s21 + $0x141] sm:$0xff]  ;;  %v948_v32 = vld [vmem:[#allocation4 + $0x78] sm:$0xff] }
 0x10b   : > { %v1438_v44 = vld [vmem:[#allocation4 + $0x18] sm:$0xff]  ;;  %v1214_v46 = vpop.f32.mrf.mxu1 }
 0x10c   : > { %1901 = vst.msk [vmem:[#allocation4] sm:$0xff] %vm393_vm2, %v1865_v40  ;;  %1406 = vst.msk [vmem:[#allocation4 + $0x38] sm:$0xff] %vm393_vm2, %v1370_v41  ;;  %v1868_v49 = vadd.f32 %v16416_v39, %v1438_v44  ;;  %v1369_v50 = vadd.f32 %v1214_v46, %v939_v45  ;;  %v16419_v57 = vpop.f32.mrf.mxu0  ;;  %16678 = vmatmul.mubr.msk.f32.gmra.mxu0 %vm503_vm1, %v3008_v28  ;;  %v4483_v28 = vld [vmem:[%s18481_s21 + $0x2b] sm:$0xff]  ;;  %v4484_v38 = vld [vmem:[%s18481_s21 + $0x33] sm:$0xff] }
 0x10d   : > { %v1437_v53 = vld [vmem:[#allocation4 + $0x10] sm:$0xff]  ;;  %v16369_v55 = vpop.f32.mrf.mxu1  ;;  %16628 = vmatmul.mubr.msk.f32.gmra.mxu1 %vm503_vm1, %v3010_v42  ;;  %16680 = vmatprep.mubr.msk.f32.mxu0 %vm503_vm1, %v3009_v33  ;;  %v3987_v39 = vld [vmem:[%s18481_s21 + $0x5a] sm:$0xff] }
 0x10e   : > { %1904 = vst.msk [vmem:[#allocation4 + $0x18] sm:$0xff] %vm393_vm2, %v1868_v49  ;;  %1405 = vst.msk [vmem:[#allocation4 + $0x30] sm:$0xff] %vm393_vm2, %v1369_v50  ;;  %v1867_v43 = vadd.f32 %v1696_v47, %v1437_v53  ;;  %v1372_v54 = vadd.f32 %v16369_v55, %v942_v51  ;;  %16630 = vmatprep.mubr.msk.f32.mxu1 %vm503_vm1, %v3011_v48  ;;  %v1706_v56 = vpop.f32.mrf.mxu0  ;;  %v3986_v37 = vld [vmem:[%s18481_s21 + $0x52] sm:$0xff]  ;;  %v4485_v45 = vld [vmem:[%s18481_s21 + $0x3b] sm:$0xff] }
 0x10f   : > { %v1440_v59 = vld [vmem:[#allocation4 + $0x28] sm:$0xff]  ;;  %v1224_v60 = vpop.f32.mrf.mxu1  ;;  %v947_v41 = vld [vmem:[#allocation4 + $0x70] sm:$0xff] }
 0x110   : > { %1903 = vst.msk [vmem:[#allocation4 + $0x10] sm:$0xff] %vm393_vm2, %v1867_v43  ;;  %1408 = vst.msk [vmem:[#allocation4 + $0x48] sm:$0xff] %vm393_vm2, %v1372_v54  ;;  %v1870_v62 = vadd.f32 %v16419_v57, %v1440_v59  ;;  %v1371_v63 = vadd.f32 %v1224_v60, %v941_v52  ;;  %v16422_v3 = vpop.f32.mrf.mxu0  ;;  %16681 = vmatmul.mubr.msk.f32.gmra.mxu0 %vm503_vm1, %v3010_v42  ;;  %v950_v49 = vld [vmem:[#allocation4 + $0x88] sm:$0xff]  ;;  %v949_v59 = vld [vmem:[#allocation4 + $0x80] sm:$0xff] }
 0x111   : > { %v1439_v0 = vld [vmem:[#allocation4 + $0x20] sm:$0xff]  ;;  %v16372_v2 = vpop.f32.mrf.mxu1  ;;  %16631 = vmatmul.mubr.msk.f32.gmra.mxu1 %vm503_vm1, %v3012_v58  ;;  %16683 = vmatprep.mubr.msk.f32.mxu0 %vm503_vm1, %v3011_v48  ;;  %v3989_v54 = vld [vmem:[%s18481_s21 + $0x6a] sm:$0xff] }
 0x112   : > { %1906 = vst.msk [vmem:[#allocation4 + $0x28] sm:$0xff] %vm393_vm2, %v1870_v62  ;;  %1407 = vst.msk [vmem:[#allocation4 + $0x40] sm:$0xff] %vm393_vm2, %v1371_v63  ;;  %v1869_v4 = vadd.f32 %v1706_v56, %v1439_v0  ;;  %v1374_v5 = vadd.f32 %v16372_v2, %v944_v1  ;;  %16691 = vmatprep.mubr.msk.f32.mxu1 %vm503_vm1, %v3981_v61  ;;  %v1716_v11 = vpop.f32.mrf.mxu0  ;;  %v3988_v57 = vld [vmem:[%s18481_s21 + $0x62] sm:$0xff]  ;;  %v4487_v56 = vld [vmem:[%s18481_s21 + $0x4b] sm:$0xff] }
 0x113   : > { %v1442_v8 = vld [vmem:[#allocation4 + $0x38] sm:$0xff]  ;;  %v1234_v10 = vpop.f32.mrf.mxu1  ;;  %v4486_v43 = vld [vmem:[%s18481_s21 + $0x43] sm:$0xff] }
 0x114   : > { %1905 = vst.msk [vmem:[#allocation4 + $0x20] sm:$0xff] %vm393_vm2, %v1869_v4  ;;  %1410 = vst.msk [vmem:[#allocation4 + $0x58] sm:$0xff] %vm393_vm2, %v1374_v5  ;;  %v1872_v13 = vadd.f32 %v16422_v3, %v1442_v8  ;;  %v1373_v14 = vadd.f32 %v1234_v10, %v943_v9  ;;  %v16425_v18 = vpop.f32.mrf.mxu0  ;;  %16684 = vmatmul.mubr.msk.f32.gmra.mxu0 %vm503_vm1, %v3012_v58  ;;  %v952_v0 = vld [vmem:[#allocation4 + $0x98] sm:$0xff]  ;;  %v951_v9 = vld [vmem:[#allocation4 + $0x90] sm:$0xff] }
 0x115   : > { %v1441_v15 = vld [vmem:[#allocation4 + $0x30] sm:$0xff]  ;;  %v16375_v17 = vpop.f32.mrf.mxu1  ;;  %16692 = vmatmul.mubr.msk.f32.vlgmr.msra.gmra.mxu1 %vm503_vm1, %v3982_v6  ;;  %16686 = vmatprep.mubr.msk.f32.mxu0 %vm503_vm1, %v3513_v7  ;;  %v3991_v7 = vld [vmem:[%s18481_s21 + $0x7a] sm:$0xff] }
 0x116   : > { %1908 = vst.msk [vmem:[#allocation4 + $0x38] sm:$0xff] %vm393_vm2, %v1872_v13  ;;  %1409 = vst.msk [vmem:[#allocation4 + $0x50] sm:$0xff] %vm393_vm2, %v1373_v14  ;;  %v1871_v19 = vadd.f32 %v1716_v11, %v1441_v15  ;;  %v1376_v20 = vadd.f32 %v16375_v17, %v946_v16  ;;  %16694 = vmatprep.mubr.msk.f32.mxu1 %vm503_vm1, %v3983_v12  ;;  %v1726_v27 = vpop.f32.mrf.mxu0  ;;  %v3990_v5 = vld [vmem:[%s18481_s21 + $0x72] sm:$0xff]  ;;  %v4489_v12 = vld [vmem:[%s18481_s21 + $0x5b] sm:$0xff] }
 0x117   : > { %v1444_v24 = vld [vmem:[#allocation4 + $0x48] sm:$0xff]  ;;  %v1244_v26 = vpop.f32.mrf.mxu1  ;;  %v4488_v6 = vld [vmem:[%s18481_s21 + $0x53] sm:$0xff] }
 0x118   : > { %1907 = vst.msk [vmem:[#allocation4 + $0x30] sm:$0xff] %vm393_vm2, %v1871_v19  ;;  %1412 = vst.msk [vmem:[#allocation4 + $0x68] sm:$0xff] %vm393_vm2, %v1376_v20  ;;  %v1874_v29 = vadd.f32 %v16425_v18, %v1444_v24  ;;  %v1375_v30 = vadd.f32 %v1244_v26, %v945_v25  ;;  %v16428_v34 = vpop.f32.mrf.mxu0  ;;  %16687 = vmatmul.mubr.msk.f32.gmra.mxu0 %vm503_vm1, %v3514_v21  ;;  %v954_v16 = vld [vmem:[#allocation4 + $0xa8] sm:$0xff]  ;;  %v953_v25 = vld [vmem:[#allocation4 + $0xa0] sm:$0xff] }
 0x119   : > { %v1443_v31 = vld [vmem:[#allocation4 + $0x40] sm:$0xff]  ;;  %v16378_v33 = vpop.f32.mrf.mxu1  ;;  %16695 = vmatmul.mubr.msk.f32.gmra.mxu1 %vm503_vm1, %v3984_v22  ;;  %16747 = vmatprep.mubr.msk.f32.mxu0 %vm503_vm1, %v4483_v28  ;;  %v4491_v28 = vld [vmem:[%s18481_s21 + $0x6b] sm:$0xff] }
 0x11a   : > { %1910 = vst.msk [vmem:[#allocation4 + $0x48] sm:$0xff] %vm393_vm2, %v1874_v29  ;;  %1411 = vst.msk [vmem:[#allocation4 + $0x60] sm:$0xff] %vm393_vm2, %v1375_v30  ;;  %v1873_v35 = vadd.f32 %v1726_v27, %v1443_v31  ;;  %v1378_v36 = vadd.f32 %v16378_v33, %v948_v32  ;;  %16697 = vmatprep.mubr.msk.f32.mxu1 %vm503_vm1, %v3985_v23  ;;  %v1736_v44 = vpop.f32.mrf.mxu0  ;;  %v3992_v21 = vld [vmem:[%s18481_s21 + $0x82] sm:$0xff]  ;;  %v3993_v23 = vld [vmem:[%s18481_s21 + $0x8a] sm:$0xff] }
 0x11b   : > { %v1446_v40 = vld [vmem:[#allocation4 + $0x58] sm:$0xff]  ;;  %v1254_v42 = vpop.f32.mrf.mxu1  ;;  %v4490_v22 = vld [vmem:[%s18481_s21 + $0x63] sm:$0xff] }
 0x11c   : > { %1909 = vst.msk [vmem:[#allocation4 + $0x40] sm:$0xff] %vm393_vm2, %v1873_v35  ;;  %1414 = vst.msk [vmem:[#allocation4 + $0x78] sm:$0xff] %vm393_vm2, %v1378_v36  ;;  %v1876_v46 = vadd.f32 %v16428_v34, %v1446_v40  ;;  %v1377_v47 = vadd.f32 %v1254_v42, %v947_v41  ;;  %v16431_v53 = vpop.f32.mrf.mxu0  ;;  %16748 = vmatmul.mubr.msk.f32.vlgmr.msra.gmra.mxu0 %vm503_vm1, %v4484_v38  ;;  %v956_v32 = vld [vmem:[#allocation4 + $0xb8] sm:$0xff]  ;;  %v955_v41 = vld [vmem:[#allocation4 + $0xb0] sm:$0xff] }
 0x11d   : > { %v1445_v48 = vld [vmem:[#allocation4 + $0x50] sm:$0xff]  ;;  %v16381_v50 = vpop.f32.mrf.mxu1  ;;  %16698 = vmatmul.mubr.msk.f32.gmra.mxu1 %vm503_vm1, %v3986_v37  ;;  %16750 = vmatprep.mubr.msk.f32.mxu0 %vm503_vm1, %v4485_v45  ;;  %v4493_v45 = vld [vmem:[%s18481_s21 + $0x7b] sm:$0xff] }
 0x11e   : > { %1912 = vst.msk [vmem:[#allocation4 + $0x58] sm:$0xff] %vm393_vm2, %v1876_v46  ;;  %1413 = vst.msk [vmem:[#allocation4 + $0x70] sm:$0xff] %vm393_vm2, %v1377_v47  ;;  %v1875_v51 = vadd.f32 %v1736_v44, %v1445_v48  ;;  %v1380_v55 = vadd.f32 %v16381_v50, %v950_v49  ;;  %16700 = vmatprep.mubr.msk.f32.mxu1 %vm503_vm1, %v3987_v39  ;;  %v1746_v60 = vpop.f32.mrf.mxu0  ;;  %v3994_v37 = vld [vmem:[%s18481_s21 + $0x92] sm:$0xff]  ;;  %v3995_v39 = vld [vmem:[%s18481_s21 + $0x9a] sm:$0xff] }
 0x11f   : > { %v1448_v58 = vld [vmem:[#allocation4 + $0x68] sm:$0xff]  ;;  %v1264_v52 = vpop.f32.mrf.mxu1  ;;  %v4492_v38 = vld [vmem:[%s18481_s21 + $0x73] sm:$0xff] }
 0x120   : > { %1911 = vst.msk [vmem:[#allocation4 + $0x50] sm:$0xff] %vm393_vm2, %v1875_v51  ;;  %1416 = vst.msk [vmem:[#allocation4 + $0x88] sm:$0xff] %vm393_vm2, %v1380_v55  ;;  %v1878_v61 = vadd.f32 %v16431_v53, %v1448_v58  ;;  %v1379_v62 = vadd.f32 %v1264_v52, %v949_v59  ;;  %v16434_v2 = vpop.f32.mrf.mxu0  ;;  %16751 = vmatmul.mubr.msk.f32.gmra.mxu0 %vm503_vm1, %v4486_v43  ;;  %v958_v49 = vld [vmem:[#allocation4 + $0xc8] sm:$0xff]  ;;  %v957_v59 = vld [vmem:[#allocation4 + $0xc0] sm:$0xff] }
 0x121   : > { %v1447_v63 = vld [vmem:[#allocation4 + $0x60] sm:$0xff]  ;;  %v16384_v1 = vpop.f32.mrf.mxu1  ;;  %16701 = vmatmul.mubr.msk.f32.gmra.mxu1 %vm503_vm1, %v3988_v57  ;;  %16753 = vmatprep.mubr.msk.f32.mxu0 %vm503_vm1, %v4487_v56  ;;  %v4495_v56 = vld [vmem:[%s18481_s21 + $0x8b] sm:$0xff] }
 0x122   : > { %1914 = vst.msk [vmem:[#allocation4 + $0x68] sm:$0xff] %vm393_vm2, %v1878_v61  ;;  %1415 = vst.msk [vmem:[#allocation4 + $0x80] sm:$0xff] %vm393_vm2, %v1379_v62  ;;  %v1877_v3 = vadd.f32 %v1746_v60, %v1447_v63  ;;  %v1382_v4 = vadd.f32 %v16384_v1, %v952_v0  ;;  %16703 = vmatprep.mubr.msk.f32.mxu1 %vm503_vm1, %v3989_v54  ;;  %v1756_v11 = vpop.f32.mrf.mxu0  ;;  %v3996_v57 = vld [vmem:[%s18481_s21 + $0xa2] sm:$0xff]  ;;  %v3997_v54 = vld [vmem:[%s18481_s21 + $0xaa] sm:$0xff] }
 0x123   : > { %v1450_v8 = vld [vmem:[#allocation4 + $0x78] sm:$0xff]  ;;  %v1274_v10 = vpop.f32.mrf.mxu1  ;;  %v4494_v43 = vld [vmem:[%s18481_s21 + $0x83] sm:$0xff] }
 0x124   : > { %1913 = vst.msk [vmem:[#allocation4 + $0x60] sm:$0xff] %vm393_vm2, %v1877_v3  ;;  %1418 = vst.msk [vmem:[#allocation4 + $0x98] sm:$0xff] %vm393_vm2, %v1382_v4  ;;  %v1880_v13 = vadd.f32 %v16434_v2, %v1450_v8  ;;  %v1381_v14 = vadd.f32 %v1274_v10, %v951_v9  ;;  %v16437_v18 = vpop.f32.mrf.mxu0  ;;  %16754 = vmatmul.mubr.msk.f32.gmra.mxu0 %vm503_vm1, %v4488_v6  ;;  %v960_v0 = vld [vmem:[#allocation4 + $0xd8] sm:$0xff]  ;;  %v959_v10 = vld [vmem:[#allocation4 + $0xd0] sm:$0xff] }
 0x125   : > { %v1449_v15 = vld [vmem:[#allocation4 + $0x70] sm:$0xff]  ;;  %v16387_v17 = vpop.f32.mrf.mxu1  ;;  %16704 = vmatmul.mubr.msk.f32.gmra.mxu1 %vm503_vm1, %v3990_v5  ;;  %16756 = vmatprep.mubr.msk.f32.mxu0 %vm503_vm1, %v4489_v12  ;;  %v5473_v8 = vld [vmem:[%s22740_s4 + $0x38] sm:$0xff] }
 0x126   : > { %1916 = vst.msk [vmem:[#allocation4 + $0x78] sm:$0xff] %vm393_vm2, %v1880_v13  ;;  %1417 = vst.msk [vmem:[#allocation4 + $0x90] sm:$0xff] %vm393_vm2, %v1381_v14  ;;  %v1879_v19 = vadd.f32 %v1756_v11, %v1449_v15  ;;  %v1384_v20 = vadd.f32 %v16387_v17, %v954_v16  ;;  %16706 = vmatprep.mubr.msk.f32.mxu1 %vm503_vm1, %v3991_v7  ;;  %v1766_v27 = vpop.f32.mrf.mxu0  ;;  %v3998_v3 = vld [vmem:[%s18481_s21 + $0xb2] sm:$0xff]  ;;  %v3999_v7 = vld [vmem:[%s18481_s21 + $0xba] sm:$0xff]  ;;  %16801 = vmatprep.subr.mxu1 %v5473_v8 }
 0x127   : > { %v1452_v24 = vld [vmem:[#allocation4 + $0x88] sm:$0xff]  ;;  %v1284_v26 = vpop.f32.mrf.mxu1  ;;  %v4496_v6 = vld [vmem:[%s18481_s21 + $0x93] sm:$0xff]  ;;  %v4497_v13 = vld [vmem:[%s18481_s21 + $0x9b] sm:$0xff]  ;;  %16802 = vmatpush3.msra.mxu1 %v5473_v8 }
 0x128   : > { %1915 = vst.msk [vmem:[#allocation4 + $0x70] sm:$0xff] %vm393_vm2, %v1879_v19  ;;  %1420 = vst.msk [vmem:[#allocation4 + $0xa8] sm:$0xff] %vm393_vm2, %v1384_v20  ;;  %v1882_v29 = vadd.f32 %v16437_v18, %v1452_v24  ;;  %v1383_v30 = vadd.f32 %v1284_v26, %v953_v25  ;;  %v16440_v34 = vpop.f32.mrf.mxu0  ;;  %16757 = vmatmul.mubr.msk.f32.gmra.mxu0 %vm503_vm1, %v4490_v22  ;;  %v962_v17 = vld [vmem:[#allocation4 + $0xe8] sm:$0xff]  ;;  %v961_v26 = vld [vmem:[#allocation4 + $0xe0] sm:$0xff] }
 0x129   : > { %v1451_v31 = vld [vmem:[#allocation4 + $0x80] sm:$0xff]  ;;  %v16390_v33 = vpop.f32.mrf.mxu1  ;;  %16707 = vmatmul.mubr.msk.f32.gmra.mxu1 %vm503_vm1, %v3992_v21  ;;  %16759 = vmatprep.mubr.msk.f32.mxu0 %vm503_vm1, %v4491_v28  ;;  %v4001_v24 = vld [vmem:[%s18481_s21 + $0xca] sm:$0xff]  ;;  %v4504_v8 = vld [vmem:[%s18481_s21 + $0xd3] sm:$0xff] }
 0x12a   : > { %1918 = vst.msk [vmem:[#allocation4 + $0x88] sm:$0xff] %vm393_vm2, %v1882_v29  ;;  %1419 = vst.msk [vmem:[#allocation4 + $0xa0] sm:$0xff] %vm393_vm2, %v1383_v30  ;;  %v1881_v35 = vadd.f32 %v1766_v27, %v1451_v31  ;;  %v1386_v36 = vadd.f32 %v16390_v33, %v956_v32  ;;  %16709 = vmatprep.mubr.msk.f32.mxu1 %vm503_vm1, %v3993_v23  ;;  %v1776_v44 = vpop.f32.mrf.mxu0  ;;  %v4000_v22 = vld [vmem:[%s18481_s21 + $0xc2] sm:$0xff]  ;;  %v4499_v29 = vld [vmem:[%s18481_s21 + $0xab] sm:$0xff] }
 0x12b   : > { %v1454_v40 = vld [vmem:[#allocation4 + $0x98] sm:$0xff]  ;;  %v1294_v42 = vpop.f32.mrf.mxu1  ;;  %v4498_v23 = vld [vmem:[%s18481_s21 + $0xa3] sm:$0xff] }
 0x12c   : > { %1917 = vst.msk [vmem:[#allocation4 + $0x80] sm:$0xff] %vm393_vm2, %v1881_v35  ;;  %1422 = vst.msk [vmem:[#allocation4 + $0xb8] sm:$0xff] %vm393_vm2, %v1386_v36  ;;  %v1884_v46 = vadd.f32 %v16440_v34, %v1454_v40  ;;  %v1385_v47 = vadd.f32 %v1294_v42, %v955_v41  ;;  %v16443_v53 = vpop.f32.mrf.mxu0  ;;  %16760 = vmatmul.mubr.msk.f32.gmra.mxu0 %vm503_vm1, %v4492_v38  ;;  %v964_v33 = vld [vmem:[#allocation4 + $0xf8] sm:$0xff]  ;;  %v963_v42 = vld [vmem:[#allocation4 + $0xf0] sm:$0xff] }
 0x12d   : > { %v1453_v48 = vld [vmem:[#allocation4 + $0x90] sm:$0xff]  ;;  %v16393_v50 = vpop.f32.mrf.mxu1  ;;  %16710 = vmatmul.mubr.msk.f32.gmra.mxu1 %vm503_vm1, %v3994_v37  ;;  %16762 = vmatprep.mubr.msk.f32.mxu0 %vm503_vm1, %v4493_v45  ;;  %v4003_v40 = vld [vmem:[%s18481_s21 + $0xda] sm:$0xff] }
 0x12e   : > { %1920 = vst.msk [vmem:[#allocation4 + $0x98] sm:$0xff] %vm393_vm2, %v1884_v46  ;;  %1421 = vst.msk [vmem:[#allocation4 + $0xb0] sm:$0xff] %vm393_vm2, %v1385_v47  ;;  %v1883_v51 = vadd.f32 %v1776_v44, %v1453_v48  ;;  %v1388_v55 = vadd.f32 %v16393_v50, %v958_v49  ;;  %16712 = vmatprep.mubr.msk.f32.mxu1 %vm503_vm1, %v3995_v39  ;;  %v1786_v60 = vpop.f32.mrf.mxu0  ;;  %v4002_v38 = vld [vmem:[%s18481_s21 + $0xd2] sm:$0xff]  ;;  %v4501_v46 = vld [vmem:[%s18481_s21 + $0xbb] sm:$0xff] }
 0x12f   : > { %v1456_v58 = vld [vmem:[#allocation4 + $0xa8] sm:$0xff]  ;;  %v1304_v52 = vpop.f32.mrf.mxu1  ;;  %v4500_v39 = vld [vmem:[%s18481_s21 + $0xb3] sm:$0xff] }
 0x130   : > { %1919 = vst.msk [vmem:[#allocation4 + $0x90] sm:$0xff] %vm393_vm2, %v1883_v51  ;;  %1424 = vst.msk [vmem:[#allocation4 + $0xc8] sm:$0xff] %vm393_vm2, %v1388_v55  ;;  %v1886_v61 = vadd.f32 %v16443_v53, %v1456_v58  ;;  %v1387_v62 = vadd.f32 %v1304_v52, %v957_v59  ;;  %v16446_v2 = vpop.f32.mrf.mxu0  ;;  %16763 = vmatmul.mubr.msk.f32.gmra.mxu0 %vm503_vm1, %v4494_v43  ;;  %v5472_v49 = vld [vmem:[%s22740_s4 + $0x30] sm:$0xff]  ;;  %v966_v53 = vld [vmem:[#allocation4 + $0x108] sm:$0xff] }
 0x131   : > { %v1455_v63 = vld [vmem:[#allocation4 + $0xa0] sm:$0xff]  ;;  %v16396_v1 = vpop.f32.mrf.mxu1  ;;  %16713 = vmatmul.mubr.msk.f32.gmra.mxu1 %vm503_vm1, %v3996_v57  ;;  %16765 = vmatprep.mubr.msk.f32.mxu0 %vm503_vm1, %v4495_v56  ;;  %v4005_v59 = vld [vmem:[%s18481_s21 + $0xea] sm:$0xff] }
 0x132   : > { %1922 = vst.msk [vmem:[#allocation4 + $0xa8] sm:$0xff] %vm393_vm2, %v1886_v61  ;;  %1423 = vst.msk [vmem:[#allocation4 + $0xc0] sm:$0xff] %vm393_vm2, %v1387_v62  ;;  %v1885_v4 = vadd.f32 %v1786_v60, %v1455_v63  ;;  %v1390_v5 = vadd.f32 %v16396_v1, %v960_v0  ;;  %16715 = vmatprep.mubr.msk.f32.mxu1 %vm503_vm1, %v3997_v54  ;;  %v1796_v12 = vpop.f32.mrf.mxu0  ;;  %v4004_v54 = vld [vmem:[%s18481_s21 + $0xe2] sm:$0xff]  ;;  %v4503_v62 = vld [vmem:[%s18481_s21 + $0xcb] sm:$0xff]  ;;  %16803 = vmatprep.subr.mxu1 %v5472_v49 }
 0x133   : > { %v1458_v9 = vld [vmem:[#allocation4 + $0xb8] sm:$0xff]  ;;  %v1314_v11 = vpop.f32.mrf.mxu1  ;;  %v4502_v58 = vld [vmem:[%s18481_s21 + $0xc3] sm:$0xff]  ;;  %16804 = vmatpush3.msra.mxu1 %v5472_v49 }
 0x134   : > { %1921 = vst.msk [vmem:[#allocation4 + $0xa0] sm:$0xff] %vm393_vm2, %v1885_v4  ;;  %1426 = vst.msk [vmem:[#allocation4 + $0xd8] sm:$0xff] %vm393_vm2, %v1390_v5  ;;  %v1888_v14 = vadd.f32 %v16446_v2, %v1458_v9  ;;  %v1389_v15 = vadd.f32 %v1314_v11, %v959_v10  ;;  %v16449_v19 = vpop.f32.mrf.mxu0  ;;  %16766 = vmatmul.mubr.msk.f32.gmra.mxu0 %vm503_vm1, %v4496_v6  ;;  %v965_v60 = vld [vmem:[#allocation4 + $0x100] sm:$0xff]  ;;  %v968_v2 = vld [vmem:[#allocation4 + $0x118] sm:$0xff] }
 0x135   : > { %v1457_v16 = vld [vmem:[#allocation4 + $0xb0] sm:$0xff]  ;;  %v16399_v18 = vpop.f32.mrf.mxu1  ;;  %16716 = vmatmul.mubr.msk.f32.gmra.mxu1 %vm503_vm1, %v3998_v3  ;;  %16768 = vmatprep.mubr.msk.f32.mxu0 %vm503_vm1, %v4497_v13  ;;  %v4007_v9 = vld [vmem:[%s18481_s21 + $0xfa] sm:$0xff] }
 0x136   : > { %1924 = vst.msk [vmem:[#allocation4 + $0xb8] sm:$0xff] %vm393_vm2, %v1888_v14  ;;  %1425 = vst.msk [vmem:[#allocation4 + $0xd0] sm:$0xff] %vm393_vm2, %v1389_v15  ;;  %v1887_v20 = vadd.f32 %v1796_v12, %v1457_v16  ;;  %v1392_v21 = vadd.f32 %v16399_v18, %v962_v17  ;;  %16718 = vmatprep.mubr.msk.f32.mxu1 %vm503_vm1, %v3999_v7  ;;  %v1806_v28 = vpop.f32.mrf.mxu0  ;;  %v4006_v7 = vld [vmem:[%s18481_s21 + $0xf2] sm:$0xff]  ;;  %v4505_v14 = vld [vmem:[%s18481_s21 + $0xdb] sm:$0xff] }
 0x137   : > { %v1460_v25 = vld [vmem:[#allocation4 + $0xc8] sm:$0xff]  ;;  %v1324_v27 = vpop.f32.mrf.mxu1  ;;  %v967_v11 = vld [vmem:[#allocation4 + $0x110] sm:$0xff] }
 0x138   : > { %1923 = vst.msk [vmem:[#allocation4 + $0xb0] sm:$0xff] %vm393_vm2, %v1887_v20  ;;  %1428 = vst.msk [vmem:[#allocation4 + $0xe8] sm:$0xff] %vm393_vm2, %v1392_v21  ;;  %v1890_v30 = vadd.f32 %v16449_v19, %v1460_v25  ;;  %v1391_v31 = vadd.f32 %v1324_v27, %v961_v26  ;;  %v16452_v35 = vpop.f32.mrf.mxu0  ;;  %16769 = vmatmul.mubr.msk.f32.gmra.mxu0 %vm503_vm1, %v4498_v23  ;;  %v5471_v17 = vld [vmem:[%s22740_s4 + $0x28] sm:$0xff] }
 0x139   : > { %v1459_v32 = vld [vmem:[#allocation4 + $0xc0] sm:$0xff]  ;;  %v16402_v34 = vpop.f32.mrf.mxu1  ;;  %16719 = vmatmul.mubr.msk.f32.gmra.mxu1 %vm503_vm1, %v4000_v22  ;;  %16771 = vmatprep.mubr.msk.f32.mxu0 %vm503_vm1, %v4499_v29  ;;  %v1938_v20 = vld [vmem:[#allocation4 + $0x8] sm:$0xff] }
 0x13a   : > { %1926 = vst.msk [vmem:[#allocation4 + $0xc8] sm:$0xff] %vm393_vm2, %v1890_v30  ;;  %1427 = vst.msk [vmem:[#allocation4 + $0xe0] sm:$0xff] %vm393_vm2, %v1391_v31  ;;  %v1889_v36 = vadd.f32 %v1806_v28, %v1459_v32  ;;  %v1394_v37 = vadd.f32 %v16402_v34, %v964_v33  ;;  %16721 = vmatprep.mubr.msk.f32.mxu1 %vm503_vm1, %v4001_v24  ;;  %v1816_v45 = vpop.f32.mrf.mxu0  ;;  %v4008_v24 = vld [vmem:[%s18481_s21 + $0x102] sm:$0xff]  ;;  %v4009_v26 = vld [vmem:[%s18481_s21 + $0x10a] sm:$0xff]  ;;  %16805 = vmatprep.subr.mxu1 %v5471_v17 }
 0x13b   : > { %v1462_v41 = vld [vmem:[#allocation4 + $0xd8] sm:$0xff]  ;;  %v1334_v44 = vpop.f32.mrf.mxu1  ;;  %v4506_v25 = vld [vmem:[%s18481_s21 + $0xe3] sm:$0xff]  ;;  %v4507_v31 = vld [vmem:[%s18481_s21 + $0xeb] sm:$0xff]  ;;  %16806 = vmatpush3.msra.mxu1 %v5471_v17 }
 0x13c   : > { %1925 = vst.msk [vmem:[#allocation4 + $0xc0] sm:$0xff] %vm393_vm2, %v1889_v36  ;;  %1430 = vst.msk [vmem:[#allocation4 + $0xf8] sm:$0xff] %vm393_vm2, %v1394_v37  ;;  %v1892_v47 = vadd.f32 %v16452_v35, %v1462_v41  ;;  %v1393_v48 = vadd.f32 %v1334_v44, %v963_v42  ;;  %v16455_v55 = vpop.f32.mrf.mxu0  ;;  %16772 = vmatmul.mubr.msk.f32.gmra.mxu0 %vm503_vm1, %v4500_v39  ;;  %v1937_v29 = vld [vmem:[#allocation4] sm:$0xff]  ;;  %v1940_v36 = vld [vmem:[#allocation4 + $0x18] sm:$0xff] }
 0x13d   : > { %v1461_v50 = vld [vmem:[#allocation4 + $0xd0] sm:$0xff]  ;;  %v16405_v51 = vpop.f32.mrf.mxu1  ;;  %16722 = vmatmul.mubr.msk.f32.gmra.mxu1 %vm503_vm1, %v4002_v38  ;;  %16774 = vmatprep.mubr.msk.f32.mxu0 %vm503_vm1, %v4501_v46  ;;  %v4011_v42 = vld [vmem:[%s18481_s21 + $0x11a] sm:$0xff] }
 0x13e   : > { %1928 = vst.msk [vmem:[#allocation4 + $0xd8] sm:$0xff] %vm393_vm2, %v1892_v47  ;;  %1429 = vst.msk [vmem:[#allocation4 + $0xf0] sm:$0xff] %vm393_vm2, %v1393_v48  ;;  %v1891_v57 = vadd.f32 %v1816_v45, %v1461_v50  ;;  %v1396_v43 = vadd.f32 %v16405_v51, %v966_v53  ;;  %16724 = vmatprep.mubr.msk.f32.mxu1 %vm503_vm1, %v4003_v40  ;;  %v1826_v61 = vpop.f32.mrf.mxu0  ;;  %v4010_v40 = vld [vmem:[%s18481_s21 + $0x112] sm:$0xff]  ;;  %v4509_v48 = vld [vmem:[%s18481_s21 + $0xfb] sm:$0xff] }
 0x13f   : > { %v1464_v52 = vld [vmem:[#allocation4 + $0xe8] sm:$0xff]  ;;  %v1344_v56 = vpop.f32.mrf.mxu1  ;;  %v4508_v41 = vld [vmem:[%s18481_s21 + $0xf3] sm:$0xff] }
 0x140   : > { %1927 = vst.msk [vmem:[#allocation4 + $0xd0] sm:$0xff] %vm393_vm2, %v1891_v57  ;;  %1432 = vst.msk [vmem:[#allocation4 + $0x108] sm:$0xff] %vm393_vm2, %v1396_v43  ;;  %v1894_v63 = vadd.f32 %v16455_v55, %v1464_v52  ;;  %v1395_v0 = vadd.f32 %v1344_v56, %v965_v60  ;;  %v16458_v4 = vpop.f32.mrf.mxu0  ;;  %16775 = vmatmul.mubr.msk.f32.gmra.mxu0 %vm503_vm1, %v4502_v58  ;;  %v1939_v46 = vld [vmem:[#allocation4 + $0x10] sm:$0xff]  ;;  %v1942_v51 = vld [vmem:[#allocation4 + $0x28] sm:$0xff] }
 0x141   : > { %v1463_v1 = vld [vmem:[#allocation4 + $0xe0] sm:$0xff]  ;;  %v16408_v3 = vpop.f32.mrf.mxu1  ;;  %16725 = vmatmul.mubr.msk.f32.gmra.mxu1 %vm503_vm1, %v4004_v54  ;;  %16777 = vmatprep.mubr.msk.f32.mxu0 %vm503_vm1, %v4503_v62  ;;  %v4013_v52 = vld [vmem:[%s18481_s21 + $0x12a] sm:$0xff] }
 0x142   : > { %1930 = vst.msk [vmem:[#allocation4 + $0xe8] sm:$0xff] %vm393_vm2, %v1894_v63  ;;  %1431 = vst.msk [vmem:[#allocation4 + $0x100] sm:$0xff] %vm393_vm2, %v1395_v0  ;;  %v1893_v5 = vadd.f32 %v1826_v61, %v1463_v1  ;;  %v1398_v6 = vadd.f32 %v16408_v3, %v968_v2  ;;  %16727 = vmatprep.mubr.msk.f32.mxu1 %vm503_vm1, %v4005_v59  ;;  %v1836_v13 = vpop.f32.mrf.mxu0  ;;  %v4012_v43 = vld [vmem:[%s18481_s21 + $0x122] sm:$0xff]  ;;  %v4511_v0 = vld [vmem:[%s18481_s21 + $0x10b] sm:$0xff] }
 0x143   : > { %v1466_v10 = vld [vmem:[#allocation4 + $0xf8] sm:$0xff]  ;;  %v1354_v12 = vpop.f32.mrf.mxu1  ;;  %v4510_v59 = vld [vmem:[%s18481_s21 + $0x103] sm:$0xff] }
 0x144   : > { %1929 = vst.msk [vmem:[#allocation4 + $0xe0] sm:$0xff] %vm393_vm2, %v1893_v5  ;;  %1434 = vst.msk [vmem:[#allocation4 + $0x118] sm:$0xff] %vm393_vm2, %v1398_v6  ;;  %v1896_v15 = vadd.f32 %v16458_v4, %v1466_v10  ;;  %v1397_v16 = vadd.f32 %v1354_v12, %v967_v11  ;;  %v16461_v19 = vpop.f32.mrf.mxu0  ;;  %16778 = vmatmul.mubr.msk.f32.gmra.mxu0 %vm503_vm1, %v4504_v8  ;;  %v5470_v60 = vld [vmem:[%s22740_s4 + $0x20] sm:$0xff]  ;;  %v1944_v4 = vld [vmem:[#allocation4 + $0x38] sm:$0xff] }
 0x145   : > { %v1465_v18 = vld [vmem:[#allocation4 + $0xf0] sm:$0xff]  ;;  %v16469_v21 = vpop.f32.mrf.mxu1  ;;  %16728 = vmatmul.mubr.msk.f32.gmra.mxu1 %vm503_vm1, %v4006_v7  ;;  %16780 = vmatprep.mubr.msk.f32.mxu0 %vm503_vm1, %v4505_v14  ;;  %v1941_v61 = vld [vmem:[#allocation4 + $0x20] sm:$0xff] }
 0x146   : > { %1932 = vst.msk [vmem:[#allocation4 + $0xf8] sm:$0xff] %vm393_vm2, %v1896_v15  ;;  %1433 = vst.msk [vmem:[#allocation4 + $0x110] sm:$0xff] %vm393_vm2, %v1397_v16  ;;  %v1895_v22 = vadd.f32 %v1836_v13, %v1465_v18  ;;  %v2368_v23 = vadd.f32 %v16469_v21, %v1938_v20  ;;  %16730 = vmatprep.mubr.msk.f32.mxu1 %vm503_vm1, %v4007_v9  ;;  %v1846_v28 = vpop.f32.mrf.mxu0  ;;  %16807 = vmatprep.subr.mxu1 %v5470_v60  ;;  %v4014_v9 = vld [vmem:[%s18481_s21 + $0x132] sm:$0xff]  ;;  %v4015_v11 = vld [vmem:[%s18481_s21 + $0x13a] sm:$0xff] }
 0x147   : > { %v1468_v27 = vld [vmem:[#allocation4 + $0x108] sm:$0xff]  ;;  %v2188_v30 = vpop.f32.mrf.mxu1  ;;  %16808 = vmatpush3.msra.mxu1 %v5470_v60  ;;  %v4512_v10 = vld [vmem:[%s18481_s21 + $0x113] sm:$0xff]  ;;  %v4513_v16 = vld [vmem:[%s18481_s21 + $0x11b] sm:$0xff] }
 0x148   : > { %1931 = vst.msk [vmem:[#allocation4 + $0xf0] sm:$0xff] %vm393_vm2, %v1895_v22  ;;  %v1898_v32 = vadd.f32 %v16461_v19, %v1468_v27  ;;  %2404 = vst.msk [vmem:[#allocation4 + $0x8] sm:$0xff] %vm393_vm2, %v2368_v23  ;;  %v2367_v33 = vadd.f32 %v2188_v30, %v1937_v29  ;;  %v16464_v35 = vpop.f32.mrf.mxu0  ;;  %16781 = vmatmul.mubr.msk.f32.gmra.mxu0 %vm503_vm1, %v4506_v25  ;;  %v1943_v13 = vld [vmem:[#allocation4 + $0x30] sm:$0xff]  ;;  %v1946_v20 = vld [vmem:[#allocation4 + $0x48] sm:$0xff] }
 0x149   : > { %v1467_v34 = vld [vmem:[#allocation4 + $0x100] sm:$0xff]  ;;  %v16472_v37 = vpop.f32.mrf.mxu1  ;;  %16731 = vmatmul.mubr.msk.f32.gmra.mxu1 %vm503_vm1, %v4008_v24  ;;  %16783 = vmatprep.mubr.msk.f32.mxu0 %vm503_vm1, %v4507_v31  ;;  %v5469_v27 = vld [vmem:[%s22740_s4 + $0x18] sm:$0xff] }
 0x14a   : > { %1934 = vst.msk [vmem:[#allocation4 + $0x108] sm:$0xff] %vm393_vm2, %v1898_v32  ;;  %v1897_v38 = vadd.f32 %v1846_v28, %v1467_v34  ;;  %2403 = vst.msk [vmem:[#allocation4] sm:$0xff] %vm393_vm2, %v2367_v33  ;;  %v2370_v39 = vadd.f32 %v16472_v37, %v1940_v36  ;;  %16733 = vmatprep.mubr.msk.f32.mxu1 %vm503_vm1, %v4009_v26  ;;  %v1856_v45 = vpop.f32.mrf.mxu0  ;;  %v4016_v25 = vld [vmem:[%s18481_s21 + $0x142] sm:$0xff]  ;;  %v4515_v32 = vld [vmem:[%s18481_s21 + $0x12b] sm:$0xff]  ;;  %16809 = vmatprep.subr.mxu1 %v5469_v27 }
 0x14b   : > { %v1470_v44 = vld [vmem:[#allocation4 + $0x118] sm:$0xff]  ;;  %v2198_v47 = vpop.f32.mrf.mxu1  ;;  %v4514_v26 = vld [vmem:[%s18481_s21 + $0x123] sm:$0xff]  ;;  %16810 = vmatpush3.msra.mxu1 %v5469_v27 }
 0x14c   : > { %1933 = vst.msk [vmem:[#allocation4 + $0x100] sm:$0xff] %vm393_vm2, %v1897_v38  ;;  %v1900_v49 = vadd.f32 %v16464_v35, %v1470_v44  ;;  %2406 = vst.msk [vmem:[#allocation4 + $0x18] sm:$0xff] %vm393_vm2, %v2370_v39  ;;  %v2369_v50 = vadd.f32 %v2198_v47, %v1939_v46  ;;  %v16525_v57 = vpop.f32.mrf.mxu0  ;;  %16784 = vmatmul.mubr.msk.f32.gmra.mxu0 %vm503_vm1, %v4508_v41  ;;  %v1945_v29 = vld [vmem:[#allocation4 + $0x40] sm:$0xff]  ;;  %v1948_v36 = vld [vmem:[#allocation4 + $0x58] sm:$0xff] }
 0x14d   : > { %v1469_v53 = vld [vmem:[#allocation4 + $0x110] sm:$0xff]  ;;  %v16475_v55 = vpop.f32.mrf.mxu1  ;;  %16734 = vmatmul.mubr.msk.f32.gmra.mxu1 %vm503_vm1, %v4010_v40  ;;  %16786 = vmatprep.mubr.msk.f32.mxu0 %vm503_vm1, %v4509_v48  ;;  %v4517_v47 = vld [vmem:[%s18481_s21 + $0x13b] sm:$0xff] }
 0x14e   : > { %1936 = vst.msk [vmem:[#allocation4 + $0x118] sm:$0xff] %vm393_vm2, %v1900_v49  ;;  %v1899_v54 = vadd.f32 %v1856_v45, %v1469_v53  ;;  %2405 = vst.msk [vmem:[#allocation4 + $0x10] sm:$0xff] %vm393_vm2, %v2369_v50  ;;  %v2372_v58 = vadd.f32 %v16475_v55, %v1942_v51  ;;  %16736 = vmatprep.mubr.msk.f32.mxu1 %vm503_vm1, %v4011_v42  ;;  %v2690_v63 = vpop.f32.mrf.mxu0  ;;  %v4516_v41 = vld [vmem:[%s18481_s21 + $0x133] sm:$0xff]  ;;  %v1950_v53 = vld [vmem:[#allocation4 + $0x68] sm:$0xff] }
 0x14f   : > { %v2440_v56 = vld [vmem:[#allocation4 + $0x8] sm:$0xff]  ;;  %v2208_v62 = vpop.f32.mrf.mxu1  ;;  %v1947_v44 = vld [vmem:[#allocation4 + $0x50] sm:$0xff]  ;;  %v1956_v27 = vld [vmem:[#allocation4 + $0x98] sm:$0xff] }
 0x150   : > { %1935 = vst.msk [vmem:[#allocation4 + $0x110] sm:$0xff] %vm393_vm2, %v1899_v54  ;;  %2408 = vst.msk [vmem:[#allocation4 + $0x28] sm:$0xff] %vm393_vm2, %v2372_v58  ;;  %v2870_v1 = vadd.f32 %v16525_v57, %v2440_v56  ;;  %v2371_v2 = vadd.f32 %v2208_v62, %v1941_v61  ;;  %v16528_v6 = vpop.f32.mrf.mxu0  ;;  %16787 = vmatmul.mubr.msk.f32.gmra.mxu0 %vm503_vm1, %v4510_v59  ;;  %v4518_v54 = vld [vmem:[%s18481_s21 + $0x143] sm:$0xff]  ;;  %v5468_v62 = vld [vmem:[%s22740_s4 + $0x10] sm:$0xff]  ;;  %s14148_s21 = scalar_lea.sflag [#allocation8], %s350_s12 }
 0x151   : > { %v2439_v3 = vld [vmem:[#allocation4] sm:$0xff]  ;;  %v16478_v5 = vpop.f32.mrf.mxu1  ;;  %16737 = vmatmul.mubr.msk.f32.gmra.mxu1 %vm503_vm1, %v4012_v43  ;;  %16789 = vmatprep.mubr.msk.f32.mxu0 %vm503_vm1, %v4511_v0  ;;  %v1952_v0 = vld [vmem:[#allocation4 + $0x78] sm:$0xff] }
 0x152   : > { %2906 = vst.msk [vmem:[#allocation4 + $0x8] sm:$0xff] %vm393_vm2, %v2870_v1  ;;  %2407 = vst.msk [vmem:[#allocation4 + $0x20] sm:$0xff] %vm393_vm2, %v2371_v2  ;;  %v2869_v7 = vadd.f32 %v2690_v63, %v2439_v3  ;;  %v2374_v8 = vadd.f32 %v16478_v5, %v1944_v4  ;;  %16739 = vmatprep.mubr.msk.f32.mxu1 %vm503_vm1, %v4013_v52  ;;  %v2700_v15 = vpop.f32.mrf.mxu0  ;;  %v1949_v59 = vld [vmem:[#allocation4 + $0x60] sm:$0xff]  ;;  %16811 = vmatprep.subr.mxu1 %v5468_v62 }
 0x153   : > { %v2442_v12 = vld [vmem:[#allocation4 + $0x18] sm:$0xff]  ;;  %v2218_v14 = vpop.f32.mrf.mxu1  ;;  %16812 = vmatpush3.msra.mxu1 %v5468_v62  ;;  %v1959_v62 = vld [vmem:[#allocation4 + $0xb0] sm:$0xff] }
 0x154   : > { %2905 = vst.msk [vmem:[#allocation4] sm:$0xff] %vm393_vm2, %v2869_v7  ;;  %2410 = vst.msk [vmem:[#allocation4 + $0x38] sm:$0xff] %vm393_vm2, %v2374_v8  ;;  %v2872_v17 = vadd.f32 %v16528_v6, %v2442_v12  ;;  %v2373_v18 = vadd.f32 %v2218_v14, %v1943_v13  ;;  %v16531_v22 = vpop.f32.mrf.mxu0  ;;  %16790 = vmatmul.mubr.msk.f32.gmra.mxu0 %vm503_vm1, %v4512_v10  ;;  %v1951_v6 = vld [vmem:[#allocation4 + $0x70] sm:$0xff]  ;;  %v1954_v13 = vld [vmem:[#allocation4 + $0x88] sm:$0xff] }
 0x155   : > { %v2441_v19 = vld [vmem:[#allocation4 + $0x10] sm:$0xff]  ;;  %v16481_v21 = vpop.f32.mrf.mxu1  ;;  %16740 = vmatmul.mubr.msk.f32.gmra.mxu1 %vm503_vm1, %v4014_v9  ;;  %16792 = vmatprep.mubr.msk.f32.mxu0 %vm503_vm1, %v4513_v16 }
 0x156   : > { %2908 = vst.msk [vmem:[#allocation4 + $0x18] sm:$0xff] %vm393_vm2, %v2872_v17  ;;  %2409 = vst.msk [vmem:[#allocation4 + $0x30] sm:$0xff] %vm393_vm2, %v2373_v18  ;;  %v2871_v23 = vadd.f32 %v2700_v15, %v2441_v19  ;;  %v2376_v24 = vadd.f32 %v16481_v21, %v1946_v20  ;;  %16742 = vmatprep.mubr.msk.f32.mxu1 %vm503_vm1, %v4015_v11  ;;  %v2710_v31 = vpop.f32.mrf.mxu0  ;;  %v14605_v11 = vld [vmem:[%s22740_s4 + $0x78] sm:$0xff]  ;;  %v14604_v18 = vld [vmem:[%s22740_s4 + $0x70] sm:$0xff] }
 0x157   : > { %v2444_v28 = vld [vmem:[#allocation4 + $0x28] sm:$0xff]  ;;  %v2228_v30 = vpop.f32.mrf.mxu1  ;;  %16871 = vmatprep.subr.mxu0 %v14605_v11  ;;  %v1953_v20 = vld [vmem:[#allocation4 + $0x80] sm:$0xff] }
 0x158   : > { %2907 = vst.msk [vmem:[#allocation4 + $0x10] sm:$0xff] %vm393_vm2, %v2871_v23  ;;  %2412 = vst.msk [vmem:[#allocation4 + $0x48] sm:$0xff] %vm393_vm2, %v2376_v24  ;;  %v2874_v33 = vadd.f32 %v16531_v22, %v2444_v28  ;;  %v2375_v34 = vadd.f32 %v2228_v30, %v1945_v29  ;;  %v16534_v38 = vpop.f32.mrf.mxu0  ;;  %16793 = vmatmul.mubr.msk.f32.gmra.mxu0 %vm503_vm1, %v4514_v26 }
 0x159   : > { %v2443_v35 = vld [vmem:[#allocation4 + $0x20] sm:$0xff]  ;;  %v16484_v37 = vpop.f32.mrf.mxu1  ;;  %16743 = vmatmul.mubr.msk.f32.gmra.mxu1 %vm503_vm1, %v4016_v25  ;;  %16795 = vmatprep.mubr.msk.f32.mxu0 %vm503_vm1, %v4515_v32  ;;  %v14603_v25 = vld [vmem:[%s22740_s4 + $0x68] sm:$0xff] }
 0x15a   : > { %2910 = vst.msk [vmem:[#allocation4 + $0x28] sm:$0xff] %vm393_vm2, %v2874_v33  ;;  %2411 = vst.msk [vmem:[#allocation4 + $0x40] sm:$0xff] %vm393_vm2, %v2375_v34  ;;  %v2873_v39 = vadd.f32 %v2710_v31, %v2443_v35  ;;  %v2378_v40 = vadd.f32 %v16484_v37, %v1948_v36  ;;  %v2720_v46 = vpop.f32.mrf.mxu0  ;;  %16872 = vmatpush3.msra.mxu0 %v14605_v11  ;;  %v14602_v32 = vld [vmem:[%s22740_s4 + $0x60] sm:$0xff]  ;;  %v1955_v34 = vld [vmem:[#allocation4 + $0x90] sm:$0xff] }
 0x15b   : > { %v2446_v42 = vld [vmem:[#allocation4 + $0x38] sm:$0xff]  ;;  %v2238_v45 = vpop.f32.mrf.mxu1  ;;  %16873 = vmatprep.subr.mxu0 %v14604_v18  ;;  %v5431_v11 = vld [vmem:[#allocation2 + $0xd] sm:$0xff] }
 0x15c   : > { %2909 = vst.msk [vmem:[#allocation4 + $0x20] sm:$0xff] %vm393_vm2, %v2873_v39  ;;  %2414 = vst.msk [vmem:[#allocation4 + $0x58] sm:$0xff] %vm393_vm2, %v2378_v40  ;;  %v2876_v48 = vadd.f32 %v16534_v38, %v2446_v42  ;;  %v2377_v49 = vadd.f32 %v2238_v45, %v1947_v44  ;;  %v16537_v55 = vpop.f32.mrf.mxu0  ;;  %16796 = vmatmul.mubr.msk.f32.gmra.mxu0 %vm503_vm1, %v4516_v41  ;;  %v1958_v40 = vld [vmem:[#allocation4 + $0xa8] sm:$0xff]  ;;  %v14601_v44 = vld [vmem:[%s22740_s4 + $0x58] sm:$0xff] }
 0x15d   : > { %v2445_v50 = vld [vmem:[#allocation4 + $0x30] sm:$0xff]  ;;  %v16487_v51 = vpop.f32.mrf.mxu1  ;;  %16798 = vmatprep.mubr.msk.f32.mxu0 %vm503_vm1, %v4517_v47  ;;  %16874 = vmatpush3.msra.mxu0 %v14604_v18 }
 0x15e   : > { %2912 = vst.msk [vmem:[#allocation4 + $0x38] sm:$0xff] %vm393_vm2, %v2876_v48  ;;  %2413 = vst.msk [vmem:[#allocation4 + $0x50] sm:$0xff] %vm393_vm2, %v2377_v49  ;;  %v2875_v57 = vadd.f32 %v2720_v46, %v2445_v50  ;;  %v2380_v43 = vadd.f32 %v16487_v51, %v1950_v53  ;;  %v2730_v60 = vpop.f32.mrf.mxu0  ;;  %16875 = vmatprep.subr.mxu0 %v14603_v25  ;;  %v1957_v48 = vld [vmem:[#allocation4 + $0xa0] sm:$0xff]  ;;  %v14600_v53 = vld [vmem:[%s22740_s4 + $0x50] sm:$0xff] }
 0x15f   : > { %v2448_v58 = vld [vmem:[#allocation4 + $0x48] sm:$0xff]  ;;  %v2248_v52 = vpop.f32.mrf.mxu1  ;;  %16876 = vmatpush3.msra.mxu0 %v14603_v25 }
 0x160   : > { %2911 = vst.msk [vmem:[#allocation4 + $0x30] sm:$0xff] %vm393_vm2, %v2875_v57  ;;  %2416 = vst.msk [vmem:[#allocation4 + $0x68] sm:$0xff] %vm393_vm2, %v2380_v43  ;;  %v2878_v56 = vadd.f32 %v16537_v55, %v2448_v58  ;;  %v2379_v61 = vadd.f32 %v2248_v52, %v1949_v59  ;;  %v16540_v2 = vpop.f32.mrf.mxu0  ;;  %16799 = vmatmul.mubr.msk.f32.gmra.mxu0 %vm503_vm1, %v4518_v54  ;;  %16877 = vmatprep.subr.mxu0 %v14602_v32  ;;  %v5467_v57 = vld [vmem:[%s22740_s4 + $0x8] sm:$0xff]  ;;  %v1960_v54 = vld [vmem:[#allocation4 + $0xb8] sm:$0xff] }
 0x161   : > { %v2447_v63 = vld [vmem:[#allocation4 + $0x40] sm:$0xff]  ;;  %v16490_v1 = vpop.f32.mrf.mxu1  ;;  %16878 = vmatpush3.msra.mxu0 %v14602_v32  ;;  %16813 = vmatprep.subr.mxu1 %v5467_v57  ;;  %v14599_v52 = vld [vmem:[%s22740_s4 + $0x48] sm:$0xff] }
 0x162   : > { %2914 = vst.msk [vmem:[#allocation4 + $0x48] sm:$0xff] %vm393_vm2, %v2878_v56  ;;  %2415 = vst.msk [vmem:[#allocation4 + $0x60] sm:$0xff] %vm393_vm2, %v2379_v61  ;;  %v2877_v3 = vadd.f32 %v2730_v60, %v2447_v63  ;;  %v2382_v4 = vadd.f32 %v16490_v1, %v1952_v0  ;;  %v2740_v8 = vpop.f32.mrf.mxu0  ;;  %16879 = vmatprep.subr.mxu0 %v14601_v44  ;;  %16814 = vmatpush3.msra.mxu1 %v5467_v57  ;;  %v5466_v1 = vld [vmem:[%s22740_s4] sm:$0xff] }
 0x163   : > { %v2450_v5 = vld [vmem:[#allocation4 + $0x58] sm:$0xff]  ;;  %v2258_v7 = vpop.f32.mrf.mxu1  ;;  %16880 = vmatpush3.msra.mxu0 %v14601_v44  ;;  %16815 = vmatprep.subr.mxu1 %v5466_v1 }
 0x164   : > { %2913 = vst.msk [vmem:[#allocation4 + $0x40] sm:$0xff] %vm393_vm2, %v2877_v3  ;;  %2418 = vst.msk [vmem:[#allocation4 + $0x78] sm:$0xff] %vm393_vm2, %v2382_v4  ;;  %v2880_v9 = vadd.f32 %v16540_v2, %v2450_v5  ;;  %v2381_v10 = vadd.f32 %v2258_v7, %v1951_v6  ;;  %v16543_v15 = vpop.f32.mrf.mxu0  ;;  %16881 = vmatprep.subr.mxu0 %v14600_v53  ;;  %v14598_v4 = vld [vmem:[%s22740_s4 + $0x40] sm:$0xff]  ;;  %16816 = vmatpush3.msra.mxu1 %v5466_v1 }
 0x165   : > { %v2449_v12 = vld [vmem:[#allocation4 + $0x50] sm:$0xff]  ;;  %v16493_v14 = vpop.f32.mrf.mxu1  ;;  %16882 = vmatpush3.msra.mxu0 %v14600_v53  ;;  %v5430_v5 = vld [vmem:[#allocation2 + $0x5] sm:$0xff] }
 0x166   : > { %2916 = vst.msk [vmem:[#allocation4 + $0x58] sm:$0xff] %vm393_vm2, %v2880_v9  ;;  %2417 = vst.msk [vmem:[#allocation4 + $0x70] sm:$0xff] %vm393_vm2, %v2381_v10  ;;  %v2879_v16 = vadd.f32 %v2740_v8, %v2449_v12  ;;  %v2384_v17 = vadd.f32 %v16493_v14, %v1954_v13  ;;  %v2750_v22 = vpop.f32.mrf.mxu0  ;;  %16883 = vmatprep.subr.mxu0 %v14599_v52  ;;  %v5935_v6 = vld [vmem:[#allocation2 + $0x6] sm:$0xff]  ;;  %16817 = vmatprep.mubr.msk.f32.mxu1 %vm393_vm2, %v5430_v5  ;;  %v5936_v14 = vld [vmem:[#allocation2 + $0xe] sm:$0xff] }
 0x167   : > { %v2452_v19 = vld [vmem:[#allocation4 + $0x68] sm:$0xff]  ;;  %v2268_v21 = vpop.f32.mrf.mxu1  ;;  %16884 = vmatpush3.msra.mxu0 %v14599_v52  ;;  %16887 = vmatprep.mubr.msk.f32.mxu0 %vm393_vm2, %v5935_v6  ;;  %v1972_v6 = vld [vmem:[#allocation4 + $0x118] sm:$0xff] }
 0x168   : > { %2915 = vst.msk [vmem:[#allocation4 + $0x50] sm:$0xff] %vm393_vm2, %v2879_v16  ;;  %2420 = vst.msk [vmem:[#allocation4 + $0x88] sm:$0xff] %vm393_vm2, %v2384_v17  ;;  %v2882_v23 = vadd.f32 %v16543_v15, %v2452_v19  ;;  %v2383_v24 = vadd.f32 %v2268_v21, %v1953_v20  ;;  %v16546_v29 = vpop.f32.mrf.mxu0  ;;  %v1962_v8 = vld [vmem:[#allocation4 + $0xc8] sm:$0xff]  ;;  %16885 = vmatprep.subr.mxu0 %v14598_v4  ;;  %v1961_v16 = vld [vmem:[#allocation4 + $0xc0] sm:$0xff]  ;;  %16818 = vmatmul.mubr.msk.f32.vlgmr.msra.gmra.mxu1 %vm393_vm2, %v5431_v11 }
 0x169   : > { %v2451_v26 = vld [vmem:[#allocation4 + $0x60] sm:$0xff]  ;;  %v16496_v28 = vpop.f32.mrf.mxu1  ;;  %16886 = vmatpush3.msra.mxu0 %v14598_v4  ;;  %v1970_v52 = vld [vmem:[#allocation4 + $0x108] sm:$0xff] }
 0x16a   : > { %2918 = vst.msk [vmem:[#allocation4 + $0x68] sm:$0xff] %vm393_vm2, %v2882_v23  ;;  %2419 = vst.msk [vmem:[#allocation4 + $0x80] sm:$0xff] %vm393_vm2, %v2383_v24  ;;  %v2881_v30 = vadd.f32 %v2750_v22, %v2451_v26  ;;  %v2386_v31 = vadd.f32 %v16496_v28, %v1956_v27  ;;  %v2760_v36 = vpop.f32.mrf.mxu0  ;;  %16888 = vmatmul.mubr.msk.f32.vlgmr.msra.gmra.mxu0 %vm393_vm2, %v5936_v14  ;;  %v1964_v22 = vld [vmem:[#allocation4 + $0xd8] sm:$0xff]  ;;  %v1963_v28 = vld [vmem:[#allocation4 + $0xd0] sm:$0xff] }
 0x16b   : > { %v2454_v33 = vld [vmem:[#allocation4 + $0x78] sm:$0xff]  ;;  %v2278_v35 = vpop.f32.mrf.mxu1 }
 0x16c   : > { %2917 = vst.msk [vmem:[#allocation4 + $0x60] sm:$0xff] %vm393_vm2, %v2881_v30  ;;  %2422 = vst.msk [vmem:[#allocation4 + $0x98] sm:$0xff] %vm393_vm2, %v2386_v31  ;;  %v2884_v37 = vadd.f32 %v16546_v29, %v2454_v33  ;;  %v2385_v38 = vadd.f32 %v2278_v35, %v1955_v34  ;;  %v16549_v42 = vpop.f32.mrf.mxu0  ;;  %v1966_v34 = vld [vmem:[#allocation4 + $0xe8] sm:$0xff] }
 0x16d   : > { %v2453_v39 = vld [vmem:[#allocation4 + $0x70] sm:$0xff]  ;;  %v16499_v41 = vpop.f32.mrf.mxu1 }
 0x16e   : > { %2920 = vst.msk [vmem:[#allocation4 + $0x78] sm:$0xff] %vm393_vm2, %v2884_v37  ;;  %2421 = vst.msk [vmem:[#allocation4 + $0x90] sm:$0xff] %vm393_vm2, %v2385_v38  ;;  %v2883_v45 = vadd.f32 %v2760_v36, %v2453_v39  ;;  %v2388_v46 = vadd.f32 %v16499_v41, %v1958_v40  ;;  %v2770_v50 = vpop.f32.mrf.mxu0  ;;  %v1965_v40 = vld [vmem:[#allocation4 + $0xe0] sm:$0xff] }
 0x16f   : > { %v2456_v47 = vld [vmem:[#allocation4 + $0x88] sm:$0xff]  ;;  %v2288_v49 = vpop.f32.mrf.mxu1 }
 0x170   : > { %2919 = vst.msk [vmem:[#allocation4 + $0x70] sm:$0xff] %vm393_vm2, %v2883_v45  ;;  %2424 = vst.msk [vmem:[#allocation4 + $0xa8] sm:$0xff] %vm393_vm2, %v2388_v46  ;;  %v2886_v51 = vadd.f32 %v16549_v42, %v2456_v47  ;;  %v2387_v55 = vadd.f32 %v2288_v49, %v1957_v48  ;;  %v16552_v59 = vpop.f32.mrf.mxu0  ;;  %v1968_v47 = vld [vmem:[#allocation4 + $0xf8] sm:$0xff] }
 0x171   : > { %v2455_v43 = vld [vmem:[#allocation4 + $0x80] sm:$0xff]  ;;  %v16502_v58 = vpop.f32.mrf.mxu1 }
 0x172   : > { %2922 = vst.msk [vmem:[#allocation4 + $0x88] sm:$0xff] %vm393_vm2, %v2886_v51  ;;  %2423 = vst.msk [vmem:[#allocation4 + $0xa0] sm:$0xff] %vm393_vm2, %v2387_v55  ;;  %v2885_v60 = vadd.f32 %v2770_v50, %v2455_v43  ;;  %v2390_v56 = vadd.f32 %v16502_v58, %v1960_v54  ;;  %v2780_v0 = vpop.f32.mrf.mxu0  ;;  %v1967_v55 = vld [vmem:[#allocation4 + $0xf0] sm:$0xff] }
 0x173   : > { %v2458_v61 = vld [vmem:[#allocation4 + $0x98] sm:$0xff]  ;;  %v2298_v63 = vpop.f32.mrf.mxu1 }
 0x174   : > { %2921 = vst.msk [vmem:[#allocation4 + $0x80] sm:$0xff] %vm393_vm2, %v2885_v60  ;;  %2426 = vst.msk [vmem:[#allocation4 + $0xb8] sm:$0xff] %vm393_vm2, %v2390_v56  ;;  %v2888_v2 = vadd.f32 %v16552_v59, %v2458_v61  ;;  %v2389_v3 = vadd.f32 %v2298_v63, %v1959_v62  ;;  %v16555_v10 = vpop.f32.mrf.mxu0 }
 0x175   : > { %v2457_v7 = vld [vmem:[#allocation4 + $0x90] sm:$0xff]  ;;  %v16505_v9 = vpop.f32.mrf.mxu1 }
 0x176   : > { %2924 = vst.msk [vmem:[#allocation4 + $0x98] sm:$0xff] %vm393_vm2, %v2888_v2  ;;  %2425 = vst.msk [vmem:[#allocation4 + $0xb0] sm:$0xff] %vm393_vm2, %v2389_v3  ;;  %v2887_v12 = vadd.f32 %v2780_v0, %v2457_v7  ;;  %v2392_v13 = vadd.f32 %v16505_v9, %v1962_v8  ;;  %v2790_v18 = vpop.f32.mrf.mxu0  ;;  %v1969_v0 = vld [vmem:[#allocation4 + $0x100] sm:$0xff]  ;;  %v14649_v9 = vld [vmem:[%s22740_s4 + $0xb8] sm:$0xff] }
 0x177   : > { %v2460_v15 = vld [vmem:[#allocation4 + $0xa8] sm:$0xff]  ;;  %v2308_v17 = vpop.f32.mrf.mxu1  ;;  %16941 = vmatprep.subr.mxu1 %v14649_v9 }
 0x178   : > { %2923 = vst.msk [vmem:[#allocation4 + $0x90] sm:$0xff] %vm393_vm2, %v2887_v12  ;;  %2428 = vst.msk [vmem:[#allocation4 + $0xc8] sm:$0xff] %vm393_vm2, %v2392_v13  ;;  %v2890_v19 = vadd.f32 %v16555_v10, %v2460_v15  ;;  %v2391_v20 = vadd.f32 %v2308_v17, %v1961_v16  ;;  %v16558_v24 = vpop.f32.mrf.mxu0  ;;  %v1971_v13 = vld [vmem:[#allocation4 + $0x110] sm:$0xff]  ;;  %16942 = vmatpush3.msra.mxu1 %v14649_v9 }
 0x179   : > { %v2459_v21 = vld [vmem:[#allocation4 + $0xa0] sm:$0xff]  ;;  %v16508_v23 = vpop.f32.mrf.mxu1 }
 0x17a   : > { %2926 = vst.msk [vmem:[#allocation4 + $0xa8] sm:$0xff] %vm393_vm2, %v2890_v19  ;;  %2427 = vst.msk [vmem:[#allocation4 + $0xc0] sm:$0xff] %vm393_vm2, %v2391_v20  ;;  %v2889_v25 = vadd.f32 %v2790_v18, %v2459_v21  ;;  %v2394_v26 = vadd.f32 %v16508_v23, %v1964_v22  ;;  %v2800_v30 = vpop.f32.mrf.mxu0  ;;  %v2942_v20 = vld [vmem:[#allocation4 + $0x8] sm:$0xff] }
 0x17b   : > { %v2462_v27 = vld [vmem:[#allocation4 + $0xb8] sm:$0xff]  ;;  %v2318_v29 = vpop.f32.mrf.mxu1 }
 0x17c   : > { %2925 = vst.msk [vmem:[#allocation4 + $0xa0] sm:$0xff] %vm393_vm2, %v2889_v25  ;;  %2430 = vst.msk [vmem:[#allocation4 + $0xd8] sm:$0xff] %vm393_vm2, %v2394_v26  ;;  %v2892_v31 = vadd.f32 %v16558_v24, %v2462_v27  ;;  %v2393_v32 = vadd.f32 %v2318_v29, %v1963_v28  ;;  %v16561_v36 = vpop.f32.mrf.mxu0  ;;  %v2941_v26 = vld [vmem:[#allocation4] sm:$0xff] }
 0x17d   : > { %v2461_v33 = vld [vmem:[#allocation4 + $0xb0] sm:$0xff]  ;;  %v16511_v35 = vpop.f32.mrf.mxu1 }
 0x17e   : > { %2928 = vst.msk [vmem:[#allocation4 + $0xb8] sm:$0xff] %vm393_vm2, %v2892_v31  ;;  %2429 = vst.msk [vmem:[#allocation4 + $0xd0] sm:$0xff] %vm393_vm2, %v2393_v32  ;;  %v2891_v37 = vadd.f32 %v2800_v30, %v2461_v33  ;;  %v2396_v38 = vadd.f32 %v16511_v35, %v1966_v34  ;;  %v2810_v42 = vpop.f32.mrf.mxu0  ;;  %v2944_v32 = vld [vmem:[#allocation4 + $0x18] sm:$0xff]  ;;  %v14648_v34 = vld [vmem:[%s22740_s4 + $0xb0] sm:$0xff] }
 0x17f   : > { %v2464_v39 = vld [vmem:[#allocation4 + $0xc8] sm:$0xff]  ;;  %v2328_v41 = vpop.f32.mrf.mxu1  ;;  %16943 = vmatprep.subr.mxu1 %v14648_v34 }
 0x180   : > { %2927 = vst.msk [vmem:[#allocation4 + $0xb0] sm:$0xff] %vm393_vm2, %v2891_v37  ;;  %2432 = vst.msk [vmem:[#allocation4 + $0xe8] sm:$0xff] %vm393_vm2, %v2396_v38  ;;  %v2894_v44 = vadd.f32 %v16561_v36, %v2464_v39  ;;  %v2395_v45 = vadd.f32 %v2328_v41, %v1965_v40  ;;  %v16564_v49 = vpop.f32.mrf.mxu0  ;;  %v2943_v39 = vld [vmem:[#allocation4 + $0x10] sm:$0xff]  ;;  %16944 = vmatpush3.msra.mxu1 %v14648_v34 }
 0x181   : > { %v2463_v46 = vld [vmem:[#allocation4 + $0xc0] sm:$0xff]  ;;  %v16514_v48 = vpop.f32.mrf.mxu1 }
 0x182   : > { %2930 = vst.msk [vmem:[#allocation4 + $0xc8] sm:$0xff] %vm393_vm2, %v2894_v44  ;;  %2431 = vst.msk [vmem:[#allocation4 + $0xe0] sm:$0xff] %vm393_vm2, %v2395_v45  ;;  %v2893_v50 = vadd.f32 %v2810_v42, %v2463_v46  ;;  %v2398_v53 = vadd.f32 %v16514_v48, %v1968_v47  ;;  %v2820_v43 = vpop.f32.mrf.mxu0  ;;  %v2946_v45 = vld [vmem:[#allocation4 + $0x28] sm:$0xff] }
 0x183   : > { %v2466_v51 = vld [vmem:[#allocation4 + $0xd8] sm:$0xff]  ;;  %v2338_v57 = vpop.f32.mrf.mxu1 }
 0x184   : > { %2929 = vst.msk [vmem:[#allocation4 + $0xc0] sm:$0xff] %vm393_vm2, %v2893_v50  ;;  %2434 = vst.msk [vmem:[#allocation4 + $0xf8] sm:$0xff] %vm393_vm2, %v2398_v53  ;;  %v2896_v54 = vadd.f32 %v16564_v49, %v2466_v51  ;;  %v2397_v58 = vadd.f32 %v2338_v57, %v1967_v55  ;;  %v16567_v56 = vpop.f32.mrf.mxu0  ;;  %v2945_v53 = vld [vmem:[#allocation4 + $0x20] sm:$0xff] }
 0x185   : > { %v2465_v59 = vld [vmem:[#allocation4 + $0xd0] sm:$0xff]  ;;  %v16517_v60 = vpop.f32.mrf.mxu1 }
 0x186   : > { %2932 = vst.msk [vmem:[#allocation4 + $0xd8] sm:$0xff] %vm393_vm2, %v2896_v54  ;;  %2433 = vst.msk [vmem:[#allocation4 + $0xf0] sm:$0xff] %vm393_vm2, %v2397_v58  ;;  %v2895_v61 = vadd.f32 %v2820_v43, %v2465_v59  ;;  %v2400_v62 = vadd.f32 %v16517_v60, %v1970_v52  ;;  %v2830_v2 = vpop.f32.mrf.mxu0  ;;  %v2948_v58 = vld [vmem:[#allocation4 + $0x38] sm:$0xff]  ;;  %v14647_v60 = vld [vmem:[%s22740_s4 + $0xa8] sm:$0xff] }
 0x187   : > { %v2468_v63 = vld [vmem:[#allocation4 + $0xe8] sm:$0xff]  ;;  %v2348_v1 = vpop.f32.mrf.mxu1  ;;  %16945 = vmatprep.subr.mxu1 %v14647_v60 }
 0x188   : > { %2931 = vst.msk [vmem:[#allocation4 + $0xd0] sm:$0xff] %vm393_vm2, %v2895_v61  ;;  %2436 = vst.msk [vmem:[#allocation4 + $0x108] sm:$0xff] %vm393_vm2, %v2400_v62  ;;  %v2898_v3 = vadd.f32 %v16567_v56, %v2468_v63  ;;  %v2399_v4 = vadd.f32 %v2348_v1, %v1969_v0  ;;  %v16570_v8 = vpop.f32.mrf.mxu0  ;;  %v2947_v63 = vld [vmem:[#allocation4 + $0x30] sm:$0xff]  ;;  %16946 = vmatpush3.msra.mxu1 %v14647_v60 }
 0x189   : > { %v2467_v5 = vld [vmem:[#allocation4 + $0xe0] sm:$0xff]  ;;  %v16520_v7 = vpop.f32.mrf.mxu1 }
 0x18a   : > { %2934 = vst.msk [vmem:[#allocation4 + $0xe8] sm:$0xff] %vm393_vm2, %v2898_v3  ;;  %2435 = vst.msk [vmem:[#allocation4 + $0x100] sm:$0xff] %vm393_vm2, %v2399_v4  ;;  %v2897_v10 = vadd.f32 %v2830_v2, %v2467_v5  ;;  %v2402_v11 = vadd.f32 %v16520_v7, %v1972_v6  ;;  %v2840_v15 = vpop.f32.mrf.mxu0  ;;  %v2950_v5 = vld [vmem:[#allocation4 + $0x48] sm:$0xff] }
 0x18b   : > { %v2470_v12 = vld [vmem:[#allocation4 + $0xf8] sm:$0xff]  ;;  %v2358_v14 = vpop.f32.mrf.mxu1 }
 0x18c   : > { %2933 = vst.msk [vmem:[#allocation4 + $0xe0] sm:$0xff] %vm393_vm2, %v2897_v10  ;;  %2438 = vst.msk [vmem:[#allocation4 + $0x118] sm:$0xff] %vm393_vm2, %v2402_v11  ;;  %v2900_v16 = vadd.f32 %v16570_v8, %v2470_v12  ;;  %v2401_v17 = vadd.f32 %v2358_v14, %v1971_v13  ;;  %v16573_v19 = vpop.f32.mrf.mxu0  ;;  %v2949_v11 = vld [vmem:[#allocation4 + $0x40] sm:$0xff] }
 0x18d   : > { %v2469_v18 = vld [vmem:[#allocation4 + $0xf0] sm:$0xff]  ;;  %v16581_v21 = vpop.f32.mrf.mxu1 }
 0x18e   : > { %2936 = vst.msk [vmem:[#allocation4 + $0xf8] sm:$0xff] %vm393_vm2, %v2900_v16  ;;  %2437 = vst.msk [vmem:[#allocation4 + $0x110] sm:$0xff] %vm393_vm2, %v2401_v17  ;;  %v2899_v22 = vadd.f32 %v2840_v15, %v2469_v18  ;;  %v3372_v23 = vadd.f32 %v16581_v21, %v2942_v20  ;;  %v2850_v25 = vpop.f32.mrf.mxu0  ;;  %v2952_v17 = vld [vmem:[#allocation4 + $0x58] sm:$0xff] }
 0x18f   : > { %v2472_v24 = vld [vmem:[#allocation4 + $0x108] sm:$0xff]  ;;  %v3192_v27 = vpop.f32.mrf.mxu1 }
 0x190   : > { %2935 = vst.msk [vmem:[#allocation4 + $0xf0] sm:$0xff] %vm393_vm2, %v2899_v22  ;;  %v2902_v28 = vadd.f32 %v16573_v19, %v2472_v24  ;;  %3408 = vst.msk [vmem:[#allocation4 + $0x8] sm:$0xff] %vm393_vm2, %v3372_v23  ;;  %v3371_v29 = vadd.f32 %v3192_v27, %v2941_v26  ;;  %v16576_v31 = vpop.f32.mrf.mxu0  ;;  %v2951_v23 = vld [vmem:[#allocation4 + $0x50] sm:$0xff] }
 0x191   : > { %v2471_v30 = vld [vmem:[#allocation4 + $0x100] sm:$0xff]  ;;  %v16584_v33 = vpop.f32.mrf.mxu1 }
 0x192   : > { %2938 = vst.msk [vmem:[#allocation4 + $0x108] sm:$0xff] %vm393_vm2, %v2902_v28  ;;  %v2901_v35 = vadd.f32 %v2850_v25, %v2471_v30  ;;  %3407 = vst.msk [vmem:[#allocation4] sm:$0xff] %vm393_vm2, %v3371_v29  ;;  %v3374_v36 = vadd.f32 %v16584_v33, %v2944_v32  ;;  %v2860_v38 = vpop.f32.mrf.mxu0  ;;  %v14646_v28 = vld [vmem:[%s22740_s4 + $0xa0] sm:$0xff]  ;;  %v2954_v30 = vld [vmem:[#allocation4 + $0x68] sm:$0xff] }
 0x193   : > { %v2474_v37 = vld [vmem:[#allocation4 + $0x118] sm:$0xff]  ;;  %v3202_v40 = vpop.f32.mrf.mxu1  ;;  %16947 = vmatprep.subr.mxu1 %v14646_v28 }
 0x194   : > { %2937 = vst.msk [vmem:[#allocation4 + $0x100] sm:$0xff] %vm393_vm2, %v2901_v35  ;;  %v2904_v41 = vadd.f32 %v16576_v31, %v2474_v37  ;;  %3410 = vst.msk [vmem:[#allocation4 + $0x18] sm:$0xff] %vm393_vm2, %v3374_v36  ;;  %v3373_v42 = vadd.f32 %v3202_v40, %v2943_v39  ;;  %v16637_v47 = vpop.f32.mrf.mxu0  ;;  %16948 = vmatpush3.msra.mxu1 %v14646_v28  ;;  %v2953_v36 = vld [vmem:[#allocation4 + $0x60] sm:$0xff] }
 0x195   : > { %v2473_v44 = vld [vmem:[#allocation4 + $0x110] sm:$0xff]  ;;  %v16587_v46 = vpop.f32.mrf.mxu1 }
 0x196   : > { %2940 = vst.msk [vmem:[#allocation4 + $0x118] sm:$0xff] %vm393_vm2, %v2904_v41  ;;  %v2903_v48 = vadd.f32 %v2860_v38, %v2473_v44  ;;  %3409 = vst.msk [vmem:[#allocation4 + $0x10] sm:$0xff] %vm393_vm2, %v3373_v42  ;;  %v3376_v49 = vadd.f32 %v16587_v46, %v2946_v45  ;;  %v3694_v55 = vpop.f32.mrf.mxu0  ;;  %v2956_v42 = vld [vmem:[#allocation4 + $0x78] sm:$0xff] }
 0x197   : > { %v3444_v50 = vld [vmem:[#allocation4 + $0x8] sm:$0xff]  ;;  %v3212_v51 = vpop.f32.mrf.mxu1 }
 0x198   : > { %2939 = vst.msk [vmem:[#allocation4 + $0x110] sm:$0xff] %vm393_vm2, %v2903_v48  ;;  %3412 = vst.msk [vmem:[#allocation4 + $0x28] sm:$0xff] %vm393_vm2, %v3376_v49  ;;  %v3874_v57 = vadd.f32 %v16637_v47, %v3444_v50  ;;  %v3375_v43 = vadd.f32 %v3212_v51, %v2945_v53  ;;  %v16640_v52 = vpop.f32.mrf.mxu0  ;;  %v2955_v49 = vld [vmem:[#allocation4 + $0x70] sm:$0xff] }
 0x199   : > { %v3443_v54 = vld [vmem:[#allocation4] sm:$0xff]  ;;  %v16590_v59 = vpop.f32.mrf.mxu1 }
 0x19a   : > { %3910 = vst.msk [vmem:[#allocation4 + $0x8] sm:$0xff] %vm393_vm2, %v3874_v57  ;;  %3411 = vst.msk [vmem:[#allocation4 + $0x20] sm:$0xff] %vm393_vm2, %v3375_v43  ;;  %v3873_v56 = vadd.f32 %v3694_v55, %v3443_v54  ;;  %v3378_v61 = vadd.f32 %v16590_v59, %v2948_v58  ;;  %v3704_v1 = vpop.f32.mrf.mxu0  ;;  %v14645_v57 = vld [vmem:[%s22740_s4 + $0x98] sm:$0xff]  ;;  %v2958_v54 = vld [vmem:[#allocation4 + $0x88] sm:$0xff] }
 0x19b   : > { %v3446_v62 = vld [vmem:[#allocation4 + $0x18] sm:$0xff]  ;;  %v3222_v0 = vpop.f32.mrf.mxu1  ;;  %16949 = vmatprep.subr.mxu1 %v14645_v57 }
 0x19c   : > { %3909 = vst.msk [vmem:[#allocation4] sm:$0xff] %vm393_vm2, %v3873_v56  ;;  %3414 = vst.msk [vmem:[#allocation4 + $0x38] sm:$0xff] %vm393_vm2, %v3378_v61  ;;  %v3876_v2 = vadd.f32 %v16640_v52, %v3446_v62  ;;  %v3377_v3 = vadd.f32 %v3222_v0, %v2947_v63  ;;  %v16643_v7 = vpop.f32.mrf.mxu0  ;;  %16950 = vmatpush3.msra.mxu1 %v14645_v57  ;;  %v2957_v61 = vld [vmem:[#allocation4 + $0x80] sm:$0xff] }
 0x19d   : > { %v3445_v4 = vld [vmem:[#allocation4 + $0x10] sm:$0xff]  ;;  %v16593_v6 = vpop.f32.mrf.mxu1 }
 0x19e   : > { %3912 = vst.msk [vmem:[#allocation4 + $0x18] sm:$0xff] %vm393_vm2, %v3876_v2  ;;  %3413 = vst.msk [vmem:[#allocation4 + $0x30] sm:$0xff] %vm393_vm2, %v3377_v3  ;;  %v3875_v8 = vadd.f32 %v3704_v1, %v3445_v4  ;;  %v3380_v9 = vadd.f32 %v16593_v6, %v2950_v5  ;;  %v3714_v13 = vpop.f32.mrf.mxu0  ;;  %v14693_v2 = vld [vmem:[%s22740_s4 + $0xf8] sm:$0xff] }
 0x19f   : > { %v3448_v10 = vld [vmem:[#allocation4 + $0x28] sm:$0xff]  ;;  %v3232_v12 = vpop.f32.mrf.mxu1  ;;  %v2960_v4 = vld [vmem:[#allocation4 + $0x98] sm:$0xff]  ;;  %17011 = vmatprep.subr.mxu0 %v14693_v2 }
 0x1a0   : > { %3911 = vst.msk [vmem:[#allocation4 + $0x10] sm:$0xff] %vm393_vm2, %v3875_v8  ;;  %3416 = vst.msk [vmem:[#allocation4 + $0x48] sm:$0xff] %vm393_vm2, %v3380_v9  ;;  %v3878_v14 = vadd.f32 %v16643_v7, %v3448_v10  ;;  %v3379_v15 = vadd.f32 %v3232_v12, %v2949_v11  ;;  %v16646_v19 = vpop.f32.mrf.mxu0  ;;  %17012 = vmatpush3.msra.mxu0 %v14693_v2  ;;  %v14692_v9 = vld [vmem:[%s22740_s4 + $0xf0] sm:$0xff] }
 0x1a1   : > { %v3447_v16 = vld [vmem:[#allocation4 + $0x20] sm:$0xff]  ;;  %v16596_v18 = vpop.f32.mrf.mxu1  ;;  %v2959_v11 = vld [vmem:[#allocation4 + $0x90] sm:$0xff]  ;;  %17013 = vmatprep.subr.mxu0 %v14692_v9 }
 0x1a2   : > { %3914 = vst.msk [vmem:[#allocation4 + $0x28] sm:$0xff] %vm393_vm2, %v3878_v14  ;;  %3415 = vst.msk [vmem:[#allocation4 + $0x40] sm:$0xff] %vm393_vm2, %v3379_v15  ;;  %v3877_v20 = vadd.f32 %v3714_v13, %v3447_v16  ;;  %v3382_v21 = vadd.f32 %v16596_v18, %v2952_v17  ;;  %v3724_v25 = vpop.f32.mrf.mxu0  ;;  %17014 = vmatpush3.msra.mxu0 %v14692_v9  ;;  %v14691_v16 = vld [vmem:[%s22740_s4 + $0xe8] sm:$0xff] }
 0x1a3   : > { %v3450_v22 = vld [vmem:[#allocation4 + $0x38] sm:$0xff]  ;;  %v3242_v24 = vpop.f32.mrf.mxu1  ;;  %v2962_v18 = vld [vmem:[#allocation4 + $0xa8] sm:$0xff]  ;;  %17015 = vmatprep.subr.mxu0 %v14691_v16 }
 0x1a4   : > { %3913 = vst.msk [vmem:[#allocation4 + $0x20] sm:$0xff] %vm393_vm2, %v3877_v20  ;;  %3418 = vst.msk [vmem:[#allocation4 + $0x58] sm:$0xff] %vm393_vm2, %v3382_v21  ;;  %v3880_v26 = vadd.f32 %v16646_v19, %v3450_v22  ;;  %v3381_v27 = vadd.f32 %v3242_v24, %v2951_v23  ;;  %v16649_v32 = vpop.f32.mrf.mxu0  ;;  %v14644_v21 = vld [vmem:[%s22740_s4 + $0x90] sm:$0xff]  ;;  %v14643_v24 = vld [vmem:[%s22740_s4 + $0x88] sm:$0xff]  ;;  %17016 = vmatpush3.msra.mxu0 %v14691_v16 }
 0x1a5   : > { %v3449_v29 = vld [vmem:[#allocation4 + $0x30] sm:$0xff]  ;;  %v16599_v31 = vpop.f32.mrf.mxu1  ;;  %16951 = vmatprep.subr.mxu1 %v14644_v21 }
 0x1a6   : > { %3916 = vst.msk [vmem:[#allocation4 + $0x38] sm:$0xff] %vm393_vm2, %v3880_v26  ;;  %3417 = vst.msk [vmem:[#allocation4 + $0x50] sm:$0xff] %vm393_vm2, %v3381_v27  ;;  %v3879_v33 = vadd.f32 %v3724_v25, %v3449_v29  ;;  %v3384_v34 = vadd.f32 %v16599_v31, %v2954_v30  ;;  %v3734_v38 = vpop.f32.mrf.mxu0  ;;  %v14690_v25 = vld [vmem:[%s22740_s4 + $0xe0] sm:$0xff]  ;;  %16952 = vmatpush3.msra.mxu1 %v14644_v21 }
 0x1a7   : > { %v3452_v35 = vld [vmem:[#allocation4 + $0x48] sm:$0xff]  ;;  %v3252_v37 = vpop.f32.mrf.mxu1  ;;  %v2961_v27 = vld [vmem:[#allocation4 + $0xa0] sm:$0xff]  ;;  %17017 = vmatprep.subr.mxu0 %v14690_v25  ;;  %16953 = vmatprep.subr.mxu1 %v14643_v24 }
 0x1a8   : > { %3915 = vst.msk [vmem:[#allocation4 + $0x30] sm:$0xff] %vm393_vm2, %v3879_v33  ;;  %3420 = vst.msk [vmem:[#allocation4 + $0x68] sm:$0xff] %vm393_vm2, %v3384_v34  ;;  %v3882_v39 = vadd.f32 %v16649_v32, %v3452_v35  ;;  %v3383_v40 = vadd.f32 %v3252_v37, %v2953_v36  ;;  %v16652_v45 = vpop.f32.mrf.mxu0  ;;  %v14642_v30 = vld [vmem:[%s22740_s4 + $0x80] sm:$0xff]  ;;  %17018 = vmatpush3.msra.mxu0 %v14690_v25  ;;  %v14689_v33 = vld [vmem:[%s22740_s4 + $0xd8] sm:$0xff]  ;;  %16954 = vmatpush3.msra.mxu1 %v14643_v24 }
 0x1a9   : > { %v3451_v41 = vld [vmem:[#allocation4 + $0x40] sm:$0xff]  ;;  %v16602_v44 = vpop.f32.mrf.mxu1  ;;  %v14688_v34 = vld [vmem:[%s22740_s4 + $0xd0] sm:$0xff]  ;;  %v2964_v36 = vld [vmem:[#allocation4 + $0xb8] sm:$0xff]  ;;  %17019 = vmatprep.subr.mxu0 %v14689_v33  ;;  %16955 = vmatprep.subr.mxu1 %v14642_v30 }
 0x1aa   : > { %3918 = vst.msk [vmem:[#allocation4 + $0x48] sm:$0xff] %vm393_vm2, %v3882_v39  ;;  %3419 = vst.msk [vmem:[#allocation4 + $0x60] sm:$0xff] %vm393_vm2, %v3383_v40  ;;  %v3881_v46 = vadd.f32 %v3734_v38, %v3451_v41  ;;  %v3386_v47 = vadd.f32 %v16602_v44, %v2956_v42  ;;  %v3744_v53 = vpop.f32.mrf.mxu0  ;;  %17020 = vmatpush3.msra.mxu0 %v14689_v33  ;;  %v2963_v42 = vld [vmem:[#allocation4 + $0xb0] sm:$0xff]  ;;  %16956 = vmatpush3.msra.mxu1 %v14642_v30  ;;  %v19868_v33 = vpop.permute.xlu1 %5076 }
 0x1ab   : > { %v3454_v48 = vld [vmem:[#allocation4 + $0x58] sm:$0xff]  ;;  %v3262_v50 = vpop.f32.mrf.mxu1  ;;  %17021 = vmatprep.subr.mxu0 %v14688_v34  ;;  %22817 = vst [vmem:[#allocation10_spill] sm:$0xff] %v19868_v33 }
 0x1ac   : > { %3917 = vst.msk [vmem:[#allocation4 + $0x40] sm:$0xff] %vm393_vm2, %v3881_v46  ;;  %3422 = vst.msk [vmem:[#allocation4 + $0x78] sm:$0xff] %vm393_vm2, %v3386_v47  ;;  %v3884_v51 = vadd.f32 %v16652_v45, %v3454_v48  ;;  %v3385_v55 = vadd.f32 %v3262_v50, %v2955_v49  ;;  %v16655_v59 = vpop.f32.mrf.mxu0  ;;  %17022 = vmatpush3.msra.mxu0 %v14688_v34  ;;  %v14687_v48 = vld [vmem:[%s22740_s4 + $0xc8] sm:$0xff] }
 0x1ad   : > { %v3453_v43 = vld [vmem:[#allocation4 + $0x50] sm:$0xff]  ;;  %v16605_v58 = vpop.f32.mrf.mxu1  ;;  %v2966_v50 = vld [vmem:[#allocation4 + $0xc8] sm:$0xff]  ;;  %17023 = vmatprep.subr.mxu0 %v14687_v48 }
 0x1ae   : > { %3920 = vst.msk [vmem:[#allocation4 + $0x58] sm:$0xff] %vm393_vm2, %v3884_v51  ;;  %3421 = vst.msk [vmem:[#allocation4 + $0x70] sm:$0xff] %vm393_vm2, %v3385_v55  ;;  %v3883_v52 = vadd.f32 %v3744_v53, %v3453_v43  ;;  %v3388_v60 = vadd.f32 %v16605_v58, %v2958_v54  ;;  %v3754_v63 = vpop.f32.mrf.mxu0  ;;  %v14686_v55 = vld [vmem:[%s22740_s4 + $0xc0] sm:$0xff]  ;;  %17024 = vmatpush3.msra.mxu0 %v14687_v48  ;;  %v14737_v54 = vld [vmem:[%s22740_s4 + $0x138] sm:$0xff] }
 0x1af   : > { %v3456_v56 = vld [vmem:[#allocation4 + $0x68] sm:$0xff]  ;;  %v3272_v62 = vpop.f32.mrf.mxu1  ;;  %17025 = vmatprep.subr.mxu0 %v14686_v55  ;;  %17081 = vmatprep.subr.mxu1 %v14737_v54 }
 0x1b0   : > { %3919 = vst.msk [vmem:[#allocation4 + $0x50] sm:$0xff] %vm393_vm2, %v3883_v52  ;;  %3424 = vst.msk [vmem:[#allocation4 + $0x88] sm:$0xff] %vm393_vm2, %v3388_v60  ;;  %v3886_v0 = vadd.f32 %v16655_v59, %v3456_v56  ;;  %v3387_v1 = vadd.f32 %v3272_v62, %v2957_v61  ;;  %v16658_v6 = vpop.f32.mrf.mxu0  ;;  %v2965_v59 = vld [vmem:[#allocation4 + $0xc0] sm:$0xff]  ;;  %17026 = vmatpush3.msra.mxu0 %v14686_v55 }
 0x1b1   : > { %v3455_v3 = vld [vmem:[#allocation4 + $0x60] sm:$0xff]  ;;  %v16608_v5 = vpop.f32.mrf.mxu1 }
 0x1b2   : > { %3922 = vst.msk [vmem:[#allocation4 + $0x68] sm:$0xff] %vm393_vm2, %v3886_v0  ;;  %3423 = vst.msk [vmem:[#allocation4 + $0x80] sm:$0xff] %vm393_vm2, %v3387_v1  ;;  %v3885_v7 = vadd.f32 %v3754_v63, %v3455_v3  ;;  %v3390_v8 = vadd.f32 %v16608_v5, %v2960_v4  ;;  %v3764_v13 = vpop.f32.mrf.mxu0  ;;  %v2968_v63 = vld [vmem:[#allocation4 + $0xd8] sm:$0xff]  ;;  %v2967_v5 = vld [vmem:[#allocation4 + $0xd0] sm:$0xff] }
 0x1b3   : > { %v3458_v10 = vld [vmem:[#allocation4 + $0x78] sm:$0xff]  ;;  %v3282_v12 = vpop.f32.mrf.mxu1 }
 0x1b4   : > { %3921 = vst.msk [vmem:[#allocation4 + $0x60] sm:$0xff] %vm393_vm2, %v3885_v7  ;;  %3426 = vst.msk [vmem:[#allocation4 + $0x98] sm:$0xff] %vm393_vm2, %v3390_v8  ;;  %v3888_v14 = vadd.f32 %v16658_v6, %v3458_v10  ;;  %v3389_v15 = vadd.f32 %v3282_v12, %v2959_v11  ;;  %v16661_v20 = vpop.f32.mrf.mxu0  ;;  %v2970_v11 = vld [vmem:[#allocation4 + $0xe8] sm:$0xff] }
 0x1b5   : > { %v3457_v17 = vld [vmem:[#allocation4 + $0x70] sm:$0xff]  ;;  %v16611_v19 = vpop.f32.mrf.mxu1 }
 0x1b6   : > { %3924 = vst.msk [vmem:[#allocation4 + $0x78] sm:$0xff] %vm393_vm2, %v3888_v14  ;;  %3425 = vst.msk [vmem:[#allocation4 + $0x90] sm:$0xff] %vm393_vm2, %v3389_v15  ;;  %v3887_v22 = vadd.f32 %v3764_v13, %v3457_v17  ;;  %v3392_v23 = vadd.f32 %v16611_v19, %v2962_v18  ;;  %v3774_v29 = vpop.f32.mrf.mxu0  ;;  %v2969_v17 = vld [vmem:[#allocation4 + $0xe0] sm:$0xff] }
 0x1b7   : > { %v3460_v26 = vld [vmem:[#allocation4 + $0x88] sm:$0xff]  ;;  %v3292_v28 = vpop.f32.mrf.mxu1 }
 0x1b8   : > { %3923 = vst.msk [vmem:[#allocation4 + $0x70] sm:$0xff] %vm393_vm2, %v3887_v22  ;;  %3428 = vst.msk [vmem:[#allocation4 + $0xa8] sm:$0xff] %vm393_vm2, %v3392_v23  ;;  %v3890_v31 = vadd.f32 %v16661_v20, %v3460_v26  ;;  %v3391_v32 = vadd.f32 %v3292_v28, %v2961_v27  ;;  %v16664_v38 = vpop.f32.mrf.mxu0  ;;  %v2972_v23 = vld [vmem:[#allocation4 + $0xf8] sm:$0xff] }
 0x1b9   : > { %v3459_v35 = vld [vmem:[#allocation4 + $0x80] sm:$0xff]  ;;  %v16614_v37 = vpop.f32.mrf.mxu1 }
 0x1ba   : > { %3926 = vst.msk [vmem:[#allocation4 + $0x88] sm:$0xff] %vm393_vm2, %v3890_v31  ;;  %3427 = vst.msk [vmem:[#allocation4 + $0xa0] sm:$0xff] %vm393_vm2, %v3391_v32  ;;  %v3889_v39 = vadd.f32 %v3774_v29, %v3459_v35  ;;  %v3394_v40 = vadd.f32 %v16614_v37, %v2964_v36  ;;  %v3784_v45 = vpop.f32.mrf.mxu0  ;;  %v2971_v29 = vld [vmem:[#allocation4 + $0xf0] sm:$0xff]  ;;  %v19866_v32 = vpop.permute.xlu0 %5066  ;;  %v2974_v37 = vld [vmem:[#allocation4 + $0x108] sm:$0xff] }
 0x1bb   : > { %v3462_v41 = vld [vmem:[#allocation4 + $0x98] sm:$0xff]  ;;  %v3302_v44 = vpop.f32.mrf.mxu1 }
 0x1bc   : > { %3925 = vst.msk [vmem:[#allocation4 + $0x80] sm:$0xff] %vm393_vm2, %v3889_v39  ;;  %3430 = vst.msk [vmem:[#allocation4 + $0xb8] sm:$0xff] %vm393_vm2, %v3394_v40  ;;  %v3892_v46 = vadd.f32 %v16664_v38, %v3462_v41  ;;  %v3393_v47 = vadd.f32 %v3302_v44, %v2963_v42  ;;  %v16667_v51 = vpop.f32.mrf.mxu0  ;;  %v2973_v44 = vld [vmem:[#allocation4 + $0x100] sm:$0xff] }
 0x1bd   : > { %v3461_v49 = vld [vmem:[#allocation4 + $0x90] sm:$0xff]  ;;  %v16617_v53 = vpop.f32.mrf.mxu1 }
 0x1be   : > { %3928 = vst.msk [vmem:[#allocation4 + $0x98] sm:$0xff] %vm393_vm2, %v3892_v46  ;;  %3429 = vst.msk [vmem:[#allocation4 + $0xb0] sm:$0xff] %vm393_vm2, %v3393_v47  ;;  %v3891_v57 = vadd.f32 %v3784_v45, %v3461_v49  ;;  %v3396_v43 = vadd.f32 %v16617_v53, %v2966_v50  ;;  %v3794_v60 = vpop.f32.mrf.mxu0  ;;  %v2976_v50 = vld [vmem:[#allocation4 + $0x118] sm:$0xff]  ;;  %v19876_v55 = vpop.permute.xlu0 %5071 }
 0x1bf   : > { %v3464_v58 = vld [vmem:[#allocation4 + $0xa8] sm:$0xff]  ;;  %v3312_v52 = vpop.f32.mrf.mxu1 }
 0x1c0   : > { %3927 = vst.msk [vmem:[#allocation4 + $0x90] sm:$0xff] %vm393_vm2, %v3891_v57  ;;  %3432 = vst.msk [vmem:[#allocation4 + $0xc8] sm:$0xff] %vm393_vm2, %v3396_v43  ;;  %v3894_v56 = vadd.f32 %v16667_v51, %v3464_v58  ;;  %v3395_v61 = vadd.f32 %v3312_v52, %v2965_v59  ;;  %v16670_v1 = vpop.f32.mrf.mxu0  ;;  %v19878_v57 = vpop.permute.xlu1 %5081  ;;  %v2975_v59 = vld [vmem:[#allocation4 + $0x110] sm:$0xff] }
 0x1c1   : > { %v3463_v62 = vld [vmem:[#allocation4 + $0xa0] sm:$0xff]  ;;  %v16620_v0 = vpop.f32.mrf.mxu1  ;;  %22818 = vst [vmem:[#allocation11_spill] sm:$0xff] %v19878_v57 }
 0x1c2   : > { %3930 = vst.msk [vmem:[#allocation4 + $0xa8] sm:$0xff] %vm393_vm2, %v3894_v56  ;;  %3431 = vst.msk [vmem:[#allocation4 + $0xc0] sm:$0xff] %vm393_vm2, %v3395_v61  ;;  %v3893_v2 = vadd.f32 %v3794_v60, %v3463_v62  ;;  %v3398_v3 = vadd.f32 %v16620_v0, %v2968_v63  ;;  %v3804_v7 = vpop.f32.mrf.mxu0  ;;  %v3946_v0 = vld [vmem:[#allocation4 + $0x8] sm:$0xff] }
 0x1c3   : > { %v3466_v4 = vld [vmem:[#allocation4 + $0xb8] sm:$0xff]  ;;  %v3322_v6 = vpop.f32.mrf.mxu1 }
 0x1c4   : > { %3929 = vst.msk [vmem:[#allocation4 + $0xa0] sm:$0xff] %vm393_vm2, %v3893_v2  ;;  %3434 = vst.msk [vmem:[#allocation4 + $0xd8] sm:$0xff] %vm393_vm2, %v3398_v3  ;;  %v3896_v8 = vadd.f32 %v16670_v1, %v3466_v4  ;;  %v3397_v9 = vadd.f32 %v3322_v6, %v2967_v5  ;;  %v16673_v13 = vpop.f32.mrf.mxu0  ;;  %v3945_v6 = vld [vmem:[#allocation4] sm:$0xff] }
 0x1c5   : > { %v3465_v10 = vld [vmem:[#allocation4 + $0xb0] sm:$0xff]  ;;  %v16623_v12 = vpop.f32.mrf.mxu1 }
 0x1c6   : > { %3932 = vst.msk [vmem:[#allocation4 + $0xb8] sm:$0xff] %vm393_vm2, %v3896_v8  ;;  %3433 = vst.msk [vmem:[#allocation4 + $0xd0] sm:$0xff] %vm393_vm2, %v3397_v9  ;;  %v3895_v14 = vadd.f32 %v3804_v7, %v3465_v10  ;;  %v3400_v15 = vadd.f32 %v16623_v12, %v2970_v11  ;;  %v3814_v19 = vpop.f32.mrf.mxu0  ;;  %v19886_v8 = vpop.permute.xlu0 %5086 }
 0x1c7   : > { %v3468_v16 = vld [vmem:[#allocation4 + $0xc8] sm:$0xff]  ;;  %v3332_v18 = vpop.f32.mrf.mxu1  ;;  %22819 = vst [vmem:[#allocation12_spill] sm:$0xff] %v19886_v8  ;;  %v19888_v9 = vpop.permute.xlu1 %5091 }
 0x1c8   : > { %3931 = vst.msk [vmem:[#allocation4 + $0xb0] sm:$0xff] %vm393_vm2, %v3895_v14  ;;  %3436 = vst.msk [vmem:[#allocation4 + $0xe8] sm:$0xff] %vm393_vm2, %v3400_v15  ;;  %v3898_v20 = vadd.f32 %v16673_v13, %v3468_v16  ;;  %v3399_v21 = vadd.f32 %v3332_v18, %v2969_v17  ;;  %v16676_v25 = vpop.f32.mrf.mxu0  ;;  %v3948_v14 = vld [vmem:[#allocation4 + $0x18] sm:$0xff] }
 0x1c9   : > { %v3467_v22 = vld [vmem:[#allocation4 + $0xc0] sm:$0xff]  ;;  %v16626_v24 = vpop.f32.mrf.mxu1  ;;  %22820 = vst [vmem:[#allocation13_spill] sm:$0xff] %v19888_v9 }
 0x1ca   : > { %3934 = vst.msk [vmem:[#allocation4 + $0xc8] sm:$0xff] %vm393_vm2, %v3898_v20  ;;  %3435 = vst.msk [vmem:[#allocation4 + $0xe0] sm:$0xff] %vm393_vm2, %v3399_v21  ;;  %v3897_v26 = vadd.f32 %v3814_v19, %v3467_v22  ;;  %v3402_v27 = vadd.f32 %v16626_v24, %v2972_v23  ;;  %v3824_v31 = vpop.f32.mrf.mxu0  ;;  %v3947_v20 = vld [vmem:[#allocation4 + $0x10] sm:$0xff] }
 0x1cb   : > { %v3470_v28 = vld [vmem:[#allocation4 + $0xd8] sm:$0xff]  ;;  %v3342_v30 = vpop.f32.mrf.mxu1 }
 0x1cc   : > { %3933 = vst.msk [vmem:[#allocation4 + $0xc0] sm:$0xff] %vm393_vm2, %v3897_v26  ;;  %3438 = vst.msk [vmem:[#allocation4 + $0xf8] sm:$0xff] %vm393_vm2, %v3402_v27  ;;  %v3900_v34 = vadd.f32 %v16676_v25, %v3470_v28  ;;  %v3401_v35 = vadd.f32 %v3342_v30, %v2971_v29  ;;  %v16679_v39 = vpop.f32.mrf.mxu0  ;;  %v3950_v25 = vld [vmem:[#allocation4 + $0x28] sm:$0xff]  ;;  %v19896_v28 = vpop.permute.xlu0 %5096 }
 0x1cd   : > { %v3469_v36 = vld [vmem:[#allocation4 + $0xd0] sm:$0xff]  ;;  %v16629_v38 = vpop.f32.mrf.mxu1  ;;  %22821 = vst [vmem:[#allocation14_spill] sm:$0xff] %v19896_v28  ;;  %v19898_v29 = vpop.permute.xlu1 %5101 }
 0x1ce   : > { %3936 = vst.msk [vmem:[#allocation4 + $0xd8] sm:$0xff] %vm393_vm2, %v3900_v34  ;;  %3437 = vst.msk [vmem:[#allocation4 + $0xf0] sm:$0xff] %vm393_vm2, %v3401_v35  ;;  %v3899_v40 = vadd.f32 %v3824_v31, %v3469_v36  ;;  %v3404_v41 = vadd.f32 %v16629_v38, %v2974_v37  ;;  %v3834_v46 = vpop.f32.mrf.mxu0  ;;  %v3949_v35 = vld [vmem:[#allocation4 + $0x20] sm:$0xff] }
 0x1cf   : > { %v3472_v42 = vld [vmem:[#allocation4 + $0xe8] sm:$0xff]  ;;  %v3352_v45 = vpop.f32.mrf.mxu1  ;;  %22822 = vst [vmem:[#allocation15_spill] sm:$0xff] %v19898_v29 }
 0x1d0   : > { %3935 = vst.msk [vmem:[#allocation4 + $0xd0] sm:$0xff] %vm393_vm2, %v3899_v40  ;;  %3440 = vst.msk [vmem:[#allocation4 + $0x108] sm:$0xff] %vm393_vm2, %v3404_v41  ;;  %v3902_v47 = vadd.f32 %v16679_v39, %v3472_v42  ;;  %v3403_v48 = vadd.f32 %v3352_v45, %v2973_v44  ;;  %v16682_v51 = vpop.f32.mrf.mxu0  ;;  %v3952_v41 = vld [vmem:[#allocation4 + $0x38] sm:$0xff] }
 0x1d1   : > { %v3471_v49 = vld [vmem:[#allocation4 + $0xe0] sm:$0xff]  ;;  %v16632_v53 = vpop.f32.mrf.mxu1 }
 0x1d2   : > { %3938 = vst.msk [vmem:[#allocation4 + $0xe8] sm:$0xff] %vm393_vm2, %v3902_v47  ;;  %3439 = vst.msk [vmem:[#allocation4 + $0x100] sm:$0xff] %vm393_vm2, %v3403_v48  ;;  %v3901_v43 = vadd.f32 %v3834_v46, %v3471_v49  ;;  %v3406_v54 = vadd.f32 %v16632_v53, %v2976_v50  ;;  %v3844_v60 = vpop.f32.mrf.mxu0  ;;  %v3951_v48 = vld [vmem:[#allocation4 + $0x30] sm:$0xff]  ;;  %v19906_v53 = vpop.permute.xlu0 %5106 }
 0x1d3   : > { %v3474_v58 = vld [vmem:[#allocation4 + $0xf8] sm:$0xff]  ;;  %v3362_v52 = vpop.f32.mrf.mxu1  ;;  %22823 = vst [vmem:[#allocation16_spill] sm:$0xff] %v19906_v53 }
 0x1d4   : > { %3937 = vst.msk [vmem:[#allocation4 + $0xe0] sm:$0xff] %vm393_vm2, %v3901_v43  ;;  %3442 = vst.msk [vmem:[#allocation4 + $0x118] sm:$0xff] %vm393_vm2, %v3406_v54  ;;  %v3904_v56 = vadd.f32 %v16682_v51, %v3474_v58  ;;  %v3405_v61 = vadd.f32 %v3362_v52, %v2975_v59  ;;  %v16685_v63 = vpop.f32.mrf.mxu0  ;;  %v19908_v51 = vpop.permute.xlu1 %5111  ;;  %v3954_v59 = vld [vmem:[#allocation4 + $0x48] sm:$0xff] }
 0x1d5   : > { %v3473_v62 = vld [vmem:[#allocation4 + $0xf0] sm:$0xff]  ;;  %v16693_v1 = vpop.f32.mrf.mxu1  ;;  %22824 = vst [vmem:[#allocation17_spill] sm:$0xff] %v19908_v51 }
 0x1d6   : > { %3940 = vst.msk [vmem:[#allocation4 + $0xf8] sm:$0xff] %vm393_vm2, %v3904_v56  ;;  %3441 = vst.msk [vmem:[#allocation4 + $0x110] sm:$0xff] %vm393_vm2, %v3405_v61  ;;  %v3903_v2 = vadd.f32 %v3844_v60, %v3473_v62  ;;  %v4376_v3 = vadd.f32 %v16693_v1, %v3946_v0  ;;  %v3854_v5 = vpop.f32.mrf.mxu0  ;;  %v19917_v62 = vld [vmem:[%s22739_s3] ss:$0 sm:$0xff] }
 0x1d7   : > { %v3476_v4 = vld [vmem:[#allocation4 + $0x108] sm:$0xff]  ;;  %v4196_v7 = vpop.f32.mrf.mxu1  ;;  %v3953_v0 = vld [vmem:[#allocation4 + $0x40] sm:$0xff] }
 0x1d8   : > { %3939 = vst.msk [vmem:[#allocation4 + $0xf0] sm:$0xff] %vm393_vm2, %v3903_v2  ;;  %v3906_v10 = vadd.f32 %v16685_v63, %v3476_v4  ;;  %4412 = vst.msk [vmem:[#allocation4 + $0x8] sm:$0xff] %vm393_vm2, %v4376_v3  ;;  %v4375_v11 = vadd.f32 %v4196_v7, %v3945_v6  ;;  %v16688_v13 = vpop.f32.mrf.mxu0  ;;  %v3956_v7 = vld [vmem:[#allocation4 + $0x58] sm:$0xff] }
 0x1d9   : > { %v3475_v12 = vld [vmem:[#allocation4 + $0x100] sm:$0xff]  ;;  %v16696_v15 = vpop.f32.mrf.mxu1 }
 0x1da   : > { %3942 = vst.msk [vmem:[#allocation4 + $0x108] sm:$0xff] %vm393_vm2, %v3906_v10  ;;  %v3905_v16 = vadd.f32 %v3854_v5, %v3475_v12  ;;  %4411 = vst.msk [vmem:[#allocation4] sm:$0xff] %vm393_vm2, %v4375_v11  ;;  %v4378_v17 = vadd.f32 %v16696_v15, %v3948_v14  ;;  %v3864_v19 = vpop.f32.mrf.mxu0  ;;  %v19921_v12 = vpop.permute.xlu0 %5116 }
 0x1db   : > { %v3478_v18 = vld [vmem:[#allocation4 + $0x118] sm:$0xff]  ;;  %v4206_v21 = vpop.f32.mrf.mxu1  ;;  %22825 = vst [vmem:[#allocation18_spill] sm:$0xff] %v19921_v12 }
 0x1dc   : > { %3941 = vst.msk [vmem:[#allocation4 + $0x100] sm:$0xff] %vm393_vm2, %v3905_v16  ;;  %v3908_v22 = vadd.f32 %v16688_v13, %v3478_v18  ;;  %4414 = vst.msk [vmem:[#allocation4 + $0x18] sm:$0xff] %vm393_vm2, %v4378_v17  ;;  %v4377_v23 = vadd.f32 %v4206_v21, %v3947_v20  ;;  %v16749_v27 = vpop.f32.mrf.mxu0  ;;  %v19923_v13 = vpop.permute.xlu1 %5121 }
 0x1dd   : > { %v3477_v24 = vld [vmem:[#allocation4 + $0x110] sm:$0xff]  ;;  %v16699_v26 = vpop.f32.mrf.mxu1  ;;  %22826 = vst [vmem:[#allocation19_spill] sm:$0xff] %v19923_v13 }
 0x1de   : > { %3944 = vst.msk [vmem:[#allocation4 + $0x118] sm:$0xff] %vm393_vm2, %v3908_v22  ;;  %v3907_v30 = vadd.f32 %v3864_v19, %v3477_v24  ;;  %4413 = vst.msk [vmem:[#allocation4 + $0x10] sm:$0xff] %vm393_vm2, %v4377_v23  ;;  %v4380_v31 = vadd.f32 %v16699_v26, %v3950_v25  ;;  %v4698_v37 = vpop.f32.mrf.mxu0  ;;  %v3955_v19 = vld [vmem:[#allocation4 + $0x50] sm:$0xff] }
 0x1df   : > { %v4448_v34 = vld [vmem:[#allocation4 + $0x8] sm:$0xff]  ;;  %v4216_v36 = vpop.f32.mrf.mxu1 }
 0x1e0   : > { %3943 = vst.msk [vmem:[#allocation4 + $0x110] sm:$0xff] %vm393_vm2, %v3907_v30  ;;  %4416 = vst.msk [vmem:[#allocation4 + $0x28] sm:$0xff] %vm393_vm2, %v4380_v31  ;;  %v4878_v38 = vadd.f32 %v16749_v27, %v4448_v34  ;;  %v4379_v39 = vadd.f32 %v4216_v36, %v3949_v35  ;;  %v16752_v44 = vpop.f32.mrf.mxu0 }
 0x1e1   : > { %v4447_v40 = vld [vmem:[#allocation4] sm:$0xff]  ;;  %v16702_v42 = vpop.f32.mrf.mxu1 }
 0x1e2   : > { %4914 = vst.msk [vmem:[#allocation4 + $0x8] sm:$0xff] %vm393_vm2, %v4878_v38  ;;  %4415 = vst.msk [vmem:[#allocation4 + $0x20] sm:$0xff] %vm393_vm2, %v4379_v39  ;;  %v4877_v45 = vadd.f32 %v4698_v37, %v4447_v40  ;;  %v4382_v46 = vadd.f32 %v16702_v42, %v3952_v41  ;;  %v4708_v50 = vpop.f32.mrf.mxu0  ;;  %v3958_v38 = vld [vmem:[#allocation4 + $0x68] sm:$0xff]  ;;  %v3957_v42 = vld [vmem:[#allocation4 + $0x60] sm:$0xff] }
 0x1e3   : > { %v4450_v47 = vld [vmem:[#allocation4 + $0x18] sm:$0xff]  ;;  %v4226_v49 = vpop.f32.mrf.mxu1 }
 0x1e4   : > { %4913 = vst.msk [vmem:[#allocation4] sm:$0xff] %vm393_vm2, %v4877_v45  ;;  %4418 = vst.msk [vmem:[#allocation4 + $0x38] sm:$0xff] %vm393_vm2, %v4382_v46  ;;  %v4880_v43 = vadd.f32 %v16752_v44, %v4450_v47  ;;  %v4381_v54 = vadd.f32 %v4226_v49, %v3951_v48  ;;  %v16755_v60 = vpop.f32.mrf.mxu0  ;;  %v19935_v46 = vpop.permute.xlu0 %5126 }
 0x1e5   : > { %v4449_v58 = vld [vmem:[#allocation4 + $0x10] sm:$0xff]  ;;  %v16705_v52 = vpop.f32.mrf.mxu1  ;;  %22827 = vst [vmem:[#allocation20_spill] sm:$0xff] %v19935_v46  ;;  %v19937_v47 = vpop.permute.xlu1 %5131 }
 0x1e6   : > { %4916 = vst.msk [vmem:[#allocation4 + $0x18] sm:$0xff] %vm393_vm2, %v4880_v43  ;;  %4417 = vst.msk [vmem:[#allocation4 + $0x30] sm:$0xff] %vm393_vm2, %v4381_v54  ;;  %v4879_v56 = vadd.f32 %v4708_v50, %v4449_v58  ;;  %v4384_v61 = vadd.f32 %v16705_v52, %v3954_v59  ;;  %v4718_v2 = vpop.f32.mrf.mxu0 }
 0x1e7   : > { %v4452_v63 = vld [vmem:[#allocation4 + $0x28] sm:$0xff]  ;;  %v4236_v1 = vpop.f32.mrf.mxu1  ;;  %22828 = vst [vmem:[#allocation21_spill] sm:$0xff] %v19937_v47 }
 0x1e8   : > { %4915 = vst.msk [vmem:[#allocation4 + $0x10] sm:$0xff] %vm393_vm2, %v4879_v56  ;;  %4420 = vst.msk [vmem:[#allocation4 + $0x48] sm:$0xff] %vm393_vm2, %v4384_v61  ;;  %v4882_v3 = vadd.f32 %v16755_v60, %v4452_v63  ;;  %v4383_v4 = vadd.f32 %v4236_v1, %v3953_v0  ;;  %v16758_v11 = vpop.f32.mrf.mxu0  ;;  %v3960_v1 = vld [vmem:[#allocation4 + $0x78] sm:$0xff] }
 0x1e9   : > { %v4950_v5 = vld [vmem:[#allocation4 + $0x8] sm:$0xff]  ;;  %v4451_v6 = vld [vmem:[#allocation4 + $0x20] sm:$0xff]  ;;  %v16708_v10 = vpop.f32.mrf.mxu1 }
 0x1ea   : > { %v4993_v14 = vadd.f32 %v19917_v62, %v4950_v5  ;;  %4918 = vst.msk [vmem:[#allocation4 + $0x28] sm:$0xff] %vm393_vm2, %v4882_v3  ;;  %4419 = vst.msk [vmem:[#allocation4 + $0x40] sm:$0xff] %vm393_vm2, %v4383_v4  ;;  %v4881_v15 = vadd.f32 %v4718_v2, %v4451_v6  ;;  %v4386_v16 = vadd.f32 %v16708_v10, %v3956_v7  ;;  %v4728_v21 = vpop.f32.mrf.mxu0  ;;  %v3959_v5 = vld [vmem:[#allocation4 + $0x70] sm:$0xff] }
 0x1eb   : > { %v4949_v17 = vld [vmem:[#allocation4] sm:$0xff]  ;;  %v4454_v18 = vld [vmem:[#allocation4 + $0x38] sm:$0xff]  ;;  %v4246_v20 = vpop.f32.mrf.mxu1 }
 0x1ec   : > { %v5029_v22 = vmax.f32 %v4993_v14, 0.0  ;;  %v4992_v23 = vadd.f32 %v19917_v62, %v4949_v17  ;;  %4917 = vst.msk [vmem:[#allocation4 + $0x20] sm:$0xff] %vm393_vm2, %v4881_v15  ;;  %4422 = vst.msk [vmem:[#allocation4 + $0x58] sm:$0xff] %vm393_vm2, %v4386_v16  ;;  %v4884_v24 = vadd.f32 %v16758_v11, %v4454_v18  ;;  %v4385_v25 = vadd.f32 %v4246_v20, %v3955_v19  ;;  %v16761_v31 = vpop.f32.mrf.mxu0 }
 0x1ed   : > { %v4952_v26 = vld [vmem:[#allocation4 + $0x18] sm:$0xff]  ;;  %v4453_v27 = vld [vmem:[#allocation4 + $0x30] sm:$0xff]  ;;  %v16711_v30 = vpop.f32.mrf.mxu1 }
 0x1ee   : > { %v5245_v34 = vmul.f32 %v19876_v55, %v5029_v22  ;;  %v5028_v35 = vmax.f32 %v4992_v23, 0.0  ;;  %v4995_v36 = vadd.f32 %v19917_v62, %v4952_v26  ;;  %4920 = vst.msk [vmem:[#allocation4 + $0x38] sm:$0xff] %vm393_vm2, %v4884_v24  ;;  %4421 = vst.msk [vmem:[#allocation4 + $0x50] sm:$0xff] %vm393_vm2, %v4385_v25  ;;  %v4883_v37 = vadd.f32 %v4728_v21, %v4453_v27  ;;  %v4738_v45 = vpop.f32.mrf.mxu0  ;;  %v19954_v21 = vpop.permute.xlu0 %5136  ;;  %v3962_v27 = vld [vmem:[#allocation4 + $0x88] sm:$0xff] }
 0x1ef   : > { %v4951_v39 = vld [vmem:[#allocation4 + $0x10] sm:$0xff]  ;;  %v4388_v40 = vadd.f32 %v16711_v30, %v3958_v38  ;;  %v4456_v41 = vld [vmem:[#allocation4 + $0x48] sm:$0xff]  ;;  %v4256_v44 = vpop.f32.mrf.mxu1  ;;  %22829 = vst [vmem:[#allocation22_spill] sm:$0xff] %v19954_v21  ;;  %v19956_v22 = vpop.permute.xlu1 %5141 }
 0x1f0   : > { %5323 = vst.msk [vmem:[#allocation2 + $0x20] sm:$0xff] %vm393_vm2, %v5245_v34  ;;  %v5031_v48 = vmax.f32 %v4995_v36, 0.0  ;;  %v4994_v49 = vadd.f32 %v19917_v62, %v4951_v39  ;;  %4919 = vst.msk [vmem:[#allocation4 + $0x30] sm:$0xff] %vm393_vm2, %v4883_v37  ;;  %v4886_v50 = vadd.f32 %v16761_v31, %v4456_v41  ;;  %v4387_v43 = vadd.f32 %v4256_v44, %v3957_v42  ;;  %v16764_v52 = vpop.f32.mrf.mxu0  ;;  %v3961_v34 = vld [vmem:[#allocation4 + $0x80] sm:$0xff]  ;;  %v19970_v42 = vld [vmem:[%s22740_s4 + $0x178] sm:$0xff] }
 0x1f1   : > { %v4954_v54 = vld [vmem:[#allocation4 + $0x28] sm:$0xff]  ;;  %4424 = vst.msk [vmem:[#allocation4 + $0x68] sm:$0xff] %vm393_vm2, %v4388_v40  ;;  %v4455_v58 = vld [vmem:[#allocation4 + $0x40] sm:$0xff]  ;;  %v16714_v59 = vpop.f32.mrf.mxu1  ;;  %v5244_v60 = vmul.f32 %v19866_v32, %v5028_v35  ;;  %22830 = vst [vmem:[#allocation23_spill] sm:$0xff] %v19956_v22  ;;  %17151 = vmatprep.subr.mxu0 %v19970_v42 }
 0x1f2   : > { %v5247_v56 = vmul.f32 %v19878_v57, %v5031_v48  ;;  %v5030_v61 = vmax.f32 %v4994_v49, 0.0  ;;  %v4997_v63 = vadd.f32 %v19917_v62, %v4954_v54  ;;  %4922 = vst.msk [vmem:[#allocation4 + $0x48] sm:$0xff] %vm393_vm2, %v4886_v50  ;;  %4423 = vst.msk [vmem:[#allocation4 + $0x60] sm:$0xff] %vm393_vm2, %v4387_v43  ;;  %v4885_v0 = vadd.f32 %v4738_v45, %v4455_v58  ;;  %v4748_v7 = vpop.f32.mrf.mxu0  ;;  %v3964_v49 = vld [vmem:[#allocation4 + $0x98] sm:$0xff]  ;;  %v14988_v57 = vld [vmem:[%s22742_s6 + $0x1a8] sm:$0xff] }
 0x1f3   : > { %v4953_v2 = vld [vmem:[#allocation4 + $0x20] sm:$0xff]  ;;  %v4390_v3 = vadd.f32 %v16714_v59, %v3960_v1  ;;  %v4458_v4 = vld [vmem:[#allocation4 + $0x58] sm:$0xff]  ;;  %v4266_v6 = vpop.f32.mrf.mxu1  ;;  %5322 = vst.msk [vmem:[#allocation2 + $0x18] sm:$0xff] %vm393_vm2, %v5244_v60  ;;  %v3963_v1 = vld [vmem:[#allocation4 + $0x90] sm:$0xff] }
 0x1f4   : > { %5325 = vst.msk [vmem:[#allocation2 + $0x30] sm:$0xff] %vm393_vm2, %v5247_v56  ;;  %v5033_v10 = vmax.f32 %v4997_v63, 0.0  ;;  %v4996_v11 = vadd.f32 %v19917_v62, %v4953_v2  ;;  %4921 = vst.msk [vmem:[#allocation4 + $0x40] sm:$0xff] %vm393_vm2, %v4885_v0  ;;  %v4888_v14 = vadd.f32 %v16764_v52, %v4458_v4  ;;  %v4389_v15 = vadd.f32 %v4266_v6, %v3959_v5  ;;  %v16767_v19 = vpop.f32.mrf.mxu0  ;;  %v19981_v5 = vpop.permute.xlu0 %5146 }
 0x1f5   : > { %v4956_v16 = vld [vmem:[#allocation4 + $0x38] sm:$0xff]  ;;  %4426 = vst.msk [vmem:[#allocation4 + $0x78] sm:$0xff] %vm393_vm2, %v4390_v3  ;;  %v4457_v17 = vld [vmem:[#allocation4 + $0x50] sm:$0xff]  ;;  %v16717_v18 = vpop.f32.mrf.mxu1  ;;  %v5246_v20 = vmul.f32 %v19868_v33, %v5030_v61  ;;  %22831 = vst [vmem:[#allocation24_spill] sm:$0xff] %v19981_v5  ;;  %v19983_v6 = vpop.permute.xlu1 %5151 }
 0x1f6   : > { %v5249_v23 = vmul.f32 %v19888_v9, %v5033_v10  ;;  %v5032_v24 = vmax.f32 %v4996_v11, 0.0  ;;  %v4999_v25 = vadd.f32 %v19917_v62, %v4956_v16  ;;  %4924 = vst.msk [vmem:[#allocation4 + $0x58] sm:$0xff] %vm393_vm2, %v4888_v14  ;;  %4425 = vst.msk [vmem:[#allocation4 + $0x70] sm:$0xff] %vm393_vm2, %v4389_v15  ;;  %v4887_v26 = vadd.f32 %v4748_v7, %v4457_v17  ;;  %v4758_v36 = vpop.f32.mrf.mxu0  ;;  %v14981_v9 = vld [vmem:[%s22742_s6 + $0x170] sm:$0xff]  ;;  %v14971_v33 = vld [vmem:[%s22742_s6 + $0x120] sm:$0xff] }
 0x1f7   : > { %v4955_v30 = vld [vmem:[#allocation4 + $0x30] sm:$0xff]  ;;  %v4392_v31 = vadd.f32 %v16717_v18, %v3962_v27  ;;  %v4276_v35 = vpop.f32.mrf.mxu1  ;;  %5324 = vst.msk [vmem:[#allocation2 + $0x28] sm:$0xff] %vm393_vm2, %v5246_v20  ;;  %22832 = vst [vmem:[#allocation25_spill] sm:$0xff] %v19983_v6 }
 0x1f8   : > { %5327 = vst.msk [vmem:[#allocation2 + $0x40] sm:$0xff] %vm393_vm2, %v5249_v23  ;;  %v5035_v37 = vmax.f32 %v4999_v25, 0.0  ;;  %v4998_v38 = vadd.f32 %v19917_v62, %v4955_v30  ;;  %4923 = vst.msk [vmem:[#allocation4 + $0x50] sm:$0xff] %vm393_vm2, %v4887_v26  ;;  %v4460_v39 = vld [vmem:[#allocation4 + $0x68] sm:$0xff]  ;;  %v4391_v40 = vadd.f32 %v4276_v35, %v3961_v34  ;;  %v5248_v41 = vmul.f32 %v19886_v8, %v5032_v24  ;;  %v16770_v43 = vpop.f32.mrf.mxu0 }
 0x1f9   : > { %v4958_v44 = vld [vmem:[#allocation4 + $0x48] sm:$0xff]  ;;  %4428 = vst.msk [vmem:[#allocation4 + $0x88] sm:$0xff] %vm393_vm2, %v4392_v31  ;;  %v4890_v45 = vadd.f32 %v16767_v19, %v4460_v39  ;;  %v4459_v48 = vld [vmem:[#allocation4 + $0x60] sm:$0xff]  ;;  %v16720_v50 = vpop.f32.mrf.mxu1 }
 0x1fa   : > { %v5251_v54 = vmul.f32 %v19898_v29, %v5035_v37  ;;  %v5034_v58 = vmax.f32 %v4998_v38, 0.0  ;;  %v5001_v59 = vadd.f32 %v19917_v62, %v4958_v44  ;;  %4427 = vst.msk [vmem:[#allocation4 + $0x80] sm:$0xff] %vm393_vm2, %v4391_v40  ;;  %v4889_v52 = vadd.f32 %v4758_v36, %v4459_v48  ;;  %v5432_v60 = vld [vmem:[#allocation2 + $0x15] sm:$0xff]  ;;  %v5433_v61 = vld [vmem:[#allocation2 + $0x1d] sm:$0xff]  ;;  %5326 = vst.msk [vmem:[#allocation2 + $0x38] sm:$0xff] %vm393_vm2, %v5248_v41  ;;  %v4768_v3 = vpop.f32.mrf.mxu0 }
 0x1fb   : > { %v5937_v56 = vld [vmem:[#allocation2 + $0x16] sm:$0xff]  ;;  %v4957_v63 = vld [vmem:[#allocation4 + $0x40] sm:$0xff]  ;;  %4926 = vst.msk [vmem:[#allocation4 + $0x68] sm:$0xff] %vm393_vm2, %v4890_v45  ;;  %v4394_v0 = vadd.f32 %v16720_v50, %v3964_v49  ;;  %16820 = vmatprep.mubr.msk.f32.mxu1 %vm393_vm2, %v5432_v60  ;;  %v4286_v2 = vpop.f32.mrf.mxu1  ;;  %v3966_v19 = vld [vmem:[#allocation4 + $0xa8] sm:$0xff] }
 0x1fc   : > { %16890 = vmatprep.mubr.msk.f32.mxu0 %vm393_vm2, %v5937_v56  ;;  %v5938_v4 = vld [vmem:[#allocation2 + $0x1e] sm:$0xff]  ;;  %5329 = vst.msk [vmem:[#allocation2 + $0x50] sm:$0xff] %vm393_vm2, %v5251_v54  ;;  %v5037_v7 = vmax.f32 %v5001_v59, 0.0  ;;  %v5000_v10 = vadd.f32 %v19917_v62, %v4957_v63  ;;  %4925 = vst.msk [vmem:[#allocation4 + $0x60] sm:$0xff] %vm393_vm2, %v4889_v52  ;;  %v4393_v14 = vadd.f32 %v4286_v2, %v3963_v1  ;;  %16821 = vmatmul.mubr.msk.f32.gmra.mxu1 %vm393_vm2, %v5433_v61  ;;  %v16773_v23 = vpop.f32.mrf.mxu0  ;;  %v20006_v56 = vpop.permute.xlu0 %5156 }
 0x1fd   : > { %v4462_v11 = vld [vmem:[#allocation4 + $0x78] sm:$0xff]  ;;  %16891 = vmatmul.mubr.msk.f32.gmra.mxu0 %vm393_vm2, %v5938_v4  ;;  %v5250_v15 = vmul.f32 %v19896_v28, %v5034_v58  ;;  %4430 = vst.msk [vmem:[#allocation4 + $0x98] sm:$0xff] %vm393_vm2, %v4394_v0  ;;  %v4461_v18 = vld [vmem:[#allocation4 + $0x70] sm:$0xff]  ;;  %v16723_v20 = vpop.f32.mrf.mxu1  ;;  %v3965_v37 = vld [vmem:[#allocation4 + $0xa0] sm:$0xff]  ;;  %v20008_v61 = vpop.permute.xlu1 %5161 }
 0x1fe   : > { %v4960_v16 = vld [vmem:[#allocation4 + $0x58] sm:$0xff]  ;;  %v4892_v17 = vadd.f32 %v16770_v43, %v4462_v11  ;;  %v5253_v24 = vmul.f32 %v19908_v51, %v5037_v7  ;;  %v5036_v25 = vmax.f32 %v5000_v10, 0.0  ;;  %4429 = vst.msk [vmem:[#allocation4 + $0x90] sm:$0xff] %vm393_vm2, %v4393_v14  ;;  %v4891_v27 = vadd.f32 %v4768_v3, %v4461_v18  ;;  %v5434_v30 = vld [vmem:[#allocation2 + $0x25] sm:$0xff]  ;;  %v5435_v34 = vld [vmem:[#allocation2 + $0x2d] sm:$0xff]  ;;  %v4778_v39 = vpop.f32.mrf.mxu0 }
 0x1ff   : > { %v5003_v26 = vadd.f32 %v19917_v62, %v4960_v16  ;;  %v5939_v31 = vld [vmem:[#allocation2 + $0x26] sm:$0xff]  ;;  %5328 = vst.msk [vmem:[#allocation2 + $0x48] sm:$0xff] %vm393_vm2, %v5250_v15  ;;  %v4959_v35 = vld [vmem:[#allocation4 + $0x50] sm:$0xff]  ;;  %v4396_v36 = vadd.f32 %v16723_v20, %v3966_v19  ;;  %16823 = vmatprep.mubr.msk.f32.mxu1 %vm393_vm2, %v5434_v30  ;;  %v4296_v38 = vpop.f32.mrf.mxu1  ;;  %v3968_v49 = vld [vmem:[#allocation4 + $0xb8] sm:$0xff] }
 0x200   : > { %4928 = vst.msk [vmem:[#allocation4 + $0x78] sm:$0xff] %vm393_vm2, %v4892_v17  ;;  %16893 = vmatprep.mubr.msk.f32.mxu0 %vm393_vm2, %v5939_v31  ;;  %v5940_v40 = vld [vmem:[#allocation2 + $0x2e] sm:$0xff]  ;;  %5331 = vst.msk [vmem:[#allocation2 + $0x60] sm:$0xff] %vm393_vm2, %v5253_v24  ;;  %v5002_v44 = vadd.f32 %v19917_v62, %v4959_v35  ;;  %v4395_v48 = vadd.f32 %v4296_v38, %v3965_v37  ;;  %16824 = vmatmul.mubr.msk.f32.gmra.mxu1 %vm393_vm2, %v5435_v34  ;;  %v16776_v59 = vpop.f32.mrf.mxu0 }
 0x201   : > { %v5039_v41 = vmax.f32 %v5003_v26, 0.0  ;;  %4927 = vst.msk [vmem:[#allocation4 + $0x70] sm:$0xff] %vm393_vm2, %v4891_v27  ;;  %v4464_v45 = vld [vmem:[#allocation4 + $0x88] sm:$0xff]  ;;  %16894 = vmatmul.mubr.msk.f32.gmra.mxu0 %vm393_vm2, %v5940_v40  ;;  %v5252_v50 = vmul.f32 %v19906_v53, %v5036_v25  ;;  %4432 = vst.msk [vmem:[#allocation4 + $0xa8] sm:$0xff] %vm393_vm2, %v4396_v36  ;;  %v4463_v54 = vld [vmem:[#allocation4 + $0x80] sm:$0xff]  ;;  %v16726_v58 = vpop.f32.mrf.mxu1 }
 0x202   : > { %v4894_v43 = vadd.f32 %v16773_v23, %v4464_v45  ;;  %v5436_v52 = vld [vmem:[#allocation2 + $0x35] sm:$0xff]  ;;  %22833 = vst [vmem:[#allocation26_spill] sm:$0xff] %v20006_v56  ;;  %22834 = vst [vmem:[#allocation27_spill] sm:$0xff] %v20008_v61  ;;  %v5038_v0 = vmax.f32 %v5002_v44, 0.0  ;;  %v4962_v1 = vld [vmem:[#allocation4 + $0x68] sm:$0xff]  ;;  %v4893_v2 = vadd.f32 %v4778_v39, %v4463_v54  ;;  %v4398_v3 = vadd.f32 %v16726_v58, %v3968_v49  ;;  %v4788_v16 = vpop.f32.mrf.mxu0  ;;  %v20033_v54 = vpop.permute.xlu1 %5171 }
 0x203   : > { %v5941_v60 = vld [vmem:[#allocation2 + $0x36] sm:$0xff]  ;;  %v5255_v63 = vmul.f32 %v19923_v13, %v5039_v41  ;;  %4431 = vst.msk [vmem:[#allocation4 + $0xa0] sm:$0xff] %vm393_vm2, %v4395_v48  ;;  %16826 = vmatprep.mubr.msk.f32.mxu1 %vm393_vm2, %v5436_v52  ;;  %v5942_v7 = vld [vmem:[#allocation2 + $0x3e] sm:$0xff]  ;;  %5330 = vst.msk [vmem:[#allocation2 + $0x58] sm:$0xff] %vm393_vm2, %v5252_v50  ;;  %v5005_v10 = vadd.f32 %v19917_v62, %v4962_v1  ;;  %v4306_v15 = vpop.f32.mrf.mxu1 }
 0x204   : > { %16896 = vmatprep.mubr.msk.f32.mxu0 %vm393_vm2, %v5941_v60  ;;  %v5437_v4 = vld [vmem:[#allocation2 + $0x3d] sm:$0xff]  ;;  %4930 = vst.msk [vmem:[#allocation4 + $0x88] sm:$0xff] %vm393_vm2, %v4894_v43  ;;  %v3967_v14 = vld [vmem:[#allocation4 + $0xb0] sm:$0xff]  ;;  %4929 = vst.msk [vmem:[#allocation4 + $0x80] sm:$0xff] %vm393_vm2, %v4893_v2  ;;  %v5254_v23 = vmul.f32 %v19921_v12, %v5038_v0  ;;  %v16779_v30 = vpop.f32.mrf.mxu0  ;;  %v20031_v43 = vpop.permute.xlu0 %5166 }
 0x205   : > { %v4961_v11 = vld [vmem:[#allocation4 + $0x60] sm:$0xff]  ;;  %5333 = vst.msk [vmem:[#allocation2 + $0x70] sm:$0xff] %vm393_vm2, %v5255_v63  ;;  %4434 = vst.msk [vmem:[#allocation4 + $0xb8] sm:$0xff] %vm393_vm2, %v4398_v3  ;;  %v4466_v18 = vld [vmem:[#allocation4 + $0x98] sm:$0xff]  ;;  %v4397_v19 = vadd.f32 %v4306_v15, %v3967_v14  ;;  %16827 = vmatmul.mubr.msk.f32.gmra.mxu1 %vm393_vm2, %v5437_v4  ;;  %16897 = vmatmul.mubr.msk.f32.gmra.mxu0 %vm393_vm2, %v5942_v7  ;;  %v5041_v24 = vmax.f32 %v5005_v10, 0.0  ;;  %v16729_v27 = vpop.f32.mrf.mxu1 }
 0x206   : > { %v5004_v17 = vadd.f32 %v19917_v62, %v4961_v11  ;;  %v3970_v20 = vld [vmem:[#allocation4 + $0xc8] sm:$0xff]  ;;  %v4896_v25 = vadd.f32 %v16776_v59, %v4466_v18  ;;  %v4465_v26 = vld [vmem:[#allocation4 + $0x90] sm:$0xff]  ;;  %5332 = vst.msk [vmem:[#allocation2 + $0x68] sm:$0xff] %vm393_vm2, %v5254_v23  ;;  %v3969_v48 = vld [vmem:[#allocation4 + $0xc0] sm:$0xff]  ;;  %v4798_v50 = vpop.f32.mrf.mxu0 }
 0x207   : > { %v5438_v31 = vld [vmem:[#allocation2 + $0x45] sm:$0xff]  ;;  %v4964_v36 = vld [vmem:[#allocation4 + $0x78] sm:$0xff]  ;;  %4433 = vst.msk [vmem:[#allocation4 + $0xb0] sm:$0xff] %vm393_vm2, %v4397_v19  ;;  %v4895_v37 = vadd.f32 %v4788_v16, %v4465_v26  ;;  %v4400_v38 = vadd.f32 %v16729_v27, %v3970_v20  ;;  %v5439_v39 = vld [vmem:[#allocation2 + $0x4d] sm:$0xff]  ;;  %v5257_v41 = vmul.f32 %v19937_v47, %v5041_v24  ;;  %v4316_v49 = vpop.f32.mrf.mxu1 }
 0x208   : > { %v5943_v34 = vld [vmem:[#allocation2 + $0x46] sm:$0xff]  ;;  %v5040_v35 = vmax.f32 %v5004_v17, 0.0  ;;  %16829 = vmatprep.mubr.msk.f32.mxu1 %vm393_vm2, %v5438_v31  ;;  %v5944_v40 = vld [vmem:[#allocation2 + $0x4e] sm:$0xff]  ;;  %v5007_v44 = vadd.f32 %v19917_v62, %v4964_v36  ;;  %4932 = vst.msk [vmem:[#allocation4 + $0x98] sm:$0xff] %vm393_vm2, %v4896_v25  ;;  %22835 = vst [vmem:[#allocation28_spill] sm:$0xff] %v20031_v43  ;;  %v4399_v52 = vadd.f32 %v4316_v49, %v3969_v48  ;;  %v16782_v4 = vpop.f32.mrf.mxu0  ;;  %v20058_v48 = vpop.permute.xlu1 %5181 }
 0x209   : > { %16899 = vmatprep.mubr.msk.f32.mxu0 %vm393_vm2, %v5943_v34  ;;  %v4963_v45 = vld [vmem:[#allocation4 + $0x70] sm:$0xff]  ;;  %22836 = vst [vmem:[#allocation29_spill] sm:$0xff] %v20033_v54  ;;  %4931 = vst.msk [vmem:[#allocation4 + $0x90] sm:$0xff] %vm393_vm2, %v4895_v37  ;;  %v4468_v59 = vld [vmem:[#allocation4 + $0xa8] sm:$0xff]  ;;  %16830 = vmatmul.mubr.msk.f32.gmra.mxu1 %vm393_vm2, %v5439_v39  ;;  %v16732_v3 = vpop.f32.mrf.mxu1 }
 0x20a   : > { %v5006_v58 = vadd.f32 %v19917_v62, %v4963_v45  ;;  %4436 = vst.msk [vmem:[#allocation4 + $0xc8] sm:$0xff] %vm393_vm2, %v4400_v38  ;;  %16900 = vmatmul.mubr.msk.f32.gmra.mxu0 %vm393_vm2, %v5944_v40  ;;  %v3972_v60 = vld [vmem:[#allocation4 + $0xd8] sm:$0xff]  ;;  %v5256_v63 = vmul.f32 %v19935_v46, %v5040_v35  ;;  %5335 = vst.msk [vmem:[#allocation2 + $0x80] sm:$0xff] %vm393_vm2, %v5257_v41  ;;  %v5043_v0 = vmax.f32 %v5007_v44, 0.0  ;;  %v4467_v2 = vld [vmem:[#allocation4 + $0xa0] sm:$0xff]  ;;  %v4808_v27 = vpop.f32.mrf.mxu0  ;;  %v20056_v45 = vpop.permute.xlu0 %5176 }
 0x20b   : > { %v4898_v1 = vadd.f32 %v16779_v30, %v4468_v59  ;;  %v5440_v7 = vld [vmem:[#allocation2 + $0x55] sm:$0xff]  ;;  %v4966_v14 = vld [vmem:[#allocation4 + $0x88] sm:$0xff]  ;;  %4435 = vst.msk [vmem:[#allocation4 + $0xc0] sm:$0xff] %vm393_vm2, %v4399_v52  ;;  %v4897_v15 = vadd.f32 %v4798_v50, %v4467_v2  ;;  %v4402_v16 = vadd.f32 %v16732_v3, %v3972_v60  ;;  %v5441_v17 = vld [vmem:[#allocation2 + $0x5d] sm:$0xff]  ;;  %v4326_v26 = vpop.f32.mrf.mxu1 }
 0x20c   : > { %v5945_v10 = vld [vmem:[#allocation2 + $0x56] sm:$0xff]  ;;  %v5042_v11 = vmax.f32 %v5006_v58, 0.0  ;;  %16832 = vmatprep.mubr.msk.f32.mxu1 %vm393_vm2, %v5440_v7  ;;  %v5946_v18 = vld [vmem:[#allocation2 + $0x5e] sm:$0xff]  ;;  %5334 = vst.msk [vmem:[#allocation2 + $0x78] sm:$0xff] %vm393_vm2, %v5256_v63  ;;  %v5259_v19 = vmul.f32 %v19956_v22, %v5043_v0  ;;  %v5009_v20 = vadd.f32 %v19917_v62, %v4966_v14  ;;  %v3974_v35 = vld [vmem:[#allocation4 + $0xe8] sm:$0xff]  ;;  %v16785_v39 = vpop.f32.mrf.mxu0 }
 0x20d   : > { %16902 = vmatprep.mubr.msk.f32.mxu0 %vm393_vm2, %v5945_v10  ;;  %v4965_v23 = vld [vmem:[#allocation4 + $0x80] sm:$0xff]  ;;  %4934 = vst.msk [vmem:[#allocation4 + $0xa8] sm:$0xff] %vm393_vm2, %v4898_v1  ;;  %v4470_v24 = vld [vmem:[#allocation4 + $0xb8] sm:$0xff]  ;;  %v3971_v25 = vld [vmem:[#allocation4 + $0xd0] sm:$0xff]  ;;  %16833 = vmatmul.mubr.msk.f32.gmra.mxu1 %vm393_vm2, %v5441_v17  ;;  %v16735_v38 = vpop.f32.mrf.mxu1 }
 0x20e   : > { %v5008_v30 = vadd.f32 %v19917_v62, %v4965_v23  ;;  %4933 = vst.msk [vmem:[#allocation4 + $0xa0] sm:$0xff] %vm393_vm2, %v4897_v15  ;;  %4438 = vst.msk [vmem:[#allocation4 + $0xd8] sm:$0xff] %vm393_vm2, %v4402_v16  ;;  %v4900_v31 = vadd.f32 %v16782_v4, %v4470_v24  ;;  %v4401_v34 = vadd.f32 %v4326_v26, %v3971_v25  ;;  %16903 = vmatmul.mubr.msk.f32.gmra.mxu0 %vm393_vm2, %v5946_v18  ;;  %v4469_v37 = vld [vmem:[#allocation4 + $0xb0] sm:$0xff]  ;;  %v5442_v40 = vld [vmem:[#allocation2 + $0x65] sm:$0xff]  ;;  %v4818_v7 = vpop.f32.mrf.mxu0 }
 0x20f   : > { %5337 = vst.msk [vmem:[#allocation2 + $0x90] sm:$0xff] %vm393_vm2, %v5259_v19  ;;  %v5045_v36 = vmax.f32 %v5009_v20, 0.0  ;;  %v5947_v41 = vld [vmem:[#allocation2 + $0x66] sm:$0xff]  ;;  %v5258_v44 = vmul.f32 %v19954_v21, %v5042_v11  ;;  %22837 = vst [vmem:[#allocation30_spill] sm:$0xff] %v20056_v45  ;;  %v4968_v50 = vld [vmem:[#allocation4 + $0x98] sm:$0xff]  ;;  %v4899_v58 = vadd.f32 %v4808_v27, %v4469_v37  ;;  %v4404_v59 = vadd.f32 %v16735_v38, %v3974_v35  ;;  %v4336_v4 = vpop.f32.mrf.mxu1 }
 0x210   : > { %22838 = vst [vmem:[#allocation31_spill] sm:$0xff] %v20058_v48  ;;  %v5044_v49 = vmax.f32 %v5008_v30, 0.0  ;;  %4936 = vst.msk [vmem:[#allocation4 + $0xb8] sm:$0xff] %vm393_vm2, %v4900_v31  ;;  %16835 = vmatprep.mubr.msk.f32.mxu1 %vm393_vm2, %v5442_v40  ;;  %16905 = vmatprep.mubr.msk.f32.mxu0 %vm393_vm2, %v5947_v41  ;;  %v5443_v52 = vld [vmem:[#allocation2 + $0x6d] sm:$0xff]  ;;  %v5011_v0 = vadd.f32 %v19917_v62, %v4968_v50  ;;  %v3973_v3 = vld [vmem:[#allocation4 + $0xe0] sm:$0xff]  ;;  %v16788_v19 = vpop.f32.mrf.mxu0 }
 0x211   : > { %4437 = vst.msk [vmem:[#allocation4 + $0xd0] sm:$0xff] %vm393_vm2, %v4401_v34  ;;  %v5948_v60 = vld [vmem:[#allocation2 + $0x6e] sm:$0xff]  ;;  %v5261_v63 = vmul.f32 %v19983_v6, %v5045_v36  ;;  %5336 = vst.msk [vmem:[#allocation2 + $0x88] sm:$0xff] %vm393_vm2, %v5258_v44  ;;  %v4403_v14 = vadd.f32 %v4336_v4, %v3973_v3  ;;  %16836 = vmatmul.mubr.msk.f32.gmra.mxu1 %vm393_vm2, %v5443_v52  ;;  %v3976_v15 = vld [vmem:[#allocation4 + $0xf8] sm:$0xff]  ;;  %v16738_v18 = vpop.f32.mrf.mxu1  ;;  %v20081_v44 = vpop.permute.xlu0 %5186 }
 0x212   : > { %v4967_v1 = vld [vmem:[#allocation4 + $0x90] sm:$0xff]  ;;  %v4472_v2 = vld [vmem:[#allocation4 + $0xc8] sm:$0xff]  ;;  %4935 = vst.msk [vmem:[#allocation4 + $0xb0] sm:$0xff] %vm393_vm2, %v4899_v58  ;;  %4440 = vst.msk [vmem:[#allocation4 + $0xe8] sm:$0xff] %vm393_vm2, %v4404_v59  ;;  %16906 = vmatmul.mubr.msk.f32.gmra.mxu0 %vm393_vm2, %v5948_v60  ;;  %v5047_v16 = vmax.f32 %v5011_v0, 0.0  ;;  %v5260_v24 = vmul.f32 %v19981_v5, %v5044_v49  ;;  %v4406_v30 = vadd.f32 %v16738_v18, %v3976_v15  ;;  %v4828_v41 = vpop.f32.mrf.mxu0  ;;  %v20083_v49 = vpop.permute.xlu1 %5191 }
 0x213   : > { %v5010_v10 = vadd.f32 %v19917_v62, %v4967_v1  ;;  %v4902_v11 = vadd.f32 %v16785_v39, %v4472_v2  ;;  %5339 = vst.msk [vmem:[#allocation2 + $0xa0] sm:$0xff] %vm393_vm2, %v5261_v63  ;;  %v4471_v17 = vld [vmem:[#allocation4 + $0xc0] sm:$0xff]  ;;  %v5444_v20 = vld [vmem:[#allocation2 + $0x75] sm:$0xff]  ;;  %4439 = vst.msk [vmem:[#allocation4 + $0xe0] sm:$0xff] %vm393_vm2, %v4403_v14  ;;  %v4346_v40 = vpop.f32.mrf.mxu1 }
 0x214   : > { %v5949_v23 = vld [vmem:[#allocation2 + $0x76] sm:$0xff]  ;;  %v4970_v26 = vld [vmem:[#allocation4 + $0xa8] sm:$0xff]  ;;  %v4901_v27 = vadd.f32 %v4818_v7, %v4471_v17  ;;  %16838 = vmatprep.mubr.msk.f32.mxu1 %vm393_vm2, %v5444_v20  ;;  %v5950_v34 = vld [vmem:[#allocation2 + $0x7e] sm:$0xff]  ;;  %v5263_v35 = vmul.f32 %v20008_v61, %v5047_v16  ;;  %5338 = vst.msk [vmem:[#allocation2 + $0x98] sm:$0xff] %vm393_vm2, %v5260_v24  ;;  %v16791_v2 = vpop.f32.mrf.mxu0 }
 0x215   : > { %v5046_v25 = vmax.f32 %v5010_v10, 0.0  ;;  %4938 = vst.msk [vmem:[#allocation4 + $0xc8] sm:$0xff] %vm393_vm2, %v4902_v11  ;;  %16908 = vmatprep.mubr.msk.f32.mxu0 %vm393_vm2, %v5949_v23  ;;  %v5445_v31 = vld [vmem:[#allocation2 + $0x7d] sm:$0xff]  ;;  %v5013_v36 = vadd.f32 %v19917_v62, %v4970_v26  ;;  %v3975_v39 = vld [vmem:[#allocation4 + $0xf0] sm:$0xff]  ;;  %22839 = vst [vmem:[#allocation32_spill] sm:$0xff] %v20081_v44  ;;  %v16741_v1 = vpop.f32.mrf.mxu1 }
 0x216   : > { %v4969_v37 = vld [vmem:[#allocation4 + $0xa0] sm:$0xff]  ;;  %v4474_v38 = vld [vmem:[#allocation4 + $0xd8] sm:$0xff]  ;;  %22840 = vst [vmem:[#allocation33_spill] sm:$0xff] %v20083_v49  ;;  %4937 = vst.msk [vmem:[#allocation4 + $0xc0] sm:$0xff] %vm393_vm2, %v4901_v27  ;;  %v4405_v59 = vadd.f32 %v4346_v40, %v3975_v39  ;;  %16839 = vmatmul.mubr.msk.f32.gmra.mxu1 %vm393_vm2, %v5445_v31  ;;  %16909 = vmatmul.mubr.msk.f32.gmra.mxu0 %vm393_vm2, %v5950_v34  ;;  %v4838_v24 = vpop.f32.mrf.mxu0 }
 0x217   : > { %v5012_v50 = vadd.f32 %v19917_v62, %v4969_v37  ;;  %4442 = vst.msk [vmem:[#allocation4 + $0xf8] sm:$0xff] %vm393_vm2, %v4406_v30  ;;  %v4904_v58 = vadd.f32 %v16788_v19, %v4474_v38  ;;  %v3978_v52 = vld [vmem:[#allocation4 + $0x108] sm:$0xff]  ;;  %5341 = vst.msk [vmem:[#allocation2 + $0xb0] sm:$0xff] %vm393_vm2, %v5263_v35  ;;  %v5049_v60 = vmax.f32 %v5013_v36, 0.0  ;;  %v4972_v63 = vld [vmem:[#allocation4 + $0xb8] sm:$0xff]  ;;  %v5262_v4 = vmul.f32 %v20006_v56, %v5046_v25  ;;  %v4356_v23 = vpop.f32.mrf.mxu1 }
 0x218   : > { %v4473_v0 = vld [vmem:[#allocation4 + $0xd0] sm:$0xff]  ;;  %v3977_v3 = vld [vmem:[#allocation4 + $0x100] sm:$0xff]  ;;  %v5015_v10 = vadd.f32 %v19917_v62, %v4972_v63  ;;  %4441 = vst.msk [vmem:[#allocation4 + $0xf0] sm:$0xff] %vm393_vm2, %v4405_v59  ;;  %v4408_v14 = vadd.f32 %v16741_v1, %v3978_v52  ;;  %v3980_v34 = vld [vmem:[#allocation4 + $0x118] sm:$0xff]  ;;  %v16794_v38 = vpop.f32.mrf.mxu0 }
 0x219   : > { %v5048_v7 = vmax.f32 %v5012_v50, 0.0  ;;  %4940 = vst.msk [vmem:[#allocation4 + $0xd8] sm:$0xff] %vm393_vm2, %v4904_v58  ;;  %v4903_v11 = vadd.f32 %v4828_v41, %v4473_v0  ;;  %v5446_v15 = vld [vmem:[#allocation2 + $0x85] sm:$0xff]  ;;  %v5447_v17 = vld [vmem:[#allocation2 + $0x8d] sm:$0xff]  ;;  %v5265_v18 = vmul.f32 %v20033_v54, %v5049_v60  ;;  %5340 = vst.msk [vmem:[#allocation2 + $0xa8] sm:$0xff] %vm393_vm2, %v5262_v4  ;;  %v4407_v31 = vadd.f32 %v4356_v23, %v3977_v3  ;;  %v16744_v37 = vpop.f32.mrf.mxu1  ;;  %v20106_v41 = vpop.permute.xlu0 %5196 }
 0x21a   : > { %v5951_v16 = vld [vmem:[#allocation2 + $0x86] sm:$0xff]  ;;  %v4971_v19 = vld [vmem:[#allocation4 + $0xb0] sm:$0xff]  ;;  %16841 = vmatprep.mubr.msk.f32.mxu1 %vm393_vm2, %v5446_v15  ;;  %v5051_v26 = vmax.f32 %v5015_v10, 0.0  ;;  %4444 = vst.msk [vmem:[#allocation4 + $0x108] sm:$0xff] %vm393_vm2, %v4408_v14  ;;  %22841 = vst [vmem:[#allocation34_spill] sm:$0xff] %v20106_v41  ;;  %v20108_v50 = vpop.permute.xlu1 %5201  ;;  %v4410_v3 = vadd.f32 %v16744_v37, %v3980_v34  ;;  %v4848_v10 = vpop.f32.mrf.mxu0 }
 0x21b   : > { %v4476_v20 = vld [vmem:[#allocation4 + $0xe8] sm:$0xff]  ;;  %16911 = vmatprep.mubr.msk.f32.mxu0 %vm393_vm2, %v5951_v16  ;;  %v5014_v27 = vadd.f32 %v19917_v62, %v4971_v19  ;;  %4939 = vst.msk [vmem:[#allocation4 + $0xd0] sm:$0xff] %vm393_vm2, %v4903_v11  ;;  %16842 = vmatmul.mubr.msk.f32.gmra.mxu1 %vm393_vm2, %v5447_v17  ;;  %5343 = vst.msk [vmem:[#allocation2 + $0xc0] sm:$0xff] %vm393_vm2, %v5265_v18  ;;  %v4475_v36 = vld [vmem:[#allocation4 + $0xe0] sm:$0xff]  ;;  %v5264_v40 = vmul.f32 %v20031_v43, %v5048_v7  ;;  %v4366_v7 = vpop.f32.mrf.mxu1 }
 0x21c   : > { %v5952_v25 = vld [vmem:[#allocation2 + $0x8e] sm:$0xff]  ;;  %v4906_v30 = vadd.f32 %v16791_v2, %v4476_v20  ;;  %22842 = vst [vmem:[#allocation35_spill] sm:$0xff] %v20108_v50  ;;  %v5267_v58 = vmul.f32 %v20058_v48, %v5051_v26  ;;  %4443 = vst.msk [vmem:[#allocation4 + $0x100] sm:$0xff] %vm393_vm2, %v4407_v31  ;;  %v4905_v60 = vadd.f32 %v4838_v24, %v4475_v36  ;;  %v5953_v0 = vld [vmem:[#allocation2 + $0x96] sm:$0xff]  ;;  %v16797_v20 = vpop.f32.mrf.mxu0 }
 0x21d   : > { %16912 = vmatmul.mubr.msk.f32.gmra.mxu0 %vm393_vm2, %v5952_v25  ;;  %v4974_v35 = vld [vmem:[#allocation4 + $0xc8] sm:$0xff]  ;;  %v3979_v39 = vld [vmem:[#allocation4 + $0x110] sm:$0xff]  ;;  %v5050_v59 = vmax.f32 %v5014_v27, 0.0  ;;  %v5449_v1 = vld [vmem:[#allocation2 + $0x9d] sm:$0xff]  ;;  %5342 = vst.msk [vmem:[#allocation2 + $0xb8] sm:$0xff] %vm393_vm2, %v5264_v40 }
 0x21e   : > { %v5017_v52 = vadd.f32 %v19917_v62, %v4974_v35  ;;  %4942 = vst.msk [vmem:[#allocation4 + $0xe8] sm:$0xff] %vm393_vm2, %v4906_v30  ;;  %v5448_v63 = vld [vmem:[#allocation2 + $0x95] sm:$0xff]  ;;  %v4973_v2 = vld [vmem:[#allocation4 + $0xc0] sm:$0xff]  ;;  %16914 = vmatprep.mubr.msk.f32.mxu0 %vm393_vm2, %v5953_v0  ;;  %5345 = vst.msk [vmem:[#allocation2 + $0xd0] sm:$0xff] %vm393_vm2, %v5267_v58  ;;  %v4409_v17 = vadd.f32 %v4366_v7, %v3979_v39  ;;  %v4858_v37 = vpop.f32.mrf.mxu0  ;;  %v20131_v39 = vpop.permute.xlu1 %5211 }
 0x21f   : > { %v4478_v4 = vld [vmem:[#allocation4 + $0xf8] sm:$0xff]  ;;  %16844 = vmatprep.mubr.msk.f32.mxu1 %vm393_vm2, %v5448_v63  ;;  %v5016_v15 = vadd.f32 %v19917_v62, %v4973_v2  ;;  %4941 = vst.msk [vmem:[#allocation4 + $0xe0] sm:$0xff] %vm393_vm2, %v4905_v60  ;;  %4446 = vst.msk [vmem:[#allocation4 + $0x118] sm:$0xff] %vm393_vm2, %v4410_v3  ;;  %v4477_v19 = vld [vmem:[#allocation4 + $0xf0] sm:$0xff]  ;;  %v5266_v23 = vmul.f32 %v20056_v45, %v5050_v59  ;;  %v20139_v60 = vpop.permute.xlu0 %5206 }
 0x220   : > { %v5954_v11 = vld [vmem:[#allocation2 + $0x9e] sm:$0xff]  ;;  %v5053_v14 = vmax.f32 %v5017_v52, 0.0  ;;  %v4908_v16 = vadd.f32 %v16794_v38, %v4478_v4  ;;  %16845 = vmatmul.mubr.msk.f32.gmra.mxu1 %vm393_vm2, %v5449_v1  ;;  %4445 = vst.msk [vmem:[#allocation4 + $0x110] sm:$0xff] %vm393_vm2, %v4409_v17  ;;  %v4907_v27 = vadd.f32 %v4848_v10, %v4477_v19  ;;  %v5955_v31 = vld [vmem:[#allocation2 + $0xa6] sm:$0xff]  ;;  %v5956_v38 = vld [vmem:[#allocation2 + $0xae] sm:$0xff]  ;;  %v16800_v1 = vpop.f32.mrf.mxu0 }
 0x221   : > { %16915 = vmatmul.mubr.msk.f32.gmra.mxu0 %vm393_vm2, %v5954_v11  ;;  %v4976_v18 = vld [vmem:[#allocation4 + $0xd8] sm:$0xff]  ;;  %v5052_v25 = vmax.f32 %v5016_v15, 0.0  ;;  %v5450_v30 = vld [vmem:[#allocation2 + $0xa5] sm:$0xff]  ;;  %v5451_v34 = vld [vmem:[#allocation2 + $0xad] sm:$0xff]  ;;  %5344 = vst.msk [vmem:[#allocation2 + $0xc8] sm:$0xff] %vm393_vm2, %v5266_v23 }
 0x222   : > { %v5269_v24 = vmul.f32 %v20083_v49, %v5053_v14  ;;  %v5019_v26 = vadd.f32 %v19917_v62, %v4976_v18  ;;  %4944 = vst.msk [vmem:[#allocation4 + $0xf8] sm:$0xff] %vm393_vm2, %v4908_v16  ;;  %v4975_v35 = vld [vmem:[#allocation4 + $0xd0] sm:$0xff]  ;;  %v4480_v36 = vld [vmem:[#allocation4 + $0x108] sm:$0xff]  ;;  %16847 = vmatprep.mubr.msk.f32.mxu1 %vm393_vm2, %v5450_v30  ;;  %16917 = vmatprep.mubr.msk.f32.mxu0 %vm393_vm2, %v5955_v31  ;;  %22843 = vst [vmem:[#allocation36_spill] sm:$0xff] %v20131_v39  ;;  %v4868_v17 = vpop.f32.mrf.mxu0 }
 0x223   : > { %v5018_v58 = vadd.f32 %v19917_v62, %v4975_v35  ;;  %4943 = vst.msk [vmem:[#allocation4 + $0xf0] sm:$0xff] %vm393_vm2, %v4907_v27  ;;  %v4910_v59 = vadd.f32 %v16797_v20, %v4480_v36  ;;  %v5268_v52 = vmul.f32 %v20081_v44, %v5052_v25  ;;  %22844 = vst [vmem:[#allocation37_spill] sm:$0xff] %v20139_v60  ;;  %v4479_v0 = vld [vmem:[#allocation4 + $0x100] sm:$0xff]  ;;  %v20153_v27 = vpop.permute.xlu1 %5221  ;;  %v8972_v53 = vld [vmem:[#allocation2 + $0x32] sm:$0xff] }
 0x224   : > { %5347 = vst.msk [vmem:[#allocation2 + $0xe0] sm:$0xff] %vm393_vm2, %v5269_v24  ;;  %v5055_v40 = vmax.f32 %v5019_v26, 0.0  ;;  %16848 = vmatmul.mubr.msk.f32.gmra.mxu1 %vm393_vm2, %v5451_v34  ;;  %v4909_v7 = vadd.f32 %v4858_v37, %v4479_v0  ;;  %v5452_v10 = vld [vmem:[#allocation2 + $0xb5] sm:$0xff]  ;;  %v5453_v14 = vld [vmem:[#allocation2 + $0xbd] sm:$0xff]  ;;  %22845 = vst [vmem:[#allocation38_spill] sm:$0xff] %v20153_v27 }
 0x225   : > { %16918 = vmatmul.mubr.msk.f32.gmra.mxu0 %vm393_vm2, %v5956_v38  ;;  %v4978_v63 = vld [vmem:[#allocation4 + $0xe8] sm:$0xff]  ;;  %v5054_v3 = vmax.f32 %v5018_v58, 0.0  ;;  %4946 = vst.msk [vmem:[#allocation4 + $0x108] sm:$0xff] %vm393_vm2, %v4910_v59  ;;  %v5957_v11 = vld [vmem:[#allocation2 + $0xb6] sm:$0xff]  ;;  %5346 = vst.msk [vmem:[#allocation2 + $0xd8] sm:$0xff] %vm393_vm2, %v5268_v52  ;;  %16850 = vmatprep.mubr.msk.f32.mxu1 %vm393_vm2, %v5452_v10 }
 0x226   : > { %v5271_v2 = vmul.f32 %v20108_v50, %v5055_v40  ;;  %v5021_v4 = vadd.f32 %v19917_v62, %v4978_v63  ;;  %v4977_v15 = vld [vmem:[#allocation4 + $0xe0] sm:$0xff]  ;;  %16920 = vmatprep.mubr.msk.f32.mxu0 %vm393_vm2, %v5957_v11  ;;  %4945 = vst.msk [vmem:[#allocation4 + $0x100] sm:$0xff] %vm393_vm2, %v4909_v7  ;;  %v4482_v20 = vld [vmem:[#allocation4 + $0x118] sm:$0xff]  ;;  %v20158_v40 = vpop.permute.xlu0 %5216 }
 0x227   : > { %v5958_v16 = vld [vmem:[#allocation2 + $0xbe] sm:$0xff]  ;;  %v5020_v19 = vadd.f32 %v19917_v62, %v4977_v15  ;;  %v5270_v23 = vmul.f32 %v20106_v41, %v5054_v3  ;;  %v4912_v25 = vadd.f32 %v16800_v1, %v4482_v20  ;;  %v4481_v26 = vld [vmem:[#allocation4 + $0x110] sm:$0xff]  ;;  %22846 = vst [vmem:[#allocation39_spill] sm:$0xff] %v20158_v40 }
 0x228   : > { %5349 = vst.msk [vmem:[#allocation2 + $0xf0] sm:$0xff] %vm393_vm2, %v5271_v2  ;;  %v5057_v18 = vmax.f32 %v5021_v4, 0.0  ;;  %16851 = vmatmul.mubr.msk.f32.gmra.mxu1 %vm393_vm2, %v5453_v14  ;;  %v4911_v35 = vadd.f32 %v4868_v17, %v4481_v26  ;;  %v5454_v36 = vld [vmem:[#allocation2 + $0xc5] sm:$0xff]  ;;  %v5455_v38 = vld [vmem:[#allocation2 + $0xcd] sm:$0xff]  ;;  %v18287_v10 = vld [vmem:[%s22739_s3] ss:$0 sm:$0xff] }
 0x229   : > { %16921 = vmatmul.mubr.msk.f32.gmra.mxu0 %vm393_vm2, %v5958_v16  ;;  %v4980_v24 = vld [vmem:[#allocation4 + $0xf8] sm:$0xff]  ;;  %v5056_v31 = vmax.f32 %v5020_v19, 0.0  ;;  %v5959_v37 = vld [vmem:[#allocation2 + $0xc6] sm:$0xff]  ;;  %5348 = vst.msk [vmem:[#allocation2 + $0xe8] sm:$0xff] %vm393_vm2, %v5270_v23  ;;  %4948 = vst.msk [vmem:[#allocation4 + $0x118] sm:$0xff] %vm393_vm2, %v4912_v25  ;;  %16853 = vmatprep.mubr.msk.f32.mxu1 %vm393_vm2, %v5454_v36  ;;  %v20176_v16 = vpop.permute.xlu1 %5231 }
 0x22a   : > { %v5273_v30 = vmul.f32 %v20131_v39, %v5057_v18  ;;  %v5023_v34 = vadd.f32 %v19917_v62, %v4980_v24  ;;  %v4979_v58 = vld [vmem:[#allocation4 + $0xf0] sm:$0xff]  ;;  %16923 = vmatprep.mubr.msk.f32.mxu0 %vm393_vm2, %v5959_v37  ;;  %4947 = vst.msk [vmem:[#allocation4 + $0x110] sm:$0xff] %vm393_vm2, %v4911_v35  ;;  %22847 = vst [vmem:[#allocation40_spill] sm:$0xff] %v20176_v16  ;;  %v20182_v20 = vpop.permute.xlu0 %5226 }
 0x22b   : > { %v5960_v59 = vld [vmem:[#allocation2 + $0xce] sm:$0xff]  ;;  %v5022_v63 = vadd.f32 %v19917_v62, %v4979_v58  ;;  %v5272_v0 = vmul.f32 %v20139_v60, %v5056_v31  ;;  %22848 = vst [vmem:[#allocation41_spill] sm:$0xff] %v20182_v20 }
 0x22c   : > { %5351 = vst.msk [vmem:[#allocation2 + $0x100] sm:$0xff] %vm393_vm2, %v5273_v30  ;;  %v5059_v52 = vmax.f32 %v5023_v34, 0.0  ;;  %16854 = vmatmul.mubr.msk.f32.gmra.mxu1 %vm393_vm2, %v5455_v38  ;;  %v4982_v1 = vld [vmem:[#allocation4 + $0x108] sm:$0xff]  ;;  %v5456_v2 = vld [vmem:[#allocation2 + $0xd5] sm:$0xff]  ;;  %v5457_v62 = vld [vmem:[#allocation2 + $0xdd] sm:$0xff] }
 0x22d   : > { %16924 = vmatmul.mubr.msk.f32.gmra.mxu0 %vm393_vm2, %v5960_v59  ;;  %v5961_v3 = vld [vmem:[#allocation2 + $0xd6] sm:$0xff]  ;;  %v5058_v7 = vmax.f32 %v5022_v63, 0.0  ;;  %v5025_v11 = vadd.f32 %v18287_v10, %v4982_v1  ;;  %16856 = vmatprep.mubr.msk.f32.mxu1 %vm393_vm2, %v5456_v2  ;;  %v5962_v14 = vld [vmem:[#allocation2 + $0xde] sm:$0xff]  ;;  %5350 = vst.msk [vmem:[#allocation2 + $0xf8] sm:$0xff] %vm393_vm2, %v5272_v0  ;;  %v20192_v0 = vpop.permute.xlu1 %5241 }
 0x22e   : > { %v5275_v4 = vmul.f32 %v20153_v27, %v5059_v52  ;;  %16926 = vmatprep.mubr.msk.f32.mxu0 %vm393_vm2, %v5961_v3  ;;  %v4981_v15 = vld [vmem:[#allocation4 + $0x100] sm:$0xff]  ;;  %22849 = vst [vmem:[#allocation42_spill] sm:$0xff] %v20192_v0  ;;  %v20197_v3 = vpop.permute.xlu0 %5236 }
 0x22f   : > { %v5061_v17 = vmax.f32 %v5025_v11, 0.0  ;;  %v5024_v18 = vadd.f32 %v18287_v10, %v4981_v15  ;;  %v5274_v19 = vmul.f32 %v20158_v40, %v5058_v7  ;;  %22850 = vst [vmem:[#allocation43_spill] sm:$0xff] %v20197_v3  ;;  %v16819_v15 = vpop.f32.mrf.mxu1 }
 0x230   : > { %5353 = vst.msk [vmem:[#allocation2 + $0x110] sm:$0xff] %vm393_vm2, %v5275_v4  ;;  %16857 = vmatmul.mubr.msk.f32.gmra.mxu1 %vm393_vm2, %v5457_v62  ;;  %v5458_v23 = vld [vmem:[#allocation2 + $0xe5] sm:$0xff]  ;;  %v5459_v25 = vld [vmem:[#allocation2 + $0xed] sm:$0xff]  ;;  %v4984_v31 = vld [vmem:[#allocation4 + $0x118] sm:$0xff] }
 0x231   : > { %16927 = vmatmul.mubr.msk.f32.gmra.mxu0 %vm393_vm2, %v5962_v14  ;;  %v5963_v24 = vld [vmem:[#allocation2 + $0xe6] sm:$0xff]  ;;  %v5277_v26 = vmul.f32 %v20176_v16, %v5061_v17  ;;  %v5060_v30 = vmax.f32 %v5024_v18, 0.0  ;;  %16859 = vmatprep.mubr.msk.f32.mxu1 %vm393_vm2, %v5458_v23  ;;  %v5964_v34 = vld [vmem:[#allocation2 + $0xee] sm:$0xff]  ;;  %5352 = vst.msk [vmem:[#allocation2 + $0x108] sm:$0xff] %vm393_vm2, %v5274_v19  ;;  %v5027_v35 = vadd.f32 %v18287_v10, %v4984_v31  ;;  %v16889_v17 = vpop.f32.mrf.mxu0 }
 0x232   : > { %16929 = vmatprep.mubr.msk.f32.mxu0 %vm393_vm2, %v5963_v24  ;;  %v4983_v36 = vld [vmem:[#allocation4 + $0x110] sm:$0xff]  ;;  %v20209_v24 = vadd.f32 %v16889_v17, %v16819_v15  ;;  %v14777_v15 = vld [vmem:[%s22740_s4 + $0x158] sm:$0xff]  ;;  %v6957_v17 = vld [vmem:[#allocation2 + $0x67] sm:$0xff] }
 0x233   : > { %5355 = vst.msk [vmem:[#allocation2 + $0x120] sm:$0xff] %vm393_vm2, %v5277_v26  ;;  %v5026_v37 = vadd.f32 %v18287_v10, %v4983_v36  ;;  %v5276_v38 = vmul.f32 %v20182_v20, %v5060_v30  ;;  %v5063_v58 = vmax.f32 %v5027_v35, 0.0  ;;  %v6441_v26 = vld [vmem:[#allocation2 + $0x7] sm:$0xff]  ;;  %v6947_v30 = vld [vmem:[#allocation2 + $0x17] sm:$0xff]  ;;  %v6442_v31 = vld [vmem:[#allocation2 + $0xf] sm:$0xff]  ;;  %v20526_v20 = vpop.f32.mrf.mxu0 }
 0x234   : > { %16860 = vmatmul.mubr.msk.f32.gmra.mxu1 %vm393_vm2, %v5459_v25  ;;  %v5460_v59 = vld [vmem:[#allocation2 + $0xf5] sm:$0xff]  ;;  %v5461_v63 = vld [vmem:[#allocation2 + $0xfd] sm:$0xff] }
 0x235   : > { %16930 = vmatmul.mubr.msk.f32.gmra.mxu0 %vm393_vm2, %v5964_v34  ;;  %v5965_v52 = vld [vmem:[#allocation2 + $0xf6] sm:$0xff]  ;;  %v5062_v1 = vmax.f32 %v5026_v37, 0.0  ;;  %16862 = vmatprep.mubr.msk.f32.mxu1 %vm393_vm2, %v5460_v59  ;;  %v5966_v2 = vld [vmem:[#allocation2 + $0xfe] sm:$0xff]  ;;  %5354 = vst.msk [vmem:[#allocation2 + $0x118] sm:$0xff] %vm393_vm2, %v5276_v38  ;;  %v5279_v4 = vmul.f32 %v20192_v0, %v5063_v58  ;;  %v6949_v37 = vld [vmem:[#allocation2 + $0x27] sm:$0xff] }
 0x236   : > { %16932 = vmatprep.mubr.msk.f32.mxu0 %vm393_vm2, %v5965_v52  ;;  %v6948_v34 = vld [vmem:[#allocation2 + $0x1f] sm:$0xff]  ;;  %v14736_v35 = vld [vmem:[%s22740_s4 + $0x130] sm:$0xff]  ;;  %v14735_v58 = vld [vmem:[%s22740_s4 + $0x128] sm:$0xff] }
 0x237   : > { %v5278_v7 = vmul.f32 %v20197_v3, %v5062_v1  ;;  %5357 = vst.msk [vmem:[#allocation2 + $0x130] sm:$0xff] %vm393_vm2, %v5279_v4  ;;  %v18288_v36 = vld [vmem:[%s22740_s4 + $0x138] sm:$0xff]  ;;  %v6950_v38 = vld [vmem:[#allocation2 + $0x2f] sm:$0xff]  ;;  %v20514_v3 = vld [vmem:[#allocation2 + $0xe1] sm:$0xff] }
 0x238   : > { %16863 = vmatmul.mubr.msk.f32.gmra.mxu1 %vm393_vm2, %v5461_v63  ;;  %v5462_v10 = vld [vmem:[#allocation2 + $0x105] sm:$0xff]  ;;  %v5463_v62 = vld [vmem:[#allocation2 + $0x10d] sm:$0xff]  ;;  %v6951_v52 = vld [vmem:[#allocation2 + $0x37] sm:$0xff] }
 0x239   : > { %16933 = vmatmul.mubr.msk.f32.gmra.mxu0 %vm393_vm2, %v5966_v2  ;;  %v5967_v11 = vld [vmem:[#allocation2 + $0x106] sm:$0xff]  ;;  %16865 = vmatprep.mubr.msk.f32.mxu1 %vm393_vm2, %v5462_v10  ;;  %v5968_v14 = vld [vmem:[#allocation2 + $0x10e] sm:$0xff]  ;;  %5356 = vst.msk [vmem:[#allocation2 + $0x128] sm:$0xff] %vm393_vm2, %v5278_v7  ;;  %v14733_v7 = vld [vmem:[%s22740_s4 + $0x118] sm:$0xff] }
 0x23a   : > { %16935 = vmatprep.mubr.msk.f32.mxu0 %vm393_vm2, %v5967_v11  ;;  %v14780_v59 = vld [vmem:[%s22740_s4 + $0x170] sm:$0xff]  ;;  %v6952_v63 = vld [vmem:[#allocation2 + $0x3f] sm:$0xff]  ;;  %v14779_v1 = vld [vmem:[%s22740_s4 + $0x168] sm:$0xff] }
 0x23b   : > { %v6953_v2 = vld [vmem:[#allocation2 + $0x47] sm:$0xff]  ;;  %v6954_v4 = vld [vmem:[#allocation2 + $0x4f] sm:$0xff]  ;;  %v6955_v11 = vld [vmem:[#allocation2 + $0x57] sm:$0xff] }
 0x23c   : > { %16866 = vmatmul.mubr.msk.f32.gmra.mxu1 %vm393_vm2, %v5463_v62  ;;  %v5464_v18 = vld [vmem:[#allocation2 + $0x115] sm:$0xff]  ;;  %v5465_v23 = vld [vmem:[#allocation2 + $0x11d] sm:$0xff]  ;;  %v20519_v0 = vld [vmem:[#allocation2 + $0xe9] sm:$0xff] }
 0x23d   : > { %16936 = vmatmul.mubr.msk.f32.gmra.mxu0 %vm393_vm2, %v5968_v14  ;;  %v5969_v19 = vld [vmem:[#allocation2 + $0x116] sm:$0xff]  ;;  %16868 = vmatprep.mubr.msk.f32.mxu1 %vm393_vm2, %v5464_v18  ;;  %v5970_v25 = vld [vmem:[#allocation2 + $0x11e] sm:$0xff] }
 0x23e   : > { %16938 = vmatprep.mubr.msk.f32.mxu0 %vm393_vm2, %v5969_v19  ;;  %v14778_v10 = vld [vmem:[%s22740_s4 + $0x160] sm:$0xff]  ;;  %v14732_v14 = vld [vmem:[%s22740_s4 + $0x110] sm:$0xff]  ;;  %v14731_v19 = vld [vmem:[%s22740_s4 + $0x108] sm:$0xff] }
 0x23f   : > { %v6956_v62 = vld [vmem:[#allocation2 + $0x5f] sm:$0xff]  ;;  %v6958_v18 = vld [vmem:[#allocation2 + $0x6f] sm:$0xff] }
 0x240   : > { %16869 = vmatmul.mubr.msk.f32.gmra.mxu1 %vm393_vm2, %v5465_v23  ;;  %v14776_v23 = vld [vmem:[%s22740_s4 + $0x150] sm:$0xff]  ;;  %v7481_v60 = vld [vmem:[#allocation2 + $0xf8] sm:$0xff]  ;;  %v7482_v49 = vld [vmem:[#allocation2 + $0x100] sm:$0xff] }
 0x241   : > { %16939 = vmatmul.mubr.msk.f32.gmra.mxu0 %vm393_vm2, %v5970_v25  ;;  %16957 = vmatprep.mubr.msk.f32.mxu1 %vm393_vm2, %v6441_v26  ;;  %v6959_v25 = vld [vmem:[#allocation2 + $0x77] sm:$0xff]  ;;  %v6960_v26 = vld [vmem:[#allocation2 + $0x7f] sm:$0xff] }
 0x242   : > { %17027 = vmatprep.mubr.msk.f32.mxu0 %vm393_vm2, %v6947_v30  ;;  %v7480_v16 = vld [vmem:[#allocation2 + $0xf0] sm:$0xff]  ;;  %v20533_v39 = vld [vmem:[#allocation2 + $0xf9] sm:$0xff]  ;;  %v20542_v45 = vld [vmem:[#allocation2 + $0x101] sm:$0xff] }
 0x243   : > { %v20528_v40 = vld [vmem:[#allocation2 + $0xf1] sm:$0xff]  ;;  %v7486_v6 = vld [vmem:[#allocation2 + $0x120] sm:$0xff] }
 0x244   : > { %16958 = vmatmul.mubr.msk.f32.vlgmr.msra.gmra.mxu1 %vm393_vm2, %v6442_v31  ;;  %v14775_v31 = vld [vmem:[%s22740_s4 + $0x148] sm:$0xff]  ;;  %v7484_v54 = vld [vmem:[#allocation2 + $0x110] sm:$0xff] }
 0x245   : > { %17028 = vmatmul.mubr.msk.f32.vlgmr.msra.gmra.mxu0 %vm393_vm2, %v6948_v34  ;;  %17082 = vmatpush3.msra.mxu1 %v18288_v36  ;;  %v14774_v36 = vld [vmem:[%s22740_s4 + $0x140] sm:$0xff]  ;;  %v20556_v56 = vld [vmem:[#allocation2 + $0x111] sm:$0xff] }
 0x246   : > { %16960 = vmatprep.mubr.msk.f32.mxu1 %vm393_vm2, %v6947_v30  ;;  %17030 = vmatprep.mubr.msk.f32.mxu0 %vm393_vm2, %v6949_v37  ;;  %v14730_v30 = vld [vmem:[%s22740_s4 + $0x100] sm:$0xff]  ;;  %v7488_v47 = vld [vmem:[#allocation2 + $0x130] sm:$0xff] }
 0x247   : > { %17083 = vmatprep.subr.mxu1 %v14736_v35  ;;  %17152 = vmatpush3.msra.mxu0 %v19970_v42  ;;  %v14734_v42 = vld [vmem:[%s22740_s4 + $0x120] sm:$0xff]  ;;  %v20584_v12 = vld [vmem:[#allocation2 + $0x131] sm:$0xff] }
 0x248   : > { %17084 = vmatpush3.msra.mxu1 %v14736_v35  ;;  %17153 = vmatprep.subr.mxu0 %v14780_v59  ;;  %v6962_v35 = vld [vmem:[#allocation2 + $0x8f] sm:$0xff]  ;;  %v20570_v21 = vld [vmem:[#allocation2 + $0x121] sm:$0xff] }
 0x249   : > { %16961 = vmatmul.mubr.msk.f32.gmra.mxu1 %vm393_vm2, %v6948_v34  ;;  %17031 = vmatmul.mubr.msk.f32.gmra.mxu0 %vm393_vm2, %v6950_v38  ;;  %v6961_v34 = vld [vmem:[#allocation2 + $0x87] sm:$0xff] }
 0x24a   : > { %16963 = vmatprep.mubr.msk.f32.mxu1 %vm393_vm2, %v6949_v37  ;;  %17033 = vmatprep.mubr.msk.f32.mxu0 %vm393_vm2, %v6951_v52  ;;  %v20294_v37 = vld [vmem:[%s22740_s4 + $0x1b8] sm:$0xff] }
 0x24b   : > { %17085 = vmatprep.subr.mxu1 %v14735_v58  ;;  %17154 = vmatpush3.msra.mxu0 %v14780_v59  ;;  %v20304_v59 = vld [vmem:[%s22740_s4 + $0x1f8] sm:$0xff] }
 0x24c   : > { %17086 = vmatpush3.msra.mxu1 %v14735_v58  ;;  %17155 = vmatprep.subr.mxu0 %v14779_v1  ;;  %v6964_v58 = vld [vmem:[#allocation2 + $0x9f] sm:$0xff] }
 0x24d   : > { %16964 = vmatmul.mubr.msk.f32.gmra.mxu1 %vm393_vm2, %v6950_v38  ;;  %17034 = vmatmul.mubr.msk.f32.gmra.mxu0 %vm393_vm2, %v6952_v63  ;;  %v6963_v38 = vld [vmem:[#allocation2 + $0x97] sm:$0xff] }
 0x24e   : > { %16966 = vmatprep.mubr.msk.f32.mxu1 %vm393_vm2, %v6951_v52  ;;  %17036 = vmatprep.mubr.msk.f32.mxu0 %vm393_vm2, %v6953_v2  ;;  %v6965_v52 = vld [vmem:[#allocation2 + $0xa7] sm:$0xff] }
 0x24f   : > { %17087 = vmatprep.subr.mxu1 %v14734_v42  ;;  %17156 = vmatpush3.msra.mxu0 %v14779_v1  ;;  %v6968_v1 = vld [vmem:[#allocation2 + $0xbf] sm:$0xff] }
 0x250   : > { %17088 = vmatpush3.msra.mxu1 %v14734_v42  ;;  %17157 = vmatprep.subr.mxu0 %v14778_v10  ;;  %v6967_v42 = vld [vmem:[#allocation2 + $0xb7] sm:$0xff] }
 0x251   : > { %16967 = vmatmul.mubr.msk.f32.gmra.mxu1 %vm393_vm2, %v6952_v63  ;;  %17037 = vmatmul.mubr.msk.f32.gmra.mxu0 %vm393_vm2, %v6954_v4  ;;  %v6966_v63 = vld [vmem:[#allocation2 + $0xaf] sm:$0xff] }
 0x252   : > { %16969 = vmatprep.mubr.msk.f32.mxu1 %vm393_vm2, %v6953_v2  ;;  %17039 = vmatprep.mubr.msk.f32.mxu0 %vm393_vm2, %v6955_v11  ;;  %v6969_v2 = vld [vmem:[#allocation2 + $0xc7] sm:$0xff] }
 0x253   : > { %17089 = vmatprep.subr.mxu1 %v14733_v7  ;;  %17158 = vmatpush3.msra.mxu0 %v14778_v10  ;;  %v6972_v10 = vld [vmem:[#allocation2 + $0xdf] sm:$0xff] }
 0x254   : > { %17090 = vmatpush3.msra.mxu1 %v14733_v7  ;;  %17159 = vmatprep.subr.mxu0 %v14777_v15  ;;  %v6971_v7 = vld [vmem:[#allocation2 + $0xd7] sm:$0xff] }
 0x255   : > { %16970 = vmatmul.mubr.msk.f32.gmra.mxu1 %vm393_vm2, %v6954_v4  ;;  %17040 = vmatmul.mubr.msk.f32.gmra.mxu0 %vm393_vm2, %v6956_v62  ;;  %v6970_v4 = vld [vmem:[#allocation2 + $0xcf] sm:$0xff] }
 0x256   : > { %16972 = vmatprep.mubr.msk.f32.mxu1 %vm393_vm2, %v6955_v11  ;;  %17042 = vmatprep.mubr.msk.f32.mxu0 %vm393_vm2, %v6957_v17  ;;  %v6973_v11 = vld [vmem:[#allocation2 + $0xe7] sm:$0xff] }
 0x257   : > { %17091 = vmatprep.subr.mxu1 %v14732_v14  ;;  %17160 = vmatpush3.msra.mxu0 %v14777_v15  ;;  %v6976_v15 = vld [vmem:[#allocation2 + $0xff] sm:$0xff] }
 0x258   : > { %17092 = vmatpush3.msra.mxu1 %v14732_v14  ;;  %17161 = vmatprep.subr.mxu0 %v14776_v23  ;;  %v6975_v14 = vld [vmem:[#allocation2 + $0xf7] sm:$0xff] }
 0x259   : > { %16973 = vmatmul.mubr.msk.f32.gmra.mxu1 %vm393_vm2, %v6956_v62  ;;  %17043 = vmatmul.mubr.msk.f32.gmra.mxu0 %vm393_vm2, %v6958_v18  ;;  %v6974_v62 = vld [vmem:[#allocation2 + $0xef] sm:$0xff] }
 0x25a   : > { %16975 = vmatprep.mubr.msk.f32.mxu1 %vm393_vm2, %v6957_v17  ;;  %17045 = vmatprep.mubr.msk.f32.mxu0 %vm393_vm2, %v6959_v25  ;;  %v6977_v17 = vld [vmem:[#allocation2 + $0x107] sm:$0xff] }
 0x25b   : > { %17093 = vmatprep.subr.mxu1 %v14731_v19  ;;  %17162 = vmatpush3.msra.mxu0 %v14776_v23  ;;  %v6980_v23 = vld [vmem:[#allocation2 + $0x11f] sm:$0xff] }
 0x25c   : > { %17094 = vmatpush3.msra.mxu1 %v14731_v19  ;;  %17163 = vmatprep.subr.mxu0 %v14775_v31  ;;  %v6979_v19 = vld [vmem:[#allocation2 + $0x117] sm:$0xff] }
 0x25d   : > { %16976 = vmatmul.mubr.msk.f32.gmra.mxu1 %vm393_vm2, %v6958_v18  ;;  %17046 = vmatmul.mubr.msk.f32.gmra.mxu0 %vm393_vm2, %v6960_v26  ;;  %v6978_v18 = vld [vmem:[#allocation2 + $0x10f] sm:$0xff] }
 0x25e   : > { %16978 = vmatprep.mubr.msk.f32.mxu1 %vm393_vm2, %v6959_v25  ;;  %17048 = vmatprep.mubr.msk.f32.mxu0 %vm393_vm2, %v6961_v34  ;;  %v6981_v25 = vld [vmem:[#allocation2 + $0x127] sm:$0xff] }
 0x25f   : > { %17095 = vmatprep.subr.mxu1 %v14730_v30  ;;  %17164 = vmatpush3.msra.mxu0 %v14775_v31  ;;  %v7959_v31 = vld [vmem:[#allocation2 + $0x19] sm:$0xff] }
 0x260   : > { %17096 = vmatpush3.msra.mxu1 %v14730_v30  ;;  %17165 = vmatprep.subr.mxu0 %v14774_v36  ;;  %v7453_v30 = vld [vmem:[#allocation2 + $0x18] sm:$0xff] }
 0x261   : > { %16979 = vmatmul.mubr.msk.f32.gmra.mxu1 %vm393_vm2, %v6960_v26  ;;  %17049 = vmatmul.mubr.msk.f32.gmra.mxu0 %vm393_vm2, %v6962_v35  ;;  %v6982_v26 = vld [vmem:[#allocation2 + $0x12f] sm:$0xff] }
 0x262   : > { %16981 = vmatprep.mubr.msk.f32.mxu1 %vm393_vm2, %v6961_v34  ;;  %17051 = vmatprep.mubr.msk.f32.mxu0 %vm393_vm2, %v6963_v38  ;;  %v7454_v34 = vld [vmem:[#allocation2 + $0x20] sm:$0xff] }
 0x263   : > { %17221 = vmatprep.subr.mxu1 %v20294_v37  ;;  %17166 = vmatpush3.msra.mxu0 %v14774_v36  ;;  %v14824_v36 = vld [vmem:[%s22740_s4 + $0x1b0] sm:$0xff] }
 0x264   : > { %17291 = vmatprep.subr.mxu0 %v20304_v59 }
 0x265   : > { %16982 = vmatmul.mubr.msk.f32.gmra.mxu1 %vm393_vm2, %v6962_v35  ;;  %17052 = vmatmul.mubr.msk.f32.gmra.mxu0 %vm393_vm2, %v6964_v58  ;;  %v7960_v35 = vld [vmem:[#allocation2 + $0x21] sm:$0xff] }
 0x266   : > { %16984 = vmatprep.mubr.msk.f32.mxu1 %vm393_vm2, %v6963_v38  ;;  %17054 = vmatprep.mubr.msk.f32.mxu0 %vm393_vm2, %v6965_v52  ;;  %v7455_v38 = vld [vmem:[#allocation2 + $0x28] sm:$0xff] }
 0x269   : > { %16985 = vmatmul.mubr.msk.f32.gmra.mxu1 %vm393_vm2, %v6964_v58  ;;  %17055 = vmatmul.mubr.msk.f32.gmra.mxu0 %vm393_vm2, %v6966_v63  ;;  %v20354_v58 = vld [vmem:[#allocation2 + $0x29] sm:$0xff] }
 0x26a   : > { %16987 = vmatprep.mubr.msk.f32.mxu1 %vm393_vm2, %v6965_v52  ;;  %17057 = vmatprep.mubr.msk.f32.mxu0 %vm393_vm2, %v6967_v42  ;;  %v7456_v52 = vld [vmem:[#allocation2 + $0x30] sm:$0xff] }
 0x26d   : > { %16988 = vmatmul.mubr.msk.f32.gmra.mxu1 %vm393_vm2, %v6966_v63  ;;  %17058 = vmatmul.mubr.msk.f32.gmra.mxu0 %vm393_vm2, %v6968_v1  ;;  %v20358_v63 = vld [vmem:[#allocation2 + $0x31] sm:$0xff] }
 0x26e   : > { %16990 = vmatprep.mubr.msk.f32.mxu1 %vm393_vm2, %v6967_v42  ;;  %17060 = vmatprep.mubr.msk.f32.mxu0 %vm393_vm2, %v6969_v2  ;;  %v14823_v42 = vld [vmem:[%s22740_s4 + $0x1a8] sm:$0xff] }
 0x271   : > { %16991 = vmatmul.mubr.msk.f32.gmra.mxu1 %vm393_vm2, %v6968_v1  ;;  %17061 = vmatmul.mubr.msk.f32.gmra.mxu0 %vm393_vm2, %v6970_v4  ;;  %v7457_v1 = vld [vmem:[#allocation2 + $0x38] sm:$0xff] }
 0x272   : > { %16993 = vmatprep.mubr.msk.f32.mxu1 %vm393_vm2, %v6969_v2  ;;  %17063 = vmatprep.mubr.msk.f32.mxu0 %vm393_vm2, %v6971_v7  ;;  %v20370_v2 = vld [vmem:[#allocation2 + $0x39] sm:$0xff] }
 0x275   : > { %16994 = vmatmul.mubr.msk.f32.gmra.mxu1 %vm393_vm2, %v6970_v4  ;;  %17064 = vmatmul.mubr.msk.f32.gmra.mxu0 %vm393_vm2, %v6972_v10  ;;  %v7458_v4 = vld [vmem:[#allocation2 + $0x40] sm:$0xff] }
 0x276   : > { %16996 = vmatprep.mubr.msk.f32.mxu1 %vm393_vm2, %v6971_v7  ;;  %17066 = vmatprep.mubr.msk.f32.mxu0 %vm393_vm2, %v6973_v11  ;;  %v14822_v7 = vld [vmem:[%s22740_s4 + $0x1a0] sm:$0xff] }
 0x279   : > { %16997 = vmatmul.mubr.msk.f32.gmra.mxu1 %vm393_vm2, %v6972_v10  ;;  %17067 = vmatmul.mubr.msk.f32.gmra.mxu0 %vm393_vm2, %v6974_v62  ;;  %v14867_v10 = vld [vmem:[%s22740_s4 + $0x1e8] sm:$0xff] }
 0x27a   : > { %16999 = vmatprep.mubr.msk.f32.mxu1 %vm393_vm2, %v6973_v11  ;;  %17069 = vmatprep.mubr.msk.f32.mxu0 %vm393_vm2, %v6975_v14  ;;  %v7459_v11 = vld [vmem:[#allocation2 + $0x48] sm:$0xff] }
 0x27d   : > { %17000 = vmatmul.mubr.msk.f32.gmra.mxu1 %vm393_vm2, %v6974_v62  ;;  %17070 = vmatmul.mubr.msk.f32.gmra.mxu0 %vm393_vm2, %v6976_v15  ;;  %v20386_v62 = vld [vmem:[#allocation2 + $0x49] sm:$0xff] }
 0x27e   : > { %17002 = vmatprep.mubr.msk.f32.mxu1 %vm393_vm2, %v6975_v14  ;;  %17072 = vmatprep.mubr.msk.f32.mxu0 %vm393_vm2, %v6977_v17  ;;  %v7460_v14 = vld [vmem:[#allocation2 + $0x50] sm:$0xff] }
 0x281   : > { %17003 = vmatmul.mubr.msk.f32.gmra.mxu1 %vm393_vm2, %v6976_v15  ;;  %17073 = vmatmul.mubr.msk.f32.gmra.mxu0 %vm393_vm2, %v6978_v18  ;;  %v20391_v15 = vld [vmem:[#allocation2 + $0x51] sm:$0xff] }
 0x282   : > { %17005 = vmatprep.mubr.msk.f32.mxu1 %vm393_vm2, %v6977_v17  ;;  %17075 = vmatprep.mubr.msk.f32.mxu0 %vm393_vm2, %v6979_v19  ;;  %v14821_v17 = vld [vmem:[%s22740_s4 + $0x198] sm:$0xff] }
 0x285   : > { %17006 = vmatmul.mubr.msk.f32.gmra.mxu1 %vm393_vm2, %v6978_v18  ;;  %17076 = vmatmul.mubr.msk.f32.gmra.mxu0 %vm393_vm2, %v6980_v23  ;;  %v14866_v18 = vld [vmem:[%s22740_s4 + $0x1e0] sm:$0xff] }
 0x286   : > { %17008 = vmatprep.mubr.msk.f32.mxu1 %vm393_vm2, %v6979_v19  ;;  %17078 = vmatprep.mubr.msk.f32.mxu0 %vm393_vm2, %v6981_v25  ;;  %v7461_v19 = vld [vmem:[#allocation2 + $0x58] sm:$0xff]  ;;  %v7462_v25 = vld [vmem:[#allocation2 + $0x60] sm:$0xff] }
 0x289   : > { %17009 = vmatmul.mubr.msk.f32.gmra.mxu1 %vm393_vm2, %v6980_v23  ;;  %17079 = vmatmul.mubr.msk.f32.gmra.mxu0 %vm393_vm2, %v6982_v26  ;;  %v20402_v23 = vld [vmem:[#allocation2 + $0x59] sm:$0xff]  ;;  %v20407_v26 = vld [vmem:[#allocation2 + $0x61] sm:$0xff] }
 0x28a   : > { %17097 = vmatprep.mubr.msk.f32.mxu1 %vm393_vm2, %v7453_v30  ;;  %17167 = vmatprep.mubr.msk.f32.mxu0 %vm393_vm2, %v7959_v31  ;;  %v14820_v30 = vld [vmem:[%s22740_s4 + $0x190] sm:$0xff]  ;;  %v14865_v31 = vld [vmem:[%s22740_s4 + $0x1d8] sm:$0xff] }
 0x28d   : > { %17098 = vmatmul.mubr.msk.f32.vlgmr.msra.gmra.mxu1 %vm393_vm2, %v7454_v34  ;;  %17168 = vmatmul.mubr.msk.f32.vlgmr.msra.gmra.mxu0 %vm393_vm2, %v7960_v35  ;;  %v7463_v34 = vld [vmem:[#allocation2 + $0x68] sm:$0xff] }
 0x28e   : > { %17222 = vmatpush3.msra.mxu1 %v20294_v37  ;;  %17100 = vmatprep.mubr.msk.f32.mxu1 %vm393_vm2, %v7455_v38  ;;  %v14868_v37 = vld [vmem:[%s22740_s4 + $0x1f0] sm:$0xff] }
 0x28f   : > { %17170 = vmatprep.mubr.msk.f32.mxu0 %vm393_vm2, %v20354_v58  ;;  %17223 = vmatprep.subr.mxu1 %v14824_v36  ;;  %v20418_v35 = vld [vmem:[#allocation2 + $0x69] sm:$0xff]  ;;  %v20423_v38 = vld [vmem:[#allocation2 + $0x71] sm:$0xff] }
 0x290   : > { %17224 = vmatpush3.msra.mxu1 %v14824_v36  ;;  %17292 = vmatpush3.msra.mxu0 %v20304_v59  ;;  %v20375_v59 = vld [vmem:[#allocation2 + $0x41] sm:$0xff]  ;;  %v7464_v36 = vld [vmem:[#allocation2 + $0x70] sm:$0xff] }
 0x291   : > { %17101 = vmatmul.mubr.msk.f32.gmra.mxu1 %vm393_vm2, %v7456_v52  ;;  %17171 = vmatmul.mubr.msk.f32.gmra.mxu0 %vm393_vm2, %v20358_v63  ;;  %v14819_v52 = vld [vmem:[%s22740_s4 + $0x188] sm:$0xff] }
 0x292   : > { %17103 = vmatprep.mubr.msk.f32.mxu1 %vm393_vm2, %v7457_v1  ;;  %17173 = vmatprep.mubr.msk.f32.mxu0 %vm393_vm2, %v20370_v2  ;;  %v20434_v1 = vld [vmem:[#allocation2 + $0x79] sm:$0xff] }
 0x293   : > { %17225 = vmatprep.subr.mxu1 %v14823_v42  ;;  %17293 = vmatprep.subr.mxu0 %v14868_v37 }
 0x294   : > { %17226 = vmatpush3.msra.mxu1 %v14823_v42  ;;  %17294 = vmatpush3.msra.mxu0 %v14868_v37  ;;  %v14864_v42 = vld [vmem:[%s22740_s4 + $0x1d0] sm:$0xff]  ;;  %v7465_v37 = vld [vmem:[#allocation2 + $0x78] sm:$0xff] }
 0x295   : > { %17104 = vmatmul.mubr.msk.f32.gmra.mxu1 %vm393_vm2, %v7458_v4  ;;  %17174 = vmatmul.mubr.msk.f32.gmra.mxu0 %vm393_vm2, %v20375_v59  ;;  %v7466_v4 = vld [vmem:[#allocation2 + $0x80] sm:$0xff] }
 0x296   : > { %17106 = vmatprep.mubr.msk.f32.mxu1 %vm393_vm2, %v7459_v11  ;;  %17176 = vmatprep.mubr.msk.f32.mxu0 %vm393_vm2, %v20386_v62  ;;  %v14863_v11 = vld [vmem:[%s22740_s4 + $0x1c8] sm:$0xff] }
 0x297   : > { %17227 = vmatprep.subr.mxu1 %v14822_v7  ;;  %17295 = vmatprep.subr.mxu0 %v14867_v10 }
 0x298   : > { %17228 = vmatpush3.msra.mxu1 %v14822_v7  ;;  %17296 = vmatpush3.msra.mxu0 %v14867_v10  ;;  %v20439_v7 = vld [vmem:[#allocation2 + $0x81] sm:$0xff] }
 0x299   : > { %17107 = vmatmul.mubr.msk.f32.gmra.mxu1 %vm393_vm2, %v7460_v14  ;;  %17177 = vmatmul.mubr.msk.f32.gmra.mxu0 %vm393_vm2, %v20391_v15  ;;  %v14818_v10 = vld [vmem:[%s22740_s4 + $0x180] sm:$0xff]  ;;  %v7467_v14 = vld [vmem:[#allocation2 + $0x88] sm:$0xff] }
 0x29a   : > { %17109 = vmatprep.mubr.msk.f32.mxu1 %vm393_vm2, %v7461_v19  ;;  %17179 = vmatprep.mubr.msk.f32.mxu0 %vm393_vm2, %v20402_v23  ;;  %v20455_v19 = vld [vmem:[#allocation2 + $0x91] sm:$0xff] }
 0x29b   : > { %17229 = vmatprep.subr.mxu1 %v14821_v17  ;;  %17297 = vmatprep.subr.mxu0 %v14866_v18 }
 0x29c   : > { %17230 = vmatpush3.msra.mxu1 %v14821_v17  ;;  %17298 = vmatpush3.msra.mxu0 %v14866_v18  ;;  %v20450_v17 = vld [vmem:[#allocation2 + $0x89] sm:$0xff] }
 0x29d   : > { %17110 = vmatmul.mubr.msk.f32.gmra.mxu1 %vm393_vm2, %v7462_v25  ;;  %17180 = vmatmul.mubr.msk.f32.gmra.mxu0 %vm393_vm2, %v20407_v26  ;;  %v7468_v18 = vld [vmem:[#allocation2 + $0x90] sm:$0xff]  ;;  %v14862_v25 = vld [vmem:[%s22740_s4 + $0x1c0] sm:$0xff] }
 0x29e   : > { %17112 = vmatprep.mubr.msk.f32.mxu1 %vm393_vm2, %v7463_v34  ;;  %17182 = vmatprep.mubr.msk.f32.mxu0 %vm393_vm2, %v20418_v35  ;;  %v20468_v34 = vld [vmem:[#allocation2 + $0x99] sm:$0xff] }
 0x29f   : > { %17231 = vmatprep.subr.mxu1 %v14820_v30  ;;  %17299 = vmatprep.subr.mxu0 %v14865_v31 }
 0x2a0   : > { %17232 = vmatpush3.msra.mxu1 %v14820_v30  ;;  %17300 = vmatpush3.msra.mxu0 %v14865_v31  ;;  %v20463_v30 = vld [vmem:[%s22740_s4 + $0x238] sm:$0xff] }
 0x2a1   : > { %17113 = vmatmul.mubr.msk.f32.gmra.mxu1 %vm393_vm2, %v7464_v36  ;;  %17183 = vmatmul.mubr.msk.f32.gmra.mxu0 %vm393_vm2, %v20423_v38  ;;  %v7469_v31 = vld [vmem:[#allocation2 + $0x98] sm:$0xff]  ;;  %v7470_v36 = vld [vmem:[#allocation2 + $0xa0] sm:$0xff] }
 0x2a2   : > { %17115 = vmatprep.mubr.msk.f32.mxu1 %vm393_vm2, %v7465_v37  ;;  %17185 = vmatprep.mubr.msk.f32.mxu0 %vm393_vm2, %v20434_v1  ;;  %v20479_v37 = vld [vmem:[#allocation2 + $0xa9] sm:$0xff] }
 0x2a3   : > { %17233 = vmatprep.subr.mxu1 %v14819_v52  ;;  %17301 = vmatprep.subr.mxu0 %v14864_v42 }
 0x2a4   : > { %17234 = vmatpush3.msra.mxu1 %v14819_v52  ;;  %17302 = vmatpush3.msra.mxu0 %v14864_v42  ;;  %v20474_v52 = vld [vmem:[#allocation2 + $0xa1] sm:$0xff] }
 0x2a5   : > { %17116 = vmatmul.mubr.msk.f32.gmra.mxu1 %vm393_vm2, %v7466_v4  ;;  %17186 = vmatmul.mubr.msk.f32.gmra.mxu0 %vm393_vm2, %v20439_v7  ;;  %v7471_v42 = vld [vmem:[#allocation2 + $0xa8] sm:$0xff]  ;;  %v7472_v4 = vld [vmem:[#allocation2 + $0xb0] sm:$0xff] }
 0x2a6   : > { %17118 = vmatprep.mubr.msk.f32.mxu1 %vm393_vm2, %v7467_v14  ;;  %17188 = vmatprep.mubr.msk.f32.mxu0 %vm393_vm2, %v20450_v17  ;;  %v20489_v14 = vld [vmem:[#allocation2 + $0xb9] sm:$0xff] }
 0x2a7   : > { %17235 = vmatprep.subr.mxu1 %v14818_v10  ;;  %17303 = vmatprep.subr.mxu0 %v14863_v11 }
 0x2a8   : > { %17236 = vmatpush3.msra.mxu1 %v14818_v10  ;;  %17304 = vmatpush3.msra.mxu0 %v14863_v11  ;;  %v20484_v10 = vld [vmem:[#allocation2 + $0xb1] sm:$0xff] }
 0x2a9   : > { %17119 = vmatmul.mubr.msk.f32.gmra.mxu1 %vm393_vm2, %v7468_v18  ;;  %17189 = vmatmul.mubr.msk.f32.gmra.mxu0 %vm393_vm2, %v20455_v19  ;;  %v7473_v11 = vld [vmem:[#allocation2 + $0xb8] sm:$0xff]  ;;  %v7474_v18 = vld [vmem:[#allocation2 + $0xc0] sm:$0xff] }
 0x2aa   : > { %17121 = vmatprep.mubr.msk.f32.mxu1 %vm393_vm2, %v7469_v31  ;;  %17191 = vmatprep.mubr.msk.f32.mxu0 %vm393_vm2, %v20468_v34  ;;  %v7475_v31 = vld [vmem:[#allocation2 + $0xc8] sm:$0xff] }
 0x2ab   : > { %17305 = vmatprep.subr.mxu0 %v14862_v25  ;;  %17361 = vmatprep.subr.mxu1 %v20463_v30 }
 0x2ac   : > { %17306 = vmatpush3.msra.mxu0 %v14862_v25  ;;  %v20494_v25 = vld [vmem:[#allocation2 + $0xc1] sm:$0xff] }
 0x2ad   : > { %17122 = vmatmul.mubr.msk.f32.gmra.mxu1 %vm393_vm2, %v7470_v36  ;;  %17192 = vmatmul.mubr.msk.f32.gmra.mxu0 %vm393_vm2, %v20474_v52  ;;  %v20499_v36 = vld [vmem:[#allocation2 + $0xc9] sm:$0xff] }
 0x2ae   : > { %17124 = vmatprep.mubr.msk.f32.mxu1 %vm393_vm2, %v7471_v42  ;;  %17194 = vmatprep.mubr.msk.f32.mxu0 %vm393_vm2, %v20479_v37  ;;  %v7476_v42 = vld [vmem:[#allocation2 + $0xd0] sm:$0xff] }
 0x2b1   : > { %17125 = vmatmul.mubr.msk.f32.gmra.mxu1 %vm393_vm2, %v7472_v4  ;;  %17195 = vmatmul.mubr.msk.f32.gmra.mxu0 %vm393_vm2, %v20484_v10  ;;  %v20504_v4 = vld [vmem:[#allocation2 + $0xd1] sm:$0xff] }
 0x2b2   : > { %17127 = vmatprep.mubr.msk.f32.mxu1 %vm393_vm2, %v7473_v11  ;;  %17197 = vmatprep.mubr.msk.f32.mxu0 %vm393_vm2, %v20489_v14  ;;  %v7477_v11 = vld [vmem:[#allocation2 + $0xd8] sm:$0xff] }
 0x2b5   : > { %17128 = vmatmul.mubr.msk.f32.gmra.mxu1 %vm393_vm2, %v7474_v18  ;;  %17198 = vmatmul.mubr.msk.f32.gmra.mxu0 %vm393_vm2, %v20494_v25  ;;  %v20509_v18 = vld [vmem:[#allocation2 + $0xd9] sm:$0xff] }
 0x2b6   : > { %17130 = vmatprep.mubr.msk.f32.mxu1 %vm393_vm2, %v7475_v31  ;;  %17200 = vmatprep.mubr.msk.f32.mxu0 %vm393_vm2, %v20499_v36  ;;  %v7478_v31 = vld [vmem:[#allocation2 + $0xe0] sm:$0xff] }
 0x2b9   : > { %17131 = vmatmul.mubr.msk.f32.gmra.mxu1 %vm393_vm2, %v7476_v42  ;;  %17201 = vmatmul.mubr.msk.f32.gmra.mxu0 %vm393_vm2, %v20504_v4  ;;  %v7479_v42 = vld [vmem:[#allocation2 + $0xe8] sm:$0xff] }
 0x2ba   : > { %17133 = vmatprep.mubr.msk.f32.mxu1 %vm393_vm2, %v7477_v11  ;;  %17203 = vmatprep.mubr.msk.f32.mxu0 %vm393_vm2, %v20509_v18  ;;  %v20524_v11 = vpop.f32.mrf.mxu1 }
 0x2bc   : > { %v16822_v27 = vpop.f32.mrf.mxu1 }
 0x2bd   : > { %17134 = vmatmul.mubr.msk.f32.gmra.mxu1 %vm393_vm2, %v7478_v31  ;;  %17204 = vmatmul.mubr.msk.f32.gmra.mxu0 %vm393_vm2, %v20514_v3  ;;  %v16892_v31 = vpop.f32.mrf.mxu0 }
 0x2be   : > { %17136 = vmatprep.mubr.msk.f32.mxu1 %vm393_vm2, %v7479_v42  ;;  %17206 = vmatprep.mubr.msk.f32.mxu0 %vm393_vm2, %v20519_v0  ;;  %v20535_v42 = vadd.f32 %v16892_v31, %v16822_v27  ;;  %v5658_v41 = vpop.f32.mrf.mxu1  ;;  %v7483_v27 = vld [vmem:[#allocation2 + $0x108] sm:$0xff] }
 0x2bf   : > { %v6164_v50 = vpop.f32.mrf.mxu0  ;;  %v20547_v31 = vld [vmem:[#allocation2 + $0x109] sm:$0xff] }
 0x2c0   : > { %v20540_v44 = vadd.f32 %v6164_v50, %v5658_v41 }
 0x2c1   : > { %17137 = vmatmul.mubr.msk.f32.gmra.mxu1 %vm393_vm2, %v7480_v16  ;;  %17207 = vmatmul.mubr.msk.f32.gmra.mxu0 %vm393_vm2, %v20528_v40  ;;  %v16825_v16 = vpop.f32.mrf.mxu1  ;;  %v16895_v48 = vpop.f32.mrf.mxu0 }
 0x2c2   : > { %17139 = vmatprep.mubr.msk.f32.mxu1 %vm393_vm2, %v7481_v60  ;;  %17209 = vmatprep.mubr.msk.f32.mxu0 %vm393_vm2, %v20533_v39  ;;  %v20549_v60 = vadd.f32 %v16895_v48, %v16825_v16  ;;  %v7485_v48 = vld [vmem:[#allocation2 + $0x118] sm:$0xff] }
 0x2c3   : > { %v5668_v41 = vpop.f32.mrf.mxu1  ;;  %v6174_v50 = vpop.f32.mrf.mxu0  ;;  %v20561_v16 = vld [vmem:[#allocation2 + $0x119] sm:$0xff] }
 0x2c4   : > { %v20554_v43 = vadd.f32 %v6174_v50, %v5668_v41 }
 0x2c5   : > { %17140 = vmatmul.mubr.msk.f32.gmra.mxu1 %vm393_vm2, %v7482_v49  ;;  %17210 = vmatmul.mubr.msk.f32.gmra.mxu0 %vm393_vm2, %v20542_v45  ;;  %v16828_v49 = vpop.f32.mrf.mxu1  ;;  %v16898_v61 = vpop.f32.mrf.mxu0 }
 0x2c6   : > { %17142 = vmatprep.mubr.msk.f32.mxu1 %vm393_vm2, %v7483_v27  ;;  %17212 = vmatprep.mubr.msk.f32.mxu0 %vm393_vm2, %v20547_v31  ;;  %v20563_v27 = vadd.f32 %v16898_v61, %v16828_v49  ;;  %v7487_v61 = vld [vmem:[#allocation2 + $0x128] sm:$0xff] }
 0x2c7   : > { %v5678_v41 = vpop.f32.mrf.mxu1  ;;  %v6184_v50 = vpop.f32.mrf.mxu0  ;;  %v20575_v49 = vld [vmem:[#allocation2 + $0x129] sm:$0xff] }
 0x2c8   : > { %v20568_v5 = vadd.f32 %v6184_v50, %v5678_v41 }
 0x2c9   : > { %17143 = vmatmul.mubr.msk.f32.gmra.mxu1 %vm393_vm2, %v7484_v54  ;;  %17213 = vmatmul.mubr.msk.f32.gmra.mxu0 %vm393_vm2, %v20556_v56  ;;  %v16831_v54 = vpop.f32.mrf.mxu1 }
 0x2ca   : > { %17145 = vmatprep.mubr.msk.f32.mxu1 %vm393_vm2, %v7485_v48  ;;  %17215 = vmatprep.mubr.msk.f32.mxu0 %vm393_vm2, %v20561_v16  ;;  %v16901_v22 = vpop.f32.mrf.mxu0 }
 0x2cb   : > { %v20577_v48 = vadd.f32 %v16901_v22, %v16831_v54  ;;  %v5688_v41 = vpop.f32.mrf.mxu1  ;;  %v8971_v22 = vld [vmem:[#allocation2 + $0x2a] sm:$0xff] }
 0x2cc   : > { %v6194_v50 = vpop.f32.mrf.mxu0 }
 0x2cd   : > { %17146 = vmatmul.mubr.msk.f32.gmra.mxu1 %vm393_vm2, %v7486_v6  ;;  %17216 = vmatmul.mubr.msk.f32.gmra.mxu0 %vm393_vm2, %v20570_v21  ;;  %v20582_v46 = vadd.f32 %v6194_v50, %v5688_v41  ;;  %v16834_v6 = vpop.f32.mrf.mxu1 }
 0x2ce   : > { %17148 = vmatprep.mubr.msk.f32.mxu1 %vm393_vm2, %v7487_v61  ;;  %17218 = vmatprep.mubr.msk.f32.mxu0 %vm393_vm2, %v20575_v49  ;;  %v16904_v13 = vpop.f32.mrf.mxu0 }
 0x2cf   : > { %v20589_v54 = vadd.f32 %v16904_v13, %v16834_v6  ;;  %v5698_v61 = vpop.f32.mrf.mxu1 }
 0x2d0   : > { %v6204_v41 = vpop.f32.mrf.mxu0 }
 0x2d1   : > { %17149 = vmatmul.mubr.msk.f32.gmra.mxu1 %vm393_vm2, %v7488_v47  ;;  %17219 = vmatmul.mubr.msk.f32.gmra.mxu0 %vm393_vm2, %v20584_v12  ;;  %v20594_v50 = vadd.f32 %v6204_v41, %v5698_v61  ;;  %v14912_v47 = vld [vmem:[%s22740_s4 + $0x230] sm:$0xff]  ;;  %v16837_v51 = vpop.f32.mrf.mxu1  ;;  %v8974_v41 = vld [vmem:[#allocation2 + $0x42] sm:$0xff] }
 0x2d2   : > { %17237 = vmatprep.mubr.msk.f32.mxu1 %vm393_vm2, %v20354_v58  ;;  %17307 = vmatprep.mubr.msk.f32.mxu0 %vm393_vm2, %v8971_v22  ;;  %v16907_v28 = vpop.f32.mrf.mxu0  ;;  %v8973_v58 = vld [vmem:[#allocation2 + $0x3a] sm:$0xff] }
 0x2d3   : > { %v20602_v13 = vadd.f32 %v16907_v28, %v16837_v51  ;;  %v5708_v6 = vpop.f32.mrf.mxu1  ;;  %v14911_v28 = vld [vmem:[%s22740_s4 + $0x228] sm:$0xff] }
 0x2d4   : > { %v6214_v22 = vpop.f32.mrf.mxu0 }
 0x2d5   : > { %17238 = vmatmul.mubr.msk.f32.vlgmr.msra.gmra.mxu1 %vm393_vm2, %v20358_v63  ;;  %17308 = vmatmul.mubr.msk.f32.vlgmr.msra.gmra.mxu0 %vm393_vm2, %v8972_v53  ;;  %v20608_v61 = vadd.f32 %v6214_v22, %v5708_v6  ;;  %v8975_v63 = vld [vmem:[#allocation2 + $0x4a] sm:$0xff]  ;;  %v8976_v6 = vld [vmem:[#allocation2 + $0x52] sm:$0xff] }
 0x2d6   : > { %17362 = vmatpush3.msra.mxu1 %v20463_v30  ;;  %17240 = vmatprep.mubr.msk.f32.mxu1 %vm393_vm2, %v20370_v2  ;;  %v16840_v53 = vpop.f32.mrf.mxu1  ;;  %v16910_v51 = vpop.f32.mrf.mxu0 }
 0x2d7   : > { %17310 = vmatprep.mubr.msk.f32.mxu0 %vm393_vm2, %v8973_v58  ;;  %17363 = vmatprep.subr.mxu1 %v14912_v47  ;;  %v20616_v2 = vadd.f32 %v16910_v51, %v16840_v53 }
 0x2d8   : > { %17364 = vmatpush3.msra.mxu1 %v14912_v47  ;;  %v5718_v30 = vpop.f32.mrf.mxu1  ;;  %v6224_v47 = vpop.f32.mrf.mxu0 }
 0x2d9   : > { %17241 = vmatmul.mubr.msk.f32.gmra.mxu1 %vm393_vm2, %v20375_v59  ;;  %17311 = vmatmul.mubr.msk.f32.gmra.mxu0 %vm393_vm2, %v8974_v41  ;;  %v20621_v58 = vadd.f32 %v6224_v47, %v5718_v30  ;;  %v14910_v59 = vld [vmem:[%s22740_s4 + $0x220] sm:$0xff] }
 0x2da   : > { %17243 = vmatprep.mubr.msk.f32.mxu1 %vm393_vm2, %v20386_v62  ;;  %17313 = vmatprep.mubr.msk.f32.mxu0 %vm393_vm2, %v8975_v63  ;;  %v8977_v62 = vld [vmem:[#allocation2 + $0x5a] sm:$0xff]  ;;  %v8978_v30 = vld [vmem:[#allocation2 + $0x62] sm:$0xff] }
 0x2db   : > { %17365 = vmatprep.subr.mxu1 %v14911_v28  ;;  %v16843_v22 = vpop.f32.mrf.mxu1 }
 0x2dc   : > { %17366 = vmatpush3.msra.mxu1 %v14911_v28 }
 0x2dd   : > { %v16913_v41 = vpop.f32.mrf.mxu0  ;;  %17244 = vmatmul.mubr.msk.f32.gmra.mxu1 %vm393_vm2, %v20391_v15  ;;  %17314 = vmatmul.mubr.msk.f32.gmra.mxu0 %vm393_vm2, %v8976_v6  ;;  %v5728_v28 = vpop.f32.mrf.mxu1  ;;  %v14909_v15 = vld [vmem:[%s22740_s4 + $0x218] sm:$0xff] }
 0x2de   : > { %v20629_v53 = vadd.f32 %v16913_v41, %v16843_v22  ;;  %17246 = vmatprep.mubr.msk.f32.mxu1 %vm393_vm2, %v20402_v23  ;;  %17316 = vmatprep.mubr.msk.f32.mxu0 %vm393_vm2, %v8977_v62  ;;  %v8979_v23 = vld [vmem:[#allocation2 + $0x6a] sm:$0xff] }
 0x2df   : > { %v6234_v51 = vpop.f32.mrf.mxu0  ;;  %17367 = vmatprep.subr.mxu1 %v14910_v59 }
 0x2e0   : > { %v20634_v63 = vadd.f32 %v6234_v51, %v5728_v28  ;;  %17368 = vmatpush3.msra.mxu1 %v14910_v59  ;;  %v16846_v47 = vpop.f32.mrf.mxu1  ;;  %v8980_v28 = vld [vmem:[#allocation2 + $0x72] sm:$0xff] }
 0x2e1   : > { %v16916_v6 = vpop.f32.mrf.mxu0  ;;  %17247 = vmatmul.mubr.msk.f32.gmra.mxu1 %vm393_vm2, %v20407_v26  ;;  %17317 = vmatmul.mubr.msk.f32.gmra.mxu0 %vm393_vm2, %v8978_v30  ;;  %v14908_v26 = vld [vmem:[%s22740_s4 + $0x210] sm:$0xff] }
 0x2e2   : > { %v20642_v22 = vadd.f32 %v16916_v6, %v16846_v47  ;;  %17249 = vmatprep.mubr.msk.f32.mxu1 %vm393_vm2, %v20418_v35  ;;  %17319 = vmatprep.mubr.msk.f32.mxu0 %vm393_vm2, %v8979_v23  ;;  %v5738_v59 = vpop.f32.mrf.mxu1  ;;  %v8981_v35 = vld [vmem:[#allocation2 + $0x7a] sm:$0xff] }
 0x2e3   : > { %v6244_v41 = vpop.f32.mrf.mxu0  ;;  %17369 = vmatprep.subr.mxu1 %v14909_v15 }
 0x2e4   : > { %v20647_v62 = vadd.f32 %v6244_v41, %v5738_v59  ;;  %17370 = vmatpush3.msra.mxu1 %v14909_v15  ;;  %v16849_v51 = vpop.f32.mrf.mxu1  ;;  %v8982_v59 = vld [vmem:[#allocation2 + $0x82] sm:$0xff] }
 0x2e5   : > { %v16919_v30 = vpop.f32.mrf.mxu0  ;;  %17250 = vmatmul.mubr.msk.f32.gmra.mxu1 %vm393_vm2, %v20423_v38  ;;  %17320 = vmatmul.mubr.msk.f32.gmra.mxu0 %vm393_vm2, %v8980_v28  ;;  %v14907_v38 = vld [vmem:[%s22740_s4 + $0x208] sm:$0xff] }
 0x2e6   : > { %v20655_v47 = vadd.f32 %v16919_v30, %v16849_v51  ;;  %17252 = vmatprep.mubr.msk.f32.mxu1 %vm393_vm2, %v20434_v1  ;;  %17322 = vmatprep.mubr.msk.f32.mxu0 %vm393_vm2, %v8981_v35  ;;  %v5748_v15 = vpop.f32.mrf.mxu1  ;;  %v8983_v1 = vld [vmem:[#allocation2 + $0x8a] sm:$0xff] }
 0x2e7   : > { %v6254_v6 = vpop.f32.mrf.mxu0  ;;  %17371 = vmatprep.subr.mxu1 %v14908_v26 }
 0x2e8   : > { %v20660_v23 = vadd.f32 %v6254_v6, %v5748_v15  ;;  %17372 = vmatpush3.msra.mxu1 %v14908_v26  ;;  %v16852_v41 = vpop.f32.mrf.mxu1  ;;  %v8984_v15 = vld [vmem:[#allocation2 + $0x92] sm:$0xff] }
 0x2e9   : > { %v16922_v28 = vpop.f32.mrf.mxu0  ;;  %17253 = vmatmul.mubr.msk.f32.gmra.mxu1 %vm393_vm2, %v20439_v7  ;;  %17323 = vmatmul.mubr.msk.f32.gmra.mxu0 %vm393_vm2, %v8982_v59  ;;  %v14906_v7 = vld [vmem:[%s22740_s4 + $0x200] sm:$0xff] }
 0x2ea   : > { %v20668_v51 = vadd.f32 %v16922_v28, %v16852_v41  ;;  %17255 = vmatprep.mubr.msk.f32.mxu1 %vm393_vm2, %v20450_v17  ;;  %17325 = vmatprep.mubr.msk.f32.mxu0 %vm393_vm2, %v8983_v1  ;;  %v5758_v26 = vpop.f32.mrf.mxu1  ;;  %v8985_v17 = vld [vmem:[#allocation2 + $0x9a] sm:$0xff] }
 0x2eb   : > { %v6264_v30 = vpop.f32.mrf.mxu0  ;;  %17373 = vmatprep.subr.mxu1 %v14907_v38 }
 0x2ec   : > { %v20673_v35 = vadd.f32 %v6264_v30, %v5758_v26  ;;  %17374 = vmatpush3.msra.mxu1 %v14907_v38  ;;  %v16855_v6 = vpop.f32.mrf.mxu1  ;;  %v8986_v26 = vld [vmem:[#allocation2 + $0xa2] sm:$0xff] }
 0x2ed   : > { %v16925_v59 = vpop.f32.mrf.mxu0  ;;  %17256 = vmatmul.mubr.msk.f32.gmra.mxu1 %vm393_vm2, %v20455_v19  ;;  %17326 = vmatmul.mubr.msk.f32.gmra.mxu0 %vm393_vm2, %v8984_v15  ;;  %v8987_v19 = vld [vmem:[#allocation2 + $0xaa] sm:$0xff] }
 0x2ee   : > { %v20681_v41 = vadd.f32 %v16925_v59, %v16855_v6  ;;  %17258 = vmatprep.mubr.msk.f32.mxu1 %vm393_vm2, %v20468_v34  ;;  %17328 = vmatprep.mubr.msk.f32.mxu0 %vm393_vm2, %v8985_v17  ;;  %v5768_v38 = vpop.f32.mrf.mxu1 }
 0x2ef   : > { %v6274_v28 = vpop.f32.mrf.mxu0  ;;  %17375 = vmatprep.subr.mxu1 %v14906_v7 }
 0x2f0   : > { %v20686_v1 = vadd.f32 %v6274_v28, %v5768_v38  ;;  %17376 = vmatpush3.msra.mxu1 %v14906_v7  ;;  %v16858_v30 = vpop.f32.mrf.mxu1  ;;  %v8988_v7 = vld [vmem:[#allocation2 + $0xb2] sm:$0xff] }
 0x2f1   : > { %v16928_v29 = vpop.f32.mrf.mxu0  ;;  %17259 = vmatmul.mubr.msk.f32.gmra.mxu1 %vm393_vm2, %v20474_v52  ;;  %17329 = vmatmul.mubr.msk.f32.gmra.mxu0 %vm393_vm2, %v8986_v26  ;;  %v8989_v52 = vld [vmem:[#allocation2 + $0xba] sm:$0xff] }
 0x2f2   : > { %v20691_v15 = vadd.f32 %v16928_v29, %v16858_v30  ;;  %17261 = vmatprep.mubr.msk.f32.mxu1 %vm393_vm2, %v20479_v37  ;;  %17331 = vmatprep.mubr.msk.f32.mxu0 %vm393_vm2, %v8987_v19  ;;  %v5778_v34 = vpop.f32.mrf.mxu1  ;;  %v8990_v30 = vld [vmem:[#allocation2 + $0xc2] sm:$0xff] }
 0x2f3   : > { %v6284_v6 = vpop.f32.mrf.mxu0 }
 0x2f4   : > { %v20696_v59 = vadd.f32 %v6284_v6, %v5778_v34  ;;  %v16861_v17 = vpop.f32.mrf.mxu1 }
 0x2f5   : > { %v16931_v38 = vpop.f32.mrf.mxu0  ;;  %17262 = vmatmul.mubr.msk.f32.gmra.mxu1 %vm393_vm2, %v20484_v10  ;;  %17332 = vmatmul.mubr.msk.f32.gmra.mxu0 %vm393_vm2, %v8988_v7  ;;  %v8991_v10 = vld [vmem:[#allocation2 + $0xca] sm:$0xff] }
 0x2f6   : > { %v20701_v29 = vadd.f32 %v16931_v38, %v16861_v17  ;;  %17264 = vmatprep.mubr.msk.f32.mxu1 %vm393_vm2, %v20489_v14  ;;  %17334 = vmatprep.mubr.msk.f32.mxu0 %vm393_vm2, %v8989_v52  ;;  %v5788_v37 = vpop.f32.mrf.mxu1  ;;  %v8992_v38 = vld [vmem:[#allocation2 + $0xd2] sm:$0xff] }
 0x2f7   : > { %v6294_v28 = vpop.f32.mrf.mxu0 }
 0x2f8   : > { %v20706_v26 = vadd.f32 %v6294_v28, %v5788_v37  ;;  %v16864_v19 = vpop.f32.mrf.mxu1 }
 0x2f9   : > { %v16934_v34 = vpop.f32.mrf.mxu0  ;;  %17265 = vmatmul.mubr.msk.f32.gmra.mxu1 %vm393_vm2, %v20494_v25  ;;  %17335 = vmatmul.mubr.msk.f32.gmra.mxu0 %vm393_vm2, %v8990_v30  ;;  %v8993_v25 = vld [vmem:[#allocation2 + $0xda] sm:$0xff] }
 0x2fa   : > { %v20711_v6 = vadd.f32 %v16934_v34, %v16864_v19  ;;  %17267 = vmatprep.mubr.msk.f32.mxu1 %vm393_vm2, %v20499_v36  ;;  %17337 = vmatprep.mubr.msk.f32.mxu0 %vm393_vm2, %v8991_v10  ;;  %v5798_v14 = vpop.f32.mrf.mxu1  ;;  %v8994_v19 = vld [vmem:[#allocation2 + $0xe2] sm:$0xff] }
 0x2fb   : > { %v6304_v7 = vpop.f32.mrf.mxu0 }
 0x2fc   : > { %v20716_v17 = vadd.f32 %v6304_v7, %v5798_v14  ;;  %v16867_v52 = vpop.f32.mrf.mxu1 }
 0x2fd   : > { %v16937_v37 = vpop.f32.mrf.mxu0  ;;  %17268 = vmatmul.mubr.msk.f32.gmra.mxu1 %vm393_vm2, %v20504_v4  ;;  %17338 = vmatmul.mubr.msk.f32.gmra.mxu0 %vm393_vm2, %v8992_v38  ;;  %v8995_v4 = vld [vmem:[#allocation2 + $0xea] sm:$0xff]  ;;  %v8996_v38 = vld [vmem:[#allocation2 + $0xf2] sm:$0xff] }
 0x2fe   : > { %v20721_v28 = vadd.f32 %v16937_v37, %v16867_v52  ;;  %17270 = vmatprep.mubr.msk.f32.mxu1 %vm393_vm2, %v20509_v18  ;;  %17340 = vmatprep.mubr.msk.f32.mxu0 %vm393_vm2, %v8993_v25  ;;  %v20726_v36 = vpop.f32.mrf.mxu1 }
 0x2ff   : > { %v20728_v30 = vpop.f32.mrf.mxu0 }
 0x300   : > { %v16870_v34 = vpop.f32.mrf.mxu1 }
 0x301   : > { %v16940_v10 = vpop.f32.mrf.mxu0  ;;  %17271 = vmatmul.mubr.msk.f32.gmra.mxu1 %vm393_vm2, %v20514_v3  ;;  %17341 = vmatmul.mubr.msk.f32.gmra.mxu0 %vm393_vm2, %v8994_v19  ;;  %v8997_v3 = vld [vmem:[#allocation2 + $0xfa] sm:$0xff] }
 0x302   : > { %v20733_v14 = vadd.f32 %v16940_v10, %v16870_v34  ;;  %17273 = vmatprep.mubr.msk.f32.mxu1 %vm393_vm2, %v20519_v0  ;;  %17343 = vmatprep.mubr.msk.f32.mxu0 %vm393_vm2, %v8995_v4  ;;  %v20738_v18 = vpop.f32.mrf.mxu1  ;;  %v8998_v10 = vld [vmem:[#allocation2 + $0x102] sm:$0xff] }
 0x303   : > { %22851 = vst [vmem:[#allocation44_spill] sm:$0xff] %v20738_v18  ;;  %v20740_v7 = vpop.f32.mrf.mxu0  ;;  %v9483_v18 = vld [vmem:[#allocation2 + $0x5b] sm:$0xff] }
 0x304   : > { %22852 = vst [vmem:[#allocation45_spill] sm:$0xff] %v20740_v7  ;;  %v16959_v52 = vpop.f32.mrf.mxu1 }
 0x305   : > { %v17029_v37 = vpop.f32.mrf.mxu0  ;;  %17274 = vmatmul.mubr.msk.f32.gmra.mxu1 %vm393_vm2, %v20528_v40  ;;  %17344 = vmatmul.mubr.msk.f32.gmra.mxu0 %vm393_vm2, %v8996_v38  ;;  %v6840_v25 = vadd.f32 %v16959_v52, %v20209_v24  ;;  %v8999_v40 = vld [vmem:[#allocation2 + $0x10a] sm:$0xff] }
 0x306   : > { %17276 = vmatprep.mubr.msk.f32.mxu1 %vm393_vm2, %v20533_v39  ;;  %17346 = vmatprep.mubr.msk.f32.mxu0 %vm393_vm2, %v8997_v3  ;;  %v20749_v0 = vpop.f32.mrf.mxu1  ;;  %v9000_v3 = vld [vmem:[#allocation2 + $0x112] sm:$0xff] }
 0x307   : > { %v20751_v19 = vpop.f32.mrf.mxu0  ;;  %v20753_v34 = vadd.f32 %v17029_v37, %v6840_v25 }
 0x309   : > { %v16962_v4 = vpop.f32.mrf.mxu1  ;;  %v17032_v7 = vpop.f32.mrf.mxu0  ;;  %17277 = vmatmul.mubr.msk.f32.gmra.mxu1 %vm393_vm2, %v20542_v45  ;;  %17347 = vmatmul.mubr.msk.f32.gmra.mxu0 %vm393_vm2, %v8998_v10 }
 0x30a   : > { %v6842_v24 = vadd.f32 %v16962_v4, %v20535_v42  ;;  %17279 = vmatprep.mubr.msk.f32.mxu1 %vm393_vm2, %v20547_v31  ;;  %17349 = vmatprep.mubr.msk.f32.mxu0 %vm393_vm2, %v8999_v40  ;;  %v9001_v42 = vld [vmem:[#allocation2 + $0x11a] sm:$0xff]  ;;  %v9002_v40 = vld [vmem:[#allocation2 + $0x122] sm:$0xff] }
 0x30b   : > { %v6670_v39 = vpop.f32.mrf.mxu1  ;;  %v20762_v38 = vpop.f32.mrf.mxu0 }
 0x30c   : > { %v20764_v52 = vadd.f32 %v17032_v7, %v6842_v24  ;;  %v20767_v37 = vadd.f32 %v6670_v39, %v20540_v44 }
 0x30d   : > { %v16965_v45 = vpop.f32.mrf.mxu1  ;;  %v17035_v25 = vpop.f32.mrf.mxu0  ;;  %17280 = vmatmul.mubr.msk.f32.gmra.mxu1 %vm393_vm2, %v20556_v56  ;;  %17350 = vmatmul.mubr.msk.f32.gmra.mxu0 %vm393_vm2, %v9000_v3 }
 0x30e   : > { %v6844_v31 = vadd.f32 %v16965_v45, %v20549_v60  ;;  %17282 = vmatprep.mubr.msk.f32.mxu1 %vm393_vm2, %v20561_v16  ;;  %17352 = vmatprep.mubr.msk.f32.mxu0 %vm393_vm2, %v9001_v42  ;;  %v9003_v60 = vld [vmem:[#allocation2 + $0x12a] sm:$0xff]  ;;  %v9005_v45 = vld [vmem:[#allocation2 + $0x13a] sm:$0xff] }
 0x30f   : > { %v6680_v7 = vpop.f32.mrf.mxu1  ;;  %v20776_v10 = vpop.f32.mrf.mxu0 }
 0x310   : > { %v20778_v44 = vadd.f32 %v17035_v25, %v6844_v31  ;;  %v20781_v4 = vadd.f32 %v6680_v7, %v20554_v43  ;;  %v8499_v43 = vld [vmem:[#allocation2 + $0x139] sm:$0xff] }
 0x311   : > { %v16968_v56 = vpop.f32.mrf.mxu1  ;;  %v17038_v24 = vpop.f32.mrf.mxu0  ;;  %17283 = vmatmul.mubr.msk.f32.gmra.mxu1 %vm393_vm2, %v20570_v21  ;;  %17353 = vmatmul.mubr.msk.f32.gmra.mxu0 %vm393_vm2, %v9002_v40  ;;  %v9004_v21 = vld [vmem:[#allocation2 + $0x132] sm:$0xff]  ;;  %v9006_v40 = vld [vmem:[#allocation2 + $0x142] sm:$0xff] }
 0x312   : > { %v6846_v16 = vadd.f32 %v16968_v56, %v20563_v27  ;;  %17285 = vmatprep.mubr.msk.f32.mxu1 %vm393_vm2, %v20575_v49  ;;  %17355 = vmatprep.mubr.msk.f32.mxu0 %vm393_vm2, %v9003_v60  ;;  %v8500_v49 = vld [vmem:[#allocation2 + $0x141] sm:$0xff] }
 0x313   : > { %v6690_v39 = vpop.f32.mrf.mxu1  ;;  %v20790_v3 = vpop.f32.mrf.mxu0 }
 0x314   : > { %v20792_v25 = vadd.f32 %v17038_v24, %v6846_v16  ;;  %v20795_v42 = vadd.f32 %v6690_v39, %v20568_v5  ;;  %v9477_v39 = vld [vmem:[#allocation2 + $0x2b] sm:$0xff] }
 0x315   : > { %v16971_v31 = vpop.f32.mrf.mxu1  ;;  %v17041_v7 = vpop.f32.mrf.mxu0  ;;  %17286 = vmatmul.mubr.msk.f32.gmra.mxu1 %vm393_vm2, %v20584_v12  ;;  %17356 = vmatmul.mubr.msk.f32.gmra.mxu0 %vm393_vm2, %v9004_v21 }
 0x316   : > { %v6848_v27 = vadd.f32 %v16971_v31, %v20577_v48  ;;  %17288 = vmatprep.mubr.msk.f32.mxu1 %vm393_vm2, %v8499_v43  ;;  %17358 = vmatprep.mubr.msk.f32.mxu0 %vm393_vm2, %v9005_v45 }
 0x317   : > { %v6700_v56 = vpop.f32.mrf.mxu1  ;;  %v20803_v24 = vpop.f32.mrf.mxu0 }
 0x318   : > { %v20805_v5 = vadd.f32 %v17041_v7, %v6848_v27  ;;  %v20808_v60 = vadd.f32 %v6700_v56, %v20582_v46  ;;  %v9478_v46 = vld [vmem:[#allocation2 + $0x33] sm:$0xff] }
 0x319   : > { %v16974_v16 = vpop.f32.mrf.mxu1  ;;  %v17044_v12 = vpop.f32.mrf.mxu0  ;;  %17289 = vmatmul.mubr.msk.f32.gmra.mxu1 %vm393_vm2, %v8500_v49  ;;  %17359 = vmatmul.mubr.msk.f32.gmra.mxu0 %vm393_vm2, %v9006_v40  ;;  %v9479_v49 = vld [vmem:[#allocation2 + $0x3b] sm:$0xff] }
 0x31a   : > { %v6850_v48 = vadd.f32 %v16974_v16, %v20589_v54  ;;  %17377 = vmatprep.mubr.msk.f32.mxu1 %vm393_vm2, %v9477_v39 }
 0x31b   : > { %v6710_v43 = vpop.f32.mrf.mxu1  ;;  %v20814_v45 = vpop.f32.mrf.mxu0 }
 0x31c   : > { %v20816_v21 = vadd.f32 %v17044_v12, %v6850_v48  ;;  %v20819_v31 = vadd.f32 %v6710_v43, %v20594_v50  ;;  %v9480_v50 = vld [vmem:[#allocation2 + $0x43] sm:$0xff]  ;;  %v9481_v43 = vld [vmem:[#allocation2 + $0x4b] sm:$0xff] }
 0x31d   : > { %v16977_v7 = vpop.f32.mrf.mxu1  ;;  %v17047_v27 = vpop.f32.mrf.mxu0  ;;  %17378 = vmatmul.mubr.msk.f32.vlgmr.msra.gmra.mxu1 %vm393_vm2, %v9478_v46 }
 0x31e   : > { %v6852_v40 = vadd.f32 %v16977_v7, %v20602_v13  ;;  %17380 = vmatprep.mubr.msk.f32.mxu1 %vm393_vm2, %v9479_v49 }
 0x31f   : > { %v6720_v54 = vpop.f32.mrf.mxu1  ;;  %v20824_v56 = vpop.f32.mrf.mxu0 }
 0x320   : > { %22853 = vst [vmem:[#allocation46_spill] sm:$0xff] %v20824_v56  ;;  %v20826_v16 = vadd.f32 %v17047_v27, %v6852_v40  ;;  %v20829_v12 = vadd.f32 %v6720_v54, %v20608_v61  ;;  %v9482_v61 = vld [vmem:[#allocation2 + $0x53] sm:$0xff] }
 0x321   : > { %v16980_v39 = vpop.f32.mrf.mxu1  ;;  %v17050_v48 = vpop.f32.mrf.mxu0  ;;  %17381 = vmatmul.mubr.msk.f32.gmra.mxu1 %vm393_vm2, %v9480_v50 }
 0x322   : > { %22854 = vst [vmem:[#allocation47_spill] sm:$0xff] %v20829_v12  ;;  %v6854_v46 = vadd.f32 %v16980_v39, %v20616_v2  ;;  %17383 = vmatprep.mubr.msk.f32.mxu1 %vm393_vm2, %v9481_v43  ;;  %v10299_v2 = vld [vmem:[%s22742_s6 + $0x78] sm:$0xff] }
 0x323   : > { %v6730_v13 = vpop.f32.mrf.mxu1  ;;  %v20834_v7 = vpop.f32.mrf.mxu0  ;;  %17431 = vmatprep.subr.mxu0 %v10299_v2 }
 0x324   : > { %22855 = vst [vmem:[#allocation48_spill] sm:$0xff] %v20834_v7  ;;  %v20836_v49 = vadd.f32 %v17050_v48, %v6854_v46  ;;  %v20839_v27 = vadd.f32 %v6730_v13, %v20621_v58  ;;  %v9484_v46 = vld [vmem:[#allocation2 + $0x63] sm:$0xff]  ;;  %17432 = vmatpush3.msra.mxu0 %v10299_v2 }
 0x325   : > { %v16983_v40 = vpop.f32.mrf.mxu1  ;;  %v17053_v54 = vpop.f32.mrf.mxu0  ;;  %17384 = vmatmul.mubr.msk.f32.gmra.mxu1 %vm393_vm2, %v9482_v61 }
 0x326   : > { %22856 = vst [vmem:[#allocation49_spill] sm:$0xff] %v20839_v27  ;;  %v6856_v50 = vadd.f32 %v16983_v40, %v20629_v53  ;;  %17386 = vmatprep.mubr.msk.f32.mxu1 %vm393_vm2, %v9483_v18  ;;  %v9485_v53 = vld [vmem:[#allocation2 + $0x6b] sm:$0xff]  ;;  %v10249_v27 = vld [vmem:[#allocation3 + $0xd] sm:$0xff] }
 0x327   : > { %v6740_v39 = vpop.f32.mrf.mxu1  ;;  %v20847_v48 = vpop.f32.mrf.mxu0 }
 0x328   : > { %22857 = vst [vmem:[#allocation50_spill] sm:$0xff] %v20847_v48  ;;  %v20849_v58 = vadd.f32 %v17053_v54, %v6856_v50  ;;  %v20852_v43 = vadd.f32 %v6740_v39, %v20634_v63  ;;  %v9486_v63 = vld [vmem:[#allocation2 + $0x73] sm:$0xff] }
 0x329   : > { %v16986_v13 = vpop.f32.mrf.mxu1  ;;  %v17056_v61 = vpop.f32.mrf.mxu0  ;;  %17387 = vmatmul.mubr.msk.f32.gmra.mxu1 %vm393_vm2, %v9484_v46  ;;  %v10298_v50 = vld [vmem:[%s22742_s6 + $0x70] sm:$0xff] }
 0x32a   : > { %22858 = vst [vmem:[#allocation51_spill] sm:$0xff] %v20852_v43  ;;  %v6858_v18 = vadd.f32 %v16986_v13, %v20642_v22  ;;  %17389 = vmatprep.mubr.msk.f32.mxu1 %vm393_vm2, %v9485_v53  ;;  %v9487_v22 = vld [vmem:[#allocation2 + $0x7b] sm:$0xff]  ;;  %17433 = vmatprep.subr.mxu0 %v10298_v50 }
 0x32b   : > { %v6750_v40 = vpop.f32.mrf.mxu1  ;;  %v20857_v8 = vpop.f32.mrf.mxu0  ;;  %17434 = vmatpush3.msra.mxu0 %v10298_v50 }
 0x32c   : > { %22859 = vst [vmem:[#allocation52_spill] sm:$0xff] %v20857_v8  ;;  %v20859_v48 = vadd.f32 %v17056_v61, %v6858_v18  ;;  %v20862_v54 = vadd.f32 %v6750_v40, %v20647_v62  ;;  %v9488_v18 = vld [vmem:[#allocation2 + $0x83] sm:$0xff] }
 0x32d   : > { %v16989_v2 = vpop.f32.mrf.mxu1  ;;  %v17059_v39 = vpop.f32.mrf.mxu0  ;;  %17390 = vmatmul.mubr.msk.f32.gmra.mxu1 %vm393_vm2, %v9486_v63  ;;  %v10297_v40 = vld [vmem:[%s22742_s6 + $0x68] sm:$0xff] }
 0x32e   : > { %22860 = vst [vmem:[#allocation53_spill] sm:$0xff] %v20862_v54  ;;  %v6860_v46 = vadd.f32 %v16989_v2, %v20655_v47  ;;  %17392 = vmatprep.mubr.msk.f32.mxu1 %vm393_vm2, %v9487_v22  ;;  %v9489_v47 = vld [vmem:[#allocation2 + $0x8b] sm:$0xff]  ;;  %17435 = vmatprep.subr.mxu0 %v10297_v40 }
 0x32f   : > { %v6760_v13 = vpop.f32.mrf.mxu1  ;;  %v20870_v61 = vpop.f32.mrf.mxu0  ;;  %17436 = vmatpush3.msra.mxu0 %v10297_v40 }
 0x330   : > { %22861 = vst [vmem:[#allocation54_spill] sm:$0xff] %v20870_v61  ;;  %v20872_v62 = vadd.f32 %v17059_v39, %v6860_v46  ;;  %v20875_v53 = vadd.f32 %v6760_v13, %v20660_v23  ;;  %v9490_v46 = vld [vmem:[#allocation2 + $0x93] sm:$0xff]  ;;  %v10296_v13 = vld [vmem:[%s22742_s6 + $0x60] sm:$0xff] }
 0x331   : > { %v16992_v63 = vpop.f32.mrf.mxu1  ;;  %v17062_v8 = vpop.f32.mrf.mxu0  ;;  %17393 = vmatmul.mubr.msk.f32.gmra.mxu1 %vm393_vm2, %v9488_v18  ;;  %17437 = vmatprep.subr.mxu0 %v10296_v13 }
 0x332   : > { %22862 = vst [vmem:[#allocation55_spill] sm:$0xff] %v20875_v53  ;;  %v6862_v50 = vadd.f32 %v16992_v63, %v20668_v51  ;;  %17395 = vmatprep.mubr.msk.f32.mxu1 %vm393_vm2, %v9489_v47  ;;  %v9491_v51 = vld [vmem:[#allocation2 + $0x9b] sm:$0xff]  ;;  %17438 = vmatpush3.msra.mxu0 %v10296_v13 }
 0x333   : > { %v6770_v2 = vpop.f32.mrf.mxu1  ;;  %v20883_v39 = vpop.f32.mrf.mxu0 }
 0x334   : > { %22863 = vst [vmem:[#allocation56_spill] sm:$0xff] %v20883_v39  ;;  %v20885_v23 = vadd.f32 %v17062_v8, %v6862_v50  ;;  %v20888_v22 = vadd.f32 %v6770_v2, %v20673_v35  ;;  %v9492_v50 = vld [vmem:[#allocation2 + $0xa3] sm:$0xff]  ;;  %v10295_v2 = vld [vmem:[%s22742_s6 + $0x58] sm:$0xff] }
 0x335   : > { %v16995_v18 = vpop.f32.mrf.mxu1  ;;  %v17065_v61 = vpop.f32.mrf.mxu0  ;;  %17396 = vmatmul.mubr.msk.f32.gmra.mxu1 %vm393_vm2, %v9490_v46  ;;  %17439 = vmatprep.subr.mxu0 %v10295_v2 }
 0x336   : > { %22864 = vst [vmem:[#allocation57_spill] sm:$0xff] %v20888_v22  ;;  %v6864_v40 = vadd.f32 %v16995_v18, %v20681_v41  ;;  %17398 = vmatprep.mubr.msk.f32.mxu1 %vm393_vm2, %v9491_v51  ;;  %v9493_v41 = vld [vmem:[#allocation2 + $0xab] sm:$0xff]  ;;  %17440 = vmatpush3.msra.mxu0 %v10295_v2 }
 0x337   : > { %v6780_v8 = vpop.f32.mrf.mxu1  ;;  %v20896_v63 = vpop.f32.mrf.mxu0 }
 0x338   : > { %22865 = vst [vmem:[#allocation58_spill] sm:$0xff] %v20896_v63  ;;  %v20898_v35 = vadd.f32 %v17065_v61, %v6864_v40  ;;  %v20901_v47 = vadd.f32 %v6780_v8, %v20686_v1  ;;  %v9494_v40 = vld [vmem:[#allocation2 + $0xb3] sm:$0xff] }
 0x339   : > { %v16998_v46 = vpop.f32.mrf.mxu1  ;;  %v17068_v39 = vpop.f32.mrf.mxu0  ;;  %17399 = vmatmul.mubr.msk.f32.gmra.mxu1 %vm393_vm2, %v9492_v50  ;;  %v9495_v50 = vld [vmem:[#allocation2 + $0xbb] sm:$0xff] }
 0x33a   : > { %22866 = vst [vmem:[#allocation59_spill] sm:$0xff] %v20901_v47  ;;  %v6866_v13 = vadd.f32 %v16998_v46, %v20691_v15  ;;  %17401 = vmatprep.mubr.msk.f32.mxu1 %vm393_vm2, %v9493_v41  ;;  %v10294_v15 = vld [vmem:[%s22742_s6 + $0x50] sm:$0xff]  ;;  %v9496_v41 = vld [vmem:[#allocation2 + $0xc3] sm:$0xff] }
 0x33b   : > { %v6790_v61 = vpop.f32.mrf.mxu1  ;;  %v20909_v18 = vpop.f32.mrf.mxu0  ;;  %17441 = vmatprep.subr.mxu0 %v10294_v15 }
 0x33c   : > { %22867 = vst [vmem:[#allocation60_spill] sm:$0xff] %v20909_v18  ;;  %v20911_v1 = vadd.f32 %v17068_v39, %v6866_v13  ;;  %v20914_v51 = vadd.f32 %v6790_v61, %v20696_v59  ;;  %17442 = vmatpush3.msra.mxu0 %v10294_v15  ;;  %v9498_v15 = vld [vmem:[#allocation2 + $0xd3] sm:$0xff]  ;;  %v9511_v18 = vld [vmem:[#allocation2 + $0x13b] sm:$0xff] }
 0x33d   : > { %v17001_v8 = vpop.f32.mrf.mxu1  ;;  %v17071_v63 = vpop.f32.mrf.mxu0  ;;  %17402 = vmatmul.mubr.msk.f32.gmra.mxu1 %vm393_vm2, %v9494_v40 }
 0x33e   : > { %22868 = vst [vmem:[#allocation61_spill] sm:$0xff] %v20914_v51  ;;  %v6868_v47 = vadd.f32 %v17001_v8, %v20701_v29  ;;  %17404 = vmatprep.mubr.msk.f32.mxu1 %vm393_vm2, %v9495_v50  ;;  %v9497_v29 = vld [vmem:[#allocation2 + $0xcb] sm:$0xff] }
 0x33f   : > { %v6800_v2 = vpop.f32.mrf.mxu1  ;;  %v20922_v39 = vpop.f32.mrf.mxu0  ;;  %v10293_v8 = vld [vmem:[%s22742_s6 + $0x48] sm:$0xff] }
 0x340   : > { %22869 = vst [vmem:[#allocation62_spill] sm:$0xff] %v20922_v39  ;;  %v20924_v59 = vadd.f32 %v17071_v63, %v6868_v47  ;;  %v20927_v46 = vadd.f32 %v6800_v2, %v20706_v26  ;;  %17443 = vmatprep.subr.mxu0 %v10293_v8 }
 0x341   : > { %v17004_v13 = vpop.f32.mrf.mxu1  ;;  %v17074_v61 = vpop.f32.mrf.mxu0  ;;  %17405 = vmatmul.mubr.msk.f32.gmra.mxu1 %vm393_vm2, %v9496_v41  ;;  %17444 = vmatpush3.msra.mxu0 %v10293_v8 }
 0x342   : > { %22870 = vst [vmem:[#allocation63_spill] sm:$0xff] %v20927_v46  ;;  %v6870_v40 = vadd.f32 %v17004_v13, %v20711_v6  ;;  %17407 = vmatprep.mubr.msk.f32.mxu1 %vm393_vm2, %v9497_v29  ;;  %v9499_v6 = vld [vmem:[#allocation2 + $0xdb] sm:$0xff]  ;;  %v6365_v13 = vadd.f32 %v20728_v30, %v20726_v36  ;;  %v9509_v46 = vld [vmem:[#allocation2 + $0x12b] sm:$0xff] }
 0x343   : > { %v6810_v63 = vpop.f32.mrf.mxu1  ;;  %v20935_v47 = vpop.f32.mrf.mxu0 }
 0x344   : > { %22871 = vst [vmem:[#allocation64_spill] sm:$0xff] %v20935_v47  ;;  %v20937_v26 = vadd.f32 %v17074_v61, %v6870_v40  ;;  %v20940_v50 = vadd.f32 %v6810_v63, %v20716_v17  ;;  %v10292_v61 = vld [vmem:[%s22742_s6 + $0x40] sm:$0xff] }
 0x345   : > { %v17007_v2 = vpop.f32.mrf.mxu1  ;;  %v17077_v41 = vpop.f32.mrf.mxu0  ;;  %17408 = vmatmul.mubr.msk.f32.gmra.mxu1 %vm393_vm2, %v9498_v15  ;;  %17445 = vmatprep.subr.mxu0 %v10292_v61  ;;  %v9500_v15 = vld [vmem:[#allocation2 + $0xe3] sm:$0xff] }
 0x346   : > { %22872 = vst [vmem:[#allocation65_spill] sm:$0xff] %v20940_v50  ;;  %v6872_v29 = vadd.f32 %v17007_v2, %v20721_v28  ;;  %17410 = vmatprep.mubr.msk.f32.mxu1 %vm393_vm2, %v9499_v6  ;;  %17446 = vmatpush3.msra.mxu0 %v10292_v61  ;;  %v9501_v28 = vld [vmem:[#allocation2 + $0xeb] sm:$0xff]  ;;  %v10291_v2 = vld [vmem:[%s22742_s6 + $0x38] sm:$0xff] }
 0x347   : > { %v6820_v17 = vpop.f32.mrf.mxu1  ;;  %v20950_v40 = vpop.f32.mrf.mxu0  ;;  %17447 = vmatprep.subr.mxu0 %v10291_v2  ;;  %v9507_v50 = vld [vmem:[#allocation2 + $0x11b] sm:$0xff] }
 0x348   : > { %22873 = vst [vmem:[#allocation66_spill] sm:$0xff] %v20950_v40  ;;  %v20952_v8 = vadd.f32 %v17077_v41, %v6872_v29  ;;  %v20954_v63 = vadd.f32 %v6820_v17, %v6365_v13  ;;  %v9502_v29 = vld [vmem:[#allocation2 + $0xf3] sm:$0xff]  ;;  %17448 = vmatpush3.msra.mxu0 %v10291_v2 }
 0x349   : > { %v17010_v47 = vpop.f32.mrf.mxu1  ;;  %v17080_v36 = vpop.f32.mrf.mxu0  ;;  %17411 = vmatmul.mubr.msk.f32.gmra.mxu1 %vm393_vm2, %v9500_v15  ;;  %v14966_v15 = vld [vmem:[%s22742_s6 + $0xf8] sm:$0xff]  ;;  %v10290_v2 = vld [vmem:[%s22742_s6 + $0x30] sm:$0xff] }
 0x34a   : > { %22874 = vst [vmem:[#allocation67_spill] sm:$0xff] %v20954_v63  ;;  %v6874_v30 = vadd.f32 %v17010_v47, %v20733_v14  ;;  %17413 = vmatprep.mubr.msk.f32.mxu1 %vm393_vm2, %v9501_v28  ;;  %v9503_v14 = vld [vmem:[#allocation2 + $0xfb] sm:$0xff]  ;;  %17517 = vmatprep.subr.mxu1 %v14966_v15 }
 0x34b   : > { %v20962_v6 = vpop.f32.mrf.mxu1  ;;  %v20964_v41 = vpop.f32.mrf.mxu0  ;;  %17518 = vmatpush3.msra.mxu1 %v14966_v15  ;;  %17449 = vmatprep.subr.mxu0 %v10290_v2 }
 0x34c   : > { %22875 = vst [vmem:[#allocation68_spill] sm:$0xff] %v20962_v6  ;;  %22876 = vst [vmem:[#allocation69_spill] sm:$0xff] %v20964_v41  ;;  %v20966_v13 = vadd.f32 %v17080_v36, %v6874_v30  ;;  %v9504_v30 = vld [vmem:[#allocation2 + $0x103] sm:$0xff]  ;;  %17450 = vmatpush3.msra.mxu0 %v10290_v2 }
 0x34d   : > { %v17099_v61 = vpop.f32.mrf.mxu1  ;;  %v17169_v17 = vpop.f32.mrf.mxu0  ;;  %17414 = vmatmul.mubr.msk.f32.gmra.mxu1 %vm393_vm2, %v9502_v29 }
 0x34e   : > { %v7852_v47 = vadd.f32 %v17099_v61, %v20753_v34  ;;  %17416 = vmatprep.mubr.msk.f32.mxu1 %vm393_vm2, %v9503_v14  ;;  %v14965_v34 = vld [vmem:[%s22742_s6 + $0xf0] sm:$0xff] }
 0x34f   : > { %v20974_v28 = vpop.f32.mrf.mxu1  ;;  %v20976_v41 = vpop.f32.mrf.mxu0  ;;  %v9505_v14 = vld [vmem:[#allocation2 + $0x10b] sm:$0xff]  ;;  %17519 = vmatprep.subr.mxu1 %v14965_v34 }
 0x350   : > { %v20978_v36 = vadd.f32 %v17169_v17, %v7852_v47  ;;  %v14964_v17 = vld [vmem:[%s22742_s6 + $0xe8] sm:$0xff]  ;;  %17520 = vmatpush3.msra.mxu1 %v14965_v34 }
 0x351   : > { %v17102_v29 = vpop.f32.mrf.mxu1  ;;  %v17172_v61 = vpop.f32.mrf.mxu0  ;;  %17417 = vmatmul.mubr.msk.f32.gmra.mxu1 %vm393_vm2, %v9504_v30  ;;  %v9506_v30 = vld [vmem:[#allocation2 + $0x113] sm:$0xff]  ;;  %17521 = vmatprep.subr.mxu1 %v14964_v17 }
 0x352   : > { %v7854_v6 = vadd.f32 %v17102_v29, %v20764_v52  ;;  %17419 = vmatprep.mubr.msk.f32.mxu1 %vm393_vm2, %v9505_v14  ;;  %v10289_v52 = vld [vmem:[%s22742_s6 + $0x28] sm:$0xff]  ;;  %v14963_v29 = vld [vmem:[%s22742_s6 + $0xe0] sm:$0xff]  ;;  %17522 = vmatpush3.msra.mxu1 %v14964_v17 }
 0x353   : > { %v20992_v47 = vpop.f32.mrf.mxu1  ;;  %v20994_v15 = vpop.f32.mrf.mxu0  ;;  %17451 = vmatprep.subr.mxu0 %v10289_v52  ;;  %17523 = vmatprep.subr.mxu1 %v14963_v29 }
 0x354   : > { %v20996_v40 = vadd.f32 %v17172_v61, %v7854_v6  ;;  %v14962_v6 = vld [vmem:[%s22742_s6 + $0xd8] sm:$0xff]  ;;  %17452 = vmatpush3.msra.mxu0 %v10289_v52  ;;  %17524 = vmatpush3.msra.mxu1 %v14963_v29 }
 0x355   : > { %v17105_v14 = vpop.f32.mrf.mxu1  ;;  %v17175_v63 = vpop.f32.mrf.mxu0  ;;  %17420 = vmatmul.mubr.msk.f32.gmra.mxu1 %vm393_vm2, %v9506_v30  ;;  %v9508_v30 = vld [vmem:[#allocation2 + $0x123] sm:$0xff]  ;;  %17525 = vmatprep.subr.mxu1 %v14962_v6 }
 0x356   : > { %v7856_v2 = vadd.f32 %v17105_v14, %v20778_v44  ;;  %17422 = vmatprep.mubr.msk.f32.mxu1 %vm393_vm2, %v9507_v50  ;;  %v14961_v44 = vld [vmem:[%s22742_s6 + $0xd0] sm:$0xff]  ;;  %v10288_v50 = vld [vmem:[%s22742_s6 + $0x20] sm:$0xff]  ;;  %17526 = vmatpush3.msra.mxu1 %v14962_v6 }
 0x357   : > { %v21010_v34 = vpop.f32.mrf.mxu1  ;;  %v21012_v61 = vpop.f32.mrf.mxu0  ;;  %17527 = vmatprep.subr.mxu1 %v14961_v44  ;;  %17453 = vmatprep.subr.mxu0 %v10288_v50 }
 0x358   : > { %v21014_v39 = vadd.f32 %v17175_v63, %v7856_v2  ;;  %v14960_v63 = vld [vmem:[%s22742_s6 + $0xc8] sm:$0xff]  ;;  %17528 = vmatpush3.msra.mxu1 %v14961_v44  ;;  %17454 = vmatpush3.msra.mxu0 %v10288_v50  ;;  %v14958_v44 = vld [vmem:[%s22742_s6 + $0xb8] sm:$0xff] }
 0x359   : > { %v17108_v17 = vpop.f32.mrf.mxu1  ;;  %v17178_v14 = vpop.f32.mrf.mxu0  ;;  %17423 = vmatmul.mubr.msk.f32.gmra.mxu1 %vm393_vm2, %v9508_v30  ;;  %v9510_v30 = vld [vmem:[#allocation2 + $0x133] sm:$0xff]  ;;  %17529 = vmatprep.subr.mxu1 %v14960_v63 }
 0x35a   : > { %v7858_v52 = vadd.f32 %v17108_v17, %v20792_v25  ;;  %17425 = vmatprep.mubr.msk.f32.mxu1 %vm393_vm2, %v9509_v46  ;;  %v14959_v25 = vld [vmem:[%s22742_s6 + $0xc0] sm:$0xff]  ;;  %v10287_v46 = vld [vmem:[%s22742_s6 + $0x18] sm:$0xff]  ;;  %17530 = vmatpush3.msra.mxu1 %v14960_v63 }
 0x35b   : > { %v21028_v29 = vpop.f32.mrf.mxu1  ;;  %v21030_v2 = vpop.f32.mrf.mxu0  ;;  %17531 = vmatprep.subr.mxu1 %v14959_v25  ;;  %17455 = vmatprep.subr.mxu0 %v10287_v46 }
 0x35c   : > { %v21032_v51 = vadd.f32 %v17178_v14, %v7858_v52  ;;  %v9512_v14 = vld [vmem:[#allocation2 + $0x143] sm:$0xff]  ;;  %17532 = vmatpush3.msra.mxu1 %v14959_v25  ;;  %17456 = vmatpush3.msra.mxu0 %v10287_v46  ;;  %v14957_v25 = vld [vmem:[%s22742_s6 + $0xb0] sm:$0xff] }
 0x35d   : > { %v17111_v6 = vpop.f32.mrf.mxu1  ;;  %v17181_v17 = vpop.f32.mrf.mxu0  ;;  %17426 = vmatmul.mubr.msk.f32.gmra.mxu1 %vm393_vm2, %v9510_v30  ;;  %17533 = vmatprep.subr.mxu1 %v14958_v44 }
 0x35e   : > { %v7860_v22 = vadd.f32 %v17111_v6, %v20805_v5  ;;  %17428 = vmatprep.mubr.msk.f32.mxu1 %vm393_vm2, %v9511_v18  ;;  %17534 = vmatpush3.msra.mxu1 %v14958_v44 }
 0x35f   : > { %v21046_v50 = vpop.f32.mrf.mxu1  ;;  %v21048_v52 = vpop.f32.mrf.mxu0  ;;  %17535 = vmatprep.subr.mxu1 %v14957_v25 }
 0x360   : > { %v21050_v53 = vadd.f32 %v17181_v17, %v7860_v22  ;;  %17536 = vmatpush3.msra.mxu1 %v14957_v25  ;;  %v10285_v25 = vld [vmem:[%s22742_s6 + $0x8] sm:$0xff] }
 0x361   : > { %v17114_v30 = vpop.f32.mrf.mxu1  ;;  %v17184_v5 = vpop.f32.mrf.mxu0  ;;  %17429 = vmatmul.mubr.msk.f32.gmra.mxu1 %vm393_vm2, %v9512_v14  ;;  %v10286_v14 = vld [vmem:[%s22742_s6 + $0x10] sm:$0xff] }
 0x362   : > { %v7862_v18 = vadd.f32 %v17114_v30, %v20816_v21  ;;  %17457 = vmatprep.subr.mxu0 %v10286_v14 }
 0x363   : > { %v21054_v63 = vpop.f32.mrf.mxu1  ;;  %v21056_v6 = vpop.f32.mrf.mxu0  ;;  %17458 = vmatpush3.msra.mxu0 %v10286_v14 }
 0x364   : > { %22877 = vst [vmem:[#allocation70_spill] sm:$0xff] %v21056_v6  ;;  %v21058_v54 = vadd.f32 %v17184_v5, %v7862_v18  ;;  %17459 = vmatprep.subr.mxu0 %v10285_v25  ;;  %v14994_v6 = vld [vmem:[%s22742_s6 + $0x1d8] sm:$0xff] }
 0x365   : > { %v17117_v43 = vpop.f32.mrf.mxu1  ;;  %v17187_v7 = vpop.f32.mrf.mxu0  ;;  %17460 = vmatpush3.msra.mxu0 %v10285_v25 }
 0x366   : > { %v7864_v22 = vadd.f32 %v17117_v43, %v20826_v16  ;;  %v14956_v16 = vld [vmem:[%s22742_s6 + $0xa8] sm:$0xff] }
 0x367   : > { %v21064_v46 = vpop.f32.mrf.mxu1  ;;  %v21066_v17 = vpop.f32.mrf.mxu0  ;;  %17537 = vmatprep.subr.mxu1 %v14956_v16 }
 0x368   : > { %22878 = vst [vmem:[#allocation71_spill] sm:$0xff] %v21064_v46  ;;  %22879 = vst [vmem:[#allocation72_spill] sm:$0xff] %v21066_v17  ;;  %v21068_v21 = vadd.f32 %v17187_v7, %v7864_v22  ;;  %17538 = vmatpush3.msra.mxu1 %v14956_v16  ;;  %v14955_v7 = vld [vmem:[%s22742_s6 + $0xa0] sm:$0xff]  ;;  %v14996_v46 = vld [vmem:[%s22742_s6 + $0x1e8] sm:$0xff] }
 0x369   : > { %v17120_v43 = vpop.f32.mrf.mxu1  ;;  %v17190_v44 = vpop.f32.mrf.mxu0  ;;  %17539 = vmatprep.subr.mxu1 %v14955_v7 }
 0x36a   : > { %v7866_v30 = vadd.f32 %v17120_v43, %v20836_v49  ;;  %17540 = vmatpush3.msra.mxu1 %v14955_v7  ;;  %v14954_v49 = vld [vmem:[%s22742_s6 + $0x98] sm:$0xff] }
 0x36b   : > { %v21080_v5 = vpop.f32.mrf.mxu1  ;;  %v21082_v18 = vpop.f32.mrf.mxu0  ;;  %17541 = vmatprep.subr.mxu1 %v14954_v49 }
 0x36c   : > { %22880 = vst [vmem:[#allocation73_spill] sm:$0xff] %v21080_v5  ;;  %22881 = vst [vmem:[#allocation74_spill] sm:$0xff] %v21082_v18  ;;  %v21084_v22 = vadd.f32 %v17190_v44, %v7866_v30  ;;  %17542 = vmatpush3.msra.mxu1 %v14954_v49  ;;  %v14953_v44 = vld [vmem:[%s22742_s6 + $0x90] sm:$0xff]  ;;  %v14952_v5 = vld [vmem:[%s22742_s6 + $0x88] sm:$0xff] }
 0x36d   : > { %v17123_v14 = vpop.f32.mrf.mxu1  ;;  %v17193_v16 = vpop.f32.mrf.mxu0  ;;  %17543 = vmatprep.subr.mxu1 %v14953_v44 }
 0x36e   : > { %v7868_v43 = vadd.f32 %v17123_v14, %v20849_v58  ;;  %17544 = vmatpush3.msra.mxu1 %v14953_v44  ;;  %v10284_v58 = vld [vmem:[%s22742_s6] sm:$0xff]  ;;  %v10653_v44 = vld [vmem:[#allocation3 + $0x6] sm:$0xff] }
 0x36f   : > { %v21096_v30 = vpop.f32.mrf.mxu1  ;;  %v21098_v7 = vpop.f32.mrf.mxu0  ;;  %17545 = vmatprep.subr.mxu1 %v14952_v5  ;;  %17461 = vmatprep.subr.mxu0 %v10284_v58 }
 0x370   : > { %22882 = vst [vmem:[#allocation75_spill] sm:$0xff] %v21096_v30  ;;  %22883 = vst [vmem:[#allocation76_spill] sm:$0xff] %v21098_v7  ;;  %v21100_v18 = vadd.f32 %v17193_v16, %v7868_v43  ;;  %17546 = vmatpush3.msra.mxu1 %v14952_v5  ;;  %17462 = vmatpush3.msra.mxu0 %v10284_v58  ;;  %v14951_v16 = vld [vmem:[%s22742_s6 + $0x80] sm:$0xff]  ;;  %v10248_v43 = vld [vmem:[#allocation3 + $0x5] sm:$0xff] }
 0x371   : > { %v17126_v25 = vpop.f32.mrf.mxu1  ;;  %v17196_v49 = vpop.f32.mrf.mxu0  ;;  %17547 = vmatprep.subr.mxu1 %v14951_v16  ;;  %17463 = vmatprep.mubr.f32.mxu0 %v10248_v43  ;;  %v14982_v5 = vld [vmem:[%s22742_s6 + $0x178] sm:$0xff] }
 0x372   : > { %v7870_v14 = vadd.f32 %v17126_v25, %v20859_v48  ;;  %17548 = vmatpush3.msra.mxu1 %v14951_v16  ;;  %17549 = vmatprep.mubr.f32.mxu1 %v10653_v44  ;;  %v10654_v48 = vld [vmem:[#allocation3 + $0xe] sm:$0xff] }
 0x373   : > { %v21112_v7 = vpop.f32.mrf.mxu1  ;;  %v21114_v30 = vpop.f32.mrf.mxu0  ;;  %17464 = vmatmul.mubr.f32.vlgmr.msra.gmra.mxu0 %v10249_v27  ;;  %17550 = vmatmul.mubr.f32.vlgmr.msra.gmra.mxu1 %v10654_v48 }
 0x374   : > { %22884 = vst [vmem:[#allocation77_spill] sm:$0xff] %v21112_v7  ;;  %22885 = vst [vmem:[#allocation78_spill] sm:$0xff] %v21114_v30  ;;  %v21116_v17 = vadd.f32 %v17196_v49, %v7870_v14  ;;  %17603 = vmatprep.subr.mxu0 %v14982_v5 }
 0x375   : > { %v17129_v58 = vpop.f32.mrf.mxu1  ;;  %v17199_v25 = vpop.f32.mrf.mxu0  ;;  %17604 = vmatpush3.msra.mxu0 %v14982_v5 }
 0x376   : > { %v7872_v7 = vadd.f32 %v17129_v58, %v20872_v62  ;;  %17605 = vmatprep.subr.mxu0 %v14981_v9 }
 0x377   : > { %v21122_v30 = vpop.f32.mrf.mxu1  ;;  %v21124_v43 = vpop.f32.mrf.mxu0  ;;  %17606 = vmatpush3.msra.mxu0 %v14981_v9 }
 0x378   : > { %22886 = vst [vmem:[#allocation79_spill] sm:$0xff] %v21122_v30  ;;  %22887 = vst [vmem:[#allocation80_spill] sm:$0xff] %v21124_v43  ;;  %v21126_v49 = vadd.f32 %v17199_v25, %v7872_v7 }
 0x379   : > { %v17132_v14 = vpop.f32.mrf.mxu1  ;;  %v17202_v16 = vpop.f32.mrf.mxu0 }
 0x37a   : > { %v7874_v44 = vadd.f32 %v17132_v14, %v20885_v23  ;;  %v14980_v23 = vld [vmem:[%s22742_s6 + $0x168] sm:$0xff] }
 0x37b   : > { %v21132_v27 = vpop.f32.mrf.mxu1  ;;  %v21134_v48 = vpop.f32.mrf.mxu0  ;;  %17607 = vmatprep.subr.mxu0 %v14980_v23 }
 0x37c   : > { %22888 = vst [vmem:[#allocation81_spill] sm:$0xff] %v21132_v27  ;;  %22889 = vst [vmem:[#allocation82_spill] sm:$0xff] %v21134_v48  ;;  %v21136_v62 = vadd.f32 %v17202_v16, %v7874_v44  ;;  %17608 = vmatpush3.msra.mxu0 %v14980_v23 }
 0x37d   : > { %v17135_v58 = vpop.f32.mrf.mxu1  ;;  %v17205_v5 = vpop.f32.mrf.mxu0 }
 0x37e   : > { %v7876_v7 = vadd.f32 %v17135_v58, %v20898_v35  ;;  %v14979_v35 = vld [vmem:[%s22742_s6 + $0x160] sm:$0xff] }
 0x37f   : > { %v21142_v25 = vpop.f32.mrf.mxu1  ;;  %v21144_v14 = vpop.f32.mrf.mxu0  ;;  %17609 = vmatprep.subr.mxu0 %v14979_v35 }
 0x380   : > { %22890 = vst [vmem:[#allocation83_spill] sm:$0xff] %v21142_v25  ;;  %22891 = vst [vmem:[#allocation84_spill] sm:$0xff] %v21144_v14  ;;  %v21146_v27 = vadd.f32 %v17205_v5, %v7876_v7  ;;  %17610 = vmatpush3.msra.mxu0 %v14979_v35 }
 0x381   : > { %v17138_v48 = vpop.f32.mrf.mxu1  ;;  %v17208_v16 = vpop.f32.mrf.mxu0 }
 0x382   : > { %v7878_v9 = vadd.f32 %v17138_v48, %v20911_v1  ;;  %v14978_v1 = vld [vmem:[%s22742_s6 + $0x158] sm:$0xff] }
 0x383   : > { %v21152_v44 = vpop.f32.mrf.mxu1  ;;  %v21154_v58 = vpop.f32.mrf.mxu0  ;;  %17611 = vmatprep.subr.mxu0 %v14978_v1 }
 0x384   : > { %22892 = vst [vmem:[#allocation85_spill] sm:$0xff] %v21152_v44  ;;  %22893 = vst [vmem:[#allocation86_spill] sm:$0xff] %v21154_v58  ;;  %v21156_v25 = vadd.f32 %v17208_v16, %v7878_v9  ;;  %17612 = vmatpush3.msra.mxu0 %v14978_v1 }
 0x385   : > { %v17141_v14 = vpop.f32.mrf.mxu1  ;;  %v17211_v5 = vpop.f32.mrf.mxu0 }
 0x386   : > { %v7880_v7 = vadd.f32 %v17141_v14, %v20924_v59  ;;  %v14977_v14 = vld [vmem:[%s22742_s6 + $0x150] sm:$0xff] }
 0x387   : > { %v21162_v48 = vpop.f32.mrf.mxu1  ;;  %v21164_v23 = vpop.f32.mrf.mxu0  ;;  %17613 = vmatprep.subr.mxu0 %v14977_v14 }
 0x388   : > { %22894 = vst [vmem:[#allocation87_spill] sm:$0xff] %v21162_v48  ;;  %22895 = vst [vmem:[#allocation88_spill] sm:$0xff] %v21164_v23  ;;  %v21166_v44 = vadd.f32 %v17211_v5, %v7880_v7  ;;  %17614 = vmatpush3.msra.mxu0 %v14977_v14 }
 0x389   : > { %v17144_v58 = vpop.f32.mrf.mxu1  ;;  %v17214_v16 = vpop.f32.mrf.mxu0 }
 0x38a   : > { %v7882_v9 = vadd.f32 %v17144_v58, %v20937_v26  ;;  %v14976_v58 = vld [vmem:[%s22742_s6 + $0x148] sm:$0xff] }
 0x38b   : > { %v21169_v35 = vpop.f32.mrf.mxu1  ;;  %v21171_v43 = vpop.f32.mrf.mxu0  ;;  %17615 = vmatprep.subr.mxu0 %v14976_v58 }
 0x38c   : > { %22896 = vst [vmem:[#allocation89_spill] sm:$0xff] %v21169_v35  ;;  %22897 = vst [vmem:[#allocation90_spill] sm:$0xff] %v21171_v43  ;;  %v21173_v59 = vadd.f32 %v17214_v16, %v7882_v9  ;;  %17616 = vmatpush3.msra.mxu0 %v14976_v58 }
 0x38d   : > { %v17147_v48 = vpop.f32.mrf.mxu1  ;;  %v17217_v23 = vpop.f32.mrf.mxu0 }
 0x38e   : > { %v7884_v5 = vadd.f32 %v17147_v48, %v20952_v8 }
 0x38f   : > { %v21179_v7 = vpop.f32.mrf.mxu1  ;;  %v21181_v1 = vpop.f32.mrf.mxu0 }
 0x390   : > { %22898 = vst [vmem:[#allocation91_spill] sm:$0xff] %v21179_v7  ;;  %22899 = vst [vmem:[#allocation92_spill] sm:$0xff] %v21181_v1  ;;  %v21183_v26 = vadd.f32 %v17217_v23, %v7884_v5  ;;  %v14975_v23 = vld [vmem:[%s22742_s6 + $0x140] sm:$0xff]  ;;  %v14998_v7 = vld [vmem:[%s22742_s6 + $0x1f8] sm:$0xff] }
 0x391   : > { %v17150_v16 = vpop.f32.mrf.mxu1  ;;  %v17220_v9 = vpop.f32.mrf.mxu0  ;;  %17617 = vmatprep.subr.mxu0 %v14975_v23  ;;  %17689 = vmatprep.subr.mxu1 %v14998_v7 }
 0x392   : > { %v7886_v43 = vadd.f32 %v17150_v16, %v20966_v13  ;;  %17618 = vmatpush3.msra.mxu0 %v14975_v23  ;;  %17690 = vmatpush3.msra.mxu1 %v14998_v7 }
 0x393   : > { %v21189_v35 = vpop.f32.mrf.mxu1  ;;  %v21191_v8 = vpop.f32.mrf.mxu0 }
 0x394   : > { %22900 = vst [vmem:[#allocation93_spill] sm:$0xff] %v21189_v35  ;;  %22901 = vst [vmem:[#allocation94_spill] sm:$0xff] %v21191_v8  ;;  %v21193_v48 = vadd.f32 %v17220_v9, %v7886_v43  ;;  %v14974_v43 = vld [vmem:[%s22742_s6 + $0x138] sm:$0xff] }
 0x395   : > { %v17239_v14 = vpop.f32.mrf.mxu1  ;;  %v21198_v5 = vpop.f32.mrf.mxu0  ;;  %17619 = vmatprep.subr.mxu0 %v14974_v43 }
 0x396   : > { %v21201_v1 = vadd.f32 %v17239_v14, %v20978_v36  ;;  %17620 = vmatpush3.msra.mxu0 %v14974_v43  ;;  %v14973_v14 = vld [vmem:[%s22742_s6 + $0x130] sm:$0xff] }
 0x397   : > { %v21203_v13 = vpop.f32.mrf.mxu1  ;;  %v21205_v58 = vpop.f32.mrf.mxu0  ;;  %17621 = vmatprep.subr.mxu0 %v14973_v14 }
 0x398   : > { %17622 = vmatpush3.msra.mxu0 %v14973_v14 }
 0x399   : > { %v17242_v16 = vpop.f32.mrf.mxu1  ;;  %v21215_v35 = vpop.f32.mrf.mxu0 }
 0x39a   : > { %v21211_v9 = vadd.f32 %v17242_v16, %v20996_v40 }
 0x39b   : > { %v21213_v8 = vpop.f32.mrf.mxu1  ;;  %v21228_v40 = vpop.f32.mrf.mxu0 }
 0x39d   : > { %v17245_v36 = vpop.f32.mrf.mxu1  ;;  %v21244_v7 = vpop.f32.mrf.mxu0 }
 0x39e   : > { %v21218_v23 = vadd.f32 %v17245_v36, %v21014_v39  ;;  %v14997_v39 = vld [vmem:[%s22742_s6 + $0x1f0] sm:$0xff]  ;;  %v14972_v36 = vld [vmem:[%s22742_s6 + $0x128] sm:$0xff] }
 0x39f   : > { %v21226_v30 = vpop.f32.mrf.mxu1  ;;  %17691 = vmatprep.subr.mxu1 %v14997_v39  ;;  %17623 = vmatprep.subr.mxu0 %v14972_v36 }
 0x3a0   : > { %17692 = vmatpush3.msra.mxu1 %v14997_v39  ;;  %17624 = vmatpush3.msra.mxu0 %v14972_v36 }
 0x3a1   : > { %v17248_v43 = vpop.f32.mrf.mxu1  ;;  %17693 = vmatprep.subr.mxu1 %v14996_v46  ;;  %17625 = vmatprep.subr.mxu0 %v14971_v33 }
 0x3a2   : > { %v21234_v16 = vadd.f32 %v17248_v43, %v21032_v51  ;;  %17694 = vmatpush3.msra.mxu1 %v14996_v46  ;;  %v14995_v51 = vld [vmem:[%s22742_s6 + $0x1e0] sm:$0xff]  ;;  %v21260_v46 = vpop.f32.mrf.mxu0  ;;  %17626 = vmatpush3.msra.mxu0 %v14971_v33 }
 0x3a3   : > { %v21242_v14 = vpop.f32.mrf.mxu1  ;;  %17695 = vmatprep.subr.mxu1 %v14995_v51 }
 0x3a4   : > { %17696 = vmatpush3.msra.mxu1 %v14995_v51  ;;  %v21276_v33 = vpop.f32.mrf.mxu0 }
 0x3a5   : > { %v17251_v39 = vpop.f32.mrf.mxu1  ;;  %17697 = vmatprep.subr.mxu1 %v14994_v6 }
 0x3a6   : > { %v21250_v43 = vadd.f32 %v17251_v39, %v21050_v53  ;;  %17698 = vmatpush3.msra.mxu1 %v14994_v6  ;;  %v14993_v53 = vld [vmem:[%s22742_s6 + $0x1d0] sm:$0xff]  ;;  %v21298_v12 = vpop.f32.mrf.mxu0 }
 0x3a7   : > { %v21258_v36 = vpop.f32.mrf.mxu1  ;;  %17699 = vmatprep.subr.mxu1 %v14993_v53 }
 0x3a8   : > { %22902 = vst [vmem:[#allocation95_spill] sm:$0xff] %v21250_v43  ;;  %22903 = vst [vmem:[#allocation96_spill] sm:$0xff] %v21258_v36  ;;  %17700 = vmatpush3.msra.mxu1 %v14993_v53  ;;  %v14992_v43 = vld [vmem:[%s22742_s6 + $0x1c8] sm:$0xff]  ;;  %v14970_v36 = vld [vmem:[%s22742_s6 + $0x118] sm:$0xff] }
 0x3a9   : > { %v17254_v51 = vpop.f32.mrf.mxu1  ;;  %17701 = vmatprep.subr.mxu1 %v14992_v43  ;;  %17627 = vmatprep.subr.mxu0 %v14970_v36  ;;  %v14990_v53 = vld [vmem:[%s22742_s6 + $0x1b8] sm:$0xff] }
 0x3aa   : > { %v21266_v39 = vadd.f32 %v17254_v51, %v21058_v54  ;;  %17702 = vmatpush3.msra.mxu1 %v14992_v43  ;;  %17628 = vmatpush3.msra.mxu0 %v14970_v36  ;;  %v14991_v54 = vld [vmem:[%s22742_s6 + $0x1c0] sm:$0xff]  ;;  %v14969_v51 = vld [vmem:[%s22742_s6 + $0x110] sm:$0xff]  ;;  %v14968_v43 = vld [vmem:[%s22742_s6 + $0x108] sm:$0xff] }
 0x3ab   : > { %v21274_v6 = vpop.f32.mrf.mxu1  ;;  %17703 = vmatprep.subr.mxu1 %v14991_v54  ;;  %17629 = vmatprep.subr.mxu0 %v14969_v51 }
 0x3ac   : > { %22904 = vst [vmem:[#allocation97_spill] sm:$0xff] %v21266_v39  ;;  %22905 = vst [vmem:[#allocation98_spill] sm:$0xff] %v21274_v6  ;;  %17704 = vmatpush3.msra.mxu1 %v14991_v54  ;;  %v14989_v6 = vld [vmem:[%s22742_s6 + $0x1b0] sm:$0xff]  ;;  %17630 = vmatpush3.msra.mxu0 %v14969_v51  ;;  %v15014_v51 = vld [vmem:[%s22742_s6 + $0x278] sm:$0xff] }
 0x3ad   : > { %v17257_v39 = vpop.f32.mrf.mxu1  ;;  %17705 = vmatprep.subr.mxu1 %v14990_v53  ;;  %17631 = vmatprep.subr.mxu0 %v14968_v43 }
 0x3ae   : > { %v21291_v36 = vadd.f32 %v17257_v39, %v21068_v21  ;;  %17706 = vmatpush3.msra.mxu1 %v14990_v53  ;;  %17632 = vmatpush3.msra.mxu0 %v14968_v43  ;;  %v14967_v21 = vld [vmem:[%s22742_s6 + $0x100] sm:$0xff] }
 0x3af   : > { %v21296_v56 = vpop.f32.mrf.mxu1  ;;  %17707 = vmatprep.subr.mxu1 %v14989_v6  ;;  %17633 = vmatprep.subr.mxu0 %v14967_v21  ;;  %v14987_v53 = vld [vmem:[%s22742_s6 + $0x1a0] sm:$0xff] }
 0x3b0   : > { %22906 = vst [vmem:[#allocation99_spill] sm:$0xff] %v21291_v36  ;;  %22907 = vst [vmem:[#allocation100_spill] sm:$0xff] %v21296_v56  ;;  %17708 = vmatpush3.msra.mxu1 %v14989_v6  ;;  %17634 = vmatpush3.msra.mxu0 %v14967_v21  ;;  %v21317_v36 = vpop.f32.mrf.mxu0  ;;  %v14985_v21 = vld [vmem:[%s22742_s6 + $0x190] sm:$0xff] }
 0x3b1   : > { %v17260_v39 = vpop.f32.mrf.mxu1  ;;  %17709 = vmatprep.subr.mxu1 %v14988_v57  ;;  %17775 = vmatprep.subr.mxu0 %v15014_v51 }
 0x3b2   : > { %v21307_v54 = vadd.f32 %v17260_v39, %v21084_v22  ;;  %17710 = vmatpush3.msra.mxu1 %v14988_v57  ;;  %v14986_v22 = vld [vmem:[%s22742_s6 + $0x198] sm:$0xff]  ;;  %v21330_v51 = vpop.f32.mrf.mxu0  ;;  %v14984_v57 = vld [vmem:[%s22742_s6 + $0x188] sm:$0xff] }
 0x3b3   : > { %v21315_v43 = vpop.f32.mrf.mxu1  ;;  %17711 = vmatprep.subr.mxu1 %v14987_v53  ;;  %22912 = vst [vmem:[#allocation105_spill] sm:$0xff] %v21330_v51 }
 0x3b4   : > { %22908 = vst [vmem:[#allocation101_spill] sm:$0xff] %v21307_v54  ;;  %22909 = vst [vmem:[#allocation102_spill] sm:$0xff] %v21315_v43  ;;  %17712 = vmatpush3.msra.mxu1 %v14987_v53  ;;  %v14983_v53 = vld [vmem:[%s22742_s6 + $0x180] sm:$0xff] }
 0x3b5   : > { %v17263_v6 = vpop.f32.mrf.mxu1  ;;  %17713 = vmatprep.subr.mxu1 %v14986_v22 }
 0x3b6   : > { %v21323_v39 = vadd.f32 %v17263_v6, %v21100_v18  ;;  %17714 = vmatpush3.msra.mxu1 %v14986_v22 }
 0x3b7   : > { %v21328_v54 = vpop.f32.mrf.mxu1  ;;  %17715 = vmatprep.subr.mxu1 %v14985_v21 }
 0x3b8   : > { %22910 = vst [vmem:[#allocation103_spill] sm:$0xff] %v21323_v39  ;;  %22911 = vst [vmem:[#allocation104_spill] sm:$0xff] %v21328_v54  ;;  %17716 = vmatpush3.msra.mxu1 %v14985_v21  ;;  %v21343_v39 = vpop.f32.mrf.mxu0 }
 0x3b9   : > { %v17266_v43 = vpop.f32.mrf.mxu1  ;;  %17717 = vmatprep.subr.mxu1 %v14984_v57  ;;  %22915 = vst [vmem:[#allocation108_spill] sm:$0xff] %v21343_v39 }
 0x3ba   : > { %v21336_v18 = vadd.f32 %v17266_v43, %v21116_v17  ;;  %17718 = vmatpush3.msra.mxu1 %v14984_v57  ;;  %v21350_v17 = vpop.f32.mrf.mxu0 }
 0x3bb   : > { %v21341_v6 = vpop.f32.mrf.mxu1  ;;  %17719 = vmatprep.subr.mxu1 %v14983_v53 }
 0x3bc   : > { %22913 = vst [vmem:[#allocation106_spill] sm:$0xff] %v21336_v18  ;;  %22914 = vst [vmem:[#allocation107_spill] sm:$0xff] %v21341_v6  ;;  %17720 = vmatpush3.msra.mxu1 %v14983_v53  ;;  %v21357_v6 = vpop.f32.mrf.mxu0 }
 0x3bd   : > { %v17269_v22 = vpop.f32.mrf.mxu1 }
 0x3be   : > { %v21346_v54 = vadd.f32 %v17269_v22, %v21126_v49  ;;  %v21364_v49 = vpop.f32.mrf.mxu0 }
 0x3bf   : > { %v21348_v56 = vpop.f32.mrf.mxu1 }
 0x3c0   : > { %22916 = vst [vmem:[#allocation109_spill] sm:$0xff] %v21346_v54 }
 0x3c1   : > { %v17272_v43 = vpop.f32.mrf.mxu1 }
 0x3c2   : > { %v21353_v21 = vadd.f32 %v17272_v43, %v21136_v62  ;;  %v6333_v62 = vadd.f32 %v20526_v20, %v20524_v11  ;;  %v21373_v43 = vpop.f32.mrf.mxu0 }
 0x3c3   : > { %v21355_v18 = vpop.f32.mrf.mxu1 }
 0x3c4   : > { %22917 = vst [vmem:[#allocation110_spill] sm:$0xff] %v21353_v21  ;;  %22918 = vst [vmem:[#allocation111_spill] sm:$0xff] %v21355_v18  ;;  %v6839_v18 = vadd.f32 %v20749_v0, %v6333_v62 }
 0x3c5   : > { %v17275_v39 = vpop.f32.mrf.mxu1 }
 0x3c6   : > { %v21360_v57 = vadd.f32 %v17275_v39, %v21146_v27 }
 0x3c7   : > { %v21362_v51 = vpop.f32.mrf.mxu1 }
 0x3c8   : > { %22919 = vst [vmem:[#allocation112_spill] sm:$0xff] %v21360_v57  ;;  %22920 = vst [vmem:[#allocation113_spill] sm:$0xff] %v21362_v51  ;;  %v21381_v57 = vpop.f32.mrf.mxu0 }
 0x3c9   : > { %v17278_v53 = vpop.f32.mrf.mxu1 }
 0x3ca   : > { %v21367_v22 = vadd.f32 %v17278_v53, %v21156_v25  ;;  %v7345_v25 = vadd.f32 %v20751_v19, %v6839_v18  ;;  %v21390_v11 = vpop.f32.mrf.mxu0 }
 0x3cb   : > { %v21369_v54 = vpop.f32.mrf.mxu1 }
 0x3cc   : > { %22921 = vst [vmem:[#allocation114_spill] sm:$0xff] %v21367_v22  ;;  %v7851_v20 = vadd.f32 %v20974_v28, %v7345_v25  ;;  %v7349_v28 = vadd.f32 %v20776_v10, %v20781_v4  ;;  %v7351_v10 = vadd.f32 %v20790_v3, %v20795_v42 }
 0x3cd   : > { %v17281_v21 = vpop.f32.mrf.mxu1 }
 0x3ce   : > { %v21377_v27 = vadd.f32 %v17281_v21, %v21166_v44  ;;  %v7347_v44 = vadd.f32 %v20762_v38, %v20767_v37  ;;  %v8357_v19 = vadd.f32 %v20976_v41, %v7851_v20  ;;  %v7855_v38 = vadd.f32 %v21010_v34, %v7349_v28  ;;  %v21427_v34 = vld [vmem:[%s22742_s6 + $0x2f8] sm:$0xff] }
 0x3cf   : > { %v21379_v39 = vpop.f32.mrf.mxu1  ;;  %v9370_v41 = vadd.f32 %v21198_v5, %v21201_v1  ;;  %17861 = vmatprep.subr.mxu1 %v21427_v34  ;;  %v7857_v42 = vadd.f32 %v21028_v29, %v7351_v10  ;;  %v9372_v20 = vadd.f32 %v21215_v35, %v21211_v9  ;;  %v9374_v9 = vadd.f32 %v21244_v7, %v21218_v23 }
 0x3d0   : > { %v8863_v25 = vadd.f32 %v21203_v13, %v8357_v19  ;;  %v8361_v3 = vadd.f32 %v21012_v61, %v7855_v38 }
 0x3d1   : > { %v17284_v51 = vpop.f32.mrf.mxu1 }
 0x3d2   : > { %v21385_v53 = vadd.f32 %v17284_v51, %v21173_v59  ;;  %v7853_v59 = vadd.f32 %v20992_v47, %v7347_v44  ;;  %v21401_v51 = vpop.f32.mrf.mxu0 }
 0x3d3   : > { %v21387_v22 = vpop.f32.mrf.mxu1 }
 0x3d4   : > { %22922 = vst [vmem:[#allocation115_spill] sm:$0xff] %v21385_v53  ;;  %v21415_v47 = vpop.f32.mrf.mxu0 }
 0x3d5   : > { %v17287_v0 = vpop.f32.mrf.mxu1 }
 0x3d6   : > { %v21395_v21 = vadd.f32 %v17287_v0, %v21183_v26  ;;  %v8359_v26 = vadd.f32 %v20994_v15, %v7853_v59  ;;  %v9369_v15 = vadd.f32 %v21205_v58, %v8863_v25  ;;  %v21436_v0 = vpop.f32.mrf.mxu0  ;;  %v7353_v58 = vadd.f32 %v20803_v24, %v20808_v60 }
 0x3d7   : > { %v21397_v62 = vpop.f32.mrf.mxu1  ;;  %v8363_v25 = vadd.f32 %v21030_v2, %v7857_v42 }
 0x3d8   : > { %v8865_v1 = vadd.f32 %v21213_v8, %v8359_v26  ;;  %v8867_v8 = vadd.f32 %v21226_v30, %v8361_v3  ;;  %v7859_v35 = vadd.f32 %v21046_v50, %v7353_v58  ;;  %v21448_v26 = vpop.f32.mrf.mxu0  ;;  %v9376_v3 = vadd.f32 %v21276_v33, %v21234_v16  ;;  %v22927_v16 = vld [vmem:[#allocation10_spill] sm:$0xff] }
 0x3d9   : > { %v17290_v18 = vpop.f32.mrf.mxu1  ;;  %v8869_v2 = vadd.f32 %v21242_v14, %v8363_v25  ;;  %v22923_v14 = vld [vmem:[#allocation11_spill] sm:$0xff] }
 0x3da   : > { %v21407_v53 = vadd.f32 %v17290_v18, %v21193_v48  ;;  %v21422_v48 = vld [vmem:[%s22741_s5] ss:$0 sm:$0xff]  ;;  %v9371_v28 = vadd.f32 %v21228_v40, %v8865_v1  ;;  %v9373_v10 = vadd.f32 %v21260_v46, %v8867_v8  ;;  %v8365_v1 = vadd.f32 %v21048_v52, %v7859_v35  ;;  %v22926_v8 = vld [vmem:[#allocation96_spill] sm:$0xff]  ;;  %v22929_v35 = vld [vmem:[#allocation71_spill] sm:$0xff] }
 0x3db   : > { %v21410_v37 = vpop.f32.mrf.mxu1  ;;  %v9375_v52 = vadd.f32 %v21298_v12, %v8869_v2  ;;  %v22931_v12 = vld [vmem:[#allocation13_spill] sm:$0xff] }
 0x3dd   : > { %v17379_v4 = vpop.f32.mrf.mxu1 }
 0x3de   : > { %v9876_v5 = vadd.f32 %v17379_v4, %v9370_v41  ;;  %v7355_v41 = vadd.f32 %v20814_v45, %v20819_v31  ;;  %v21462_v31 = vpop.f32.mrf.mxu0 }
 0x3df   : > { %v9696_v13 = vpop.f32.mrf.mxu1 }
 0x3e0   : > { %v9991_v44 = vadd.f32 %v21422_v48, %v9876_v5  ;;  %v9875_v19 = vadd.f32 %v9696_v13, %v9369_v15  ;;  %v7861_v5 = vadd.f32 %v21054_v63, %v7355_v41  ;;  %v8871_v63 = vadd.f32 %v22926_v8, %v8365_v1  ;;  %v22935_v1 = vld [vmem:[#allocation98_spill] sm:$0xff]  ;;  %v22940_v8 = vld [vmem:[#allocation108_spill] sm:$0xff] }
 0x3e1   : > { %v17382_v59 = vpop.f32.mrf.mxu1 }
 0x3e2   : > { %v10027_v61 = vmax.f32 %v9991_v44, 0.0  ;;  %v9990_v29 = vadd.f32 %v21422_v48, %v9875_v19  ;;  %v9878_v18 = vadd.f32 %v17382_v59, %v9372_v20  ;;  %v22924_v44 = vld [vmem:[#allocation47_spill] sm:$0xff]  ;;  %v22925_v19 = vld [vmem:[#allocation46_spill] sm:$0xff] }
 0x3e3   : > { %v9706_v38 = vpop.f32.mrf.mxu1  ;;  %v7357_v58 = vadd.f32 %v22925_v19, %v22924_v44  ;;  %v22938_v19 = vld [vmem:[#allocation73_spill] sm:$0xff] }
 0x3e4   : > { %v10063_v24 = vmul.f32 %v10027_v61, %v19876_v55  ;;  %v10026_v60 = vmax.f32 %v9990_v29, 0.0  ;;  %v9993_v30 = vadd.f32 %v21422_v48, %v9878_v18  ;;  %v9877_v40 = vadd.f32 %v9706_v38, %v9371_v28  ;;  %v22928_v18 = vld [vmem:[#allocation70_spill] sm:$0xff]  ;;  %v22930_v38 = vld [vmem:[#allocation95_spill] sm:$0xff] }
 0x3e5   : > { %v17385_v50 = vpop.f32.mrf.mxu1  ;;  %v8367_v25 = vadd.f32 %v22928_v18, %v7861_v5  ;;  %v22941_v18 = vld [vmem:[#allocation15_spill] sm:$0xff] }
 0x3e6   : > { %10141 = vst [vmem:[#allocation3 + $0x20] sm:$0xff] %v10063_v24  ;;  %v10062_v23 = vmul.f32 %v10026_v60, %v19866_v32  ;;  %v10029_v7 = vmax.f32 %v9993_v30, 0.0  ;;  %v9992_v4 = vadd.f32 %v21422_v48, %v9877_v40  ;;  %v9880_v15 = vadd.f32 %v17385_v50, %v9374_v9  ;;  %v21476_v30 = vpop.f32.mrf.mxu0  ;;  %v22932_v50 = vld [vmem:[#allocation49_spill] sm:$0xff] }
 0x3e7   : > { %v9716_v45 = vpop.f32.mrf.mxu1  ;;  %v7863_v9 = vadd.f32 %v22929_v35, %v7357_v58  ;;  %v9378_v24 = vadd.f32 %v21317_v36, %v22930_v38  ;;  %v8873_v5 = vadd.f32 %v22935_v1, %v8367_v25  ;;  %v22936_v36 = vld [vmem:[#allocation12_spill] sm:$0xff] }
 0x3e8   : > { %10140 = vst [vmem:[#allocation3 + $0x18] sm:$0xff] %v10062_v23  ;;  %v10065_v46 = vmul.f32 %v10029_v7, %v22923_v14  ;;  %v10028_v42 = vmax.f32 %v9992_v4, 0.0  ;;  %v9995_v13 = vadd.f32 %v21422_v48, %v9880_v15  ;;  %v9879_v20 = vadd.f32 %v9716_v45, %v9373_v10  ;;  %v22933_v23 = vld [vmem:[#allocation48_spill] sm:$0xff]  ;;  %v22934_v4 = vld [vmem:[#allocation105_spill] sm:$0xff] }
 0x3e9   : > { %v17388_v59 = vpop.f32.mrf.mxu1  ;;  %v7359_v7 = vadd.f32 %v22933_v23, %v22932_v50  ;;  %v9377_v15 = vadd.f32 %v22934_v4, %v8871_v63 }
 0x3ea   : > { %10143 = vst [vmem:[#allocation3 + $0x30] sm:$0xff] %v10065_v46  ;;  %v10064_v33 = vmul.f32 %v10028_v42, %v22927_v16  ;;  %v10031_v28 = vmax.f32 %v9995_v13, 0.0  ;;  %v9994_v61 = vadd.f32 %v21422_v48, %v9879_v20  ;;  %v9882_v29 = vadd.f32 %v17388_v59, %v9376_v3  ;;  %v22937_v20 = vld [vmem:[#allocation72_spill] sm:$0xff] }
 0x3eb   : > { %v9726_v60 = vpop.f32.mrf.mxu1  ;;  %v8369_v44 = vadd.f32 %v22937_v20, %v7863_v9  ;;  %v7865_v58 = vadd.f32 %v22938_v19, %v7359_v7  ;;  %v22945_v7 = vld [vmem:[#allocation14_spill] sm:$0xff]  ;;  %v22948_v20 = vld [vmem:[#allocation99_spill] sm:$0xff] }
 0x3ec   : > { %10142 = vst [vmem:[#allocation3 + $0x28] sm:$0xff] %v10064_v33  ;;  %v10067_v40 = vmul.f32 %v10031_v28, %v22931_v12  ;;  %v10030_v41 = vmax.f32 %v9994_v61, 0.0  ;;  %v9997_v10 = vadd.f32 %v21422_v48, %v9882_v29  ;;  %v9881_v2 = vadd.f32 %v9726_v60, %v9375_v52  ;;  %v22939_v52 = vld [vmem:[#allocation97_spill] sm:$0xff]  ;;  %v21490_v29 = vpop.f32.mrf.mxu0  ;;  %v22942_v60 = vld [vmem:[#allocation51_spill] sm:$0xff] }
 0x3ed   : > { %v17391_v3 = vpop.f32.mrf.mxu1  ;;  %v9380_v59 = vadd.f32 %v22940_v8, %v22939_v52  ;;  %v9382_v19 = vadd.f32 %v21357_v6, %v22948_v20 }
 0x3ee   : > { %10145 = vst [vmem:[#allocation3 + $0x40] sm:$0xff] %v10067_v40  ;;  %v10066_v45 = vmul.f32 %v10030_v41, %v22936_v36  ;;  %v10033_v46 = vmax.f32 %v9997_v10, 0.0  ;;  %v9996_v42 = vadd.f32 %v21422_v48, %v9881_v2  ;;  %v9884_v13 = vadd.f32 %v17391_v3, %v9378_v24  ;;  %v22943_v40 = vld [vmem:[#allocation50_spill] sm:$0xff]  ;;  %v22944_v2 = vld [vmem:[#allocation100_spill] sm:$0xff]  ;;  %v21504_v8 = vpop.f32.mrf.mxu0 }
 0x3ef   : > { %v9736_v33 = vpop.f32.mrf.mxu1  ;;  %v10250_v28 = vld [vmem:[#allocation3 + $0x15] sm:$0xff]  ;;  %v10251_v61 = vld [vmem:[#allocation3 + $0x1d] sm:$0xff]  ;;  %v7361_v41 = vadd.f32 %v22943_v40, %v22942_v60  ;;  %v9379_v10 = vadd.f32 %v21350_v17, %v8873_v5  ;;  %v8875_v50 = vadd.f32 %v22944_v2, %v8369_v44 }
 0x3f0   : > { %v10655_v63 = vld [vmem:[#allocation3 + $0x16] sm:$0xff]  ;;  %10144 = vst [vmem:[#allocation3 + $0x38] sm:$0xff] %v10066_v45  ;;  %v10069_v25 = vmul.f32 %v10033_v46, %v22941_v18  ;;  %v10032_v35 = vmax.f32 %v9996_v42, 0.0  ;;  %v9999_v38 = vadd.f32 %v21422_v48, %v9884_v13  ;;  %v9883_v24 = vadd.f32 %v9736_v33, %v9377_v15  ;;  %17466 = vmatprep.mubr.f32.mxu0 %v10250_v28  ;;  %v10656_v9 = vld [vmem:[#allocation3 + $0x1e] sm:$0xff]  ;;  %v22949_v33 = vld [vmem:[#allocation17_spill] sm:$0xff] }
 0x3f1   : > { %17552 = vmatprep.mubr.f32.mxu1 %v10655_v63  ;;  %v17394_v23 = vpop.f32.mrf.mxu1  ;;  %17467 = vmatmul.mubr.f32.gmra.mxu0 %v10251_v61  ;;  %v22946_v45 = vld [vmem:[#allocation74_spill] sm:$0xff]  ;;  %v22947_v42 = vld [vmem:[#allocation75_spill] sm:$0xff]  ;;  %v9381_v6 = vadd.f32 %v21364_v49, %v8875_v50  ;;  %v22953_v40 = vld [vmem:[#allocation16_spill] sm:$0xff] }
 0x3f2   : > { %17553 = vmatmul.mubr.f32.gmra.mxu1 %v10656_v9  ;;  %10147 = vst [vmem:[#allocation3 + $0x50] sm:$0xff] %v10069_v25  ;;  %v10068_v4 = vmul.f32 %v10032_v35, %v22945_v7  ;;  %v10035_v1 = vmax.f32 %v9999_v38, 0.0  ;;  %v9998_v3 = vadd.f32 %v21422_v48, %v9883_v24  ;;  %v9886_v15 = vadd.f32 %v17394_v23, %v9380_v59  ;;  %v22950_v25 = vld [vmem:[#allocation53_spill] sm:$0xff]  ;;  %v22951_v35 = vld [vmem:[#allocation52_spill] sm:$0xff]  ;;  %v22952_v24 = vld [vmem:[#allocation102_spill] sm:$0xff] }
 0x3f3   : > { %v8371_v46 = vadd.f32 %v22946_v45, %v7865_v58  ;;  %v7867_v13 = vadd.f32 %v22947_v42, %v7361_v41  ;;  %v9746_v17 = vpop.f32.mrf.mxu1  ;;  %v10252_v5 = vld [vmem:[#allocation3 + $0x25] sm:$0xff]  ;;  %v10253_v52 = vld [vmem:[#allocation3 + $0x2d] sm:$0xff]  ;;  %v7363_v38 = vadd.f32 %v22951_v35, %v22950_v25 }
 0x3f4   : > { %v10657_v44 = vld [vmem:[#allocation3 + $0x26] sm:$0xff]  ;;  %10146 = vst [vmem:[#allocation3 + $0x48] sm:$0xff] %v10068_v4  ;;  %v10071_v28 = vmul.f32 %v10035_v1, %v22949_v33  ;;  %v10034_v63 = vmax.f32 %v9998_v3, 0.0  ;;  %v10001_v61 = vadd.f32 %v21422_v48, %v9886_v15  ;;  %v9885_v59 = vadd.f32 %v9746_v17, %v9379_v10  ;;  %17469 = vmatprep.mubr.f32.mxu0 %v10252_v5  ;;  %v10658_v58 = vld [vmem:[#allocation3 + $0x2e] sm:$0xff]  ;;  %v21518_v17 = vpop.f32.mrf.mxu0  ;;  %v22957_v5 = vld [vmem:[#allocation19_spill] sm:$0xff] }
 0x3f5   : > { %17555 = vmatprep.mubr.f32.mxu1 %v10657_v44  ;;  %v8877_v9 = vadd.f32 %v22952_v24, %v8371_v46  ;;  %v17397_v60 = vpop.f32.mrf.mxu1  ;;  %17470 = vmatmul.mubr.f32.gmra.mxu0 %v10253_v52  ;;  %v22954_v4 = vld [vmem:[#allocation76_spill] sm:$0xff]  ;;  %v22955_v3 = vld [vmem:[#allocation77_spill] sm:$0xff] }
 0x3f6   : > { %17556 = vmatmul.mubr.f32.gmra.mxu1 %v10658_v58  ;;  %10149 = vst [vmem:[#allocation3 + $0x60] sm:$0xff] %v10071_v28  ;;  %v10070_v41 = vmul.f32 %v10034_v63, %v22953_v40  ;;  %v10037_v2 = vmax.f32 %v10001_v61, 0.0  ;;  %v10000_v23 = vadd.f32 %v21422_v48, %v9885_v59  ;;  %v9888_v10 = vadd.f32 %v17397_v60, %v9382_v19  ;;  %v22956_v45 = vld [vmem:[#allocation101_spill] sm:$0xff]  ;;  %v22958_v63 = vld [vmem:[#allocation55_spill] sm:$0xff]  ;;  %v22959_v61 = vld [vmem:[#allocation54_spill] sm:$0xff] }
 0x3f7   : > { %v8373_v1 = vadd.f32 %v22954_v4, %v7867_v13  ;;  %v7869_v15 = vadd.f32 %v22955_v3, %v7363_v38  ;;  %v9384_v42 = vadd.f32 %v21373_v43, %v22956_v45  ;;  %v9756_v49 = vpop.f32.mrf.mxu1  ;;  %v10254_v50 = vld [vmem:[#allocation3 + $0x35] sm:$0xff]  ;;  %v10255_v20 = vld [vmem:[#allocation3 + $0x3d] sm:$0xff]  ;;  %v7365_v59 = vadd.f32 %v22959_v61, %v22958_v63  ;;  %v13089_v40 = vld [vmem:[#allocation3 + $0x2a] sm:$0xff] }
 0x3f8   : > { %v10659_v46 = vld [vmem:[#allocation3 + $0x36] sm:$0xff]  ;;  %10148 = vst [vmem:[#allocation3 + $0x58] sm:$0xff] %v10070_v41  ;;  %v10073_v44 = vmul.f32 %v10037_v2, %v22957_v5  ;;  %v10036_v52 = vmax.f32 %v10000_v23, 0.0  ;;  %v10003_v28 = vadd.f32 %v21422_v48, %v9888_v10  ;;  %v9887_v19 = vadd.f32 %v9756_v49, %v9381_v6  ;;  %17472 = vmatprep.mubr.f32.mxu0 %v10254_v50  ;;  %v10660_v13 = vld [vmem:[#allocation3 + $0x3e] sm:$0xff]  ;;  %v21532_v50 = vpop.f32.mrf.mxu0 }
 0x3f9   : > { %17558 = vmatprep.mubr.f32.mxu1 %v10659_v46  ;;  %v9383_v43 = vadd.f32 %v21381_v57, %v8877_v9  ;;  %v22960_v58 = vld [vmem:[#allocation104_spill] sm:$0xff]  ;;  %v17400_v35 = vpop.f32.mrf.mxu1  ;;  %17473 = vmatmul.mubr.f32.gmra.mxu0 %v10255_v20  ;;  %v22961_v38 = vld [vmem:[#allocation18_spill] sm:$0xff]  ;;  %v22963_v10 = vld [vmem:[#allocation79_spill] sm:$0xff] }
 0x3fa   : > { %v8879_v25 = vadd.f32 %v22960_v58, %v8373_v1  ;;  %17559 = vmatmul.mubr.f32.gmra.mxu1 %v10660_v13  ;;  %10151 = vst [vmem:[#allocation3 + $0x70] sm:$0xff] %v10073_v44  ;;  %v10072_v24 = vmul.f32 %v10036_v52, %v22961_v38  ;;  %v10039_v60 = vmax.f32 %v10003_v28, 0.0  ;;  %v10002_v41 = vadd.f32 %v21422_v48, %v9887_v19  ;;  %v22962_v2 = vld [vmem:[#allocation78_spill] sm:$0xff]  ;;  %v22964_v3 = vld [vmem:[#allocation103_spill] sm:$0xff]  ;;  %v22965_v46 = vld [vmem:[#allocation21_spill] sm:$0xff] }
 0x3fb   : > { %v9890_v6 = vadd.f32 %v17400_v35, %v9384_v42  ;;  %v8375_v23 = vadd.f32 %v22962_v2, %v7869_v15  ;;  %v7871_v4 = vadd.f32 %v22963_v10, %v7365_v59  ;;  %v9386_v45 = vadd.f32 %v21390_v11, %v22964_v3  ;;  %v9766_v57 = vpop.f32.mrf.mxu1  ;;  %v10256_v9 = vld [vmem:[#allocation3 + $0x45] sm:$0xff]  ;;  %v10257_v49 = vld [vmem:[#allocation3 + $0x4d] sm:$0xff]  ;;  %v22968_v63 = vld [vmem:[#allocation107_spill] sm:$0xff] }
 0x3fc   : > { %v10661_v1 = vld [vmem:[#allocation3 + $0x46] sm:$0xff]  ;;  %10150 = vst [vmem:[#allocation3 + $0x68] sm:$0xff] %v10072_v24  ;;  %v10075_v20 = vmul.f32 %v10039_v60, %v22965_v46  ;;  %v10038_v44 = vmax.f32 %v10002_v41, 0.0  ;;  %v9889_v42 = vadd.f32 %v9766_v57, %v9383_v43  ;;  %17475 = vmatprep.mubr.f32.mxu0 %v10256_v9  ;;  %v10662_v15 = vld [vmem:[#allocation3 + $0x4e] sm:$0xff]  ;;  %v9385_v11 = vadd.f32 %v21401_v51, %v8879_v25 }
 0x3fd   : > { %v10005_v52 = vadd.f32 %v21422_v48, %v9890_v6  ;;  %17561 = vmatprep.mubr.f32.mxu1 %v10661_v1  ;;  %v22966_v28 = vld [vmem:[#allocation57_spill] sm:$0xff]  ;;  %v22967_v19 = vld [vmem:[#allocation56_spill] sm:$0xff]  ;;  %v8881_v61 = vadd.f32 %v22968_v63, %v8375_v23  ;;  %v17403_v59 = vpop.f32.mrf.mxu1  ;;  %17476 = vmatmul.mubr.f32.gmra.mxu0 %v10257_v49  ;;  %v22972_v3 = vld [vmem:[#allocation106_spill] sm:$0xff]  ;;  %v21546_v1 = vpop.f32.mrf.mxu0 }
 0x3fe   : > { %v7367_v13 = vadd.f32 %v22967_v19, %v22966_v28  ;;  %17562 = vmatmul.mubr.f32.gmra.mxu1 %v10662_v15  ;;  %10153 = vst [vmem:[#allocation3 + $0x80] sm:$0xff] %v10075_v20  ;;  %v22969_v58 = vld [vmem:[#allocation20_spill] sm:$0xff]  ;;  %v10004_v60 = vadd.f32 %v21422_v48, %v9889_v42  ;;  %v9892_v43 = vadd.f32 %v17403_v59, %v9386_v45  ;;  %v22971_v2 = vld [vmem:[#allocation81_spill] sm:$0xff]  ;;  %v22973_v49 = vld [vmem:[#allocation23_spill] sm:$0xff] }
 0x3ff   : > { %v10074_v35 = vmul.f32 %v10038_v44, %v22969_v58  ;;  %v10041_v24 = vmax.f32 %v10005_v52, 0.0  ;;  %v22970_v41 = vld [vmem:[#allocation80_spill] sm:$0xff]  ;;  %v9388_v57 = vadd.f32 %v21415_v47, %v22972_v3  ;;  %v9776_v51 = vpop.f32.mrf.mxu1  ;;  %v10258_v25 = vld [vmem:[#allocation3 + $0x55] sm:$0xff]  ;;  %v9387_v47 = vadd.f32 %v21436_v0, %v8881_v61  ;;  %v22979_v3 = vld [vmem:[#allocation109_spill] sm:$0xff] }
 0x400   : > { %v8377_v6 = vadd.f32 %v22970_v41, %v7871_v4  ;;  %v7873_v10 = vadd.f32 %v22971_v2, %v7367_v13  ;;  %v10663_v23 = vld [vmem:[#allocation3 + $0x56] sm:$0xff]  ;;  %v10040_v44 = vmax.f32 %v10004_v60, 0.0  ;;  %v10007_v52 = vadd.f32 %v21422_v48, %v9892_v43  ;;  %17478 = vmatprep.mubr.f32.mxu0 %v10258_v25  ;;  %v10664_v4 = vld [vmem:[#allocation3 + $0x5e] sm:$0xff]  ;;  %v21560_v25 = vpop.f32.mrf.mxu0 }
 0x401   : > { %v10259_v9 = vld [vmem:[#allocation3 + $0x5d] sm:$0xff]  ;;  %10152 = vst [vmem:[#allocation3 + $0x78] sm:$0xff] %v10074_v35  ;;  %v10077_v20 = vmul.f32 %v10041_v24, %v22973_v49  ;;  %v9891_v45 = vadd.f32 %v9776_v51, %v9385_v11  ;;  %17564 = vmatprep.mubr.f32.mxu1 %v10663_v23  ;;  %v22975_v15 = vld [vmem:[#allocation58_spill] sm:$0xff]  ;;  %v17406_v13 = vpop.f32.mrf.mxu1  ;;  %v9390_v51 = vadd.f32 %v21448_v26, %v22979_v3  ;;  %v22980_v23 = vld [vmem:[#allocation25_spill] sm:$0xff] }
 0x402   : > { %v22974_v42 = vld [vmem:[#allocation59_spill] sm:$0xff]  ;;  %v8883_v19 = vadd.f32 %v21348_v56, %v8377_v6  ;;  %17479 = vmatmul.mubr.f32.gmra.mxu0 %v10259_v9  ;;  %17565 = vmatmul.mubr.f32.gmra.mxu1 %v10664_v4  ;;  %v22976_v63 = vld [vmem:[#allocation22_spill] sm:$0xff]  ;;  %v10043_v35 = vmax.f32 %v10007_v52, 0.0  ;;  %v9894_v11 = vadd.f32 %v17406_v13, %v9388_v57  ;;  %v22981_v52 = vld [vmem:[#allocation61_spill] sm:$0xff] }
 0x403   : > { %v7369_v28 = vadd.f32 %v22975_v15, %v22974_v42  ;;  %10155 = vst [vmem:[#allocation3 + $0x90] sm:$0xff] %v10077_v20  ;;  %v10076_v59 = vmul.f32 %v10040_v44, %v22976_v63  ;;  %v10006_v24 = vadd.f32 %v21422_v48, %v9891_v45  ;;  %v22977_v60 = vld [vmem:[#allocation82_spill] sm:$0xff]  ;;  %v22978_v41 = vld [vmem:[#allocation83_spill] sm:$0xff]  ;;  %v9786_v0 = vpop.f32.mrf.mxu1  ;;  %v10260_v61 = vld [vmem:[#allocation3 + $0x65] sm:$0xff] }
 0x404   : > { %v8379_v43 = vadd.f32 %v22977_v60, %v7873_v10  ;;  %v10665_v56 = vld [vmem:[#allocation3 + $0x66] sm:$0xff]  ;;  %v10079_v9 = vmul.f32 %v10043_v35, %v22980_v23  ;;  %v10009_v44 = vadd.f32 %v21422_v48, %v9894_v11  ;;  %v9893_v57 = vadd.f32 %v9786_v0, %v9387_v47  ;;  %17481 = vmatprep.mubr.f32.mxu0 %v10260_v61  ;;  %v10666_v10 = vld [vmem:[#allocation3 + $0x6e] sm:$0xff]  ;;  %v22983_v42 = vld [vmem:[#allocation111_spill] sm:$0xff] }
 0x405   : > { %v7875_v2 = vadd.f32 %v22978_v41, %v7369_v28  ;;  %v10261_v6 = vld [vmem:[#allocation3 + $0x6d] sm:$0xff]  ;;  %10154 = vst [vmem:[#allocation3 + $0x88] sm:$0xff] %v10076_v59  ;;  %v10042_v20 = vmax.f32 %v10006_v24, 0.0  ;;  %17567 = vmatprep.mubr.f32.mxu1 %v10665_v56  ;;  %v22982_v45 = vld [vmem:[#allocation60_spill] sm:$0xff]  ;;  %v9389_v26 = vadd.f32 %v21462_v31, %v8883_v19  ;;  %v17409_v28 = vpop.f32.mrf.mxu1 }
 0x406   : > { %v7371_v4 = vadd.f32 %v22982_v45, %v22981_v52  ;;  %v8885_v15 = vadd.f32 %v22983_v42, %v8379_v43  ;;  %17482 = vmatmul.mubr.f32.gmra.mxu0 %v10261_v6  ;;  %17568 = vmatmul.mubr.f32.gmra.mxu1 %v10666_v10  ;;  %10157 = vst [vmem:[#allocation3 + $0xa0] sm:$0xff] %v10079_v9  ;;  %v22984_v13 = vld [vmem:[#allocation24_spill] sm:$0xff]  ;;  %v10045_v35 = vmax.f32 %v10009_v44, 0.0  ;;  %v22986_v41 = vld [vmem:[#allocation85_spill] sm:$0xff]  ;;  %v22987_v0 = vld [vmem:[#allocation110_spill] sm:$0xff]  ;;  %v21574_v6 = vpop.f32.mrf.mxu0 }
 0x407   : > { %v10078_v59 = vmul.f32 %v10042_v20, %v22984_v13  ;;  %v10008_v24 = vadd.f32 %v21422_v48, %v9893_v57  ;;  %v9896_v47 = vadd.f32 %v17409_v28, %v9390_v51  ;;  %v22985_v11 = vld [vmem:[#allocation84_spill] sm:$0xff]  ;;  %v9392_v61 = vadd.f32 %v21476_v30, %v22987_v0  ;;  %v9796_v31 = vpop.f32.mrf.mxu1  ;;  %v22988_v9 = vld [vmem:[#allocation27_spill] sm:$0xff]  ;;  %v22990_v52 = vld [vmem:[#allocation62_spill] sm:$0xff] }
 0x408   : > { %v8381_v60 = vadd.f32 %v22985_v11, %v7875_v2  ;;  %v7877_v3 = vadd.f32 %v22986_v41, %v7371_v4  ;;  %v10262_v19 = vld [vmem:[#allocation3 + $0x75] sm:$0xff]  ;;  %v10263_v56 = vld [vmem:[#allocation3 + $0x7d] sm:$0xff]  ;;  %v10081_v20 = vmul.f32 %v10045_v35, %v22988_v9  ;;  %v9895_v51 = vadd.f32 %v9796_v31, %v9389_v26  ;;  %v22991_v4 = vld [vmem:[#allocation113_spill] sm:$0xff] }
 0x409   : > { %v10667_v43 = vld [vmem:[#allocation3 + $0x76] sm:$0xff]  ;;  %10156 = vst [vmem:[#allocation3 + $0x98] sm:$0xff] %v10078_v59  ;;  %v10044_v44 = vmax.f32 %v10008_v24, 0.0  ;;  %v10011_v57 = vadd.f32 %v21422_v48, %v9896_v47  ;;  %17484 = vmatprep.mubr.f32.mxu0 %v10262_v19  ;;  %v10668_v2 = vld [vmem:[#allocation3 + $0x7e] sm:$0xff]  ;;  %v9391_v30 = vadd.f32 %v21490_v29, %v8885_v15  ;;  %v17412_v28 = vpop.f32.mrf.mxu1  ;;  %v22994_v41 = vld [vmem:[#allocation45_spill] sm:$0xff] }
 0x40a   : > { %17570 = vmatprep.mubr.f32.mxu1 %v10667_v43  ;;  %v22989_v10 = vld [vmem:[#allocation63_spill] sm:$0xff]  ;;  %v8887_v42 = vadd.f32 %v22991_v4, %v8381_v60  ;;  %17485 = vmatmul.mubr.f32.gmra.mxu0 %v10263_v56  ;;  %10159 = vst [vmem:[#allocation3 + $0xb0] sm:$0xff] %v10081_v20  ;;  %v22992_v59 = vld [vmem:[#allocation26_spill] sm:$0xff]  ;;  %v10010_v47 = vadd.f32 %v21422_v48, %v9895_v51  ;;  %v22993_v11 = vld [vmem:[#allocation44_spill] sm:$0xff] }
 0x40b   : > { %v7373_v45 = vadd.f32 %v22990_v52, %v22989_v10  ;;  %17571 = vmatmul.mubr.f32.gmra.mxu1 %v10668_v2  ;;  %v10080_v35 = vmul.f32 %v10044_v44, %v22992_v59  ;;  %v10047_v24 = vmax.f32 %v10011_v57, 0.0  ;;  %v9898_v26 = vadd.f32 %v17412_v28, %v9392_v61  ;;  %v22995_v31 = vld [vmem:[#allocation86_spill] sm:$0xff]  ;;  %v22996_v43 = vld [vmem:[#allocation87_spill] sm:$0xff]  ;;  %v22997_v29 = vld [vmem:[#allocation112_spill] sm:$0xff]  ;;  %v9806_v60 = vpop.f32.mrf.mxu1  ;;  %v21590_v52 = vpop.f32.mrf.mxu0 }
 0x40c   : > { %v6367_v0 = vadd.f32 %v22994_v41, %v22993_v11  ;;  %v8383_v19 = vadd.f32 %v22995_v31, %v7877_v3  ;;  %v9394_v15 = vadd.f32 %v21504_v8, %v22997_v29  ;;  %v10264_v56 = vld [vmem:[#allocation3 + $0x85] sm:$0xff]  ;;  %v10265_v20 = vld [vmem:[#allocation3 + $0x8d] sm:$0xff]  ;;  %v10046_v61 = vmax.f32 %v10010_v47, 0.0 }
 0x40d   : > { %v7879_v10 = vadd.f32 %v22996_v43, %v7373_v45  ;;  %v10669_v2 = vld [vmem:[#allocation3 + $0x86] sm:$0xff]  ;;  %10158 = vst [vmem:[#allocation3 + $0xa8] sm:$0xff] %v10080_v35  ;;  %v10013_v51 = vadd.f32 %v21422_v48, %v9898_v26  ;;  %v9897_v4 = vadd.f32 %v9806_v60, %v9391_v30  ;;  %17487 = vmatprep.mubr.f32.mxu0 %v10264_v56  ;;  %v10670_v3 = vld [vmem:[#allocation3 + $0x8e] sm:$0xff]  ;;  %v17415_v31 = vpop.f32.mrf.mxu1  ;;  %v23002_v43 = vld [vmem:[#allocation67_spill] sm:$0xff] }
 0x40e   : > { %v22998_v44 = vld [vmem:[#allocation29_spill] sm:$0xff]  ;;  %17573 = vmatprep.mubr.f32.mxu1 %v10669_v2  ;;  %v23000_v28 = vld [vmem:[#allocation64_spill] sm:$0xff]  ;;  %v9393_v8 = vadd.f32 %v21518_v17, %v8887_v42  ;;  %v8889_v41 = vadd.f32 %v21369_v54, %v8383_v19  ;;  %17488 = vmatmul.mubr.f32.gmra.mxu0 %v10265_v20  ;;  %v9900_v30 = vadd.f32 %v17415_v31, %v9394_v15  ;;  %v23003_v29 = vld [vmem:[#allocation66_spill] sm:$0xff] }
 0x40f   : > { %v10083_v57 = vmul.f32 %v10047_v24, %v22998_v44  ;;  %v22999_v45 = vld [vmem:[#allocation65_spill] sm:$0xff]  ;;  %17574 = vmatmul.mubr.f32.gmra.mxu1 %v10670_v3  ;;  %v23001_v35 = vld [vmem:[#allocation28_spill] sm:$0xff]  ;;  %v10049_v47 = vmax.f32 %v10013_v51, 0.0  ;;  %v10012_v26 = vadd.f32 %v21422_v48, %v9897_v4  ;;  %v7377_v60 = vadd.f32 %v23003_v29, %v23002_v43  ;;  %v23006_v17 = vld [vmem:[#allocation114_spill] sm:$0xff]  ;;  %v9816_v42 = vpop.f32.mrf.mxu1  ;;  %v21606_v3 = vpop.f32.mrf.mxu0 }
 0x410   : > { %v7375_v11 = vadd.f32 %v23000_v28, %v22999_v45  ;;  %v10082_v24 = vmul.f32 %v10046_v61, %v23001_v35  ;;  %v23004_v56 = vld [vmem:[#allocation88_spill] sm:$0xff]  ;;  %v23005_v45 = vld [vmem:[#allocation89_spill] sm:$0xff]  ;;  %v9396_v54 = vadd.f32 %v21532_v50, %v23006_v17  ;;  %v10266_v19 = vld [vmem:[#allocation3 + $0x95] sm:$0xff]  ;;  %v10015_v4 = vadd.f32 %v21422_v48, %v9900_v30 }
 0x411   : > { %10161 = vst [vmem:[#allocation3 + $0xc0] sm:$0xff] %v10083_v57  ;;  %v8385_v2 = vadd.f32 %v23004_v56, %v7879_v10  ;;  %v10671_v20 = vld [vmem:[#allocation3 + $0x96] sm:$0xff]  ;;  %v10048_v15 = vmax.f32 %v10012_v26, 0.0  ;;  %v9899_v31 = vadd.f32 %v9816_v42, %v9393_v8  ;;  %17490 = vmatprep.mubr.f32.mxu0 %v10266_v19  ;;  %v10672_v10 = vld [vmem:[#allocation3 + $0x9e] sm:$0xff]  ;;  %v9395_v50 = vadd.f32 %v21546_v1, %v8889_v41  ;;  %v17418_v56 = vpop.f32.mrf.mxu1 }
 0x412   : > { %v7881_v28 = vadd.f32 %v23005_v45, %v7375_v11  ;;  %v10267_v57 = vld [vmem:[#allocation3 + $0x9d] sm:$0xff]  ;;  %10160 = vst [vmem:[#allocation3 + $0xb8] sm:$0xff] %v10082_v24  ;;  %17576 = vmatprep.mubr.f32.mxu1 %v10671_v20  ;;  %v23009_v24 = vld [vmem:[#allocation30_spill] sm:$0xff]  ;;  %v9902_v30 = vadd.f32 %v17418_v56, %v9396_v54  ;;  %v17357_v20 = vpop.f32.mrf.mxu0  ;;  %v23013_v54 = vld [vmem:[#allocation69_spill] sm:$0xff] }
 0x413   : > { %v23007_v61 = vld [vmem:[#allocation31_spill] sm:$0xff]  ;;  %v23008_v11 = vld [vmem:[#allocation68_spill] sm:$0xff]  ;;  %v8891_v29 = vadd.f32 %v21379_v39, %v8385_v2  ;;  %17491 = vmatmul.mubr.f32.gmra.mxu0 %v10267_v57  ;;  %17577 = vmatmul.mubr.f32.gmra.mxu1 %v10672_v10  ;;  %v10084_v45 = vmul.f32 %v10048_v15, %v23009_v24  ;;  %v10014_v26 = vadd.f32 %v21422_v48, %v9899_v31  ;;  %v23010_v8 = vld [vmem:[#allocation90_spill] sm:$0xff]  ;;  %v9826_v1 = vpop.f32.mrf.mxu1 }
 0x414   : > { %v10085_v51 = vmul.f32 %v10049_v47, %v23007_v61  ;;  %v6873_v43 = vadd.f32 %v23008_v11, %v6367_v0  ;;  %v10051_v47 = vmax.f32 %v10015_v4, 0.0  ;;  %v8387_v17 = vadd.f32 %v23010_v8, %v7881_v28  ;;  %v23011_v42 = vld [vmem:[#allocation91_spill] sm:$0xff]  ;;  %v10268_v41 = vld [vmem:[#allocation3 + $0xa5] sm:$0xff]  ;;  %v10269_v2 = vld [vmem:[#allocation3 + $0xad] sm:$0xff] }
 0x415   : > { %v7883_v19 = vadd.f32 %v23011_v42, %v7377_v60  ;;  %v9398_v0 = vadd.f32 %v21560_v25, %v21377_v27  ;;  %v10673_v39 = vld [vmem:[#allocation3 + $0xa6] sm:$0xff]  ;;  %10162 = vst [vmem:[#allocation3 + $0xc8] sm:$0xff] %v10084_v45  ;;  %v10050_v15 = vmax.f32 %v10014_v26, 0.0  ;;  %v10017_v4 = vadd.f32 %v21422_v48, %v9902_v30  ;;  %17493 = vmatprep.mubr.f32.mxu0 %v10268_v41  ;;  %v10674_v28 = vld [vmem:[#allocation3 + $0xae] sm:$0xff]  ;;  %v17421_v25 = vpop.f32.mrf.mxu1  ;;  %v9350_v41 = vpop.f32.mrf.mxu0 }
 0x416   : > { %10163 = vst [vmem:[#allocation3 + $0xd0] sm:$0xff] %v10085_v51  ;;  %v23012_v57 = vld [vmem:[#allocation33_spill] sm:$0xff]  ;;  %v9901_v31 = vadd.f32 %v9826_v1, %v9395_v50  ;;  %17579 = vmatprep.mubr.f32.mxu1 %v10673_v39  ;;  %v7379_v60 = vadd.f32 %v23013_v54, %v6873_v43  ;;  %v9397_v10 = vadd.f32 %v21574_v6, %v8891_v29  ;;  %v23014_v11 = vld [vmem:[#allocation32_spill] sm:$0xff]  ;;  %v23017_v1 = vld [vmem:[#allocation115_spill] sm:$0xff] }
 0x417   : > { %v10087_v51 = vmul.f32 %v10051_v47, %v23012_v57  ;;  %v8893_v27 = vadd.f32 %v21387_v22, %v8387_v17  ;;  %17494 = vmatmul.mubr.f32.gmra.mxu0 %v10269_v2  ;;  %17580 = vmatmul.mubr.f32.gmra.mxu1 %v10674_v28  ;;  %v10086_v56 = vmul.f32 %v10050_v15, %v23014_v11  ;;  %v10053_v45 = vmax.f32 %v10017_v4, 0.0  ;;  %v23015_v50 = vld [vmem:[#allocation92_spill] sm:$0xff]  ;;  %v23016_v8 = vld [vmem:[#allocation93_spill] sm:$0xff]  ;;  %v9836_v6 = vpop.f32.mrf.mxu1  ;;  %v23018_v39 = vld [vmem:[#allocation35_spill] sm:$0xff]  ;;  %v17360_v28 = vpop.f32.mrf.mxu0 }
 0x418   : > { %v10016_v47 = vadd.f32 %v21422_v48, %v9901_v31  ;;  %v9904_v26 = vadd.f32 %v17421_v25, %v9398_v0  ;;  %v8389_v30 = vadd.f32 %v23015_v50, %v7883_v19  ;;  %v7885_v42 = vadd.f32 %v23016_v8, %v7379_v60  ;;  %v23019_v54 = vld [vmem:[#allocation34_spill] sm:$0xff] }
 0x419   : > { %10165 = vst [vmem:[#allocation3 + $0xe0] sm:$0xff] %v10087_v51  ;;  %v9400_v43 = vadd.f32 %v21590_v52, %v23017_v1  ;;  %v10270_v29 = vld [vmem:[#allocation3 + $0xb5] sm:$0xff]  ;;  %v10271_v17 = vld [vmem:[#allocation3 + $0xbd] sm:$0xff]  ;;  %10164 = vst [vmem:[#allocation3 + $0xd8] sm:$0xff] %v10086_v56  ;;  %v10089_v2 = vmul.f32 %v10053_v45, %v23018_v39  ;;  %v9903_v4 = vadd.f32 %v9836_v6, %v9397_v10  ;;  %v17424_v52 = vpop.f32.mrf.mxu1 }
 0x41a   : > { %v10675_v22 = vld [vmem:[#allocation3 + $0xb6] sm:$0xff]  ;;  %v10052_v51 = vmax.f32 %v10016_v47, 0.0  ;;  %v10019_v15 = vadd.f32 %v21422_v48, %v9904_v26  ;;  %17496 = vmatprep.mubr.f32.mxu0 %v10270_v29  ;;  %v10676_v19 = vld [vmem:[#allocation3 + $0xbe] sm:$0xff]  ;;  %v9399_v0 = vadd.f32 %v21606_v3, %v8893_v27  ;;  %v8895_v31 = vadd.f32 %v21397_v62, %v8389_v30 }
 0x41b   : > { %17582 = vmatprep.mubr.f32.mxu1 %v10675_v22  ;;  %17497 = vmatmul.mubr.f32.gmra.mxu0 %v10271_v17  ;;  %10167 = vst [vmem:[#allocation3 + $0xf0] sm:$0xff] %v10089_v2  ;;  %v10018_v56 = vadd.f32 %v21422_v48, %v9903_v4  ;;  %v9906_v45 = vadd.f32 %v17424_v52, %v9400_v43  ;;  %v23020_v47 = vld [vmem:[#allocation94_spill] sm:$0xff]  ;;  %v9846_v50 = vpop.f32.mrf.mxu1  ;;  %v23021_v62 = vld [vmem:[#allocation36_spill] sm:$0xff] }
 0x41c   : > { %17583 = vmatmul.mubr.f32.gmra.mxu1 %v10676_v19  ;;  %v10088_v60 = vmul.f32 %v10052_v51, %v23019_v54  ;;  %v10055_v25 = vmax.f32 %v10019_v15, 0.0  ;;  %v8391_v10 = vadd.f32 %v23020_v47, %v7885_v42  ;;  %v9402_v26 = vadd.f32 %v17357_v20, %v21395_v21  ;;  %v10272_v8 = vld [vmem:[#allocation3 + $0xc5] sm:$0xff]  ;;  %v9360_v21 = vpop.f32.mrf.mxu0 }
 0x41d   : > { %v10677_v3 = vld [vmem:[#allocation3 + $0xc6] sm:$0xff]  ;;  %v10054_v1 = vmax.f32 %v10018_v56, 0.0  ;;  %v10021_v6 = vadd.f32 %v21422_v48, %v9906_v45  ;;  %v9905_v29 = vadd.f32 %v9846_v50, %v9399_v0  ;;  %17499 = vmatprep.mubr.f32.mxu0 %v10272_v8  ;;  %v10678_v22 = vld [vmem:[#allocation3 + $0xce] sm:$0xff]  ;;  %v9401_v17 = vadd.f32 %v9350_v41, %v8895_v31  ;;  %v17427_v42 = vpop.f32.mrf.mxu1 }
 0x41e   : > { %v10273_v27 = vld [vmem:[#allocation3 + $0xcd] sm:$0xff]  ;;  %10166 = vst [vmem:[#allocation3 + $0xe8] sm:$0xff] %v10088_v60  ;;  %v10091_v30 = vmul.f32 %v10055_v25, %v23021_v62  ;;  %17585 = vmatprep.mubr.f32.mxu1 %v10677_v3  ;;  %v8897_v43 = vadd.f32 %v21410_v37, %v8391_v10  ;;  %v9908_v4 = vadd.f32 %v17427_v42, %v9402_v26 }
 0x41f   : > { %17500 = vmatmul.mubr.f32.gmra.mxu0 %v10273_v27  ;;  %v23022_v20 = vld [vmem:[#allocation37_spill] sm:$0xff]  ;;  %v10057_v51 = vmax.f32 %v10021_v6, 0.0  ;;  %v10020_v15 = vadd.f32 %v21422_v48, %v9905_v29  ;;  %v9404_v19 = vadd.f32 %v17360_v28, %v21407_v53  ;;  %v9856_v0 = vpop.f32.mrf.mxu1  ;;  %v23023_v41 = vld [vmem:[#allocation38_spill] sm:$0xff]  ;;  %v23024_v53 = vld [vmem:[#allocation39_spill] sm:$0xff] }
 0x420   : > { %17586 = vmatmul.mubr.f32.gmra.mxu1 %v10678_v22  ;;  %10169 = vst [vmem:[#allocation3 + $0x100] sm:$0xff] %v10091_v30  ;;  %v10090_v2 = vmul.f32 %v10054_v1, %v23022_v20  ;;  %v10274_v52 = vld [vmem:[#allocation3 + $0xd5] sm:$0xff]  ;;  %v10275_v25 = vld [vmem:[#allocation3 + $0xdd] sm:$0xff]  ;;  %v10023_v56 = vadd.f32 %v21422_v48, %v9908_v4  ;;  %v9907_v45 = vadd.f32 %v9856_v0, %v9401_v17 }
 0x421   : > { %v10679_v60 = vld [vmem:[#allocation3 + $0xd6] sm:$0xff]  ;;  %v10093_v37 = vmul.f32 %v10057_v51, %v23023_v41  ;;  %v10056_v31 = vmax.f32 %v10020_v15, 0.0  ;;  %17502 = vmatprep.mubr.f32.mxu0 %v10274_v52  ;;  %v10680_v47 = vld [vmem:[#allocation3 + $0xde] sm:$0xff]  ;;  %v9403_v10 = vadd.f32 %v9360_v21, %v8897_v43  ;;  %v17430_v50 = vpop.f32.mrf.mxu1 }
 0x422   : > { %10168 = vst [vmem:[#allocation3 + $0xf8] sm:$0xff] %v10090_v2  ;;  %17588 = vmatprep.mubr.f32.mxu1 %v10679_v60  ;;  %v10059_v26 = vmax.f32 %v10023_v56, 0.0  ;;  %v10022_v8 = vadd.f32 %v21422_v48, %v9907_v45  ;;  %v9910_v3 = vadd.f32 %v17430_v50, %v9404_v19  ;;  %v23025_v29 = vld [vmem:[#allocation40_spill] sm:$0xff]  ;;  %v23026_v2 = vld [vmem:[#allocation41_spill] sm:$0xff]  ;;  %v23027_v60 = vld [vmem:[#allocation42_spill] sm:$0xff] }
 0x423   : > { %17503 = vmatmul.mubr.f32.gmra.mxu0 %v10275_v25  ;;  %10171 = vst [vmem:[#allocation3 + $0x110] sm:$0xff] %v10093_v37  ;;  %v10092_v28 = vmul.f32 %v10056_v31, %v23024_v53  ;;  %v9866_v27 = vpop.f32.mrf.mxu1  ;;  %v23028_v56 = vld [vmem:[#allocation43_spill] sm:$0xff]  ;;  %v11898_v53 = vld [vmem:[#allocation3 + $0xf0] sm:$0xff] }
 0x424   : > { %17589 = vmatmul.mubr.f32.gmra.mxu1 %v10680_v47  ;;  %v10095_v22 = vmul.f32 %v10059_v26, %v23025_v29  ;;  %v10058_v17 = vmax.f32 %v10022_v8, 0.0  ;;  %v10025_v43 = vadd.f32 %v21422_v48, %v9910_v3  ;;  %v9909_v42 = vadd.f32 %v9866_v27, %v9403_v10  ;;  %v11896_v29 = vld [vmem:[#allocation3 + $0xe0] sm:$0xff] }
 0x425   : > { %v10276_v30 = vld [vmem:[#allocation3 + $0xe5] sm:$0xff]  ;;  %v10277_v6 = vld [vmem:[#allocation3 + $0xed] sm:$0xff]  ;;  %10170 = vst [vmem:[#allocation3 + $0x108] sm:$0xff] %v10092_v28 }
 0x426   : > { %v10681_v1 = vld [vmem:[#allocation3 + $0xe6] sm:$0xff]  ;;  %17505 = vmatprep.mubr.f32.mxu0 %v10276_v30  ;;  %v10682_v21 = vld [vmem:[#allocation3 + $0xee] sm:$0xff]  ;;  %10173 = vst [vmem:[#allocation3 + $0x120] sm:$0xff] %v10095_v22  ;;  %v10094_v51 = vmul.f32 %v10058_v17, %v23026_v2  ;;  %v10061_v15 = vmax.f32 %v10025_v43, 0.0  ;;  %v10024_v4 = vadd.f32 %v21422_v48, %v9909_v42  ;;  %v11465_v30 = vld [vmem:[#allocation3 + $0x17] sm:$0xff] }
 0x427   : > { %17591 = vmatprep.mubr.f32.mxu1 %v10681_v1  ;;  %17506 = vmatmul.mubr.f32.gmra.mxu0 %v10277_v6  ;;  %v11059_v28 = vld [vmem:[#allocation3 + $0x7] sm:$0xff]  ;;  %v11060_v1 = vld [vmem:[#allocation3 + $0xf] sm:$0xff]  ;;  %v11466_v6 = vld [vmem:[#allocation3 + $0x1f] sm:$0xff] }
 0x428   : > { %17592 = vmatmul.mubr.f32.gmra.mxu1 %v10682_v21  ;;  %10172 = vst [vmem:[#allocation3 + $0x118] sm:$0xff] %v10094_v51  ;;  %v10097_v25 = vmul.f32 %v10061_v15, %v23027_v60  ;;  %v10060_v37 = vmax.f32 %v10024_v4, 0.0  ;;  %v15013_v22 = vld [vmem:[%s22742_s6 + $0x270] sm:$0xff]  ;;  %v18289_v42 = vld [vmem:[%s22742_s6 + $0x278] sm:$0xff]  ;;  %v15012_v4 = vld [vmem:[%s22742_s6 + $0x268] sm:$0xff] }
 0x429   : > { %v10278_v19 = vld [vmem:[#allocation3 + $0xf5] sm:$0xff]  ;;  %v10279_v52 = vld [vmem:[#allocation3 + $0xfd] sm:$0xff]  ;;  %v11467_v21 = vld [vmem:[#allocation3 + $0x27] sm:$0xff] }
 0x42a   : > { %v10683_v0 = vld [vmem:[#allocation3 + $0xf6] sm:$0xff]  ;;  %17508 = vmatprep.mubr.f32.mxu0 %v10278_v19  ;;  %v10684_v31 = vld [vmem:[#allocation3 + $0xfe] sm:$0xff]  ;;  %10175 = vst [vmem:[#allocation3 + $0x130] sm:$0xff] %v10097_v25  ;;  %v10096_v45 = vmul.f32 %v10060_v37, %v23028_v56  ;;  %v11471_v37 = vld [vmem:[#allocation3 + $0x47] sm:$0xff] }
 0x42b   : > { %17594 = vmatprep.mubr.f32.mxu1 %v10683_v0  ;;  %17509 = vmatmul.mubr.f32.gmra.mxu0 %v10279_v52  ;;  %v11468_v15 = vld [vmem:[#allocation3 + $0x2f] sm:$0xff]  ;;  %v15029_v19 = vld [vmem:[%s22742_s6 + $0x2f0] sm:$0xff]  ;;  %v11469_v0 = vld [vmem:[#allocation3 + $0x37] sm:$0xff] }
 0x42c   : > { %17595 = vmatmul.mubr.f32.gmra.mxu1 %v10684_v31  ;;  %v10280_v47 = vld [vmem:[#allocation3 + $0x105] sm:$0xff]  ;;  %v10281_v50 = vld [vmem:[#allocation3 + $0x10d] sm:$0xff]  ;;  %10174 = vst [vmem:[#allocation3 + $0x128] sm:$0xff] %v10096_v45  ;;  %v21891_v56 = vld [vmem:[#allocation3 + $0xd9] sm:$0xff] }
 0x42d   : > { %v10685_v10 = vld [vmem:[#allocation3 + $0x106] sm:$0xff]  ;;  %17511 = vmatprep.mubr.f32.mxu0 %v10280_v47  ;;  %v10686_v48 = vld [vmem:[#allocation3 + $0x10e] sm:$0xff]  ;;  %v11899_v39 = vld [vmem:[#allocation3 + $0xf8] sm:$0xff] }
 0x42e   : > { %17597 = vmatprep.mubr.f32.mxu1 %v10685_v10  ;;  %v11470_v52 = vld [vmem:[#allocation3 + $0x3f] sm:$0xff]  ;;  %v15011_v25 = vld [vmem:[%s22742_s6 + $0x260] sm:$0xff]  ;;  %v15010_v45 = vld [vmem:[%s22742_s6 + $0x258] sm:$0xff] }
 0x42f   : > { %17512 = vmatmul.mubr.f32.gmra.mxu0 %v10281_v50  ;;  %v10282_v26 = vld [vmem:[#allocation3 + $0x115] sm:$0xff]  ;;  %v10283_v3 = vld [vmem:[#allocation3 + $0x11d] sm:$0xff]  ;;  %v21903_v2 = vld [vmem:[#allocation3 + $0xe9] sm:$0xff] }
 0x430   : > { %17598 = vmatmul.mubr.f32.gmra.mxu1 %v10686_v48  ;;  %v10687_v8 = vld [vmem:[#allocation3 + $0x116] sm:$0xff]  ;;  %17514 = vmatprep.mubr.f32.mxu0 %v10282_v26  ;;  %v10688_v27 = vld [vmem:[#allocation3 + $0x11e] sm:$0xff]  ;;  %v11475_v26 = vld [vmem:[#allocation3 + $0x67] sm:$0xff] }
 0x431   : > { %17600 = vmatprep.mubr.f32.mxu1 %v10687_v8  ;;  %v11472_v31 = vld [vmem:[#allocation3 + $0x4f] sm:$0xff]  ;;  %v11473_v10 = vld [vmem:[#allocation3 + $0x57] sm:$0xff]  ;;  %v11474_v50 = vld [vmem:[#allocation3 + $0x5f] sm:$0xff] }
 0x432   : > { %v15027_v47 = vld [vmem:[%s22742_s6 + $0x2e0] sm:$0xff]  ;;  %v15009_v48 = vld [vmem:[%s22742_s6 + $0x250] sm:$0xff]  ;;  %v11901_v44 = vld [vmem:[#allocation3 + $0x108] sm:$0xff] }
 0x433   : > { %17515 = vmatmul.mubr.f32.gmra.mxu0 %v10283_v3  ;;  %v17465_v17 = vpop.f32.mrf.mxu0  ;;  %v17551_v43 = vpop.f32.mrf.mxu1  ;;  %v11476_v8 = vld [vmem:[#allocation3 + $0x6f] sm:$0xff]  ;;  %v15008_v3 = vld [vmem:[%s22742_s6 + $0x248] sm:$0xff]  ;;  %v21926_v24 = vld [vmem:[#allocation3 + $0x101] sm:$0xff] }
 0x434   : > { %17601 = vmatmul.mubr.f32.gmra.mxu1 %v10688_v27  ;;  %17635 = vmatprep.mubr.f32.mxu0 %v11059_v28  ;;  %v21660_v51 = vadd.f32 %v17551_v43, %v17465_v17  ;;  %v15026_v28 = vld [vmem:[%s22742_s6 + $0x2d8] sm:$0xff]  ;;  %v15025_v27 = vld [vmem:[%s22742_s6 + $0x2d0] sm:$0xff]  ;;  %v11894_v60 = vld [vmem:[#allocation3 + $0xd0] sm:$0xff] }
 0x435   : > { %17721 = vmatprep.mubr.f32.mxu1 %v11465_v30  ;;  %v11479_v17 = vld [vmem:[#allocation3 + $0x87] sm:$0xff]  ;;  %v11480_v43 = vld [vmem:[#allocation3 + $0x8f] sm:$0xff]  ;;  %v21906_v41 = vpop.f32.mrf.mxu0  ;;  %v21919_v54 = vld [vmem:[#allocation3 + $0xf9] sm:$0xff] }
 0x436   : > { %v21942_v59 = vld [vmem:[#allocation3 + $0x111] sm:$0xff]  ;;  %v11904_v49 = vld [vmem:[#allocation3 + $0x120] sm:$0xff] }
 0x437   : > { %17636 = vmatmul.mubr.f32.vlgmr.msra.gmra.mxu0 %v11060_v1  ;;  %v11478_v1 = vld [vmem:[#allocation3 + $0x7f] sm:$0xff]  ;;  %v21968_v38 = vld [vmem:[#allocation3 + $0x131] sm:$0xff] }
 0x438   : > { %17722 = vmatmul.mubr.f32.vlgmr.msra.gmra.mxu1 %v11466_v6  ;;  %17776 = vmatpush3.msra.mxu0 %v18289_v42  ;;  %v15006_v42 = vld [vmem:[%s22742_s6 + $0x238] sm:$0xff]  ;;  %v11903_v23 = vld [vmem:[#allocation3 + $0x118] sm:$0xff] }
 0x439   : > { %17638 = vmatprep.mubr.f32.mxu0 %v11465_v30  ;;  %17724 = vmatprep.mubr.f32.mxu1 %v11467_v21  ;;  %v11477_v30 = vld [vmem:[#allocation3 + $0x77] sm:$0xff]  ;;  %v21958_v63 = vld [vmem:[#allocation3 + $0x121] sm:$0xff] }
 0x43a   : > { %17777 = vmatprep.subr.mxu0 %v15013_v22  ;;  %17862 = vmatpush3.msra.mxu1 %v21427_v34  ;;  %v15028_v34 = vld [vmem:[%s22742_s6 + $0x2e8] sm:$0xff] }
 0x43b   : > { %17778 = vmatpush3.msra.mxu0 %v15013_v22  ;;  %17863 = vmatprep.subr.mxu1 %v15029_v19  ;;  %v15024_v22 = vld [vmem:[%s22742_s6 + $0x2c8] sm:$0xff] }
 0x43c   : > { %17639 = vmatmul.mubr.f32.gmra.mxu0 %v11466_v6  ;;  %17725 = vmatmul.mubr.f32.gmra.mxu1 %v11468_v15  ;;  %v15007_v6 = vld [vmem:[%s22742_s6 + $0x240] sm:$0xff] }
 0x43d   : > { %17641 = vmatprep.mubr.f32.mxu0 %v11467_v21  ;;  %17727 = vmatprep.mubr.f32.mxu1 %v11469_v0  ;;  %v15023_v21 = vld [vmem:[%s22742_s6 + $0x2c0] sm:$0xff] }
 0x43e   : > { %17779 = vmatprep.subr.mxu0 %v15012_v4  ;;  %17864 = vmatpush3.msra.mxu1 %v15029_v19  ;;  %v15005_v19 = vld [vmem:[%s22742_s6 + $0x230] sm:$0xff] }
 0x43f   : > { %17780 = vmatpush3.msra.mxu0 %v15012_v4  ;;  %17865 = vmatprep.subr.mxu1 %v15028_v34  ;;  %v11482_v4 = vld [vmem:[#allocation3 + $0x9f] sm:$0xff] }
 0x440   : > { %17642 = vmatmul.mubr.f32.gmra.mxu0 %v11468_v15  ;;  %17728 = vmatmul.mubr.f32.gmra.mxu1 %v11470_v52  ;;  %v11481_v15 = vld [vmem:[#allocation3 + $0x97] sm:$0xff] }
 0x441   : > { %17644 = vmatprep.mubr.f32.mxu0 %v11469_v0  ;;  %17730 = vmatprep.mubr.f32.mxu1 %v11471_v37  ;;  %v15022_v0 = vld [vmem:[%s22742_s6 + $0x2b8] sm:$0xff] }
 0x442   : > { %17781 = vmatprep.subr.mxu0 %v15011_v25  ;;  %17866 = vmatpush3.msra.mxu1 %v15028_v34  ;;  %v15004_v34 = vld [vmem:[%s22742_s6 + $0x228] sm:$0xff] }
 0x443   : > { %17782 = vmatpush3.msra.mxu0 %v15011_v25  ;;  %17867 = vmatprep.subr.mxu1 %v15027_v47  ;;  %v11484_v25 = vld [vmem:[#allocation3 + $0xaf] sm:$0xff] }
 0x444   : > { %17645 = vmatmul.mubr.f32.gmra.mxu0 %v11470_v52  ;;  %17731 = vmatmul.mubr.f32.gmra.mxu1 %v11472_v31  ;;  %v11483_v52 = vld [vmem:[#allocation3 + $0xa7] sm:$0xff] }
 0x445   : > { %17647 = vmatprep.mubr.f32.mxu0 %v11471_v37  ;;  %17733 = vmatprep.mubr.f32.mxu1 %v11473_v10  ;;  %v15021_v37 = vld [vmem:[%s22742_s6 + $0x2b0] sm:$0xff] }
 0x446   : > { %17783 = vmatprep.subr.mxu0 %v15010_v45  ;;  %17868 = vmatpush3.msra.mxu1 %v15027_v47  ;;  %v15003_v47 = vld [vmem:[%s22742_s6 + $0x220] sm:$0xff] }
 0x447   : > { %17784 = vmatpush3.msra.mxu0 %v15010_v45  ;;  %17869 = vmatprep.subr.mxu1 %v15026_v28  ;;  %v11486_v45 = vld [vmem:[#allocation3 + $0xbf] sm:$0xff] }
 0x448   : > { %17648 = vmatmul.mubr.f32.gmra.mxu0 %v11472_v31  ;;  %17734 = vmatmul.mubr.f32.gmra.mxu1 %v11474_v50  ;;  %v11485_v31 = vld [vmem:[#allocation3 + $0xb7] sm:$0xff] }
 0x449   : > { %17650 = vmatprep.mubr.f32.mxu0 %v11473_v10  ;;  %17736 = vmatprep.mubr.f32.mxu1 %v11475_v26  ;;  %v15020_v10 = vld [vmem:[%s22742_s6 + $0x2a8] sm:$0xff] }
 0x44a   : > { %17785 = vmatprep.subr.mxu0 %v15009_v48  ;;  %17870 = vmatpush3.msra.mxu1 %v15026_v28  ;;  %v15002_v28 = vld [vmem:[%s22742_s6 + $0x218] sm:$0xff] }
 0x44b   : > { %17786 = vmatpush3.msra.mxu0 %v15009_v48  ;;  %17871 = vmatprep.subr.mxu1 %v15025_v27  ;;  %v11488_v48 = vld [vmem:[#allocation3 + $0xcf] sm:$0xff] }
 0x44c   : > { %17651 = vmatmul.mubr.f32.gmra.mxu0 %v11474_v50  ;;  %17737 = vmatmul.mubr.f32.gmra.mxu1 %v11476_v8  ;;  %v11487_v50 = vld [vmem:[#allocation3 + $0xc7] sm:$0xff] }
 0x44d   : > { %17653 = vmatprep.mubr.f32.mxu0 %v11475_v26  ;;  %17739 = vmatprep.mubr.f32.mxu1 %v11477_v30  ;;  %v15019_v26 = vld [vmem:[%s22742_s6 + $0x2a0] sm:$0xff] }
 0x44e   : > { %17787 = vmatprep.subr.mxu0 %v15008_v3  ;;  %17872 = vmatpush3.msra.mxu1 %v15025_v27  ;;  %v15001_v27 = vld [vmem:[%s22742_s6 + $0x210] sm:$0xff] }
 0x44f   : > { %17788 = vmatpush3.msra.mxu0 %v15008_v3  ;;  %17873 = vmatprep.subr.mxu1 %v15024_v22  ;;  %v11490_v3 = vld [vmem:[#allocation3 + $0xdf] sm:$0xff] }
 0x450   : > { %17654 = vmatmul.mubr.f32.gmra.mxu0 %v11476_v8  ;;  %17740 = vmatmul.mubr.f32.gmra.mxu1 %v11478_v1  ;;  %v11489_v8 = vld [vmem:[#allocation3 + $0xd7] sm:$0xff] }
 0x451   : > { %17656 = vmatprep.mubr.f32.mxu0 %v11477_v30  ;;  %17742 = vmatprep.mubr.f32.mxu1 %v11479_v17  ;;  %v15018_v30 = vld [vmem:[%s22742_s6 + $0x298] sm:$0xff] }
 0x452   : > { %17789 = vmatprep.subr.mxu0 %v15007_v6  ;;  %17874 = vmatpush3.msra.mxu1 %v15024_v22  ;;  %v15000_v22 = vld [vmem:[%s22742_s6 + $0x208] sm:$0xff] }
 0x453   : > { %17790 = vmatpush3.msra.mxu0 %v15007_v6  ;;  %17875 = vmatprep.subr.mxu1 %v15023_v21  ;;  %v11492_v6 = vld [vmem:[#allocation3 + $0xef] sm:$0xff] }
 0x454   : > { %17657 = vmatmul.mubr.f32.gmra.mxu0 %v11478_v1  ;;  %17743 = vmatmul.mubr.f32.gmra.mxu1 %v11480_v43  ;;  %v11491_v1 = vld [vmem:[#allocation3 + $0xe7] sm:$0xff] }
 0x455   : > { %17659 = vmatprep.mubr.f32.mxu0 %v11479_v17  ;;  %17745 = vmatprep.mubr.f32.mxu1 %v11481_v15  ;;  %v15017_v17 = vld [vmem:[%s22742_s6 + $0x290] sm:$0xff] }
 0x456   : > { %17791 = vmatprep.subr.mxu0 %v15006_v42  ;;  %17876 = vmatpush3.msra.mxu1 %v15023_v21  ;;  %v14999_v21 = vld [vmem:[%s22742_s6 + $0x200] sm:$0xff] }
 0x457   : > { %17792 = vmatpush3.msra.mxu0 %v15006_v42  ;;  %17877 = vmatprep.subr.mxu1 %v15022_v0  ;;  %v11494_v42 = vld [vmem:[#allocation3 + $0xff] sm:$0xff] }
 0x458   : > { %17660 = vmatmul.mubr.f32.gmra.mxu0 %v11480_v43  ;;  %17746 = vmatmul.mubr.f32.gmra.mxu1 %v11482_v4  ;;  %v11493_v43 = vld [vmem:[#allocation3 + $0xf7] sm:$0xff] }
 0x459   : > { %17662 = vmatprep.mubr.f32.mxu0 %v11481_v15  ;;  %17748 = vmatprep.mubr.f32.mxu1 %v11483_v52  ;;  %v15016_v15 = vld [vmem:[%s22742_s6 + $0x288] sm:$0xff] }
 0x45a   : > { %17793 = vmatprep.subr.mxu0 %v15005_v19  ;;  %17878 = vmatpush3.msra.mxu1 %v15022_v0  ;;  %v15015_v0 = vld [vmem:[%s22742_s6 + $0x280] sm:$0xff] }
 0x45b   : > { %17794 = vmatpush3.msra.mxu0 %v15005_v19  ;;  %17879 = vmatprep.subr.mxu1 %v15021_v37  ;;  %v11496_v19 = vld [vmem:[#allocation3 + $0x10f] sm:$0xff] }
 0x45c   : > { %17663 = vmatmul.mubr.f32.gmra.mxu0 %v11482_v4  ;;  %17749 = vmatmul.mubr.f32.gmra.mxu1 %v11484_v25  ;;  %v11495_v4 = vld [vmem:[#allocation3 + $0x107] sm:$0xff] }
 0x45d   : > { %17665 = vmatprep.mubr.f32.mxu0 %v11483_v52  ;;  %17751 = vmatprep.mubr.f32.mxu1 %v11485_v31  ;;  %v15046_v52 = vld [vmem:[%s22742_s6 + $0x378] sm:$0xff] }
 0x45e   : > { %17795 = vmatprep.subr.mxu0 %v15004_v34  ;;  %17880 = vmatpush3.msra.mxu1 %v15021_v37  ;;  %v15062_v37 = vld [vmem:[%s22742_s6 + $0x3f8] sm:$0xff] }
 0x45f   : > { %17796 = vmatpush3.msra.mxu0 %v15004_v34  ;;  %17881 = vmatprep.subr.mxu1 %v15020_v10  ;;  %v11498_v34 = vld [vmem:[#allocation3 + $0x11f] sm:$0xff] }
 0x460   : > { %17666 = vmatmul.mubr.f32.gmra.mxu0 %v11484_v25  ;;  %17752 = vmatmul.mubr.f32.gmra.mxu1 %v11486_v45  ;;  %v11497_v25 = vld [vmem:[#allocation3 + $0x117] sm:$0xff] }
 0x461   : > { %17668 = vmatprep.mubr.f32.mxu0 %v11485_v31  ;;  %17754 = vmatprep.mubr.f32.mxu1 %v11487_v50  ;;  %v11499_v31 = vld [vmem:[#allocation3 + $0x127] sm:$0xff] }
 0x462   : > { %17797 = vmatprep.subr.mxu0 %v15003_v47  ;;  %17882 = vmatpush3.msra.mxu1 %v15020_v10  ;;  %v12277_v10 = vld [vmem:[#allocation3 + $0x19] sm:$0xff] }
 0x463   : > { %17798 = vmatpush3.msra.mxu0 %v15003_v47  ;;  %17883 = vmatprep.subr.mxu1 %v15019_v26  ;;  %v11871_v47 = vld [vmem:[#allocation3 + $0x18] sm:$0xff] }
 0x464   : > { %17669 = vmatmul.mubr.f32.gmra.mxu0 %v11486_v45  ;;  %17755 = vmatmul.mubr.f32.gmra.mxu1 %v11488_v48  ;;  %v11500_v45 = vld [vmem:[#allocation3 + $0x12f] sm:$0xff] }
 0x465   : > { %17671 = vmatprep.mubr.f32.mxu0 %v11487_v50  ;;  %17757 = vmatprep.mubr.f32.mxu1 %v11489_v8  ;;  %v11872_v50 = vld [vmem:[#allocation3 + $0x20] sm:$0xff] }
 0x466   : > { %17799 = vmatprep.subr.mxu0 %v15002_v28  ;;  %17884 = vmatpush3.msra.mxu1 %v15019_v26  ;;  %v11873_v26 = vld [vmem:[#allocation3 + $0x28] sm:$0xff] }
 0x467   : > { %17800 = vmatpush3.msra.mxu0 %v15002_v28  ;;  %17885 = vmatprep.subr.mxu1 %v15018_v30  ;;  %v15045_v28 = vld [vmem:[%s22742_s6 + $0x370] sm:$0xff] }
 0x468   : > { %17672 = vmatmul.mubr.f32.gmra.mxu0 %v11488_v48  ;;  %17758 = vmatmul.mubr.f32.gmra.mxu1 %v11490_v3  ;;  %v12278_v48 = vld [vmem:[#allocation3 + $0x21] sm:$0xff] }
 0x469   : > { %17674 = vmatprep.mubr.f32.mxu0 %v11489_v8  ;;  %17760 = vmatprep.mubr.f32.mxu1 %v11491_v1  ;;  %v21759_v8 = vld [vmem:[#allocation3 + $0x29] sm:$0xff] }
 0x46a   : > { %17801 = vmatprep.subr.mxu0 %v15001_v27  ;;  %17886 = vmatpush3.msra.mxu1 %v15018_v30  ;;  %v15044_v30 = vld [vmem:[%s22742_s6 + $0x368] sm:$0xff] }
 0x46b   : > { %17802 = vmatpush3.msra.mxu0 %v15001_v27  ;;  %17887 = vmatprep.subr.mxu1 %v15017_v17  ;;  %v21762_v27 = vld [vmem:[#allocation3 + $0x31] sm:$0xff] }
 0x46c   : > { %17675 = vmatmul.mubr.f32.gmra.mxu0 %v11490_v3  ;;  %17761 = vmatmul.mubr.f32.gmra.mxu1 %v11492_v6  ;;  %v11874_v3 = vld [vmem:[#allocation3 + $0x30] sm:$0xff] }
 0x46d   : > { %17677 = vmatprep.mubr.f32.mxu0 %v11491_v1  ;;  %17763 = vmatprep.mubr.f32.mxu1 %v11493_v43  ;;  %v15061_v1 = vld [vmem:[%s22742_s6 + $0x3f0] sm:$0xff] }
 0x46e   : > { %17803 = vmatprep.subr.mxu0 %v15000_v22  ;;  %17888 = vmatpush3.msra.mxu1 %v15017_v17  ;;  %v11876_v17 = vld [vmem:[#allocation3 + $0x40] sm:$0xff] }
 0x46f   : > { %17804 = vmatpush3.msra.mxu0 %v15000_v22  ;;  %17889 = vmatprep.subr.mxu1 %v15016_v15  ;;  %v21771_v22 = vld [vmem:[#allocation3 + $0x39] sm:$0xff] }
 0x470   : > { %17678 = vmatmul.mubr.f32.gmra.mxu0 %v11492_v6  ;;  %17764 = vmatmul.mubr.f32.gmra.mxu1 %v11494_v42  ;;  %v11875_v6 = vld [vmem:[#allocation3 + $0x38] sm:$0xff] }
 0x471   : > { %17680 = vmatprep.mubr.f32.mxu0 %v11493_v43  ;;  %17766 = vmatprep.mubr.f32.mxu1 %v11495_v4  ;;  %v21774_v43 = vld [vmem:[#allocation3 + $0x41] sm:$0xff] }
 0x472   : > { %17805 = vmatprep.subr.mxu0 %v14999_v21  ;;  %17890 = vmatpush3.msra.mxu1 %v15016_v15  ;;  %v11877_v15 = vld [vmem:[#allocation3 + $0x48] sm:$0xff] }
 0x473   : > { %17806 = vmatpush3.msra.mxu0 %v14999_v21  ;;  %17891 = vmatprep.subr.mxu1 %v15015_v0  ;;  %v15060_v21 = vld [vmem:[%s22742_s6 + $0x3e8] sm:$0xff] }
 0x474   : > { %17681 = vmatmul.mubr.f32.gmra.mxu0 %v11494_v42  ;;  %17767 = vmatmul.mubr.f32.gmra.mxu1 %v11496_v19  ;;  %v15043_v42 = vld [vmem:[%s22742_s6 + $0x360] sm:$0xff] }
 0x475   : > { %17683 = vmatprep.mubr.f32.mxu0 %v11495_v4  ;;  %17769 = vmatprep.mubr.f32.mxu1 %v11497_v25  ;;  %v21783_v4 = vld [vmem:[#allocation3 + $0x49] sm:$0xff] }
 0x476   : > { %17947 = vmatprep.subr.mxu0 %v15046_v52  ;;  %17892 = vmatpush3.msra.mxu1 %v15015_v0  ;;  %v21786_v0 = vld [vmem:[#allocation3 + $0x51] sm:$0xff] }
 0x477   : > { %18033 = vmatprep.subr.mxu1 %v15062_v37 }
 0x478   : > { %17684 = vmatmul.mubr.f32.gmra.mxu0 %v11496_v19  ;;  %17770 = vmatmul.mubr.f32.gmra.mxu1 %v11498_v34  ;;  %v11878_v19 = vld [vmem:[#allocation3 + $0x50] sm:$0xff] }
 0x479   : > { %17686 = vmatprep.mubr.f32.mxu0 %v11497_v25  ;;  %17772 = vmatprep.mubr.f32.mxu1 %v11499_v31  ;;  %v15059_v25 = vld [vmem:[%s22742_s6 + $0x3e0] sm:$0xff]  ;;  %v11880_v31 = vld [vmem:[#allocation3 + $0x60] sm:$0xff] }
 0x47c   : > { %17687 = vmatmul.mubr.f32.gmra.mxu0 %v11498_v34  ;;  %17773 = vmatmul.mubr.f32.gmra.mxu1 %v11500_v45  ;;  %v11879_v34 = vld [vmem:[#allocation3 + $0x58] sm:$0xff]  ;;  %v21798_v45 = vld [vmem:[#allocation3 + $0x61] sm:$0xff] }
 0x47d   : > { %17807 = vmatprep.mubr.f32.mxu0 %v11871_v47  ;;  %17893 = vmatprep.mubr.f32.mxu1 %v12277_v10  ;;  %v15041_v47 = vld [vmem:[%s22742_s6 + $0x350] sm:$0xff]  ;;  %v15058_v10 = vld [vmem:[%s22742_s6 + $0x3d8] sm:$0xff] }
 0x480   : > { %17808 = vmatmul.mubr.f32.vlgmr.msra.gmra.mxu0 %v11872_v50  ;;  %17894 = vmatmul.mubr.f32.vlgmr.msra.gmra.mxu1 %v12278_v48  ;;  %v11881_v50 = vld [vmem:[#allocation3 + $0x68] sm:$0xff] }
 0x481   : > { %17948 = vmatpush3.msra.mxu0 %v15046_v52  ;;  %17810 = vmatprep.mubr.f32.mxu0 %v11873_v26  ;;  %v15042_v52 = vld [vmem:[%s22742_s6 + $0x358] sm:$0xff]  ;;  %v21810_v26 = vld [vmem:[#allocation3 + $0x71] sm:$0xff] }
 0x482   : > { %17896 = vmatprep.mubr.f32.mxu1 %v21759_v8  ;;  %17949 = vmatprep.subr.mxu0 %v15045_v28  ;;  %v21807_v48 = vld [vmem:[#allocation3 + $0x69] sm:$0xff] }
 0x483   : > { %17950 = vmatpush3.msra.mxu0 %v15045_v28  ;;  %18034 = vmatpush3.msra.mxu1 %v15062_v37  ;;  %v21795_v37 = vld [vmem:[#allocation3 + $0x59] sm:$0xff]  ;;  %v11882_v28 = vld [vmem:[#allocation3 + $0x70] sm:$0xff] }
 0x484   : > { %17811 = vmatmul.mubr.f32.gmra.mxu0 %v11874_v3  ;;  %17897 = vmatmul.mubr.f32.gmra.mxu1 %v21762_v27  ;;  %v15040_v3 = vld [vmem:[%s22742_s6 + $0x348] sm:$0xff] }
 0x485   : > { %17813 = vmatprep.mubr.f32.mxu0 %v11875_v6  ;;  %17899 = vmatprep.mubr.f32.mxu1 %v21771_v22  ;;  %v21819_v6 = vld [vmem:[#allocation3 + $0x79] sm:$0xff] }
 0x486   : > { %17951 = vmatprep.subr.mxu0 %v15044_v30  ;;  %18035 = vmatprep.subr.mxu1 %v15061_v1 }
 0x487   : > { %17952 = vmatpush3.msra.mxu0 %v15044_v30  ;;  %18036 = vmatpush3.msra.mxu1 %v15061_v1  ;;  %v15057_v30 = vld [vmem:[%s22742_s6 + $0x3d0] sm:$0xff]  ;;  %v11883_v1 = vld [vmem:[#allocation3 + $0x78] sm:$0xff] }
 0x488   : > { %17814 = vmatmul.mubr.f32.gmra.mxu0 %v11876_v17  ;;  %17900 = vmatmul.mubr.f32.gmra.mxu1 %v21774_v43  ;;  %v11884_v17 = vld [vmem:[#allocation3 + $0x80] sm:$0xff] }
 0x489   : > { %17816 = vmatprep.mubr.f32.mxu0 %v11877_v15  ;;  %17902 = vmatprep.mubr.f32.mxu1 %v21783_v4  ;;  %v15056_v15 = vld [vmem:[%s22742_s6 + $0x3c8] sm:$0xff] }
 0x48a   : > { %17953 = vmatprep.subr.mxu0 %v15043_v42  ;;  %18037 = vmatprep.subr.mxu1 %v15060_v21 }
 0x48b   : > { %17954 = vmatpush3.msra.mxu0 %v15043_v42  ;;  %18038 = vmatpush3.msra.mxu1 %v15060_v21  ;;  %v21822_v42 = vld [vmem:[#allocation3 + $0x81] sm:$0xff]  ;;  %v15039_v21 = vld [vmem:[%s22742_s6 + $0x340] sm:$0xff] }
 0x48c   : > { %17817 = vmatmul.mubr.f32.gmra.mxu0 %v11878_v19  ;;  %17903 = vmatmul.mubr.f32.gmra.mxu1 %v21786_v0  ;;  %v11885_v19 = vld [vmem:[#allocation3 + $0x88] sm:$0xff] }
 0x48d   : > { %17819 = vmatprep.mubr.f32.mxu0 %v11879_v34  ;;  %17905 = vmatprep.mubr.f32.mxu1 %v21795_v37  ;;  %v21834_v34 = vld [vmem:[#allocation3 + $0x91] sm:$0xff] }
 0x48e   : > { %17955 = vmatprep.subr.mxu0 %v15042_v52  ;;  %18039 = vmatprep.subr.mxu1 %v15059_v25 }
 0x48f   : > { %17956 = vmatpush3.msra.mxu0 %v15042_v52  ;;  %18040 = vmatpush3.msra.mxu1 %v15059_v25  ;;  %v21831_v52 = vld [vmem:[#allocation3 + $0x89] sm:$0xff] }
 0x490   : > { %17820 = vmatmul.mubr.f32.gmra.mxu0 %v11880_v31  ;;  %17906 = vmatmul.mubr.f32.gmra.mxu1 %v21798_v45  ;;  %v11886_v25 = vld [vmem:[#allocation3 + $0x90] sm:$0xff]  ;;  %v15038_v31 = vld [vmem:[%s22742_s6 + $0x338] sm:$0xff] }
 0x491   : > { %17822 = vmatprep.mubr.f32.mxu0 %v11881_v50  ;;  %17908 = vmatprep.mubr.f32.mxu1 %v21807_v48  ;;  %v21843_v50 = vld [vmem:[#allocation3 + $0x99] sm:$0xff] }
 0x492   : > { %17957 = vmatprep.subr.mxu0 %v15041_v47  ;;  %18041 = vmatprep.subr.mxu1 %v15058_v10 }
 0x493   : > { %17958 = vmatpush3.msra.mxu0 %v15041_v47  ;;  %18042 = vmatpush3.msra.mxu1 %v15058_v10  ;;  %v15055_v47 = vld [vmem:[%s22742_s6 + $0x3c0] sm:$0xff]  ;;  %v11887_v10 = vld [vmem:[#allocation3 + $0x98] sm:$0xff] }
 0x494   : > { %17823 = vmatmul.mubr.f32.gmra.mxu0 %v11882_v28  ;;  %17909 = vmatmul.mubr.f32.gmra.mxu1 %v21810_v26  ;;  %v11888_v28 = vld [vmem:[#allocation3 + $0xa0] sm:$0xff] }
 0x495   : > { %17825 = vmatprep.mubr.f32.mxu0 %v11883_v1  ;;  %17911 = vmatprep.mubr.f32.mxu1 %v21819_v6  ;;  %v15054_v1 = vld [vmem:[%s22742_s6 + $0x3b8] sm:$0xff] }
 0x496   : > { %17959 = vmatprep.subr.mxu0 %v15040_v3  ;;  %18043 = vmatprep.subr.mxu1 %v15057_v30 }
 0x497   : > { %17960 = vmatpush3.msra.mxu0 %v15040_v3  ;;  %18044 = vmatpush3.msra.mxu1 %v15057_v30  ;;  %v21846_v3 = vld [vmem:[#allocation3 + $0xa1] sm:$0xff] }
 0x498   : > { %17826 = vmatmul.mubr.f32.gmra.mxu0 %v11884_v17  ;;  %17912 = vmatmul.mubr.f32.gmra.mxu1 %v21822_v42  ;;  %v15037_v30 = vld [vmem:[%s22742_s6 + $0x330] sm:$0xff]  ;;  %v11889_v17 = vld [vmem:[#allocation3 + $0xa8] sm:$0xff] }
 0x499   : > { %17828 = vmatprep.mubr.f32.mxu0 %v11885_v19  ;;  %17914 = vmatprep.mubr.f32.mxu1 %v21831_v52  ;;  %v21858_v19 = vld [vmem:[#allocation3 + $0xb1] sm:$0xff] }
 0x49a   : > { %17961 = vmatprep.subr.mxu0 %v15039_v21  ;;  %18045 = vmatprep.subr.mxu1 %v15056_v15 }
 0x49b   : > { %17962 = vmatpush3.msra.mxu0 %v15039_v21  ;;  %18046 = vmatpush3.msra.mxu1 %v15056_v15  ;;  %v21855_v21 = vld [vmem:[#allocation3 + $0xa9] sm:$0xff] }
 0x49c   : > { %17829 = vmatmul.mubr.f32.gmra.mxu0 %v11886_v25  ;;  %17915 = vmatmul.mubr.f32.gmra.mxu1 %v21834_v34  ;;  %v11890_v15 = vld [vmem:[#allocation3 + $0xb0] sm:$0xff]  ;;  %v15036_v25 = vld [vmem:[%s22742_s6 + $0x328] sm:$0xff] }
 0x49d   : > { %17831 = vmatprep.mubr.f32.mxu0 %v11887_v10  ;;  %17917 = vmatprep.mubr.f32.mxu1 %v21843_v50  ;;  %v21867_v10 = vld [vmem:[#allocation3 + $0xb9] sm:$0xff] }
 0x49e   : > { %17963 = vmatprep.subr.mxu0 %v15038_v31  ;;  %18047 = vmatprep.subr.mxu1 %v15055_v47 }
 0x49f   : > { %17964 = vmatpush3.msra.mxu0 %v15038_v31  ;;  %18048 = vmatpush3.msra.mxu1 %v15055_v47  ;;  %v15053_v31 = vld [vmem:[%s22742_s6 + $0x3b0] sm:$0xff]  ;;  %v11891_v47 = vld [vmem:[#allocation3 + $0xb8] sm:$0xff] }
 0x4a0   : > { %17832 = vmatmul.mubr.f32.gmra.mxu0 %v11888_v28  ;;  %17918 = vmatmul.mubr.f32.gmra.mxu1 %v21846_v3  ;;  %v11892_v28 = vld [vmem:[#allocation3 + $0xc0] sm:$0xff] }
 0x4a1   : > { %17834 = vmatprep.mubr.f32.mxu0 %v11889_v17  ;;  %17920 = vmatprep.mubr.f32.mxu1 %v21855_v21  ;;  %v15052_v17 = vld [vmem:[%s22742_s6 + $0x3a8] sm:$0xff] }
 0x4a2   : > { %17965 = vmatprep.subr.mxu0 %v15037_v30  ;;  %18049 = vmatprep.subr.mxu1 %v15054_v1 }
 0x4a3   : > { %17966 = vmatpush3.msra.mxu0 %v15037_v30  ;;  %18050 = vmatpush3.msra.mxu1 %v15054_v1  ;;  %v21870_v30 = vld [vmem:[#allocation3 + $0xc1] sm:$0xff]  ;;  %v15035_v1 = vld [vmem:[%s22742_s6 + $0x320] sm:$0xff] }
 0x4a4   : > { %17835 = vmatmul.mubr.f32.gmra.mxu0 %v11890_v15  ;;  %17921 = vmatmul.mubr.f32.gmra.mxu1 %v21858_v19  ;;  %v11893_v15 = vld [vmem:[#allocation3 + $0xc8] sm:$0xff] }
 0x4a5   : > { %17837 = vmatprep.mubr.f32.mxu0 %v11891_v47  ;;  %17923 = vmatprep.mubr.f32.mxu1 %v21867_v10  ;;  %v21879_v47 = vld [vmem:[#allocation3 + $0xc9] sm:$0xff] }
 0x4a6   : > { %17967 = vmatprep.subr.mxu0 %v15036_v25  ;;  %18051 = vmatprep.subr.mxu1 %v15053_v31 }
 0x4a7   : > { %17968 = vmatpush3.msra.mxu0 %v15036_v25  ;;  %18052 = vmatpush3.msra.mxu1 %v15053_v31  ;;  %v21882_v25 = vld [vmem:[#allocation3 + $0xd1] sm:$0xff]  ;;  %v15034_v31 = vld [vmem:[%s22742_s6 + $0x318] sm:$0xff] }
 0x4a8   : > { %17838 = vmatmul.mubr.f32.gmra.mxu0 %v11892_v28  ;;  %17924 = vmatmul.mubr.f32.gmra.mxu1 %v21870_v30  ;;  %v15051_v28 = vld [vmem:[%s22742_s6 + $0x3a0] sm:$0xff] }
 0x4a9   : > { %17840 = vmatprep.mubr.f32.mxu0 %v11893_v15  ;;  %17926 = vmatprep.mubr.f32.mxu1 %v21879_v47  ;;  %v11895_v15 = vld [vmem:[#allocation3 + $0xd8] sm:$0xff] }
 0x4aa   : > { %17969 = vmatprep.subr.mxu0 %v15035_v1  ;;  %18053 = vmatprep.subr.mxu1 %v15052_v17 }
 0x4ab   : > { %17970 = vmatpush3.msra.mxu0 %v15035_v1  ;;  %18054 = vmatpush3.msra.mxu1 %v15052_v17  ;;  %v21894_v1 = vld [vmem:[#allocation3 + $0xe1] sm:$0xff] }
 0x4ac   : > { %17841 = vmatmul.mubr.f32.gmra.mxu0 %v11894_v60  ;;  %17927 = vmatmul.mubr.f32.gmra.mxu1 %v21882_v25  ;;  %v15033_v17 = vld [vmem:[%s22742_s6 + $0x310] sm:$0xff]  ;;  %v15050_v60 = vld [vmem:[%s22742_s6 + $0x398] sm:$0xff] }
 0x4ad   : > { %17843 = vmatprep.mubr.f32.mxu0 %v11895_v15  ;;  %17929 = vmatprep.mubr.f32.mxu1 %v21891_v56  ;;  %v11897_v15 = vld [vmem:[#allocation3 + $0xe8] sm:$0xff] }
 0x4ae   : > { %17971 = vmatprep.subr.mxu0 %v15034_v31  ;;  %18055 = vmatprep.subr.mxu1 %v15051_v28 }
 0x4af   : > { %17972 = vmatpush3.msra.mxu0 %v15034_v31  ;;  %18056 = vmatpush3.msra.mxu1 %v15051_v28  ;;  %v21908_v31 = vpop.f32.mrf.mxu1  ;;  %v21910_v28 = vld [vmem:[#allocation3 + $0xf1] sm:$0xff] }
 0x4b0   : > { %17844 = vmatmul.mubr.f32.gmra.mxu0 %v11896_v29  ;;  %17930 = vmatmul.mubr.f32.gmra.mxu1 %v21894_v1  ;;  %v15032_v29 = vld [vmem:[%s22742_s6 + $0x308] sm:$0xff] }
 0x4b1   : > { %17846 = vmatprep.mubr.f32.mxu0 %v11897_v15  ;;  %17932 = vmatprep.mubr.f32.mxu1 %v21903_v2  ;;  %v15049_v15 = vld [vmem:[%s22742_s6 + $0x390] sm:$0xff]  ;;  %v17468_v62 = vpop.f32.mrf.mxu0 }
 0x4b2   : > { %17973 = vmatprep.subr.mxu0 %v15033_v17  ;;  %18057 = vmatprep.subr.mxu1 %v15050_v60  ;;  %v17554_v20 = vpop.f32.mrf.mxu1 }
 0x4b3   : > { %17974 = vmatpush3.msra.mxu0 %v15033_v17  ;;  %18058 = vmatpush3.msra.mxu1 %v15050_v60  ;;  %v21921_v57 = vadd.f32 %v17554_v20, %v17468_v62  ;;  %v10376_v17 = vpop.f32.mrf.mxu0  ;;  %v11900_v60 = vld [vmem:[#allocation3 + $0x100] sm:$0xff] }
 0x4b4   : > { %17847 = vmatmul.mubr.f32.gmra.mxu0 %v11898_v53  ;;  %17933 = vmatmul.mubr.f32.gmra.mxu1 %v21910_v28  ;;  %v10782_v11 = vpop.f32.mrf.mxu1  ;;  %v15031_v53 = vld [vmem:[%s22742_s6 + $0x300] sm:$0xff] }
 0x4b5   : > { %17849 = vmatprep.mubr.f32.mxu0 %v11899_v39  ;;  %17935 = vmatprep.mubr.f32.mxu1 %v21919_v54  ;;  %v21924_v61 = vadd.f32 %v10782_v11, %v10376_v17  ;;  %v15048_v39 = vld [vmem:[%s22742_s6 + $0x388] sm:$0xff]  ;;  %v17471_v62 = vpop.f32.mrf.mxu0  ;;  %v21935_v11 = vld [vmem:[#allocation3 + $0x109] sm:$0xff] }
 0x4b6   : > { %17975 = vmatprep.subr.mxu0 %v15032_v29  ;;  %18059 = vmatprep.subr.mxu1 %v15049_v15  ;;  %v17557_v20 = vpop.f32.mrf.mxu1 }
 0x4b7   : > { %17976 = vmatpush3.msra.mxu0 %v15032_v29  ;;  %18060 = vmatpush3.msra.mxu1 %v15049_v15  ;;  %v21937_v17 = vadd.f32 %v17557_v20, %v17471_v62  ;;  %v10386_v29 = vpop.f32.mrf.mxu0  ;;  %v11902_v15 = vld [vmem:[#allocation3 + $0x110] sm:$0xff] }
 0x4b8   : > { %17850 = vmatmul.mubr.f32.gmra.mxu0 %v11900_v60  ;;  %17936 = vmatmul.mubr.f32.gmra.mxu1 %v21926_v24  ;;  %v10792_v35 = vpop.f32.mrf.mxu1  ;;  %v15047_v60 = vld [vmem:[%s22742_s6 + $0x380] sm:$0xff] }
 0x4b9   : > { %17852 = vmatprep.mubr.f32.mxu0 %v11901_v44  ;;  %17938 = vmatprep.mubr.f32.mxu1 %v21935_v11  ;;  %v21940_v9 = vadd.f32 %v10792_v35, %v10386_v29  ;;  %v15078_v44 = vld [vmem:[%s22742_s6 + $0x478] sm:$0xff]  ;;  %v17474_v62 = vpop.f32.mrf.mxu0  ;;  %v21951_v35 = vld [vmem:[#allocation3 + $0x119] sm:$0xff] }
 0x4ba   : > { %17977 = vmatprep.subr.mxu0 %v15031_v53  ;;  %18061 = vmatprep.subr.mxu1 %v15048_v39  ;;  %v17560_v20 = vpop.f32.mrf.mxu1 }
 0x4bb   : > { %17978 = vmatpush3.msra.mxu0 %v15031_v53  ;;  %18062 = vmatpush3.msra.mxu1 %v15048_v39  ;;  %v21953_v29 = vadd.f32 %v17560_v20, %v17474_v62  ;;  %v10396_v53 = vpop.f32.mrf.mxu0  ;;  %v11905_v62 = vld [vmem:[#allocation3 + $0x128] sm:$0xff] }
 0x4bc   : > { %17853 = vmatmul.mubr.f32.gmra.mxu0 %v11902_v15  ;;  %17939 = vmatmul.mubr.f32.gmra.mxu1 %v21942_v59  ;;  %v10802_v39 = vpop.f32.mrf.mxu1  ;;  %v21961_v20 = vld [vmem:[#allocation3 + $0x129] sm:$0xff] }
 0x4bd   : > { %17855 = vmatprep.mubr.f32.mxu0 %v11903_v23  ;;  %17941 = vmatprep.mubr.f32.mxu1 %v21951_v35  ;;  %v21956_v13 = vadd.f32 %v10802_v39, %v10396_v53  ;;  %v17477_v15 = vpop.f32.mrf.mxu0  ;;  %v18290_v39 = vld [vmem:[#allocation3] sm:$0xff] }
 0x4be   : > { %18063 = vmatprep.subr.mxu1 %v15047_v60  ;;  %18119 = vmatprep.subr.mxu0 %v15078_v44  ;;  %v17563_v46 = vpop.f32.mrf.mxu1 }
 0x4bf   : > { %18064 = vmatpush3.msra.mxu1 %v15047_v60  ;;  %v21963_v23 = vadd.f32 %v17563_v46, %v17477_v15  ;;  %v10406_v58 = vpop.f32.mrf.mxu0  ;;  %v11906_v60 = vld [vmem:[#allocation3 + $0x130] sm:$0xff] }
 0x4c0   : > { %17856 = vmatmul.mubr.f32.gmra.mxu0 %v11904_v49  ;;  %17942 = vmatmul.mubr.f32.gmra.mxu1 %v21958_v63  ;;  %v10812_v53 = vpop.f32.mrf.mxu1 }
 0x4c1   : > { %17858 = vmatprep.mubr.f32.mxu0 %v11905_v62  ;;  %17944 = vmatprep.mubr.f32.mxu1 %v21961_v20  ;;  %v21966_v5 = vadd.f32 %v10812_v53, %v10406_v58  ;;  %v13090_v58 = vld [vmem:[#allocation3 + $0x32] sm:$0xff]  ;;  %v15077_v53 = vld [vmem:[%s22742_s6 + $0x470] sm:$0xff] }
 0x4c2   : > { %18205 = vmatprep.subr.mxu1 %v18290_v39  ;;  %v17480_v49 = vpop.f32.mrf.mxu0  ;;  %v17566_v33 = vpop.f32.mrf.mxu1 }
 0x4c3   : > { %v21971_v46 = vadd.f32 %v17566_v33, %v17480_v49  ;;  %v13091_v33 = vld [vmem:[#allocation3 + $0x3a] sm:$0xff] }
 0x4c4   : > { %17859 = vmatmul.mubr.f32.gmra.mxu0 %v11906_v60  ;;  %17945 = vmatmul.mubr.f32.gmra.mxu1 %v21968_v38  ;;  %v10416_v15 = vpop.f32.mrf.mxu0  ;;  %v10822_v62 = vpop.f32.mrf.mxu1 }
 0x4c5   : > { %17979 = vmatprep.mubr.f32.mxu0 %v21759_v8  ;;  %18065 = vmatprep.mubr.f32.mxu1 %v13089_v40  ;;  %v21974_v18 = vadd.f32 %v10822_v62, %v10416_v15  ;;  %v13092_v15 = vld [vmem:[#allocation3 + $0x42] sm:$0xff]  ;;  %v15076_v62 = vld [vmem:[%s22742_s6 + $0x468] sm:$0xff] }
 0x4c6   : > { %v17483_v39 = vpop.f32.mrf.mxu0  ;;  %v17569_v7 = vpop.f32.mrf.mxu1 }
 0x4c7   : > { %v21980_v60 = vadd.f32 %v17569_v7, %v17483_v39  ;;  %v13093_v7 = vld [vmem:[#allocation3 + $0x4a] sm:$0xff] }
 0x4c8   : > { %17980 = vmatmul.mubr.f32.vlgmr.msra.gmra.mxu0 %v21762_v27  ;;  %18066 = vmatmul.mubr.f32.vlgmr.msra.gmra.mxu1 %v13090_v58  ;;  %v10426_v40 = vpop.f32.mrf.mxu0  ;;  %v10832_v8 = vpop.f32.mrf.mxu1 }
 0x4c9   : > { %18120 = vmatpush3.msra.mxu0 %v15078_v44  ;;  %17982 = vmatprep.mubr.f32.mxu0 %v21771_v22  ;;  %v21983_v49 = vadd.f32 %v10832_v8, %v10426_v40  ;;  %v15075_v40 = vld [vmem:[%s22742_s6 + $0x460] sm:$0xff] }
 0x4ca   : > { %18068 = vmatprep.mubr.f32.mxu1 %v13091_v33  ;;  %18121 = vmatprep.subr.mxu0 %v15077_v53  ;;  %v17486_v27 = vpop.f32.mrf.mxu0 }
 0x4cb   : > { %18122 = vmatpush3.msra.mxu0 %v15077_v53  ;;  %v17572_v58 = vpop.f32.mrf.mxu1  ;;  %v13094_v53 = vld [vmem:[#allocation3 + $0x52] sm:$0xff] }
 0x4cc   : > { %17983 = vmatmul.mubr.f32.gmra.mxu0 %v21774_v43  ;;  %18069 = vmatmul.mubr.f32.gmra.mxu1 %v13092_v15  ;;  %v21989_v22 = vadd.f32 %v17572_v58, %v17486_v27  ;;  %v10436_v44 = vpop.f32.mrf.mxu0  ;;  %v13095_v15 = vld [vmem:[#allocation3 + $0x5a] sm:$0xff] }
 0x4cd   : > { %17985 = vmatprep.mubr.f32.mxu0 %v21783_v4  ;;  %18071 = vmatprep.mubr.f32.mxu1 %v13093_v7  ;;  %v10842_v39 = vpop.f32.mrf.mxu1 }
 0x4ce   : > { %18123 = vmatprep.subr.mxu0 %v15076_v62  ;;  %v21992_v33 = vadd.f32 %v10842_v39, %v10436_v44  ;;  %v17489_v8 = vpop.f32.mrf.mxu0  ;;  %v15074_v44 = vld [vmem:[%s22742_s6 + $0x458] sm:$0xff] }
 0x4cf   : > { %18124 = vmatpush3.msra.mxu0 %v15076_v62  ;;  %v17575_v43 = vpop.f32.mrf.mxu1  ;;  %v13096_v62 = vld [vmem:[#allocation3 + $0x62] sm:$0xff] }
 0x4d0   : > { %17986 = vmatmul.mubr.f32.gmra.mxu0 %v21786_v0  ;;  %18072 = vmatmul.mubr.f32.gmra.mxu1 %v13094_v53  ;;  %v21998_v27 = vadd.f32 %v17575_v43, %v17489_v8  ;;  %v10446_v4 = vpop.f32.mrf.mxu0  ;;  %v13097_v53 = vld [vmem:[#allocation3 + $0x6a] sm:$0xff] }
 0x4d1   : > { %17988 = vmatprep.mubr.f32.mxu0 %v21795_v37  ;;  %18074 = vmatprep.mubr.f32.mxu1 %v13095_v15  ;;  %v10852_v58 = vpop.f32.mrf.mxu1 }
 0x4d2   : > { %18125 = vmatprep.subr.mxu0 %v15075_v40  ;;  %v22001_v7 = vadd.f32 %v10852_v58, %v10446_v4  ;;  %v15073_v4 = vld [vmem:[%s22742_s6 + $0x450] sm:$0xff] }
 0x4d3   : > { %18126 = vmatpush3.msra.mxu0 %v15075_v40  ;;  %v17492_v39 = vpop.f32.mrf.mxu0  ;;  %v17578_v0 = vpop.f32.mrf.mxu1  ;;  %v13098_v40 = vld [vmem:[#allocation3 + $0x72] sm:$0xff] }
 0x4d4   : > { %17989 = vmatmul.mubr.f32.gmra.mxu0 %v21798_v45  ;;  %18075 = vmatmul.mubr.f32.gmra.mxu1 %v13096_v62  ;;  %v22007_v8 = vadd.f32 %v17578_v0, %v17492_v39  ;;  %v13099_v62 = vld [vmem:[#allocation3 + $0x7a] sm:$0xff] }
 0x4d5   : > { %17991 = vmatprep.mubr.f32.mxu0 %v21807_v48  ;;  %18077 = vmatprep.mubr.f32.mxu1 %v13097_v53  ;;  %v10456_v37 = vpop.f32.mrf.mxu0  ;;  %v10862_v43 = vpop.f32.mrf.mxu1 }
 0x4d6   : > { %18127 = vmatprep.subr.mxu0 %v15074_v44  ;;  %v22010_v15 = vadd.f32 %v10862_v43, %v10456_v37  ;;  %v15072_v37 = vld [vmem:[%s22742_s6 + $0x448] sm:$0xff] }
 0x4d7   : > { %18128 = vmatpush3.msra.mxu0 %v15074_v44  ;;  %v17495_v58 = vpop.f32.mrf.mxu0  ;;  %v17581_v45 = vpop.f32.mrf.mxu1  ;;  %v13100_v44 = vld [vmem:[#allocation3 + $0x82] sm:$0xff] }
 0x4d8   : > { %17992 = vmatmul.mubr.f32.gmra.mxu0 %v21810_v26  ;;  %18078 = vmatmul.mubr.f32.gmra.mxu1 %v13098_v40  ;;  %v22016_v39 = vadd.f32 %v17581_v45, %v17495_v58  ;;  %v13101_v40 = vld [vmem:[#allocation3 + $0x8a] sm:$0xff] }
 0x4d9   : > { %17994 = vmatprep.mubr.f32.mxu0 %v21819_v6  ;;  %18080 = vmatprep.mubr.f32.mxu1 %v13099_v62  ;;  %v10466_v48 = vpop.f32.mrf.mxu0  ;;  %v10872_v0 = vpop.f32.mrf.mxu1 }
 0x4da   : > { %18129 = vmatprep.subr.mxu0 %v15073_v4  ;;  %v22019_v53 = vadd.f32 %v10872_v0, %v10466_v48  ;;  %v15071_v48 = vld [vmem:[%s22742_s6 + $0x440] sm:$0xff] }
 0x4db   : > { %18130 = vmatpush3.msra.mxu0 %v15073_v4  ;;  %v17498_v43 = vpop.f32.mrf.mxu0  ;;  %v13102_v4 = vld [vmem:[#allocation3 + $0x92] sm:$0xff] }
 0x4dc   : > { %v17584_v26 = vpop.f32.mrf.mxu1  ;;  %17995 = vmatmul.mubr.f32.gmra.mxu0 %v21822_v42  ;;  %18081 = vmatmul.mubr.f32.gmra.mxu1 %v13100_v44  ;;  %v13103_v44 = vld [vmem:[#allocation3 + $0x9a] sm:$0xff] }
 0x4dd   : > { %v22025_v58 = vadd.f32 %v17584_v26, %v17498_v43  ;;  %17997 = vmatprep.mubr.f32.mxu0 %v21831_v52  ;;  %18083 = vmatprep.mubr.f32.mxu1 %v13101_v40  ;;  %v10476_v6 = vpop.f32.mrf.mxu0 }
 0x4de   : > { %v10882_v45 = vpop.f32.mrf.mxu1  ;;  %18131 = vmatprep.subr.mxu0 %v15072_v37 }
 0x4df   : > { %v22028_v62 = vadd.f32 %v10882_v45, %v10476_v6  ;;  %18132 = vmatpush3.msra.mxu0 %v15072_v37  ;;  %v17501_v0 = vpop.f32.mrf.mxu0  ;;  %v13104_v37 = vld [vmem:[#allocation3 + $0xa2] sm:$0xff] }
 0x4e0   : > { %v17587_v42 = vpop.f32.mrf.mxu1  ;;  %17998 = vmatmul.mubr.f32.gmra.mxu0 %v21834_v34  ;;  %18084 = vmatmul.mubr.f32.gmra.mxu1 %v13102_v4  ;;  %v15070_v6 = vld [vmem:[%s22742_s6 + $0x438] sm:$0xff] }
 0x4e1   : > { %v22034_v43 = vadd.f32 %v17587_v42, %v17501_v0  ;;  %18000 = vmatprep.mubr.f32.mxu0 %v21843_v50  ;;  %18086 = vmatprep.mubr.f32.mxu1 %v13103_v44  ;;  %v10486_v52 = vpop.f32.mrf.mxu0  ;;  %v13105_v4 = vld [vmem:[#allocation3 + $0xaa] sm:$0xff] }
 0x4e2   : > { %v10892_v26 = vpop.f32.mrf.mxu1  ;;  %18133 = vmatprep.subr.mxu0 %v15071_v48 }
 0x4e3   : > { %v22037_v40 = vadd.f32 %v10892_v26, %v10486_v52  ;;  %18134 = vmatpush3.msra.mxu0 %v15071_v48  ;;  %v17504_v45 = vpop.f32.mrf.mxu0  ;;  %v13106_v48 = vld [vmem:[#allocation3 + $0xb2] sm:$0xff]  ;;  %v15069_v52 = vld [vmem:[%s22742_s6 + $0x430] sm:$0xff] }
 0x4e4   : > { %v17590_v34 = vpop.f32.mrf.mxu1  ;;  %18001 = vmatmul.mubr.f32.gmra.mxu0 %v21846_v3  ;;  %18087 = vmatmul.mubr.f32.gmra.mxu1 %v13104_v37  ;;  %v13107_v37 = vld [vmem:[#allocation3 + $0xba] sm:$0xff] }
 0x4e5   : > { %v22043_v0 = vadd.f32 %v17590_v34, %v17504_v45  ;;  %18003 = vmatprep.mubr.f32.mxu0 %v21855_v21  ;;  %18089 = vmatprep.mubr.f32.mxu1 %v13105_v4  ;;  %v10496_v50 = vpop.f32.mrf.mxu0 }
 0x4e6   : > { %v10902_v42 = vpop.f32.mrf.mxu1  ;;  %18135 = vmatprep.subr.mxu0 %v15070_v6 }
 0x4e7   : > { %v22046_v44 = vadd.f32 %v10902_v42, %v10496_v50  ;;  %18136 = vmatpush3.msra.mxu0 %v15070_v6  ;;  %v17507_v26 = vpop.f32.mrf.mxu0  ;;  %v13108_v6 = vld [vmem:[#allocation3 + $0xc2] sm:$0xff]  ;;  %v15068_v50 = vld [vmem:[%s22742_s6 + $0x428] sm:$0xff] }
 0x4e8   : > { %v17593_v3 = vpop.f32.mrf.mxu1  ;;  %18004 = vmatmul.mubr.f32.gmra.mxu0 %v21858_v19  ;;  %18090 = vmatmul.mubr.f32.gmra.mxu1 %v13106_v48  ;;  %v13109_v48 = vld [vmem:[#allocation3 + $0xca] sm:$0xff] }
 0x4e9   : > { %v22052_v45 = vadd.f32 %v17593_v3, %v17507_v26  ;;  %18006 = vmatprep.mubr.f32.mxu0 %v21867_v10  ;;  %18092 = vmatprep.mubr.f32.mxu1 %v13107_v37  ;;  %v10506_v21 = vpop.f32.mrf.mxu0 }
 0x4ea   : > { %v10912_v34 = vpop.f32.mrf.mxu1  ;;  %18137 = vmatprep.subr.mxu0 %v15069_v52 }
 0x4eb   : > { %v22055_v4 = vadd.f32 %v10912_v34, %v10506_v21  ;;  %18138 = vmatpush3.msra.mxu0 %v15069_v52  ;;  %v17510_v42 = vpop.f32.mrf.mxu0  ;;  %v13110_v52 = vld [vmem:[#allocation3 + $0xd2] sm:$0xff] }
 0x4ec   : > { %v17596_v19 = vpop.f32.mrf.mxu1  ;;  %18007 = vmatmul.mubr.f32.gmra.mxu0 %v21870_v30  ;;  %18093 = vmatmul.mubr.f32.gmra.mxu1 %v13108_v6  ;;  %v15067_v21 = vld [vmem:[%s22742_s6 + $0x420] sm:$0xff]  ;;  %v13111_v6 = vld [vmem:[#allocation3 + $0xda] sm:$0xff] }
 0x4ed   : > { %v22061_v26 = vadd.f32 %v17596_v19, %v17510_v42  ;;  %18009 = vmatprep.mubr.f32.mxu0 %v21879_v47  ;;  %18095 = vmatprep.mubr.f32.mxu1 %v13109_v48  ;;  %v10516_v10 = vpop.f32.mrf.mxu0  ;;  %v15066_v48 = vld [vmem:[%s22742_s6 + $0x418] sm:$0xff] }
 0x4ee   : > { %v10922_v3 = vpop.f32.mrf.mxu1  ;;  %18139 = vmatprep.subr.mxu0 %v15068_v50 }
 0x4ef   : > { %v22064_v37 = vadd.f32 %v10922_v3, %v10516_v10  ;;  %18140 = vmatpush3.msra.mxu0 %v15068_v50  ;;  %v17513_v34 = vpop.f32.mrf.mxu0  ;;  %v13112_v50 = vld [vmem:[#allocation3 + $0xe2] sm:$0xff]  ;;  %v13113_v3 = vld [vmem:[#allocation3 + $0xea] sm:$0xff] }
 0x4f0   : > { %v17599_v30 = vpop.f32.mrf.mxu1  ;;  %18010 = vmatmul.mubr.f32.gmra.mxu0 %v21882_v25  ;;  %18096 = vmatmul.mubr.f32.gmra.mxu1 %v13110_v52 }
 0x4f1   : > { %v22070_v42 = vadd.f32 %v17599_v30, %v17513_v34  ;;  %18012 = vmatprep.mubr.f32.mxu0 %v21891_v56  ;;  %18098 = vmatprep.mubr.f32.mxu1 %v13111_v6  ;;  %v22073_v47 = vpop.f32.mrf.mxu0  ;;  %v15065_v6 = vld [vmem:[%s22742_s6 + $0x410] sm:$0xff] }
 0x4f2   : > { %v22075_v19 = vpop.f32.mrf.mxu1  ;;  %18141 = vmatprep.subr.mxu0 %v15067_v21 }
 0x4f3   : > { %18142 = vmatpush3.msra.mxu0 %v15067_v21  ;;  %v17516_v10 = vpop.f32.mrf.mxu0  ;;  %v13114_v21 = vld [vmem:[#allocation3 + $0xf2] sm:$0xff] }
 0x4f4   : > { %v17602_v25 = vpop.f32.mrf.mxu1  ;;  %18013 = vmatmul.mubr.f32.gmra.mxu0 %v21894_v1  ;;  %18099 = vmatmul.mubr.f32.gmra.mxu1 %v13112_v50  ;;  %v13115_v50 = vld [vmem:[#allocation3 + $0xfa] sm:$0xff] }
 0x4f5   : > { %v22081_v52 = vadd.f32 %v17602_v25, %v17516_v10  ;;  %18015 = vmatprep.mubr.f32.mxu0 %v21903_v2  ;;  %18101 = vmatprep.mubr.f32.mxu1 %v13113_v3  ;;  %v10536_v56 = vpop.f32.mrf.mxu0  ;;  %v10951_v2 = vadd.f32 %v21908_v31, %v21906_v41 }
 0x4f6   : > { %v10942_v34 = vpop.f32.mrf.mxu1  ;;  %18143 = vmatprep.subr.mxu0 %v15066_v48 }
 0x4f7   : > { %v22084_v30 = vadd.f32 %v10942_v34, %v10536_v56  ;;  %18144 = vmatpush3.msra.mxu0 %v15066_v48  ;;  %v17637_v12 = vpop.f32.mrf.mxu0  ;;  %v13116_v34 = vld [vmem:[#allocation3 + $0x102] sm:$0xff] }
 0x4f8   : > { %v17723_v1 = vpop.f32.mrf.mxu1  ;;  %18016 = vmatmul.mubr.f32.gmra.mxu0 %v21910_v28  ;;  %18102 = vmatmul.mubr.f32.gmra.mxu1 %v13114_v21  ;;  %v11358_v10 = vadd.f32 %v17637_v12, %v21660_v51  ;;  %v15064_v28 = vld [vmem:[%s22742_s6 + $0x408] sm:$0xff]  ;;  %v13117_v12 = vld [vmem:[#allocation3 + $0x10a] sm:$0xff] }
 0x4f9   : > { %18018 = vmatprep.mubr.f32.mxu0 %v21919_v54  ;;  %18104 = vmatprep.mubr.f32.mxu1 %v13115_v50  ;;  %v11178_v25 = vpop.f32.mrf.mxu0  ;;  %v13118_v50 = vld [vmem:[#allocation3 + $0x112] sm:$0xff] }
 0x4fa   : > { %v11584_v48 = vpop.f32.mrf.mxu1  ;;  %18145 = vmatprep.subr.mxu0 %v15065_v6  ;;  %v22094_v3 = vadd.f32 %v17723_v1, %v11358_v10  ;;  %v11357_v56 = vadd.f32 %v11178_v25, %v10951_v2 }
 0x4fb   : > { %18146 = vmatpush3.msra.mxu0 %v15065_v6 }
 0x4fc   : > { %v17640_v21 = vpop.f32.mrf.mxu0  ;;  %v17726_v36 = vpop.f32.mrf.mxu1  ;;  %18019 = vmatmul.mubr.f32.gmra.mxu0 %v21926_v24  ;;  %18105 = vmatmul.mubr.f32.gmra.mxu1 %v13116_v34  ;;  %v22100_v54 = vadd.f32 %v11584_v48, %v11357_v56  ;;  %v15063_v24 = vld [vmem:[%s22742_s6 + $0x400] sm:$0xff]  ;;  %v13120_v34 = vld [vmem:[#allocation3 + $0x122] sm:$0xff] }
 0x4fd   : > { %v11360_v41 = vadd.f32 %v17640_v21, %v21921_v57  ;;  %18021 = vmatprep.mubr.f32.mxu0 %v21935_v11  ;;  %18107 = vmatprep.mubr.f32.mxu1 %v13117_v12  ;;  %v13119_v57 = vld [vmem:[#allocation3 + $0x11a] sm:$0xff]  ;;  %v13121_v21 = vld [vmem:[#allocation3 + $0x12a] sm:$0xff] }
 0x4fe   : > { %v11188_v51 = vpop.f32.mrf.mxu0  ;;  %v11594_v31 = vpop.f32.mrf.mxu1  ;;  %18147 = vmatprep.subr.mxu0 %v15064_v28 }
 0x4ff   : > { %v22104_v6 = vadd.f32 %v17726_v36, %v11360_v41  ;;  %v11359_v1 = vadd.f32 %v11188_v51, %v21924_v61  ;;  %18148 = vmatpush3.msra.mxu0 %v15064_v28  ;;  %v12717_v51 = vld [vmem:[#allocation3 + $0x139] sm:$0xff] }
 0x500   : > { %v17643_v2 = vpop.f32.mrf.mxu0  ;;  %v17729_v10 = vpop.f32.mrf.mxu1  ;;  %18022 = vmatmul.mubr.f32.gmra.mxu0 %v21942_v59  ;;  %18108 = vmatmul.mubr.f32.gmra.mxu1 %v13118_v50  ;;  %v13122_v50 = vld [vmem:[#allocation3 + $0x132] sm:$0xff] }
 0x501   : > { %v22111_v11 = vadd.f32 %v11594_v31, %v11359_v1  ;;  %v11362_v25 = vadd.f32 %v17643_v2, %v21937_v17  ;;  %18024 = vmatprep.mubr.f32.mxu0 %v21951_v35  ;;  %18110 = vmatprep.mubr.f32.mxu1 %v13119_v57  ;;  %v13123_v31 = vld [vmem:[#allocation3 + $0x13a] sm:$0xff] }
 0x502   : > { %v11198_v36 = vpop.f32.mrf.mxu0  ;;  %v11604_v61 = vpop.f32.mrf.mxu1  ;;  %18149 = vmatprep.subr.mxu0 %v15063_v24 }
 0x503   : > { %v22115_v48 = vadd.f32 %v17729_v10, %v11362_v25  ;;  %v11361_v56 = vadd.f32 %v11198_v36, %v21940_v9  ;;  %18150 = vmatpush3.msra.mxu0 %v15063_v24  ;;  %v13124_v10 = vld [vmem:[#allocation3 + $0x142] sm:$0xff] }
 0x504   : > { %v17646_v28 = vpop.f32.mrf.mxu0  ;;  %v17732_v59 = vpop.f32.mrf.mxu1  ;;  %18025 = vmatmul.mubr.f32.gmra.mxu0 %v21958_v63  ;;  %18111 = vmatmul.mubr.f32.gmra.mxu1 %v13120_v34  ;;  %v13495_v34 = vld [vmem:[#allocation3 + $0x2b] sm:$0xff] }
 0x505   : > { %v22119_v12 = vadd.f32 %v11604_v61, %v11361_v56  ;;  %v11364_v17 = vadd.f32 %v17646_v28, %v21953_v29  ;;  %18027 = vmatprep.mubr.f32.mxu0 %v21961_v20  ;;  %18113 = vmatprep.mubr.f32.mxu1 %v13121_v21  ;;  %v12718_v20 = vld [vmem:[#allocation3 + $0x141] sm:$0xff] }
 0x506   : > { %v11208_v35 = vpop.f32.mrf.mxu0  ;;  %v11614_v41 = vpop.f32.mrf.mxu1 }
 0x507   : > { %v22123_v9 = vadd.f32 %v17732_v59, %v11364_v17  ;;  %v11363_v1 = vadd.f32 %v11208_v35, %v21956_v13  ;;  %v13496_v35 = vld [vmem:[#allocation3 + $0x33] sm:$0xff] }
 0x508   : > { %v17649_v24 = vpop.f32.mrf.mxu0  ;;  %v17735_v63 = vpop.f32.mrf.mxu1  ;;  %18028 = vmatmul.mubr.f32.gmra.mxu0 %v21968_v38  ;;  %18114 = vmatmul.mubr.f32.gmra.mxu1 %v13122_v50 }
 0x509   : > { %v22127_v2 = vadd.f32 %v11614_v41, %v11363_v1  ;;  %v11366_v29 = vadd.f32 %v17649_v24, %v21963_v23  ;;  %18030 = vmatprep.mubr.f32.mxu0 %v12717_v51  ;;  %18116 = vmatprep.mubr.f32.mxu1 %v13123_v31 }
 0x50a   : > { %v11218_v57 = vpop.f32.mrf.mxu0  ;;  %v11624_v25 = vpop.f32.mrf.mxu1 }
 0x50b   : > { %v22130_v36 = vadd.f32 %v17735_v63, %v11366_v29  ;;  %v11365_v13 = vadd.f32 %v11218_v57, %v21966_v5  ;;  %v13497_v5 = vld [vmem:[#allocation3 + $0x3b] sm:$0xff]  ;;  %v13498_v29 = vld [vmem:[#allocation3 + $0x43] sm:$0xff] }
 0x50c   : > { %v17652_v61 = vpop.f32.mrf.mxu0  ;;  %v17738_v56 = vpop.f32.mrf.mxu1  ;;  %18031 = vmatmul.mubr.f32.gmra.mxu0 %v12718_v20  ;;  %18117 = vmatmul.mubr.f32.gmra.mxu1 %v13124_v10 }
 0x50d   : > { %v22133_v38 = vadd.f32 %v11624_v25, %v11365_v13  ;;  %v11368_v28 = vadd.f32 %v17652_v61, %v21971_v46  ;;  %18151 = vmatprep.mubr.f32.mxu0 %v13495_v34  ;;  %v13500_v34 = vld [vmem:[#allocation3 + $0x53] sm:$0xff] }
 0x50e   : > { %v11228_v23 = vpop.f32.mrf.mxu0  ;;  %v11634_v59 = vpop.f32.mrf.mxu1 }
 0x50f   : > { %v22136_v21 = vadd.f32 %v17738_v56, %v11368_v28  ;;  %v11367_v17 = vadd.f32 %v11228_v23, %v21974_v18  ;;  %v13499_v18 = vld [vmem:[#allocation3 + $0x4b] sm:$0xff] }
 0x510   : > { %v17655_v41 = vpop.f32.mrf.mxu0  ;;  %v17741_v51 = vpop.f32.mrf.mxu1  ;;  %18152 = vmatmul.mubr.f32.vlgmr.msra.gmra.mxu0 %v13496_v35 }
 0x511   : > { %v22139_v31 = vadd.f32 %v11634_v59, %v11367_v17  ;;  %v11370_v1 = vadd.f32 %v17655_v41, %v21980_v60  ;;  %18154 = vmatprep.mubr.f32.mxu0 %v13497_v5  ;;  %v13502_v5 = vld [vmem:[#allocation3 + $0x63] sm:$0xff] }
 0x512   : > { %v11238_v50 = vpop.f32.mrf.mxu0  ;;  %v11644_v24 = vpop.f32.mrf.mxu1 }
 0x513   : > { %v22142_v46 = vadd.f32 %v17741_v51, %v11370_v1  ;;  %v11369_v63 = vadd.f32 %v11238_v50, %v21983_v49  ;;  %v13501_v49 = vld [vmem:[#allocation3 + $0x5b] sm:$0xff] }
 0x514   : > { %v17658_v20 = vpop.f32.mrf.mxu0  ;;  %v17744_v10 = vpop.f32.mrf.mxu1  ;;  %18155 = vmatmul.mubr.f32.gmra.mxu0 %v13498_v29 }
 0x515   : > { %v22145_v57 = vadd.f32 %v11644_v24, %v11369_v63  ;;  %v11372_v25 = vadd.f32 %v17658_v20, %v21989_v22  ;;  %18157 = vmatprep.mubr.f32.mxu0 %v13499_v18  ;;  %v13504_v18 = vld [vmem:[#allocation3 + $0x73] sm:$0xff] }
 0x516   : > { %v11248_v13 = vpop.f32.mrf.mxu0  ;;  %v11654_v61 = vpop.f32.mrf.mxu1 }
 0x517   : > { %v22148_v60 = vadd.f32 %v17744_v10, %v11372_v25  ;;  %v11371_v56 = vadd.f32 %v11248_v13, %v21992_v33  ;;  %v13503_v33 = vld [vmem:[#allocation3 + $0x6b] sm:$0xff] }
 0x518   : > { %v17661_v28 = vpop.f32.mrf.mxu0  ;;  %v17747_v23 = vpop.f32.mrf.mxu1  ;;  %18158 = vmatmul.mubr.f32.gmra.mxu0 %v13500_v34 }
 0x519   : > { %v22151_v59 = vadd.f32 %v11654_v61, %v11371_v56  ;;  %v11374_v17 = vadd.f32 %v17661_v28, %v21998_v27  ;;  %18160 = vmatprep.mubr.f32.mxu0 %v13501_v49  ;;  %v13506_v49 = vld [vmem:[#allocation3 + $0x83] sm:$0xff] }
 0x51a   : > { %v11258_v35 = vpop.f32.mrf.mxu0  ;;  %v11664_v41 = vpop.f32.mrf.mxu1 }
 0x51b   : > { %v22154_v22 = vadd.f32 %v17747_v23, %v11374_v17  ;;  %v11373_v51 = vadd.f32 %v11258_v35, %v22001_v7  ;;  %v13505_v7 = vld [vmem:[#allocation3 + $0x7b] sm:$0xff] }
 0x51c   : > { %v17664_v1 = vpop.f32.mrf.mxu0  ;;  %v17750_v50 = vpop.f32.mrf.mxu1  ;;  %18161 = vmatmul.mubr.f32.gmra.mxu0 %v13502_v5 }
 0x51d   : > { %v22157_v24 = vadd.f32 %v11664_v41, %v11373_v51  ;;  %v11376_v63 = vadd.f32 %v17664_v1, %v22007_v8  ;;  %18163 = vmatprep.mubr.f32.mxu0 %v13503_v33  ;;  %v13508_v33 = vld [vmem:[#allocation3 + $0x93] sm:$0xff] }
 0x51e   : > { %v11268_v29 = vpop.f32.mrf.mxu0  ;;  %v11674_v20 = vpop.f32.mrf.mxu1 }
 0x51f   : > { %v22160_v27 = vadd.f32 %v17750_v50, %v11376_v63  ;;  %v11375_v10 = vadd.f32 %v11268_v29, %v22010_v15  ;;  %v13507_v15 = vld [vmem:[#allocation3 + $0x8b] sm:$0xff] }
 0x520   : > { %v17667_v25 = vpop.f32.mrf.mxu0  ;;  %v17753_v13 = vpop.f32.mrf.mxu1  ;;  %18164 = vmatmul.mubr.f32.gmra.mxu0 %v13504_v18 }
 0x521   : > { %v22163_v61 = vadd.f32 %v11674_v20, %v11375_v10  ;;  %v11378_v56 = vadd.f32 %v17667_v25, %v22016_v39  ;;  %18166 = vmatprep.mubr.f32.mxu0 %v13505_v7  ;;  %v13510_v7 = vld [vmem:[#allocation3 + $0xa3] sm:$0xff] }
 0x522   : > { %v11278_v34 = vpop.f32.mrf.mxu0  ;;  %v11684_v28 = vpop.f32.mrf.mxu1 }
 0x523   : > { %v22166_v8 = vadd.f32 %v17753_v13, %v11378_v56  ;;  %v11377_v23 = vadd.f32 %v11278_v34, %v22019_v53  ;;  %v13509_v53 = vld [vmem:[#allocation3 + $0x9b] sm:$0xff] }
 0x524   : > { %v17670_v17 = vpop.f32.mrf.mxu0  ;;  %v17756_v35 = vpop.f32.mrf.mxu1  ;;  %18167 = vmatmul.mubr.f32.gmra.mxu0 %v13506_v49 }
 0x525   : > { %v22169_v41 = vadd.f32 %v11684_v28, %v11377_v23  ;;  %v11380_v51 = vadd.f32 %v17670_v17, %v22025_v58  ;;  %18169 = vmatprep.mubr.f32.mxu0 %v13507_v15  ;;  %v13512_v15 = vld [vmem:[#allocation3 + $0xb3] sm:$0xff] }
 0x526   : > { %v11288_v5 = vpop.f32.mrf.mxu0  ;;  %v11694_v1 = vpop.f32.mrf.mxu1 }
 0x527   : > { %v22172_v39 = vadd.f32 %v17756_v35, %v11380_v51  ;;  %v11379_v50 = vadd.f32 %v11288_v5, %v22028_v62  ;;  %v13511_v62 = vld [vmem:[#allocation3 + $0xab] sm:$0xff] }
 0x528   : > { %v17673_v63 = vpop.f32.mrf.mxu0  ;;  %v17759_v29 = vpop.f32.mrf.mxu1  ;;  %18170 = vmatmul.mubr.f32.gmra.mxu0 %v13508_v33 }
 0x529   : > { %v22175_v20 = vadd.f32 %v11694_v1, %v11379_v50  ;;  %v11382_v10 = vadd.f32 %v17673_v63, %v22034_v43  ;;  %18172 = vmatprep.mubr.f32.mxu0 %v13509_v53  ;;  %v13514_v53 = vld [vmem:[#allocation3 + $0xc3] sm:$0xff] }
 0x52a   : > { %v11298_v18 = vpop.f32.mrf.mxu0  ;;  %v11704_v25 = vpop.f32.mrf.mxu1 }
 0x52b   : > { %v22178_v58 = vadd.f32 %v17759_v29, %v11382_v10  ;;  %v11381_v13 = vadd.f32 %v11298_v18, %v22037_v40  ;;  %v13513_v40 = vld [vmem:[#allocation3 + $0xbb] sm:$0xff] }
 0x52c   : > { %v17676_v56 = vpop.f32.mrf.mxu0  ;;  %v17762_v34 = vpop.f32.mrf.mxu1  ;;  %18173 = vmatmul.mubr.f32.gmra.mxu0 %v13510_v7 }
 0x52d   : > { %v22181_v28 = vadd.f32 %v11704_v25, %v11381_v13  ;;  %v11384_v23 = vadd.f32 %v17676_v56, %v22043_v0  ;;  %18175 = vmatprep.mubr.f32.mxu0 %v13511_v62  ;;  %v13516_v62 = vld [vmem:[#allocation3 + $0xd3] sm:$0xff] }
 0x52e   : > { %v11308_v49 = vpop.f32.mrf.mxu0  ;;  %v11714_v17 = vpop.f32.mrf.mxu1 }
 0x52f   : > { %v22184_v43 = vadd.f32 %v17762_v34, %v11384_v23  ;;  %v11383_v35 = vadd.f32 %v11308_v49, %v22046_v44  ;;  %v13515_v44 = vld [vmem:[#allocation3 + $0xcb] sm:$0xff] }
 0x530   : > { %v17679_v51 = vpop.f32.mrf.mxu0  ;;  %v17765_v5 = vpop.f32.mrf.mxu1  ;;  %18176 = vmatmul.mubr.f32.gmra.mxu0 %v13512_v15 }
 0x531   : > { %v22187_v1 = vadd.f32 %v11714_v17, %v11383_v35  ;;  %v11386_v50 = vadd.f32 %v17679_v51, %v22052_v45  ;;  %18178 = vmatprep.mubr.f32.mxu0 %v13513_v40  ;;  %v10983_v17 = vadd.f32 %v22075_v19, %v22073_v47 }
 0x532   : > { %v11318_v33 = vpop.f32.mrf.mxu0  ;;  %v11724_v63 = vpop.f32.mrf.mxu1 }
 0x533   : > { %v22190_v0 = vadd.f32 %v17765_v5, %v11386_v50  ;;  %v11385_v29 = vadd.f32 %v11318_v33, %v22055_v4  ;;  %v13517_v4 = vld [vmem:[#allocation3 + $0xdb] sm:$0xff]  ;;  %v13518_v50 = vld [vmem:[#allocation3 + $0xe3] sm:$0xff] }
 0x534   : > { %v17682_v10 = vpop.f32.mrf.mxu0  ;;  %v17768_v18 = vpop.f32.mrf.mxu1  ;;  %18179 = vmatmul.mubr.f32.gmra.mxu0 %v13514_v53 }
 0x535   : > { %v22193_v25 = vadd.f32 %v11724_v63, %v11385_v29  ;;  %v11388_v13 = vadd.f32 %v17682_v10, %v22061_v26  ;;  %18181 = vmatprep.mubr.f32.mxu0 %v13515_v44  ;;  %v13519_v63 = vld [vmem:[#allocation3 + $0xeb] sm:$0xff] }
 0x536   : > { %v11328_v7 = vpop.f32.mrf.mxu0  ;;  %v11734_v56 = vpop.f32.mrf.mxu1 }
 0x537   : > { %v22196_v45 = vadd.f32 %v17768_v18, %v11388_v13  ;;  %v11387_v34 = vadd.f32 %v11328_v7, %v22064_v37  ;;  %v13520_v18 = vld [vmem:[#allocation3 + $0xf3] sm:$0xff]  ;;  %v13521_v7 = vld [vmem:[#allocation3 + $0xfb] sm:$0xff] }
 0x538   : > { %v17685_v23 = vpop.f32.mrf.mxu0  ;;  %v17771_v49 = vpop.f32.mrf.mxu1  ;;  %18182 = vmatmul.mubr.f32.gmra.mxu0 %v13516_v62 }
 0x539   : > { %v22201_v35 = vadd.f32 %v11734_v56, %v11387_v34  ;;  %v11390_v15 = vadd.f32 %v17685_v23, %v22070_v42  ;;  %18184 = vmatprep.mubr.f32.mxu0 %v13517_v4  ;;  %v13522_v4 = vld [vmem:[#allocation3 + $0x103] sm:$0xff] }
 0x53a   : > { %v11338_v26 = vpop.f32.mrf.mxu0  ;;  %v11744_v51 = vpop.f32.mrf.mxu1 }
 0x53b   : > { %v22204_v5 = vadd.f32 %v17771_v49, %v11390_v15  ;;  %v11389_v40 = vadd.f32 %v11338_v26, %v10983_v17 }
 0x53c   : > { %v17688_v37 = vpop.f32.mrf.mxu0  ;;  %v17774_v33 = vpop.f32.mrf.mxu1  ;;  %18185 = vmatmul.mubr.f32.gmra.mxu0 %v13518_v50 }
 0x53d   : > { %v22206_v29 = vadd.f32 %v11744_v51, %v11389_v40  ;;  %v11392_v53 = vadd.f32 %v17688_v37, %v22081_v52  ;;  %18187 = vmatprep.mubr.f32.mxu0 %v13519_v63 }
 0x53e   : > { %v11348_v47 = vpop.f32.mrf.mxu0  ;;  %v11754_v19 = vpop.f32.mrf.mxu1 }
 0x53f   : > { %v22209_v10 = vadd.f32 %v17774_v33, %v11392_v53  ;;  %v11391_v42 = vadd.f32 %v11348_v47, %v22084_v30  ;;  %v13523_v30 = vld [vmem:[#allocation3 + $0x10b] sm:$0xff]  ;;  %v13524_v33 = vld [vmem:[#allocation3 + $0x113] sm:$0xff] }
 0x540   : > { %v17809_v44 = vpop.f32.mrf.mxu0  ;;  %v17895_v13 = vpop.f32.mrf.mxu1  ;;  %18188 = vmatmul.mubr.f32.gmra.mxu0 %v13520_v18 }
 0x541   : > { %v22212_v56 = vadd.f32 %v11754_v19, %v11391_v42  ;;  %v12170_v34 = vadd.f32 %v17809_v44, %v22094_v3  ;;  %18190 = vmatprep.mubr.f32.mxu0 %v13521_v7 }
 0x542   : > { %v11990_v62 = vpop.f32.mrf.mxu0  ;;  %v12396_v23 = vpop.f32.mrf.mxu1 }
 0x543   : > { %v22215_v52 = vadd.f32 %v17895_v13, %v12170_v34  ;;  %v12169_v49 = vadd.f32 %v11990_v62, %v22100_v54  ;;  %v13525_v54 = vld [vmem:[#allocation3 + $0x11b] sm:$0xff]  ;;  %v13526_v13 = vld [vmem:[#allocation3 + $0x123] sm:$0xff] }
 0x544   : > { %v17812_v17 = vpop.f32.mrf.mxu0  ;;  %v17898_v15 = vpop.f32.mrf.mxu1  ;;  %18191 = vmatmul.mubr.f32.gmra.mxu0 %v13522_v4 }
 0x545   : > { %v22218_v26 = vadd.f32 %v12396_v23, %v12169_v49  ;;  %v12172_v51 = vadd.f32 %v17812_v17, %v22104_v6  ;;  %18193 = vmatprep.mubr.f32.mxu0 %v13523_v30  ;;  %v13528_v30 = vld [vmem:[#allocation3 + $0x133] sm:$0xff] }
 0x546   : > { %v12000_v40 = vpop.f32.mrf.mxu0  ;;  %v12406_v50 = vpop.f32.mrf.mxu1 }
 0x547   : > { %v22221_v3 = vadd.f32 %v17898_v15, %v12172_v51  ;;  %v12171_v37 = vadd.f32 %v12000_v40, %v22111_v11  ;;  %v13527_v11 = vld [vmem:[#allocation3 + $0x12b] sm:$0xff] }
 0x548   : > { %v17815_v63 = vpop.f32.mrf.mxu0  ;;  %v17901_v53 = vpop.f32.mrf.mxu1  ;;  %18194 = vmatmul.mubr.f32.gmra.mxu0 %v13524_v33 }
 0x549   : > { %v22224_v47 = vadd.f32 %v12406_v50, %v12171_v37  ;;  %v12174_v19 = vadd.f32 %v17815_v63, %v22115_v48  ;;  %18196 = vmatprep.mubr.f32.mxu0 %v13525_v54  ;;  %v13529_v48 = vld [vmem:[#allocation3 + $0x13b] sm:$0xff]  ;;  %v13530_v37 = vld [vmem:[#allocation3 + $0x143] sm:$0xff] }
 0x54a   : > { %v12010_v42 = vpop.f32.mrf.mxu0  ;;  %v12416_v18 = vpop.f32.mrf.mxu1 }
 0x54b   : > { %v22227_v6 = vadd.f32 %v17901_v53, %v12174_v19  ;;  %v12173_v44 = vadd.f32 %v12010_v42, %v22119_v12 }
 0x54c   : > { %v17818_v7 = vpop.f32.mrf.mxu0  ;;  %v17904_v34 = vpop.f32.mrf.mxu1  ;;  %18197 = vmatmul.mubr.f32.gmra.mxu0 %v13526_v13 }
 0x54d   : > { %v22230_v62 = vadd.f32 %v12416_v18, %v12173_v44  ;;  %v12176_v23 = vadd.f32 %v17818_v7, %v22123_v9  ;;  %18199 = vmatprep.mubr.f32.mxu0 %v13527_v11 }
 0x54e   : > { %v12020_v49 = vpop.f32.mrf.mxu0  ;;  %v12426_v4 = vpop.f32.mrf.mxu1 }
 0x54f   : > { %v22233_v17 = vadd.f32 %v17904_v34, %v12176_v23  ;;  %v12175_v15 = vadd.f32 %v12020_v49, %v22127_v2 }
 0x550   : > { %v17821_v51 = vpop.f32.mrf.mxu0  ;;  %v17907_v12 = vpop.f32.mrf.mxu1  ;;  %18200 = vmatmul.mubr.f32.gmra.mxu0 %v13528_v30 }
 0x551   : > { %v22236_v40 = vadd.f32 %v12426_v4, %v12175_v15  ;;  %v12178_v50 = vadd.f32 %v17821_v51, %v22130_v36  ;;  %18202 = vmatprep.mubr.f32.mxu0 %v13529_v48 }
 0x552   : > { %v12030_v33 = vpop.f32.mrf.mxu0  ;;  %v12436_v9 = vpop.f32.mrf.mxu1 }
 0x553   : > { %v22239_v63 = vadd.f32 %v17907_v12, %v12178_v50  ;;  %v12177_v53 = vadd.f32 %v12030_v33, %v22133_v38 }
 0x554   : > { %v17824_v54 = vpop.f32.mrf.mxu0  ;;  %v17910_v19 = vpop.f32.mrf.mxu1  ;;  %18203 = vmatmul.mubr.f32.gmra.mxu0 %v13530_v37 }
 0x555   : > { %v22242_v2 = vadd.f32 %v12436_v9, %v12177_v53  ;;  %v12180_v42 = vadd.f32 %v17824_v54, %v22136_v21 }
 0x556   : > { %v12040_v18 = vpop.f32.mrf.mxu0  ;;  %v12446_v44 = vpop.f32.mrf.mxu1 }
 0x557   : > { %v22245_v13 = vadd.f32 %v17910_v19, %v12180_v42  ;;  %v12179_v36 = vadd.f32 %v12040_v18, %v22139_v31 }
 0x558   : > { %v17827_v7 = vpop.f32.mrf.mxu0  ;;  %v17913_v34 = vpop.f32.mrf.mxu1 }
 0x559   : > { %v22248_v11 = vadd.f32 %v12446_v44, %v12179_v36  ;;  %v12182_v23 = vadd.f32 %v17827_v7, %v22142_v46 }
 0x55a   : > { %v12050_v38 = vpop.f32.mrf.mxu0  ;;  %v12456_v49 = vpop.f32.mrf.mxu1 }
 0x55b   : > { %v22251_v4 = vadd.f32 %v17913_v34, %v12182_v23  ;;  %v12181_v48 = vadd.f32 %v12050_v38, %v22145_v57 }
 0x55c   : > { %v17830_v15 = vpop.f32.mrf.mxu0  ;;  %v17916_v21 = vpop.f32.mrf.mxu1 }
 0x55d   : > { %v22254_v30 = vadd.f32 %v12456_v49, %v12181_v48  ;;  %v12184_v51 = vadd.f32 %v17830_v15, %v22148_v60 }
 0x55e   : > { %v12060_v12 = vpop.f32.mrf.mxu0  ;;  %v12466_v31 = vpop.f32.mrf.mxu1 }
 0x55f   : > { %v22257_v50 = vadd.f32 %v17916_v21, %v12184_v51  ;;  %v12183_v37 = vadd.f32 %v12060_v12, %v22151_v59 }
 0x560   : > { %v17833_v33 = vpop.f32.mrf.mxu0  ;;  %v17919_v46 = vpop.f32.mrf.mxu1 }
 0x561   : > { %v22260_v9 = vadd.f32 %v12466_v31, %v12183_v37  ;;  %v12186_v53 = vadd.f32 %v17833_v33, %v22154_v22 }
 0x562   : > { %v12070_v54 = vpop.f32.mrf.mxu0  ;;  %v12476_v57 = vpop.f32.mrf.mxu1 }
 0x563   : > { %v22263_v19 = vadd.f32 %v17919_v46, %v12186_v53  ;;  %v12185_v42 = vadd.f32 %v12070_v54, %v22157_v24 }
 0x564   : > { %v17836_v18 = vpop.f32.mrf.mxu0  ;;  %v17922_v60 = vpop.f32.mrf.mxu1 }
 0x565   : > { %v22266_v44 = vadd.f32 %v12476_v57, %v12185_v42  ;;  %v12188_v36 = vadd.f32 %v17836_v18, %v22160_v27  ;;  %v14073_v57 = vld [vmem:[%s22744_s8 + $0x78] sm:$0xff] }
 0x566   : > { %v12080_v7 = vpop.f32.mrf.mxu0  ;;  %v12486_v59 = vpop.f32.mrf.mxu1  ;;  %18206 = vmatpush3.msra.mxu1 %v14073_v57 }
 0x567   : > { %v22269_v34 = vadd.f32 %v17922_v60, %v12188_v36  ;;  %v12187_v23 = vadd.f32 %v12080_v7, %v22163_v61 }
 0x568   : > { %v17839_v38 = vpop.f32.mrf.mxu0  ;;  %v17925_v22 = vpop.f32.mrf.mxu1 }
 0x569   : > { %v22272_v49 = vadd.f32 %v12486_v59, %v12187_v23  ;;  %v12190_v48 = vadd.f32 %v17839_v38, %v22166_v8 }
 0x56a   : > { %v12090_v15 = vpop.f32.mrf.mxu0  ;;  %v12496_v24 = vpop.f32.mrf.mxu1 }
 0x56b   : > { %v22275_v21 = vadd.f32 %v17925_v22, %v12190_v48  ;;  %v12189_v51 = vadd.f32 %v12090_v15, %v22169_v41 }
 0x56c   : > { %v17842_v12 = vpop.f32.mrf.mxu0  ;;  %v17928_v27 = vpop.f32.mrf.mxu1 }
 0x56d   : > { %v22278_v31 = vadd.f32 %v12496_v24, %v12189_v51  ;;  %v12192_v37 = vadd.f32 %v17842_v12, %v22172_v39  ;;  %v22290_v39 = vld [vmem:[#allocation3] sm:$0xff] }
 0x56e   : > { %v12100_v33 = vpop.f32.mrf.mxu0  ;;  %v12506_v61 = vpop.f32.mrf.mxu1  ;;  %18207 = vmatprep.subr.mxu1 %v22290_v39  ;;  %v14072_v12 = vld [vmem:[%s22744_s8 + $0x70] sm:$0xff]  ;;  %18237 = vmatprep.mubr.msk.f32.mxu1 %vm18356_vm3, %v22290_v39 }
 0x56f   : > { %v22281_v46 = vadd.f32 %v17928_v27, %v12192_v37  ;;  %v12191_v53 = vadd.f32 %v12100_v33, %v22175_v20  ;;  %18208 = vmatpush3.msra.mxu1 %v14072_v12 }
 0x570   : > { %v17845_v54 = vpop.f32.mrf.mxu0  ;;  %v17931_v8 = vpop.f32.mrf.mxu1  ;;  %18209 = vmatprep.subr.mxu1 %v22290_v39 }
 0x571   : > { %v22287_v42 = vadd.f32 %v12506_v61, %v12191_v53  ;;  %v12194_v41 = vadd.f32 %v17845_v54, %v22178_v58  ;;  %v14071_v54 = vld [vmem:[%s22744_s8 + $0x68] sm:$0xff] }
 0x572   : > { %v12110_v18 = vpop.f32.mrf.mxu0  ;;  %v12516_v60 = vpop.f32.mrf.mxu1  ;;  %18210 = vmatpush3.msra.mxu1 %v14071_v54 }
 0x573   : > { %v22293_v36 = vadd.f32 %v17931_v8, %v12194_v41  ;;  %v12193_v20 = vadd.f32 %v12110_v18, %v22181_v28  ;;  %18211 = vmatprep.subr.mxu1 %v22290_v39 }
 0x574   : > { %v17848_v7 = vpop.f32.mrf.mxu0  ;;  %v17934_v59 = vpop.f32.mrf.mxu1 }
 0x575   : > { %v22296_v23 = vadd.f32 %v12516_v60, %v12193_v20  ;;  %v12196_v38 = vadd.f32 %v17848_v7, %v22184_v43  ;;  %v14070_v7 = vld [vmem:[%s22744_s8 + $0x60] sm:$0xff] }
 0x576   : > { %v12120_v22 = vpop.f32.mrf.mxu0  ;;  %v12526_v48 = vpop.f32.mrf.mxu1  ;;  %18212 = vmatpush3.msra.mxu1 %v14070_v7 }
 0x577   : > { %v22299_v58 = vadd.f32 %v17934_v59, %v12196_v38  ;;  %v12195_v15 = vadd.f32 %v12120_v22, %v22187_v1  ;;  %18213 = vmatprep.subr.mxu1 %v22290_v39 }
 0x578   : > { %v17851_v24 = vpop.f32.mrf.mxu0  ;;  %v17937_v51 = vpop.f32.mrf.mxu1 }
 0x579   : > { %v22305_v27 = vadd.f32 %v12526_v48, %v12195_v15  ;;  %v12198_v28 = vadd.f32 %v17851_v24, %v22190_v0 }
 0x57a   : > { %v12130_v37 = vpop.f32.mrf.mxu0  ;;  %v12536_v33 = vpop.f32.mrf.mxu1 }
 0x57b   : > { %v22309_v43 = vadd.f32 %v17937_v51, %v12198_v28  ;;  %v12197_v61 = vadd.f32 %v12130_v37, %v22193_v25  ;;  %v14069_v51 = vld [vmem:[%s22744_s8 + $0x58] sm:$0xff] }
 0x57c   : > { %v17854_v1 = vpop.f32.mrf.mxu0  ;;  %v17940_v53 = vpop.f32.mrf.mxu1  ;;  %18214 = vmatpush3.msra.mxu1 %v14069_v51 }
 0x57d   : > { %v22315_v8 = vadd.f32 %v12536_v33, %v12197_v61  ;;  %v12200_v57 = vadd.f32 %v17854_v1, %v22196_v45  ;;  %18215 = vmatprep.subr.mxu1 %v22290_v39 }
 0x57e   : > { %v12140_v0 = vpop.f32.mrf.mxu0  ;;  %v12546_v41 = vpop.f32.mrf.mxu1 }
 0x57f   : > { %v22319_v18 = vadd.f32 %v17940_v53, %v12200_v57  ;;  %v12199_v60 = vadd.f32 %v12140_v0, %v22201_v35  ;;  %v14068_v53 = vld [vmem:[%s22744_s8 + $0x50] sm:$0xff] }
 0x580   : > { %v17857_v25 = vpop.f32.mrf.mxu0  ;;  %v17943_v20 = vpop.f32.mrf.mxu1  ;;  %18216 = vmatpush3.msra.mxu1 %v14068_v53  ;;  %v14064_v53 = vld [vmem:[%s22744_s8 + $0x30] sm:$0xff] }
 0x581   : > { %v22325_v59 = vadd.f32 %v12546_v41, %v12199_v60  ;;  %v12202_v38 = vadd.f32 %v17857_v25, %v22204_v5  ;;  %18217 = vmatprep.subr.mxu1 %v22290_v39  ;;  %v14067_v60 = vld [vmem:[%s22744_s8 + $0x48] sm:$0xff] }
 0x582   : > { %v12150_v45 = vpop.f32.mrf.mxu0  ;;  %v12556_v22 = vpop.f32.mrf.mxu1  ;;  %18218 = vmatpush3.msra.mxu1 %v14067_v60 }
 0x583   : > { %v22329_v48 = vadd.f32 %v17943_v20, %v12202_v38  ;;  %v12201_v15 = vadd.f32 %v12150_v45, %v22206_v29  ;;  %18219 = vmatprep.subr.mxu1 %v22290_v39  ;;  %v14066_v38 = vld [vmem:[%s22744_s8 + $0x40] sm:$0xff] }
 0x584   : > { %v17860_v35 = vpop.f32.mrf.mxu0  ;;  %v17946_v24 = vpop.f32.mrf.mxu1  ;;  %18220 = vmatpush3.msra.mxu1 %v14066_v38 }
 0x585   : > { %v22335_v12 = vadd.f32 %v12556_v22, %v12201_v15  ;;  %v12204_v28 = vadd.f32 %v17860_v35, %v22209_v10  ;;  %18221 = vmatprep.subr.mxu1 %v22290_v39  ;;  %v14065_v35 = vld [vmem:[%s22744_s8 + $0x38] sm:$0xff] }
 0x586   : > { %v12160_v5 = vpop.f32.mrf.mxu0  ;;  %v12566_v37 = vpop.f32.mrf.mxu1  ;;  %18222 = vmatpush3.msra.mxu1 %v14065_v35 }
 0x587   : > { %v22339_v33 = vadd.f32 %v17946_v24, %v12204_v28  ;;  %v12203_v61 = vadd.f32 %v12160_v5, %v22212_v56  ;;  %18223 = vmatprep.subr.mxu1 %v22290_v39 }
 0x588   : > { %v17981_v29 = vpop.f32.mrf.mxu0  ;;  %v22342_v1 = vpop.f32.mrf.mxu1  ;;  %18224 = vmatpush3.msra.mxu1 %v14064_v53 }
 0x589   : > { %v22347_v54 = vadd.f32 %v12566_v37, %v12203_v61  ;;  %v22350_v10 = vadd.f32 %v17981_v29, %v22215_v52  ;;  %18225 = vmatprep.subr.mxu1 %v22290_v39 }
 0x58a   : > { %v12802_v57 = vpop.f32.mrf.mxu0  ;;  %v22356_v56 = vpop.f32.mrf.mxu1 }
 0x58b   : > { %v22354_v0 = vadd.f32 %v12802_v57, %v22218_v26 }
 0x58c   : > { %v17984_v41 = vpop.f32.mrf.mxu0  ;;  %v22368_v7 = vpop.f32.mrf.mxu1 }
 0x58d   : > { %v22362_v25 = vadd.f32 %v17984_v41, %v22221_v3 }
 0x58e   : > { %v12812_v52 = vpop.f32.mrf.mxu0  ;;  %v22380_v15 = vpop.f32.mrf.mxu1 }
 0x58f   : > { %v22366_v20 = vadd.f32 %v12812_v52, %v22224_v47 }
 0x590   : > { %v17987_v26 = vpop.f32.mrf.mxu0  ;;  %v22392_v28 = vpop.f32.mrf.mxu1 }
 0x591   : > { %v22374_v45 = vadd.f32 %v17987_v26, %v22227_v6 }
 0x592   : > { %v12822_v3 = vpop.f32.mrf.mxu0  ;;  %v22400_v29 = vpop.f32.mrf.mxu1 }
 0x593   : > { %v22378_v22 = vadd.f32 %v12822_v3, %v22230_v62 }
 0x594   : > { %v17990_v47 = vpop.f32.mrf.mxu0  ;;  %v22412_v41 = vpop.f32.mrf.mxu1 }
 0x595   : > { %v22386_v24 = vadd.f32 %v17990_v47, %v22233_v17 }
 0x596   : > { %v12832_v6 = vpop.f32.mrf.mxu0  ;;  %v22420_v38 = vpop.f32.mrf.mxu1 }
 0x597   : > { %v22390_v51 = vadd.f32 %v12832_v6, %v22236_v40 }
 0x598   : > { %v17993_v62 = vpop.f32.mrf.mxu0  ;;  %v22428_v35 = vpop.f32.mrf.mxu1 }
 0x599   : > { %v22395_v5 = vadd.f32 %v17993_v62, %v22239_v63 }
 0x59a   : > { %v12842_v37 = vpop.f32.mrf.mxu0 }
 0x59b   : > { %v22398_v61 = vadd.f32 %v12842_v37, %v22242_v2  ;;  %v22436_v37 = vpop.f32.mrf.mxu1 }
 0x59c   : > { %v17996_v17 = vpop.f32.mrf.mxu0 }
 0x59d   : > { %v22406_v40 = vadd.f32 %v17996_v17, %v22245_v13 }
 0x59e   : > { %v12852_v57 = vpop.f32.mrf.mxu0 }
 0x59f   : > { %v22410_v63 = vadd.f32 %v12852_v57, %v22248_v11  ;;  %v22444_v57 = vpop.f32.mrf.mxu1 }
 0x5a0   : > { %v17999_v2 = vpop.f32.mrf.mxu0 }
 0x5a1   : > { %v22415_v60 = vadd.f32 %v17999_v2, %v22251_v4 }
 0x5a2   : > { %v12862_v52 = vpop.f32.mrf.mxu0 }
 0x5a3   : > { %v22418_v26 = vadd.f32 %v12862_v52, %v22254_v30 }
 0x5a4   : > { %v18002_v13 = vpop.f32.mrf.mxu0 }
 0x5a5   : > { %v22423_v3 = vadd.f32 %v18002_v13, %v22257_v50 }
 0x5a6   : > { %v12872_v47 = vpop.f32.mrf.mxu0 }
 0x5a7   : > { %v22426_v11 = vadd.f32 %v12872_v47, %v22260_v9  ;;  %v22463_v47 = vpop.f32.mrf.mxu1 }
 0x5a8   : > { %v18005_v6 = vpop.f32.mrf.mxu0 }
 0x5a9   : > { %v22431_v4 = vadd.f32 %v18005_v6, %v22263_v19  ;;  %v14063_v19 = vld [vmem:[%s22744_s8 + $0x28] sm:$0xff] }
 0x5aa   : > { %v12882_v62 = vpop.f32.mrf.mxu0  ;;  %18226 = vmatpush3.msra.mxu1 %v14063_v19 }
 0x5ab   : > { %v22434_v30 = vadd.f32 %v12882_v62, %v22266_v44  ;;  %v14062_v44 = vld [vmem:[%s22744_s8 + $0x20] sm:$0xff]  ;;  %18227 = vmatprep.subr.mxu1 %v22290_v39 }
 0x5ac   : > { %v18008_v17 = vpop.f32.mrf.mxu0  ;;  %18228 = vmatpush3.msra.mxu1 %v14062_v44 }
 0x5ad   : > { %v22439_v50 = vadd.f32 %v18008_v17, %v22269_v34  ;;  %18229 = vmatprep.subr.mxu1 %v22290_v39 }
 0x5ae   : > { %v12892_v53 = vpop.f32.mrf.mxu0 }
 0x5af   : > { %v22442_v9 = vadd.f32 %v12892_v53, %v22272_v49  ;;  %v14061_v49 = vld [vmem:[%s22744_s8 + $0x18] sm:$0xff] }
 0x5b0   : > { %v18011_v2 = vpop.f32.mrf.mxu0  ;;  %18230 = vmatpush3.msra.mxu1 %v14061_v49 }
 0x5b1   : > { %v22453_v52 = vadd.f32 %v18011_v2, %v22275_v21  ;;  %v14060_v21 = vld [vmem:[%s22744_s8 + $0x10] sm:$0xff]  ;;  %18231 = vmatprep.subr.mxu1 %v22290_v39  ;;  %v22479_v2 = vpop.f32.mrf.mxu1 }
 0x5b2   : > { %v12902_v34 = vpop.f32.mrf.mxu0  ;;  %18232 = vmatpush3.msra.mxu1 %v14060_v21 }
 0x5b3   : > { %v22461_v13 = vadd.f32 %v12902_v34, %v22278_v31  ;;  %v14059_v31 = vld [vmem:[%s22744_s8 + $0x8] sm:$0xff]  ;;  %18233 = vmatprep.subr.mxu1 %v22290_v39  ;;  %v22492_v49 = vpop.f32.mrf.mxu1 }
 0x5b4   : > { %v18014_v6 = vpop.f32.mrf.mxu0  ;;  %18234 = vmatpush3.msra.mxu1 %v14059_v31 }
 0x5b5   : > { %v22470_v62 = vadd.f32 %v18014_v6, %v22281_v46  ;;  %v14058_v46 = vld [vmem:[%s22744_s8] sm:$0xff]  ;;  %18235 = vmatprep.subr.mxu1 %v22290_v39 }
 0x5b6   : > { %v12912_v17 = vpop.f32.mrf.mxu0  ;;  %18236 = vmatpush3.msra.mxu1 %v14058_v46 }
 0x5b7   : > { %v22477_v53 = vadd.f32 %v12912_v17, %v22287_v42 }
 0x5b8   : > { %v18017_v19 = vpop.f32.mrf.mxu0 }
 0x5b9   : > { %23029 = vst [vmem:[#allocation11_spill] sm:$0xff] %v22477_v53  ;;  %v22486_v44 = vadd.f32 %v18017_v19, %v22293_v36  ;;  %v22500_v36 = vpop.f32.mrf.mxu1 }
 0x5ba   : > { %v12922_v34 = vpop.f32.mrf.mxu0 }
 0x5bb   : > { %v22490_v42 = vadd.f32 %v12922_v34, %v22296_v23  ;;  %v22508_v46 = vpop.f32.mrf.mxu1 }
 0x5bc   : > { %v18020_v6 = vpop.f32.mrf.mxu0 }
 0x5bd   : > { %v22495_v21 = vadd.f32 %v18020_v6, %v22299_v58 }
 0x5be   : > { %v12932_v17 = vpop.f32.mrf.mxu0 }
 0x5bf   : > { %v22498_v53 = vadd.f32 %v12932_v17, %v22305_v27  ;;  %v22516_v17 = vpop.f32.mrf.mxu1 }
 0x5c0   : > { %v18023_v31 = vpop.f32.mrf.mxu0 }
 0x5c1   : > { %23030 = vst [vmem:[#allocation47_spill] sm:$0xff] %v22498_v53  ;;  %v22503_v19 = vadd.f32 %v18023_v31, %v22309_v43 }
 0x5c2   : > { %v12942_v39 = vpop.f32.mrf.mxu0 }
 0x5c3   : > { %v22506_v23 = vadd.f32 %v12942_v39, %v22315_v8  ;;  %v22524_v39 = vpop.f32.mrf.mxu1 }
 0x5c4   : > { %v18026_v34 = vpop.f32.mrf.mxu0 }
 0x5c5   : > { %23031 = vst [vmem:[#allocation46_spill] sm:$0xff] %v22506_v23  ;;  %v22511_v58 = vadd.f32 %v18026_v34, %v22319_v18 }
 0x5c6   : > { %v12952_v6 = vpop.f32.mrf.mxu0 }
 0x5c7   : > { %23032 = vst [vmem:[#allocation96_spill] sm:$0xff] %v22511_v58  ;;  %v22514_v27 = vadd.f32 %v12952_v6, %v22325_v59  ;;  %v13388_v59 = vadd.f32 %v22342_v1, %v22350_v10 }
 0x5c8   : > { %v18029_v53 = vpop.f32.mrf.mxu0 }
 0x5c9   : > { %23033 = vst [vmem:[#allocation10_spill] sm:$0xff] %v22514_v27  ;;  %v22519_v43 = vadd.f32 %v18029_v53, %v22329_v48  ;;  %v22534_v27 = vpop.f32.mrf.mxu1  ;;  %v13387_v53 = vadd.f32 %v22356_v56, %v22354_v0  ;;  %v13392_v0 = vadd.f32 %v22392_v28, %v22374_v45  ;;  %v13394_v45 = vadd.f32 %v22412_v41, %v22386_v24 }
 0x5ca   : > { %v12962_v31 = vpop.f32.mrf.mxu0  ;;  %v13396_v24 = vadd.f32 %v22428_v35, %v22395_v5 }
 0x5cb   : > { %23034 = vst [vmem:[#allocation70_spill] sm:$0xff] %v22519_v43  ;;  %v22522_v8 = vadd.f32 %v12962_v31, %v22335_v12  ;;  %v22539_v12 = vld [vmem:[%s22743_s7] ss:$0 sm:$0xff]  ;;  %v13390_v31 = vadd.f32 %v22368_v7, %v22362_v25  ;;  %v22546_v10 = vpop.f32.mrf.mxu1 }
 0x5cc   : > { %v18032_v23 = vpop.f32.mrf.mxu0 }
 0x5cd   : > { %23035 = vst [vmem:[#allocation71_spill] sm:$0xff] %v22522_v8  ;;  %v22527_v18 = vadd.f32 %v18032_v23, %v22339_v33 }
 0x5ce   : > { %v12972_v34 = vpop.f32.mrf.mxu0 }
 0x5cf   : > { %23036 = vst [vmem:[#allocation95_spill] sm:$0xff] %v22527_v18  ;;  %v22532_v6 = vadd.f32 %v12972_v34, %v22347_v54 }
 0x5d0   : > { %v18153_v48 = vpop.f32.mrf.mxu0 }
 0x5d1   : > { %23037 = vst [vmem:[#allocation49_spill] sm:$0xff] %v22532_v6  ;;  %v13794_v33 = vadd.f32 %v18153_v48, %v13388_v59  ;;  %v13389_v6 = vadd.f32 %v22380_v15, %v22366_v20  ;;  %v22554_v59 = vpop.f32.mrf.mxu1 }
 0x5d2   : > { %v13614_v23 = vpop.f32.mrf.mxu0 }
 0x5d3   : > { %v13909_v1 = vadd.f32 %v22539_v12, %v13794_v33  ;;  %v13793_v54 = vadd.f32 %v13614_v23, %v13387_v53  ;;  %v13391_v23 = vadd.f32 %v22400_v29, %v22378_v22 }
 0x5d4   : > { %v18156_v34 = vpop.f32.mrf.mxu0 }
 0x5d5   : > { %v13945_v18 = vmax.f32 %v13909_v1, 0.0  ;;  %v13908_v8 = vadd.f32 %v22539_v12, %v13793_v54  ;;  %v13796_v43 = vadd.f32 %v18156_v34, %v13390_v31 }
 0x5d6   : > { %v13624_v58 = vpop.f32.mrf.mxu0 }
 0x5d7   : > { %v13944_v56 = vmax.f32 %v13908_v8, 0.0  ;;  %v13911_v25 = vadd.f32 %v22539_v12, %v13796_v43  ;;  %v13795_v7 = vadd.f32 %v13624_v58, %v13389_v6  ;;  %v13981_v53 = vmul.f32 %v13945_v18, %v19876_v55  ;;  %v22563_v8 = vpop.f32.mrf.mxu1 }
 0x5d8   : > { %v18159_v48 = vpop.f32.mrf.mxu0 }
 0x5d9   : > { %v13980_v33 = vmul.f32 %v13944_v56, %v19866_v32  ;;  %v13910_v20 = vadd.f32 %v22539_v12, %v13795_v7  ;;  %v13798_v15 = vadd.f32 %v18159_v48, %v13392_v0  ;;  %v13947_v43 = vmax.f32 %v13911_v25, 0.0  ;;  %v22573_v56 = vpop.f32.mrf.mxu1 }
 0x5da   : > { %v13634_v31 = vpop.f32.mrf.mxu0  ;;  %v13393_v32 = vadd.f32 %v22420_v38, %v22390_v51 }
 0x5db   : > { %v14016_v28 = vadd.f32 %v13981_v53, %v13980_v33  ;;  %v13946_v58 = vmax.f32 %v13910_v20, 0.0  ;;  %v13913_v6 = vadd.f32 %v22539_v12, %v13798_v15  ;;  %v13797_v55 = vadd.f32 %v13634_v31, %v13391_v23  ;;  %v23038_v20 = vld [vmem:[#allocation12_spill] sm:$0xff]  ;;  %v22582_v31 = vpop.f32.mrf.mxu1 }
 0x5dc   : > { %v18162_v18 = vpop.f32.mrf.mxu0  ;;  %v13983_v41 = vmul.f32 %v13947_v43, %v22923_v14  ;;  %v13398_v14 = vadd.f32 %v22444_v57, %v22406_v40 }
 0x5dd   : > { %v13982_v1 = vmul.f32 %v13946_v58, %v22927_v16  ;;  %v13800_v54 = vadd.f32 %v18162_v18, %v13394_v45  ;;  %v13912_v22 = vadd.f32 %v22539_v12, %v13797_v55  ;;  %v13949_v25 = vmax.f32 %v13913_v6, 0.0  ;;  %v23039_v45 = vld [vmem:[#allocation13_spill] sm:$0xff]  ;;  %v23040_v55 = vld [vmem:[#allocation14_spill] sm:$0xff] }
 0x5de   : > { %v13644_v29 = vpop.f32.mrf.mxu0  ;;  %v13395_v16 = vadd.f32 %v22436_v37, %v22398_v61  ;;  %v13397_v6 = vadd.f32 %v22463_v47, %v22410_v63 }
 0x5df   : > { %v14017_v34 = vadd.f32 %v14016_v28, %v13982_v1  ;;  %v13799_v0 = vadd.f32 %v13644_v29, %v13393_v32  ;;  %v13948_v7 = vmax.f32 %v13912_v22, 0.0  ;;  %v13915_v48 = vadd.f32 %v22539_v12, %v13800_v54 }
 0x5e0   : > { %v18165_v51 = vpop.f32.mrf.mxu0  ;;  %v13985_v28 = vmul.f32 %v13949_v25, %v23039_v45  ;;  %v13400_v54 = vadd.f32 %v22479_v2, %v22415_v60  ;;  %v13401_v45 = vadd.f32 %v22508_v46, %v22426_v11 }
 0x5e1   : > { %v14018_v38 = vadd.f32 %v14017_v34, %v13983_v41  ;;  %v13914_v53 = vadd.f32 %v22539_v12, %v13799_v0  ;;  %v13802_v33 = vadd.f32 %v18165_v51, %v13396_v24  ;;  %v13984_v5 = vmul.f32 %v13948_v7, %v23038_v20  ;;  %v22592_v24 = vpop.f32.mrf.mxu1  ;;  %v23041_v41 = vld [vmem:[#allocation15_spill] sm:$0xff] }
 0x5e2   : > { %v13654_v35 = vpop.f32.mrf.mxu0  ;;  %v13951_v58 = vmax.f32 %v13915_v48, 0.0  ;;  %v13399_v7 = vadd.f32 %v22492_v49, %v22418_v26  ;;  %v23042_v48 = vld [vmem:[#allocation16_spill] sm:$0xff] }
 0x5e3   : > { %v13950_v15 = vmax.f32 %v13914_v53, 0.0  ;;  %v13801_v23 = vadd.f32 %v13654_v35, %v13395_v16  ;;  %v14019_v43 = vadd.f32 %v14018_v38, %v13984_v5  ;;  %v13917_v61 = vadd.f32 %v22539_v12, %v13802_v33  ;;  %v22602_v5 = vpop.f32.mrf.mxu1  ;;  %v23043_v35 = vld [vmem:[#allocation17_spill] sm:$0xff] }
 0x5e4   : > { %v18168_v37 = vpop.f32.mrf.mxu0  ;;  %v13987_v34 = vmul.f32 %v13951_v58, %v23041_v41  ;;  %v13402_v53 = vadd.f32 %v22500_v36, %v22423_v3 }
 0x5e5   : > { %v13986_v18 = vmul.f32 %v13950_v15, %v23040_v55  ;;  %v13916_v32 = vadd.f32 %v22539_v12, %v13801_v23  ;;  %v13804_v1 = vadd.f32 %v18168_v37, %v13398_v14  ;;  %v14020_v40 = vadd.f32 %v14019_v43, %v13985_v28  ;;  %v23044_v28 = vld [vmem:[#allocation18_spill] sm:$0xff] }
 0x5e6   : > { %v13664_v57 = vpop.f32.mrf.mxu0  ;;  %v13953_v25 = vmax.f32 %v13917_v61, 0.0  ;;  %v13404_v37 = vadd.f32 %v22516_v17, %v22431_v4 }
 0x5e7   : > { %v13952_v22 = vmax.f32 %v13916_v32, 0.0  ;;  %v13803_v29 = vadd.f32 %v13664_v57, %v13397_v6  ;;  %v14021_v0 = vadd.f32 %v14020_v40, %v13986_v18  ;;  %v13919_v63 = vadd.f32 %v22539_v12, %v13804_v1  ;;  %v22612_v18 = vpop.f32.mrf.mxu1  ;;  %v23045_v32 = vld [vmem:[#allocation19_spill] sm:$0xff] }
 0x5e8   : > { %v18171_v47 = vpop.f32.mrf.mxu0  ;;  %v13989_v14 = vmul.f32 %v13953_v25, %v23043_v35 }
 0x5e9   : > { %v13988_v51 = vmul.f32 %v13952_v22, %v23042_v48  ;;  %v13918_v16 = vadd.f32 %v22539_v12, %v13803_v29  ;;  %v13806_v38 = vadd.f32 %v18171_v47, %v13400_v54  ;;  %v14022_v60 = vadd.f32 %v14021_v0, %v13987_v34  ;;  %v23046_v22 = vld [vmem:[#allocation20_spill] sm:$0xff]  ;;  %v22622_v47 = vpop.f32.mrf.mxu1 }
 0x5ea   : > { %v13674_v2 = vpop.f32.mrf.mxu0  ;;  %v13955_v23 = vmax.f32 %v13919_v63, 0.0  ;;  %v13403_v54 = vadd.f32 %v22524_v39, %v22434_v30  ;;  %v13406_v0 = vadd.f32 %v22534_v27, %v22439_v50 }
 0x5eb   : > { %v13954_v33 = vmax.f32 %v13918_v16, 0.0  ;;  %v13805_v20 = vadd.f32 %v13674_v2, %v13399_v7  ;;  %v14023_v15 = vadd.f32 %v14022_v60, %v13988_v51  ;;  %v13921_v26 = vadd.f32 %v22539_v12, %v13806_v38  ;;  %v23047_v7 = vld [vmem:[#allocation21_spill] sm:$0xff]  ;;  %v23048_v60 = vld [vmem:[#allocation22_spill] sm:$0xff] }
 0x5ec   : > { %v18174_v49 = vpop.f32.mrf.mxu0  ;;  %v13991_v1 = vmul.f32 %v13955_v23, %v23045_v32  ;;  %v13405_v38 = vadd.f32 %v22546_v10, %v22442_v9  ;;  %v23049_v23 = vld [vmem:[#allocation23_spill] sm:$0xff]  ;;  %v13407_v10 = vadd.f32 %v22563_v8, %v22461_v13  ;;  %v23051_v32 = vld [vmem:[#allocation25_spill] sm:$0xff] }
 0x5ed   : > { %v13990_v43 = vmul.f32 %v13954_v33, %v23044_v28  ;;  %v13920_v58 = vadd.f32 %v22539_v12, %v13805_v20  ;;  %v13808_v61 = vadd.f32 %v18174_v49, %v13402_v53  ;;  %v14024_v3 = vadd.f32 %v14023_v15, %v13989_v14  ;;  %v18109_v15 = vpop.f32.mrf.mxu1  ;;  %v23052_v8 = vld [vmem:[#allocation11_spill] sm:$0xff] }
 0x5ee   : > { %v13684_v36 = vpop.f32.mrf.mxu0  ;;  %v13957_v57 = vmax.f32 %v13921_v26, 0.0  ;;  %v13408_v20 = vadd.f32 %v22554_v59, %v22453_v52  ;;  %v13410_v59 = vadd.f32 %v22573_v56, %v22470_v62  ;;  %v13412_v56 = vadd.f32 %v22592_v24, %v22486_v44 }
 0x5ef   : > { %v13956_v6 = vmax.f32 %v13920_v58, 0.0  ;;  %v13807_v55 = vadd.f32 %v13684_v36, %v13401_v45  ;;  %v14025_v40 = vadd.f32 %v14024_v3, %v13990_v43  ;;  %v13923_v11 = vadd.f32 %v22539_v12, %v13808_v61  ;;  %v23050_v43 = vld [vmem:[#allocation24_spill] sm:$0xff] }
 0x5f0   : > { %v18177_v46 = vpop.f32.mrf.mxu0  ;;  %v13993_v48 = vmul.f32 %v13957_v57, %v23047_v7  ;;  %v13414_v24 = vadd.f32 %v22612_v18, %v22495_v21  ;;  %v13416_v18 = vadd.f32 %v18109_v15, %v22503_v19  ;;  %v23062_v19 = vld [vmem:[#allocation96_spill] sm:$0xff] }
 0x5f1   : > { %v13992_v29 = vmul.f32 %v13956_v6, %v23046_v22  ;;  %v13922_v41 = vadd.f32 %v22539_v12, %v13807_v55  ;;  %v13810_v34 = vadd.f32 %v18177_v46, %v13404_v37  ;;  %v14026_v4 = vadd.f32 %v14025_v40, %v13991_v1  ;;  %v13348_v55 = vpop.f32.mrf.mxu1 }
 0x5f2   : > { %v13694_v17 = vpop.f32.mrf.mxu0  ;;  %v13959_v16 = vmax.f32 %v13923_v11, 0.0  ;;  %v13409_v46 = vadd.f32 %v22582_v31, %v23052_v8 }
 0x5f3   : > { %v13958_v25 = vmax.f32 %v13922_v41, 0.0  ;;  %v13809_v63 = vadd.f32 %v13694_v17, %v13403_v54  ;;  %v14027_v51 = vadd.f32 %v14026_v4, %v13992_v29  ;;  %v13925_v30 = vadd.f32 %v22539_v12, %v13810_v34  ;;  %v23053_v54 = vld [vmem:[#allocation26_spill] sm:$0xff] }
 0x5f4   : > { %v18180_v39 = vpop.f32.mrf.mxu0  ;;  %v13995_v26 = vmul.f32 %v13959_v16, %v23049_v23  ;;  %v13411_v16 = vadd.f32 %v22602_v5, %v22490_v42  ;;  %v23057_v5 = vld [vmem:[#allocation47_spill] sm:$0xff] }
 0x5f5   : > { %v13994_v2 = vmul.f32 %v13958_v25, %v23048_v60  ;;  %v13924_v53 = vadd.f32 %v22539_v12, %v13809_v63  ;;  %v13812_v33 = vadd.f32 %v18180_v39, %v13406_v0  ;;  %v14028_v50 = vadd.f32 %v14027_v51, %v13993_v48  ;;  %v18112_v0 = vpop.f32.mrf.mxu1  ;;  %v23054_v25 = vld [vmem:[#allocation27_spill] sm:$0xff] }
 0x5f6   : > { %v13704_v27 = vpop.f32.mrf.mxu0  ;;  %v13961_v45 = vmax.f32 %v13925_v30, 0.0  ;;  %v23055_v30 = vld [vmem:[#allocation28_spill] sm:$0xff]  ;;  %v13418_v15 = vadd.f32 %v18112_v0, %v23062_v19 }
 0x5f7   : > { %v13960_v35 = vmax.f32 %v13924_v53, 0.0  ;;  %v13811_v14 = vadd.f32 %v13704_v27, %v13405_v38  ;;  %v14029_v49 = vadd.f32 %v14028_v50, %v13994_v2  ;;  %v13927_v28 = vadd.f32 %v22539_v12, %v13812_v33  ;;  %v13358_v50 = vpop.f32.mrf.mxu1  ;;  %v23056_v27 = vld [vmem:[#allocation29_spill] sm:$0xff] }
 0x5f8   : > { %v18183_v9 = vpop.f32.mrf.mxu0  ;;  %v13997_v1 = vmul.f32 %v13961_v45, %v23051_v32 }
 0x5f9   : > { %v13996_v58 = vmul.f32 %v13960_v35, %v23050_v43  ;;  %v13926_v61 = vadd.f32 %v22539_v12, %v13811_v14  ;;  %v13814_v3 = vadd.f32 %v18183_v9, %v13408_v20  ;;  %v14030_v36 = vadd.f32 %v14029_v49, %v13995_v26  ;;  %v23058_v49 = vld [vmem:[#allocation30_spill] sm:$0xff] }
 0x5fa   : > { %v13714_v52 = vpop.f32.mrf.mxu0  ;;  %v13963_v57 = vmax.f32 %v13927_v28, 0.0  ;;  %v13413_v26 = vadd.f32 %v22622_v47, %v23057_v5  ;;  %v23060_v47 = vld [vmem:[#allocation46_spill] sm:$0xff] }
 0x5fb   : > { %v13962_v37 = vmax.f32 %v13926_v61, 0.0  ;;  %v13813_v6 = vadd.f32 %v13714_v52, %v13407_v10  ;;  %v14031_v40 = vadd.f32 %v14030_v36, %v13996_v58  ;;  %v13929_v11 = vadd.f32 %v22539_v12, %v13814_v3  ;;  %v18115_v61 = vpop.f32.mrf.mxu1  ;;  %v23059_v3 = vld [vmem:[#allocation31_spill] sm:$0xff] }
 0x5fc   : > { %v18186_v13 = vpop.f32.mrf.mxu0  ;;  %v13999_v63 = vmul.f32 %v13963_v57, %v23054_v25  ;;  %v13415_v32 = vadd.f32 %v13348_v55, %v23060_v47  ;;  %v23064_v55 = vld [vmem:[#allocation10_spill] sm:$0xff] }
 0x5fd   : > { %v13998_v22 = vmul.f32 %v13962_v37, %v23053_v54  ;;  %v13928_v29 = vadd.f32 %v22539_v12, %v13813_v6  ;;  %v13816_v41 = vadd.f32 %v18186_v13, %v13410_v59  ;;  %v14032_v34 = vadd.f32 %v14031_v40, %v13997_v1  ;;  %v23061_v1 = vld [vmem:[#allocation32_spill] sm:$0xff]  ;;  %v23065_v25 = vld [vmem:[#allocation34_spill] sm:$0xff] }
 0x5fe   : > { %v13724_v62 = vpop.f32.mrf.mxu0  ;;  %v13965_v48 = vmax.f32 %v13929_v11, 0.0 }
 0x5ff   : > { %v13964_v4 = vmax.f32 %v13928_v29, 0.0  ;;  %v13815_v17 = vadd.f32 %v13724_v62, %v13409_v46  ;;  %v14033_v7 = vadd.f32 %v14032_v34, %v13998_v22  ;;  %v13931_v51 = vadd.f32 %v22539_v12, %v13816_v41  ;;  %v13368_v22 = vpop.f32.mrf.mxu1  ;;  %v23063_v29 = vld [vmem:[#allocation33_spill] sm:$0xff] }
 0x600   : > { %v18189_v31 = vpop.f32.mrf.mxu0  ;;  %v14001_v20 = vmul.f32 %v13965_v48, %v23056_v27 }
 0x601   : > { %v14000_v39 = vmul.f32 %v13964_v4, %v23055_v30  ;;  %v13930_v38 = vadd.f32 %v22539_v12, %v13815_v17  ;;  %v13818_v60 = vadd.f32 %v18189_v31, %v13412_v56  ;;  %v14034_v2 = vadd.f32 %v14033_v7, %v13999_v63 }
 0x602   : > { %v13734_v44 = vpop.f32.mrf.mxu0  ;;  %v13967_v14 = vmax.f32 %v13931_v51, 0.0  ;;  %v13417_v17 = vadd.f32 %v13358_v50, %v23064_v55  ;;  %v18118_v51 = vpop.f32.mrf.mxu1  ;;  %v23068_v50 = vld [vmem:[#allocation71_spill] sm:$0xff] }
 0x603   : > { %v13966_v53 = vmax.f32 %v13930_v38, 0.0  ;;  %v13817_v33 = vadd.f32 %v13734_v44, %v13411_v16  ;;  %v14035_v35 = vadd.f32 %v14034_v2, %v14000_v39  ;;  %v13933_v23 = vadd.f32 %v22539_v12, %v13818_v60  ;;  %v23066_v16 = vld [vmem:[#allocation70_spill] sm:$0xff]  ;;  %v23067_v60 = vld [vmem:[#allocation35_spill] sm:$0xff] }
 0x604   : > { %v18192_v42 = vpop.f32.mrf.mxu0  ;;  %v14003_v36 = vmul.f32 %v13967_v14, %v23059_v3  ;;  %v13420_v30 = vadd.f32 %v18115_v61, %v23066_v16  ;;  %v13419_v27 = vadd.f32 %v13368_v22, %v23068_v50  ;;  %v23072_v3 = vld [vmem:[#allocation49_spill] sm:$0xff] }
 0x605   : > { %v14002_v45 = vmul.f32 %v13966_v53, %v23058_v49  ;;  %v13932_v28 = vadd.f32 %v22539_v12, %v13817_v33  ;;  %v13820_v9 = vadd.f32 %v18192_v42, %v13414_v24  ;;  %v14036_v10 = vadd.f32 %v14035_v35, %v14001_v20  ;;  %v23069_v20 = vld [vmem:[#allocation37_spill] sm:$0xff]  ;;  %v13378_v42 = vpop.f32.mrf.mxu1  ;;  %v23070_v49 = vld [vmem:[#allocation95_spill] sm:$0xff] }
 0x606   : > { %v13744_v21 = vpop.f32.mrf.mxu0  ;;  %v13969_v59 = vmax.f32 %v13933_v23, 0.0 }
 0x607   : > { %v13968_v43 = vmax.f32 %v13932_v28, 0.0  ;;  %v13819_v58 = vadd.f32 %v13744_v21, %v13413_v26  ;;  %v14037_v52 = vadd.f32 %v14036_v10, %v14002_v45  ;;  %v13935_v37 = vadd.f32 %v22539_v12, %v13820_v9  ;;  %v23071_v10 = vld [vmem:[#allocation36_spill] sm:$0xff] }
 0x608   : > { %v18195_v6 = vpop.f32.mrf.mxu0  ;;  %v14005_v41 = vmul.f32 %v13969_v59, %v23063_v29  ;;  %v13422_v45 = vadd.f32 %v18118_v51, %v23070_v49 }
 0x609   : > { %v14004_v40 = vmul.f32 %v13968_v43, %v23061_v1  ;;  %v13934_v57 = vadd.f32 %v22539_v12, %v13819_v58  ;;  %v13822_v11 = vadd.f32 %v18195_v6, %v13416_v18  ;;  %v14038_v13 = vadd.f32 %v14037_v52, %v14003_v36  ;;  %v23073_v52 = vld [vmem:[#allocation39_spill] sm:$0xff] }
 0x60a   : > { %v13754_v8 = vpop.f32.mrf.mxu0  ;;  %v13971_v62 = vmax.f32 %v13935_v37, 0.0  ;;  %v13421_v36 = vadd.f32 %v13378_v42, %v23072_v3 }
 0x60b   : > { %v13970_v46 = vmax.f32 %v13934_v57, 0.0  ;;  %v13821_v54 = vadd.f32 %v13754_v8, %v13415_v32  ;;  %v14039_v34 = vadd.f32 %v14038_v13, %v14004_v40  ;;  %v13937_v56 = vadd.f32 %v22539_v12, %v13822_v11  ;;  %v23074_v57 = vld [vmem:[#allocation38_spill] sm:$0xff] }
 0x60c   : > { %v18198_v4 = vpop.f32.mrf.mxu0  ;;  %v14007_v2 = vmul.f32 %v13971_v62, %v23067_v60 }
 0x60d   : > { %v14006_v63 = vmul.f32 %v13970_v46, %v23065_v25  ;;  %v13936_v7 = vadd.f32 %v22539_v12, %v13821_v54  ;;  %v13824_v48 = vadd.f32 %v18198_v4, %v13418_v15  ;;  %v14040_v31 = vadd.f32 %v14039_v34, %v14005_v41  ;;  %v23075_v15 = vld [vmem:[#allocation41_spill] sm:$0xff]  ;;  %v23076_v41 = vld [vmem:[#allocation40_spill] sm:$0xff]  ;;  %v23077_v4 = vld [vmem:[#allocation43_spill] sm:$0xff] }
 0x60e   : > { %v13764_v0 = vpop.f32.mrf.mxu0  ;;  %v13973_v24 = vmax.f32 %v13937_v56, 0.0  ;;  %v23078_v25 = vld [vmem:[#allocation42_spill] sm:$0xff] }
 0x60f   : > { %v13972_v39 = vmax.f32 %v13936_v7, 0.0  ;;  %v13823_v38 = vadd.f32 %v13764_v0, %v13417_v17  ;;  %v14041_v44 = vadd.f32 %v14040_v31, %v14006_v63  ;;  %v13939_v53 = vadd.f32 %v22539_v12, %v13824_v48 }
 0x610   : > { %v18201_v33 = vpop.f32.mrf.mxu0  ;;  %v14009_v21 = vmul.f32 %v13973_v24, %v23071_v10 }
 0x611   : > { %v14008_v35 = vmul.f32 %v13972_v39, %v23069_v20  ;;  %v13938_v14 = vadd.f32 %v22539_v12, %v13823_v38  ;;  %v13826_v23 = vadd.f32 %v18201_v33, %v13420_v30  ;;  %v14042_v5 = vadd.f32 %v14041_v44, %v14007_v2  ;;  %v14074_v38 = vld [vmem:[%s22745_s9] sm:$0x1] }
 0x612   : > { %v13774_v26 = vpop.f32.mrf.mxu0  ;;  %v13975_v43 = vmax.f32 %v13939_v53, 0.0 }
 0x613   : > { %v13974_v28 = vmax.f32 %v13938_v14, 0.0  ;;  %v13825_v9 = vadd.f32 %v13774_v26, %v13419_v27  ;;  %v14043_v18 = vadd.f32 %v14042_v5, %v14008_v35  ;;  %v13941_v58 = vadd.f32 %v22539_v12, %v13826_v23 }
 0x614   : > { %v18204_v61 = vpop.f32.mrf.mxu0  ;;  %v14011_v11 = vmul.f32 %v13975_v43, %v23074_v57 }
 0x615   : > { %v14010_v59 = vmul.f32 %v13974_v28, %v23073_v52  ;;  %v13940_v37 = vadd.f32 %v22539_v12, %v13825_v9  ;;  %v13828_v6 = vadd.f32 %v18204_v61, %v13422_v45  ;;  %v14044_v47 = vadd.f32 %v14043_v18, %v14009_v21 }
 0x616   : > { %v13784_v32 = vpop.f32.mrf.mxu0  ;;  %v13977_v8 = vmax.f32 %v13941_v58, 0.0 }
 0x617   : > { %v13976_v1 = vmax.f32 %v13940_v37, 0.0  ;;  %v13827_v40 = vadd.f32 %v13784_v32, %v13421_v36  ;;  %v14045_v13 = vadd.f32 %v14044_v47, %v14010_v59  ;;  %v13943_v19 = vadd.f32 %v22539_v12, %v13828_v6 }
 0x618   : > { %v14013_v34 = vmul.f32 %v13977_v8, %v23076_v41 }
 0x619   : > { %v14012_v46 = vmul.f32 %v13976_v1, %v23075_v15  ;;  %v13942_v54 = vadd.f32 %v22539_v12, %v13827_v40  ;;  %v14046_v22 = vadd.f32 %v14045_v13, %v14011_v11  ;;  %v13979_v56 = vmax.f32 %v13943_v19, 0.0 }
 0x61b   : > { %v13978_v29 = vmax.f32 %v13942_v54, 0.0  ;;  %v14047_v62 = vadd.f32 %v14046_v22, %v14012_v46  ;;  %v14015_v63 = vmul.f32 %v13979_v56, %v23078_v25 }
 0x61d   : > { %v14014_v55 = vmul.f32 %v13978_v29, %v23077_v4  ;;  %v14048_v17 = vadd.f32 %v14047_v62, %v14013_v34 }
 0x61f   : > { %v14049_v7 = vadd.f32 %v14048_v17, %v14014_v55 }
 0x621   : > { %v14050_v48 = vadd.f32 %v14049_v7, %v14015_v63 }
 0x623   : > { %v14051_v51 = vrot.slane %v14050_v48, 4 }
 0x625   : > { %v14052_v31 = vadd.f32 %v14051_v51, %v14050_v48 }
 0x627   : > { %v14053_v0 = vrot.slane %v14052_v31, 2 }
 0x629   : > { %v14054_v16 = vadd.f32 %v14053_v0, %v14052_v31 }
 0x62b   : > { %v14055_v12 = vrot.slane %v14054_v16, 1 }
 0x62d   : > { %v14056_v30 = vadd.f32 %v14055_v12, %v14054_v16 }
 0x62f   : > { %v14057_v39 = vmul.f32 0.00390625, %v14056_v30 }
 0x631   : > { %18238 = vmatmul.mubr.f32.vlgmr.msra.gmra.mxu1 %v14057_v39 }
 0x6f1   : > { %v14141_v60 = vpop.f32.mrf.mxu1 }
 0x6f2   : > { %v14142_v2 = vadd.f32 %v14141_v60, %v14074_v38 }
 0x6f3   : > { %v18239_v44 = vpop.f32.mrf.mxu1 }
 0x6f4   : > { %14146 = vst.msk [vmem:[%s351_s26] sm:$0x1] %vm14145_vm4, %v14142_v2 }
 0x6f5   : > { %18305 = shalt.err (!%p18302_p3)
}
 0x6f6   : > { %s18306_s25 = scalar_lea.hbm %s22701_s30, 16  ;;  %s18310_s28 = scalar_lea.hbm %s22746_s10, 32 }
 0x6f7   : > { %p18307_p4 = scmp.ne.s32.totalorder %s22701_s30, %s18306_s25  ;;  %p18311_p9 = scmp.lt.s32.totalorder %s22701_s30, %s22746_s10 }
 0x6f8   : > { %p18312_p10 = scmp.lt.s32.totalorder %s18310_s28, %s18306_s25 }
 0x6f9   : > { %p18308_p7 = pnand %p18307_p4, %p18451_p5 }
 0x6fa   : > { %p18313_p11 = por %p18312_p10, %p18311_p9 }
 0x6fb   : > { %p18309_p8 = pneg %p18308_p7 }
 0x6fd   : > { %p18314_p12 = pnand %p18313_p11, %p18309_p8 }
 0x6ff   : > { %18317 = shalt.err (!%p18314_p12)
}
 0x700   : > { %18243 = dma.vmem_to_hbm [thread:$0]  (%p18451_p5), %s14161_s27, 16, %s22701_s30, %s14148_s21  }
 0x701 PF: > { %p18249_p13 = scmp.ge.s32.totalorder %s18352_s16, 2  ;;  %s14172_s11 = sand.u32 1, %s18340_s13  }
 0x702   : > { %s14173_s18 = scalar_lea.sflag [#allocation8], %s14172_s11 }
 0x703   : > { %p18246_p0 = pnand %p18249_p13, %p18455_p6 }
 0x705   : > { %p18247_p1 = pneg %p18246_p0 }
 0x707   : > { %18335 = dma.done.wait (%p18247_p1), %s14173_s18, 16  }
 0x708   : > { %18337 = vsyncadd (%p18247_p1), %s14173_s18, 4294967280  ;;  %p20_p2 = scmp.ge.s32.totalorder %s18438_s19, 4   ;;  %s23079_s13 = smov %s18344_s14 }
 0x709   : > { %s23080_s14 = smov %s18348_s15  ;;  %s23081_s15 = smov %s18449_s22 }
 0x70a   : > { %s23082_s16 = smov %s18438_s19  ;;  %22 = sbr.rel (!%p20_p2) target bundleno = 3 (0x3), region = 119 }
 0x70f   :  { %14177 = vsyncpa [#allocation8], 1 }
 0x710   :  { %14179 = vsyncpa [#allocation8 + $0x1], 1 }

</bundles_post_ra>
